<compile_context>
chip_gen: v6e
topology: v6e:2x2x1
jax: 0.10.0
libtpu: 0.0.40
codegen_flags: <defaults>
</compile_context>

<pallas_src>
import jax
import jax.numpy as jnp
from jax import lax
from jax.experimental import pallas as pl
from jax.experimental.pallas import tpu as pltpu


def _round_up(x, m):
    return ((x + m - 1) // m) * m


# ----------------------------- Pallas kernel ------------------------------- #

def _make_block_kernel(identity, ho, wo, cin, coutp):
    """Fused residual block: conv1+BN1+ReLU -> conv2+BN2 -> +shortcut -> ReLU.

    One whole image per grid step.  conv inputs are bf16, accumulation f32,
    y1 is stashed in a spatially padded bf16 VMEM scratch (never hits HBM).
    """

    def _conv3x3(window, w_ref, k):
        # window(ky, kx) -> (ho, wo, k) bf16 tap window; w_ref: (3, 3, k, coutp)
        acc = jnp.zeros((ho * wo, coutp), jnp.float32)
        for ky in range(3):
            for kx in range(3):
                win = window(ky, kx).reshape(ho * wo, k)
                acc += jnp.dot(win, w_ref[ky, kx, :, :],
                               preferred_element_type=jnp.float32)
        return acc

    def _tail(acc1, b1_ref, w2_ref, b2_ref, sc, w3_ref, o_ref, y1_ref):
        # BN1 shift + ReLU; store y1 (bf16) into the zero-padded scratch.
        y1 = jnp.maximum(acc1 + b1_ref[...], 0.0).astype(jnp.bfloat16)
        y1_ref[...] = jnp.zeros_like(y1_ref)
        y1_ref[1:ho + 1, 1:wo + 1, :] = y1.reshape(ho, wo, coutp)

        # conv2 + BN2 shift + shortcut (extra small dot) + ReLU.
        acc2 = _conv3x3(lambda ky, kx: y1_ref[ky:ky + ho, kx:kx + wo, :],
                        w2_ref, coutp)
        acc2 += jnp.dot(sc.reshape(ho * wo, cin), w3_ref[...],
                        preferred_element_type=jnp.float32)
        out = jnp.maximum(acc2 + b2_ref[...], 0.0)
        o_ref[...] = out.reshape(ho, wo, coutp).astype(o_ref.dtype)

    if not identity:
        # stride-1 conv1; identity shortcut via w3 == channel-padded identity.
        def kernel(x_ref, w1_ref, b1_ref, w2_ref, b2_ref, w3_ref,
                   o_ref, y1_ref):
            acc1 = _conv3x3(lambda ky, kx: x_ref[ky:ky + ho, kx:kx + wo, :],
                            w1_ref, cin)
            sc = x_ref[1:ho + 1, 1:wo + 1, :]        # interior == original x
            _tail(acc1, b1_ref, w2_ref, b2_ref, sc, w3_ref, o_ref, y1_ref)
    else:
        # stride-2 conv1 via polyphase inputs; 1x1/stride-2 projection shortcut.
        def kernel(xee_ref, xeo_ref, xoe_ref, xoo_ref, w1_ref, b1_ref,
                   w2_ref, b2_ref, w3_ref, o_ref, y1_ref):
            phases = ((xee_ref, xeo_ref), (xoe_ref, xoo_ref))

            def window(ky, kx):
                ref = phases[ky % 2][kx % 2]
                oy, ox = ky // 2, kx // 2
                return ref[oy:oy + ho, ox:ox + wo, :]

            acc1 = _conv3x3(window, w1_ref, cin)
            sc = xoo_ref[0:ho, 0:wo, :]              # == x[::2, ::2, :]
            _tail(acc1, b1_ref, w2_ref, b2_ref, sc, w3_ref, o_ref, y1_ref)

    return kernel


# --------------------------- pallas_call plumbing --------------------------- #

def _residual_block_pallas(x_inputs, w1, b1, w2, b2, w3, *, identity,
                           n, ho, wo, cin, coutp):
    kernel = _make_block_kernel(identity, ho, wo, cin, coutp)

    def batch_spec(shape):
        # batch dim squeezed; one whole (padded) image per grid step.
        return pl.BlockSpec((None,) + tuple(shape[1:]),
                            lambda i: (i, 0, 0, 0))

    def full_spec(arr):
        nd = arr.ndim
        return pl.BlockSpec(tuple(arr.shape), lambda i, _nd=nd: (0,) * _nd)

    in_specs = ([batch_spec(x.shape) for x in x_inputs] +
                [full_spec(w1), full_spec(b1), full_spec(w2),
                 full_spec(b2), full_spec(w3)])

    return pl.pallas_call(
        kernel,
        out_shape=jax.ShapeDtypeStruct((n, ho, wo, coutp), jnp.float32),
        grid_spec=pltpu.PrefetchScalarGridSpec(
            num_scalar_prefetch=0,
            grid=(n,),
            in_specs=in_specs,
            out_specs=pl.BlockSpec((None, ho, wo, coutp),
                                   lambda i: (i, 0, 0, 0)),
            scratch_shapes=[pltpu.VMEM((ho + 2, wo + 2, coutp), jnp.bfloat16)],
        ),
        compiler_params=pltpu.CompilerParams(
            dimension_semantics=("parallel",)),
    )(*x_inputs, w1, b1, w2, b2, w3)


# ------------------------------ JAX glue ----------------------------------- #

def _fold_bn_params(params, identity, cin, cout, coutp, eps=1e-5):
    """Fold inference-mode BN into weights (scale) + a single bias row (shift)."""
    s1 = params["g1"] * lax.rsqrt(params["v1"] + eps)
    sh1 = (params["b1"] - params["m1"]) * s1 + params["beta1"]
    s2 = params["g2"] * lax.rsqrt(params["v2"] + eps)
    sh2 = (params["b2"] - params["m2"]) * s2 + params["beta2"]

    pad_o = coutp - cout
    w1 = jnp.transpose(params["w1"], (2, 3, 1, 0)) * s1            # (3,3,ci,co)
    w1 = jnp.pad(w1, ((0, 0), (0, 0), (0, 0), (0, pad_o))).astype(jnp.bfloat16)
    w2 = jnp.transpose(params["w2"], (2, 3, 1, 0)) * s2            # (3,3,co,co)
    w2 = jnp.pad(w2, ((0, 0), (0, 0), (0, pad_o), (0, pad_o))).astype(jnp.bfloat16)
    b1 = jnp.pad(sh1, (0, pad_o)).reshape(1, coutp).astype(jnp.float32)

    if identity:
        w3 = params["w3"][:, :, 0, 0].T                            # (cin, cout)
        b2r = sh2 + params["b3"]
    else:
        w3 = jnp.eye(cin, cout, dtype=jnp.float32)                 # cin == cout
        b2r = sh2
    w3 = jnp.pad(w3, ((0, 0), (0, pad_o))).astype(jnp.bfloat16)
    b2 = jnp.pad(b2r, (0, pad_o)).reshape(1, coutp).astype(jnp.float32)
    return w1, b1, w2, b2, w3


def init_params(key, cin, cout, identity):
    ks = jax.random.split(key, 16)

    def nrm(k, shape, s=0.1):
        return (jax.random.normal(k, shape) * s).astype(jnp.float32)

    p = {
        "w1": nrm(ks[0], (cout, cin, 3, 3)),   # Conv2d(3x3, pad=1, stride=s)
        "b1": nrm(ks[1], (cout,)),
        "g1": jax.random.uniform(ks[2], (cout,), minval=0.8, maxval=1.2),
        "beta1": nrm(ks[3], (cout,)),
        "m1": nrm(ks[4], (cout,)),
        "v1": jax.random.uniform(ks[5], (cout,), minval=0.5, maxval=1.5),
        "w2": nrm(ks[6], (cout, cout, 3, 3)),  # Conv2d(3x3, pad=1, stride=1)
        "b2": nrm(ks[7], (cout,)),
        "g2": jax.random.uniform(ks[8], (cout,), minval=0.8, maxval=1.2),
        "beta2": nrm(ks[9], (cout,)),
        "m2": nrm(ks[10], (cout,)),
        "v2": jax.random.uniform(ks[11], (cout,), minval=0.5, maxval=1.5),
    }
    if identity:
        p["w3"] = nrm(ks[12], (cout, cin, 1, 1))  # Conv2d(1x1, stride=2)
        p["b3"] = nrm(ks[13], (cout,))
    return p


def residual_block_forward(params, x_nchw, identity):
    x = jnp.transpose(x_nchw, (0, 2, 3, 1)).astype(jnp.float32)   # NCHW -> NHWC
    n, h, w, cin = x.shape
    cout = params["w1"].shape[0]
    coutp = _round_up(cout, 128)                    # lane-dense output channels
    stride = 2 if identity else 1
    ho = (h + 2 - 3) // stride + 1
    wo = (w + 2 - 3) // stride + 1

    w1, b1, w2, b2, w3 = _fold_bn_params(params, identity, cin, cout, coutp)

    # bf16 input, spatially padded once (pad=1 for the 3x3 convs).
    xp = jnp.pad(x, ((0, 0), (1, 1), (1, 1), (0, 0))).astype(jnp.bfloat16)

    if identity:
        # Polyphase split so the stride-2 conv1 only needs contiguous windows.
        def phase(ry, rx):
            p = xp[:, ry::2, rx::2, :]
            return jnp.pad(p, ((0, 0), (0, ho + 1 - p.shape[1]),
                               (0, wo + 1 - p.shape[2]), (0, 0)))
        x_inputs = (phase(0, 0), phase(0, 1), phase(1, 0), phase(1, 1))
    else:
        assert cin == cout, "identity shortcut requires input_channels == num_channels"
        x_inputs = (xp,)

    out = _residual_block_pallas(x_inputs, w1, b1, w2, b2, w3,
                                 identity=identity, n=n, ho=ho, wo=wo,
                                 cin=cin, coutp=coutp)
    out = out[..., :cout]
    return jnp.transpose(out, (0, 3, 1, 2))                       # NHWC -> NCHW


# --------------------------- pure-JAX reference ----------------------------- #

def _ref_forward(params, x_nchw, identity):
    eps = 1e-5
    x = jnp.transpose(x_nchw, (0, 2, 3, 1))
    stride = 2 if identity else 1

    def conv(xx, w_oihw, b, s, pad):
        y = lax.conv_general_dilated(
            xx, jnp.transpose(w_oihw, (2, 3, 1, 0)),
            window_strides=(s, s), padding=((pad, pad), (pad, pad)),
            dimension_numbers=("NHWC", "HWIO", "NHWC"))
        return y + b

    def bn(y, g, beta, m, v):
        return (y - m) / jnp.sqrt(v + eps) * g + beta

    y = conv(x, params["w1"], params["b1"], stride, 1)
    y = jax.nn.relu(bn(y, params["g1"], params["beta1"],
                       params["m1"], params["v1"]))
    y = conv(y, params["w2"], params["b2"], 1, 1)
    y = bn(y, params["g2"], params["beta2"], params["m2"], params["v2"])
    sc = conv(x, params["w3"], params["b3"], 2, 0) if identity else x
    return jnp.transpose(jax.nn.relu(y + sc), (0, 3, 1, 2))


# ----------------------------------- main ----------------------------------- #

if __name__ == "__main__":
    key = jax.random.PRNGKey(0)
    k_x1, k_p1, k_x2, k_p2 = jax.random.split(key, 4)

    fwd = jax.jit(residual_block_forward, static_argnums=2)

    # Case 1: identity=False  (input_channels == num_channels, stride 1)
    x1 = jax.random.normal(k_x1, (2, 8, 16, 16), dtype=jnp.float32)   # NCHW
    params1 = init_params(k_p1, 8, 8, identity=False)
    out1 = jax.block_until_ready(fwd(params1, x1, False))
    ref1 = _ref_forward(params1, x1, False)
    assert out1.shape == (2, 8, 16, 16), out1.shape
    assert jnp.allclose(out1, ref1, atol=3e-2, rtol=2e-2), \
        float(jnp.max(jnp.abs(out1 - ref1)))

    # Case 2: identity=True  (stride-2 downsample + 1x1 projection shortcut)
    x2 = jax.random.normal(k_x2, (2, 4, 16, 16), dtype=jnp.float32)   # NCHW
    params2 = init_params(k_p2, 4, 8, identity=True)
    out2 = jax.block_until_ready(fwd(params2, x2, True))
    ref2 = _ref_forward(params2, x2, True)
    assert out2.shape == (2, 8, 8, 8), out2.shape
    assert jnp.allclose(out2, ref2, atol=3e-2, rtol=2e-2), \
        float(jnp.max(jnp.abs(out2 - ref2)))

    print("KERNEL_OK")
</pallas_src>

<mosaic_0001>
module attributes {stable_mosaic.version = 11 : i64} {
  func.func @kernel(%arg0: i32, %arg1: memref<1x18x18x8xbf16, #tpu.memory_space<vmem>>, %arg2: memref<3x3x8x128xbf16, #tpu.memory_space<vmem>>, %arg3: memref<1x128xf32, #tpu.memory_space<vmem>>, %arg4: memref<3x3x128x128xbf16, #tpu.memory_space<vmem>>, %arg5: memref<1x128xf32, #tpu.memory_space<vmem>>, %arg6: memref<8x128xbf16, #tpu.memory_space<vmem>>, %arg7: memref<1x16x16x128xf32, #tpu.memory_space<vmem>>, %arg8: memref<18x18x128xbf16, #tpu.memory_space<vmem>>) attributes {dimension_semantics = [#tpu.dimension_semantics<parallel>], iteration_bounds = array<i64: 2>, scalar_prefetch = 0 : i64, scratch_operands = 1 : i64, tpu.core_type = #tpu.core_type<tc>, window_params = [{transform_indices = @transform_0, window_bounds = array<i64: 1, 18, 18, 8>}, {pipeline_mode = #tpu.pipeline_mode<synchronous>, transform_indices = @transform_1, window_bounds = array<i64: 3, 3, 8, 128>}, {pipeline_mode = #tpu.pipeline_mode<synchronous>, transform_indices = @transform_2, window_bounds = array<i64: 1, 128>}, {pipeline_mode = #tpu.pipeline_mode<synchronous>, transform_indices = @transform_3, window_bounds = array<i64: 3, 3, 128, 128>}, {pipeline_mode = #tpu.pipeline_mode<synchronous>, transform_indices = @transform_4, window_bounds = array<i64: 1, 128>}, {pipeline_mode = #tpu.pipeline_mode<synchronous>, transform_indices = @transform_5, window_bounds = array<i64: 8, 128>}, {transform_indices = @transform_6, window_bounds = array<i64: 1, 16, 16, 128>}]} {
    %cst = arith.constant 0.000000e+00 : f32
    %0 = vector.broadcast %cst : f32 to vector<256x128xf32>
    %c0 = arith.constant 0 : index
    %c0_0 = arith.constant 0 : index
    %c0_1 = arith.constant 0 : index
    %c0_2 = arith.constant 0 : index
    %1 = vector.load %arg1[%c0, %c0_0, %c0_1, %c0_2] : memref<1x18x18x8xbf16, #tpu.memory_space<vmem>>, vector<1x16x16x8xbf16>
    %2 = vector.shape_cast %1 : vector<1x16x16x8xbf16> to vector<16x16x8xbf16>
    %3 = vector.shape_cast %2 : vector<16x16x8xbf16> to vector<256x8xbf16>
    %c0_3 = arith.constant 0 : index
    %c0_4 = arith.constant 0 : index
    %c0_5 = arith.constant 0 : index
    %c0_6 = arith.constant 0 : index
    %4 = vector.load %arg2[%c0_3, %c0_4, %c0_5, %c0_6] : memref<3x3x8x128xbf16, #tpu.memory_space<vmem>>, vector<1x1x8x128xbf16>
    %5 = vector.shape_cast %4 : vector<1x1x8x128xbf16> to vector<8x128xbf16>
    %cst_7 = arith.constant dense<0.000000e+00> : vector<256x128xf32>
    %6 = tpu.matmul %3, %5, %cst_7 {dimension_numbers = #tpu.dot_dimension_numbers<[1], [0], [0], [1], [0, 0, 1, 1], [], []>} : vector<256x8xbf16>, vector<8x128xbf16>, vector<256x128xf32> -> vector<256x128xf32>
    %7 = arith.addf %0, %6 : vector<256x128xf32>
    %c0_8 = arith.constant 0 : index
    %c0_9 = arith.constant 0 : index
    %c1 = arith.constant 1 : index
    %c0_10 = arith.constant 0 : index
    %8 = vector.load %arg1[%c0_8, %c0_9, %c1, %c0_10] : memref<1x18x18x8xbf16, #tpu.memory_space<vmem>>, vector<1x16x16x8xbf16>
    %9 = vector.shape_cast %8 : vector<1x16x16x8xbf16> to vector<16x16x8xbf16>
    %10 = vector.shape_cast %9 : vector<16x16x8xbf16> to vector<256x8xbf16>
    %c0_11 = arith.constant 0 : index
    %c1_12 = arith.constant 1 : index
    %c0_13 = arith.constant 0 : index
    %c0_14 = arith.constant 0 : index
    %11 = vector.load %arg2[%c0_11, %c1_12, %c0_13, %c0_14] : memref<3x3x8x128xbf16, #tpu.memory_space<vmem>>, vector<1x1x8x128xbf16>
    %12 = vector.shape_cast %11 : vector<1x1x8x128xbf16> to vector<8x128xbf16>
    %cst_15 = arith.constant dense<0.000000e+00> : vector<256x128xf32>
    %13 = tpu.matmul %10, %12, %cst_15 {dimension_numbers = #tpu.dot_dimension_numbers<[1], [0], [0], [1], [0, 0, 1, 1], [], []>} : vector<256x8xbf16>, vector<8x128xbf16>, vector<256x128xf32> -> vector<256x128xf32>
    %14 = arith.addf %7, %13 : vector<256x128xf32>
    %c0_16 = arith.constant 0 : index
    %c0_17 = arith.constant 0 : index
    %c2 = arith.constant 2 : index
    %c0_18 = arith.constant 0 : index
    %15 = vector.load %arg1[%c0_16, %c0_17, %c2, %c0_18] : memref<1x18x18x8xbf16, #tpu.memory_space<vmem>>, vector<1x16x16x8xbf16>
    %16 = vector.shape_cast %15 : vector<1x16x16x8xbf16> to vector<16x16x8xbf16>
    %17 = vector.shape_cast %16 : vector<16x16x8xbf16> to vector<256x8xbf16>
    %c0_19 = arith.constant 0 : index
    %c2_20 = arith.constant 2 : index
    %c0_21 = arith.constant 0 : index
    %c0_22 = arith.constant 0 : index
    %18 = vector.load %arg2[%c0_19, %c2_20, %c0_21, %c0_22] : memref<3x3x8x128xbf16, #tpu.memory_space<vmem>>, vector<1x1x8x128xbf16>
    %19 = vector.shape_cast %18 : vector<1x1x8x128xbf16> to vector<8x128xbf16>
    %cst_23 = arith.constant dense<0.000000e+00> : vector<256x128xf32>
    %20 = tpu.matmul %17, %19, %cst_23 {dimension_numbers = #tpu.dot_dimension_numbers<[1], [0], [0], [1], [0, 0, 1, 1], [], []>} : vector<256x8xbf16>, vector<8x128xbf16>, vector<256x128xf32> -> vector<256x128xf32>
    %21 = arith.addf %14, %20 : vector<256x128xf32>
    %c0_24 = arith.constant 0 : index
    %c1_25 = arith.constant 1 : index
    %c0_26 = arith.constant 0 : index
    %c0_27 = arith.constant 0 : index
    %22 = vector.load %arg1[%c0_24, %c1_25, %c0_26, %c0_27] : memref<1x18x18x8xbf16, #tpu.memory_space<vmem>>, vector<1x16x16x8xbf16>
    %23 = vector.shape_cast %22 : vector<1x16x16x8xbf16> to vector<16x16x8xbf16>
    %24 = vector.shape_cast %23 : vector<16x16x8xbf16> to vector<256x8xbf16>
    %c1_28 = arith.constant 1 : index
    %c0_29 = arith.constant 0 : index
    %c0_30 = arith.constant 0 : index
    %c0_31 = arith.constant 0 : index
    %25 = vector.load %arg2[%c1_28, %c0_29, %c0_30, %c0_31] : memref<3x3x8x128xbf16, #tpu.memory_space<vmem>>, vector<1x1x8x128xbf16>
    %26 = vector.shape_cast %25 : vector<1x1x8x128xbf16> to vector<8x128xbf16>
    %cst_32 = arith.constant dense<0.000000e+00> : vector<256x128xf32>
    %27 = tpu.matmul %24, %26, %cst_32 {dimension_numbers = #tpu.dot_dimension_numbers<[1], [0], [0], [1], [0, 0, 1, 1], [], []>} : vector<256x8xbf16>, vector<8x128xbf16>, vector<256x128xf32> -> vector<256x128xf32>
    %28 = arith.addf %21, %27 : vector<256x128xf32>
    %c0_33 = arith.constant 0 : index
    %c1_34 = arith.constant 1 : index
    %c1_35 = arith.constant 1 : index
    %c0_36 = arith.constant 0 : index
    %29 = vector.load %arg1[%c0_33, %c1_34, %c1_35, %c0_36] : memref<1x18x18x8xbf16, #tpu.memory_space<vmem>>, vector<1x16x16x8xbf16>
    %30 = vector.shape_cast %29 : vector<1x16x16x8xbf16> to vector<16x16x8xbf16>
    %31 = vector.shape_cast %30 : vector<16x16x8xbf16> to vector<256x8xbf16>
    %c1_37 = arith.constant 1 : index
    %c1_38 = arith.constant 1 : index
    %c0_39 = arith.constant 0 : index
    %c0_40 = arith.constant 0 : index
    %32 = vector.load %arg2[%c1_37, %c1_38, %c0_39, %c0_40] : memref<3x3x8x128xbf16, #tpu.memory_space<vmem>>, vector<1x1x8x128xbf16>
    %33 = vector.shape_cast %32 : vector<1x1x8x128xbf16> to vector<8x128xbf16>
    %cst_41 = arith.constant dense<0.000000e+00> : vector<256x128xf32>
    %34 = tpu.matmul %31, %33, %cst_41 {dimension_numbers = #tpu.dot_dimension_numbers<[1], [0], [0], [1], [0, 0, 1, 1], [], []>} : vector<256x8xbf16>, vector<8x128xbf16>, vector<256x128xf32> -> vector<256x128xf32>
    %35 = arith.addf %28, %34 : vector<256x128xf32>
    %c0_42 = arith.constant 0 : index
    %c1_43 = arith.constant 1 : index
    %c2_44 = arith.constant 2 : index
    %c0_45 = arith.constant 0 : index
    %36 = vector.load %arg1[%c0_42, %c1_43, %c2_44, %c0_45] : memref<1x18x18x8xbf16, #tpu.memory_space<vmem>>, vector<1x16x16x8xbf16>
    %37 = vector.shape_cast %36 : vector<1x16x16x8xbf16> to vector<16x16x8xbf16>
    %38 = vector.shape_cast %37 : vector<16x16x8xbf16> to vector<256x8xbf16>
    %c1_46 = arith.constant 1 : index
    %c2_47 = arith.constant 2 : index
    %c0_48 = arith.constant 0 : index
    %c0_49 = arith.constant 0 : index
    %39 = vector.load %arg2[%c1_46, %c2_47, %c0_48, %c0_49] : memref<3x3x8x128xbf16, #tpu.memory_space<vmem>>, vector<1x1x8x128xbf16>
    %40 = vector.shape_cast %39 : vector<1x1x8x128xbf16> to vector<8x128xbf16>
    %cst_50 = arith.constant dense<0.000000e+00> : vector<256x128xf32>
    %41 = tpu.matmul %38, %40, %cst_50 {dimension_numbers = #tpu.dot_dimension_numbers<[1], [0], [0], [1], [0, 0, 1, 1], [], []>} : vector<256x8xbf16>, vector<8x128xbf16>, vector<256x128xf32> -> vector<256x128xf32>
    %42 = arith.addf %35, %41 : vector<256x128xf32>
    %c0_51 = arith.constant 0 : index
    %c2_52 = arith.constant 2 : index
    %c0_53 = arith.constant 0 : index
    %c0_54 = arith.constant 0 : index
    %43 = vector.load %arg1[%c0_51, %c2_52, %c0_53, %c0_54] : memref<1x18x18x8xbf16, #tpu.memory_space<vmem>>, vector<1x16x16x8xbf16>
    %44 = vector.shape_cast %43 : vector<1x16x16x8xbf16> to vector<16x16x8xbf16>
    %45 = vector.shape_cast %44 : vector<16x16x8xbf16> to vector<256x8xbf16>
    %c2_55 = arith.constant 2 : index
    %c0_56 = arith.constant 0 : index
    %c0_57 = arith.constant 0 : index
    %c0_58 = arith.constant 0 : index
    %46 = vector.load %arg2[%c2_55, %c0_56, %c0_57, %c0_58] : memref<3x3x8x128xbf16, #tpu.memory_space<vmem>>, vector<1x1x8x128xbf16>
    %47 = vector.shape_cast %46 : vector<1x1x8x128xbf16> to vector<8x128xbf16>
    %cst_59 = arith.constant dense<0.000000e+00> : vector<256x128xf32>
    %48 = tpu.matmul %45, %47, %cst_59 {dimension_numbers = #tpu.dot_dimension_numbers<[1], [0], [0], [1], [0, 0, 1, 1], [], []>} : vector<256x8xbf16>, vector<8x128xbf16>, vector<256x128xf32> -> vector<256x128xf32>
    %49 = arith.addf %42, %48 : vector<256x128xf32>
    %c0_60 = arith.constant 0 : index
    %c2_61 = arith.constant 2 : index
    %c1_62 = arith.constant 1 : index
    %c0_63 = arith.constant 0 : index
    %50 = vector.load %arg1[%c0_60, %c2_61, %c1_62, %c0_63] : memref<1x18x18x8xbf16, #tpu.memory_space<vmem>>, vector<1x16x16x8xbf16>
    %51 = vector.shape_cast %50 : vector<1x16x16x8xbf16> to vector<16x16x8xbf16>
    %52 = vector.shape_cast %51 : vector<16x16x8xbf16> to vector<256x8xbf16>
    %c2_64 = arith.constant 2 : index
    %c1_65 = arith.constant 1 : index
    %c0_66 = arith.constant 0 : index
    %c0_67 = arith.constant 0 : index
    %53 = vector.load %arg2[%c2_64, %c1_65, %c0_66, %c0_67] : memref<3x3x8x128xbf16, #tpu.memory_space<vmem>>, vector<1x1x8x128xbf16>
    %54 = vector.shape_cast %53 : vector<1x1x8x128xbf16> to vector<8x128xbf16>
    %cst_68 = arith.constant dense<0.000000e+00> : vector<256x128xf32>
    %55 = tpu.matmul %52, %54, %cst_68 {dimension_numbers = #tpu.dot_dimension_numbers<[1], [0], [0], [1], [0, 0, 1, 1], [], []>} : vector<256x8xbf16>, vector<8x128xbf16>, vector<256x128xf32> -> vector<256x128xf32>
    %56 = arith.addf %49, %55 : vector<256x128xf32>
    %c0_69 = arith.constant 0 : index
    %c2_70 = arith.constant 2 : index
    %c2_71 = arith.constant 2 : index
    %c0_72 = arith.constant 0 : index
    %57 = vector.load %arg1[%c0_69, %c2_70, %c2_71, %c0_72] : memref<1x18x18x8xbf16, #tpu.memory_space<vmem>>, vector<1x16x16x8xbf16>
    %58 = vector.shape_cast %57 : vector<1x16x16x8xbf16> to vector<16x16x8xbf16>
    %59 = vector.shape_cast %58 : vector<16x16x8xbf16> to vector<256x8xbf16>
    %c2_73 = arith.constant 2 : index
    %c2_74 = arith.constant 2 : index
    %c0_75 = arith.constant 0 : index
    %c0_76 = arith.constant 0 : index
    %60 = vector.load %arg2[%c2_73, %c2_74, %c0_75, %c0_76] : memref<3x3x8x128xbf16, #tpu.memory_space<vmem>>, vector<1x1x8x128xbf16>
    %61 = vector.shape_cast %60 : vector<1x1x8x128xbf16> to vector<8x128xbf16>
    %cst_77 = arith.constant dense<0.000000e+00> : vector<256x128xf32>
    %62 = tpu.matmul %59, %61, %cst_77 {dimension_numbers = #tpu.dot_dimension_numbers<[1], [0], [0], [1], [0, 0, 1, 1], [], []>} : vector<256x8xbf16>, vector<8x128xbf16>, vector<256x128xf32> -> vector<256x128xf32>
    %63 = arith.addf %56, %62 : vector<256x128xf32>
    %c0_78 = arith.constant 0 : index
    %c1_79 = arith.constant 1 : index
    %c1_80 = arith.constant 1 : index
    %c0_81 = arith.constant 0 : index
    %64 = vector.load %arg1[%c0_78, %c1_79, %c1_80, %c0_81] : memref<1x18x18x8xbf16, #tpu.memory_space<vmem>>, vector<1x16x16x8xbf16>
    %65 = vector.shape_cast %64 : vector<1x16x16x8xbf16> to vector<16x16x8xbf16>
    %c0_82 = arith.constant 0 : index
    %c0_83 = arith.constant 0 : index
    %66 = vector.load %arg3[%c0_82, %c0_83] : memref<1x128xf32, #tpu.memory_space<vmem>>, vector<1x128xf32>
    %67 = vector.broadcast %66 : vector<1x128xf32> to vector<256x128xf32>
    %68 = arith.addf %63, %67 : vector<256x128xf32>
    %cst_84 = arith.constant 0.000000e+00 : f32
    %69 = vector.broadcast %cst_84 : f32 to vector<256x128xf32>
    %70 = arith.maximumf %68, %69 : vector<256x128xf32>
    %71 = arith.truncf %70 : vector<256x128xf32> to vector<256x128xbf16>
    %cst_85 = arith.constant 0.000000e+00 : bf16
    %72 = vector.broadcast %cst_85 : bf16 to vector<18x18x128xbf16>
    %c0_86 = arith.constant 0 : index
    %c0_87 = arith.constant 0 : index
    %c0_88 = arith.constant 0 : index
    %73 = vector.load %arg8[%c0_86, %c0_87, %c0_88] : memref<18x18x128xbf16, #tpu.memory_space<vmem>>, vector<18x18x128xbf16>
    tpu.vector_store %arg8[%c0_86, %c0_87, %c0_88], %72 {strides = array<i32>} : memref<18x18x128xbf16, #tpu.memory_space<vmem>>, vector<18x18x128xbf16>,
    %74 = vector.shape_cast %71 : vector<256x128xbf16> to vector<16x16x128xbf16>
    %c1_89 = arith.constant 1 : index
    %c1_90 = arith.constant 1 : index
    %c0_91 = arith.constant 0 : index
    %75 = vector.load %arg8[%c1_89, %c1_90, %c0_91] : memref<18x18x128xbf16, #tpu.memory_space<vmem>>, vector<16x16x128xbf16>
    tpu.vector_store %arg8[%c1_89, %c1_90, %c0_91], %74 {strides = array<i32>} : memref<18x18x128xbf16, #tpu.memory_space<vmem>>, vector<16x16x128xbf16>,
    %cst_92 = arith.constant 0.000000e+00 : f32
    %76 = vector.broadcast %cst_92 : f32 to vector<256x128xf32>
    %c0_93 = arith.constant 0 : index
    %c0_94 = arith.constant 0 : index
    %c0_95 = arith.constant 0 : index
    %77 = vector.load %arg8[%c0_93, %c0_94, %c0_95] : memref<18x18x128xbf16, #tpu.memory_space<vmem>>, vector<16x16x128xbf16>
    %78 = vector.shape_cast %77 : vector<16x16x128xbf16> to vector<256x128xbf16>
    %c0_96 = arith.constant 0 : index
    %c0_97 = arith.constant 0 : index
    %c0_98 = arith.constant 0 : index
    %c0_99 = arith.constant 0 : index
    %79 = vector.load %arg4[%c0_96, %c0_97, %c0_98, %c0_99] : memref<3x3x128x128xbf16, #tpu.memory_space<vmem>>, vector<1x1x128x128xbf16>
    %80 = vector.shape_cast %79 : vector<1x1x128x128xbf16> to vector<128x128xbf16>
    %cst_100 = arith.constant dense<0.000000e+00> : vector<256x128xf32>
    %81 = tpu.matmul %78, %80, %cst_100 {dimension_numbers = #tpu.dot_dimension_numbers<[1], [0], [0], [1], [0, 0, 1, 1], [], []>} : vector<256x128xbf16>, vector<128x128xbf16>, vector<256x128xf32> -> vector<256x128xf32>
    %82 = arith.addf %76, %81 : vector<256x128xf32>
    %c0_101 = arith.constant 0 : index
    %c1_102 = arith.constant 1 : index
    %c0_103 = arith.constant 0 : index
    %83 = vector.load %arg8[%c0_101, %c1_102, %c0_103] : memref<18x18x128xbf16, #tpu.memory_space<vmem>>, vector<16x16x128xbf16>
    %84 = vector.shape_cast %83 : vector<16x16x128xbf16> to vector<256x128xbf16>
    %c0_104 = arith.constant 0 : index
    %c1_105 = arith.constant 1 : index
    %c0_106 = arith.constant 0 : index
    %c0_107 = arith.constant 0 : index
    %85 = vector.load %arg4[%c0_104, %c1_105, %c0_106, %c0_107] : memref<3x3x128x128xbf16, #tpu.memory_space<vmem>>, vector<1x1x128x128xbf16>
    %86 = vector.shape_cast %85 : vector<1x1x128x128xbf16> to vector<128x128xbf16>
    %cst_108 = arith.constant dense<0.000000e+00> : vector<256x128xf32>
    %87 = tpu.matmul %84, %86, %cst_108 {dimension_numbers = #tpu.dot_dimension_numbers<[1], [0], [0], [1], [0, 0, 1, 1], [], []>} : vector<256x128xbf16>, vector<128x128xbf16>, vector<256x128xf32> -> vector<256x128xf32>
    %88 = arith.addf %82, %87 : vector<256x128xf32>
    %c0_109 = arith.constant 0 : index
    %c2_110 = arith.constant 2 : index
    %c0_111 = arith.constant 0 : index
    %89 = vector.load %arg8[%c0_109, %c2_110, %c0_111] : memref<18x18x128xbf16, #tpu.memory_space<vmem>>, vector<16x16x128xbf16>
    %90 = vector.shape_cast %89 : vector<16x16x128xbf16> to vector<256x128xbf16>
    %c0_112 = arith.constant 0 : index
    %c2_113 = arith.constant 2 : index
    %c0_114 = arith.constant 0 : index
    %c0_115 = arith.constant 0 : index
    %91 = vector.load %arg4[%c0_112, %c2_113, %c0_114, %c0_115] : memref<3x3x128x128xbf16, #tpu.memory_space<vmem>>, vector<1x1x128x128xbf16>
    %92 = vector.shape_cast %91 : vector<1x1x128x128xbf16> to vector<128x128xbf16>
    %cst_116 = arith.constant dense<0.000000e+00> : vector<256x128xf32>
    %93 = tpu.matmul %90, %92, %cst_116 {dimension_numbers = #tpu.dot_dimension_numbers<[1], [0], [0], [1], [0, 0, 1, 1], [], []>} : vector<256x128xbf16>, vector<128x128xbf16>, vector<256x128xf32> -> vector<256x128xf32>
    %94 = arith.addf %88, %93 : vector<256x128xf32>
    %c1_117 = arith.constant 1 : index
    %c0_118 = arith.constant 0 : index
    %c0_119 = arith.constant 0 : index
    %95 = vector.load %arg8[%c1_117, %c0_118, %c0_119] : memref<18x18x128xbf16, #tpu.memory_space<vmem>>, vector<16x16x128xbf16>
    %96 = vector.shape_cast %95 : vector<16x16x128xbf16> to vector<256x128xbf16>
    %c1_120 = arith.constant 1 : index
    %c0_121 = arith.constant 0 : index
    %c0_122 = arith.constant 0 : index
    %c0_123 = arith.constant 0 : index
    %97 = vector.load %arg4[%c1_120, %c0_121, %c0_122, %c0_123] : memref<3x3x128x128xbf16, #tpu.memory_space<vmem>>, vector<1x1x128x128xbf16>
    %98 = vector.shape_cast %97 : vector<1x1x128x128xbf16> to vector<128x128xbf16>
    %cst_124 = arith.constant dense<0.000000e+00> : vector<256x128xf32>
    %99 = tpu.matmul %96, %98, %cst_124 {dimension_numbers = #tpu.dot_dimension_numbers<[1], [0], [0], [1], [0, 0, 1, 1], [], []>} : vector<256x128xbf16>, vector<128x128xbf16>, vector<256x128xf32> -> vector<256x128xf32>
    %100 = arith.addf %94, %99 : vector<256x128xf32>
    %c1_125 = arith.constant 1 : index
    %c1_126 = arith.constant 1 : index
    %c0_127 = arith.constant 0 : index
    %101 = vector.load %arg8[%c1_125, %c1_126, %c0_127] : memref<18x18x128xbf16, #tpu.memory_space<vmem>>, vector<16x16x128xbf16>
    %102 = vector.shape_cast %101 : vector<16x16x128xbf16> to vector<256x128xbf16>
    %c1_128 = arith.constant 1 : index
    %c1_129 = arith.constant 1 : index
    %c0_130 = arith.constant 0 : index
    %c0_131 = arith.constant 0 : index
    %103 = vector.load %arg4[%c1_128, %c1_129, %c0_130, %c0_131] : memref<3x3x128x128xbf16, #tpu.memory_space<vmem>>, vector<1x1x128x128xbf16>
    %104 = vector.shape_cast %103 : vector<1x1x128x128xbf16> to vector<128x128xbf16>
    %cst_132 = arith.constant dense<0.000000e+00> : vector<256x128xf32>
    %105 = tpu.matmul %102, %104, %cst_132 {dimension_numbers = #tpu.dot_dimension_numbers<[1], [0], [0], [1], [0, 0, 1, 1], [], []>} : vector<256x128xbf16>, vector<128x128xbf16>, vector<256x128xf32> -> vector<256x128xf32>
    %106 = arith.addf %100, %105 : vector<256x128xf32>
    %c1_133 = arith.constant 1 : index
    %c2_134 = arith.constant 2 : index
    %c0_135 = arith.constant 0 : index
    %107 = vector.load %arg8[%c1_133, %c2_134, %c0_135] : memref<18x18x128xbf16, #tpu.memory_space<vmem>>, vector<16x16x128xbf16>
    %108 = vector.shape_cast %107 : vector<16x16x128xbf16> to vector<256x128xbf16>
    %c1_136 = arith.constant 1 : index
    %c2_137 = arith.constant 2 : index
    %c0_138 = arith.constant 0 : index
    %c0_139 = arith.constant 0 : index
    %109 = vector.load %arg4[%c1_136, %c2_137, %c0_138, %c0_139] : memref<3x3x128x128xbf16, #tpu.memory_space<vmem>>, vector<1x1x128x128xbf16>
    %110 = vector.shape_cast %109 : vector<1x1x128x128xbf16> to vector<128x128xbf16>
    %cst_140 = arith.constant dense<0.000000e+00> : vector<256x128xf32>
    %111 = tpu.matmul %108, %110, %cst_140 {dimension_numbers = #tpu.dot_dimension_numbers<[1], [0], [0], [1], [0, 0, 1, 1], [], []>} : vector<256x128xbf16>, vector<128x128xbf16>, vector<256x128xf32> -> vector<256x128xf32>
    %112 = arith.addf %106, %111 : vector<256x128xf32>
    %c2_141 = arith.constant 2 : index
    %c0_142 = arith.constant 0 : index
    %c0_143 = arith.constant 0 : index
    %113 = vector.load %arg8[%c2_141, %c0_142, %c0_143] : memref<18x18x128xbf16, #tpu.memory_space<vmem>>, vector<16x16x128xbf16>
    %114 = vector.shape_cast %113 : vector<16x16x128xbf16> to vector<256x128xbf16>
    %c2_144 = arith.constant 2 : index
    %c0_145 = arith.constant 0 : index
    %c0_146 = arith.constant 0 : index
    %c0_147 = arith.constant 0 : index
    %115 = vector.load %arg4[%c2_144, %c0_145, %c0_146, %c0_147] : memref<3x3x128x128xbf16, #tpu.memory_space<vmem>>, vector<1x1x128x128xbf16>
    %116 = vector.shape_cast %115 : vector<1x1x128x128xbf16> to vector<128x128xbf16>
    %cst_148 = arith.constant dense<0.000000e+00> : vector<256x128xf32>
    %117 = tpu.matmul %114, %116, %cst_148 {dimension_numbers = #tpu.dot_dimension_numbers<[1], [0], [0], [1], [0, 0, 1, 1], [], []>} : vector<256x128xbf16>, vector<128x128xbf16>, vector<256x128xf32> -> vector<256x128xf32>
    %118 = arith.addf %112, %117 : vector<256x128xf32>
    %c2_149 = arith.constant 2 : index
    %c1_150 = arith.constant 1 : index
    %c0_151 = arith.constant 0 : index
    %119 = vector.load %arg8[%c2_149, %c1_150, %c0_151] : memref<18x18x128xbf16, #tpu.memory_space<vmem>>, vector<16x16x128xbf16>
    %120 = vector.shape_cast %119 : vector<16x16x128xbf16> to vector<256x128xbf16>
    %c2_152 = arith.constant 2 : index
    %c1_153 = arith.constant 1 : index
    %c0_154 = arith.constant 0 : index
    %c0_155 = arith.constant 0 : index
    %121 = vector.load %arg4[%c2_152, %c1_153, %c0_154, %c0_155] : memref<3x3x128x128xbf16, #tpu.memory_space<vmem>>, vector<1x1x128x128xbf16>
    %122 = vector.shape_cast %121 : vector<1x1x128x128xbf16> to vector<128x128xbf16>
    %cst_156 = arith.constant dense<0.000000e+00> : vector<256x128xf32>
    %123 = tpu.matmul %120, %122, %cst_156 {dimension_numbers = #tpu.dot_dimension_numbers<[1], [0], [0], [1], [0, 0, 1, 1], [], []>} : vector<256x128xbf16>, vector<128x128xbf16>, vector<256x128xf32> -> vector<256x128xf32>
    %124 = arith.addf %118, %123 : vector<256x128xf32>
    %c2_157 = arith.constant 2 : index
    %c2_158 = arith.constant 2 : index
    %c0_159 = arith.constant 0 : index
    %125 = vector.load %arg8[%c2_157, %c2_158, %c0_159] : memref<18x18x128xbf16, #tpu.memory_space<vmem>>, vector<16x16x128xbf16>
    %126 = vector.shape_cast %125 : vector<16x16x128xbf16> to vector<256x128xbf16>
    %c2_160 = arith.constant 2 : index
    %c2_161 = arith.constant 2 : index
    %c0_162 = arith.constant 0 : index
    %c0_163 = arith.constant 0 : index
    %127 = vector.load %arg4[%c2_160, %c2_161, %c0_162, %c0_163] : memref<3x3x128x128xbf16, #tpu.memory_space<vmem>>, vector<1x1x128x128xbf16>
    %128 = vector.shape_cast %127 : vector<1x1x128x128xbf16> to vector<128x128xbf16>
    %cst_164 = arith.constant dense<0.000000e+00> : vector<256x128xf32>
    %129 = tpu.matmul %126, %128, %cst_164 {dimension_numbers = #tpu.dot_dimension_numbers<[1], [0], [0], [1], [0, 0, 1, 1], [], []>} : vector<256x128xbf16>, vector<128x128xbf16>, vector<256x128xf32> -> vector<256x128xf32>
    %130 = arith.addf %124, %129 : vector<256x128xf32>
    %131 = vector.shape_cast %65 : vector<16x16x8xbf16> to vector<256x8xbf16>
    %c0_165 = arith.constant 0 : index
    %c0_166 = arith.constant 0 : index
    %132 = vector.load %arg6[%c0_165, %c0_166] : memref<8x128xbf16, #tpu.memory_space<vmem>>, vector<8x128xbf16>
    %cst_167 = arith.constant dense<0.000000e+00> : vector<256x128xf32>
    %133 = tpu.matmul %131, %132, %cst_167 {dimension_numbers = #tpu.dot_dimension_numbers<[1], [0], [0], [1], [0, 0, 1, 1], [], []>} : vector<256x8xbf16>, vector<8x128xbf16>, vector<256x128xf32> -> vector<256x128xf32>
    %134 = arith.addf %130, %133 : vector<256x128xf32>
    %c0_168 = arith.constant 0 : index
    %c0_169 = arith.constant 0 : index
    %135 = vector.load %arg5[%c0_168, %c0_169] : memref<1x128xf32, #tpu.memory_space<vmem>>, vector<1x128xf32>
    %136 = vector.broadcast %135 : vector<1x128xf32> to vector<256x128xf32>
    %137 = arith.addf %134, %136 : vector<256x128xf32>
    %cst_170 = arith.constant 0.000000e+00 : f32
    %138 = vector.broadcast %cst_170 : f32 to vector<256x128xf32>
    %139 = arith.maximumf %137, %138 : vector<256x128xf32>
    %140 = vector.shape_cast %139 : vector<256x128xf32> to vector<16x16x128xf32>
    %c0_171 = arith.constant 0 : index
    %c0_172 = arith.constant 0 : index
    %c0_173 = arith.constant 0 : index
    %c0_174 = arith.constant 0 : index
    %141 = vector.load %arg7[%c0_171, %c0_172, %c0_173, %c0_174] : memref<1x16x16x128xf32, #tpu.memory_space<vmem>>, vector<1x16x16x128xf32>
    %142 = vector.shape_cast %141 : vector<1x16x16x128xf32> to vector<16x16x128xf32>
    %143 = vector.shape_cast %140 : vector<16x16x128xf32> to vector<1x16x16x128xf32>
    tpu.vector_store %arg7[%c0_171, %c0_172, %c0_173, %c0_174], %143 {strides = array<i32>} : memref<1x16x16x128xf32, #tpu.memory_space<vmem>>, vector<1x16x16x128xf32>,
    return
  }
  func.func @transform_0(%arg0: i32) -> (i32, i32, i32, i32) {
    %c0_i32 = arith.constant 0 : i32
    %c0_i32_0 = arith.constant 0 : i32
    %c0_i32_1 = arith.constant 0 : i32
    %c0_i32_2 = arith.constant 0 : i32
    return %arg0, %c0_i32, %c0_i32_0, %c0_i32_1 : i32, i32, i32, i32
  }
  func.func @transform_1(%arg0: i32) -> (i32, i32, i32, i32) {
    %c0_i32 = arith.constant 0 : i32
    %c0_i32_0 = arith.constant 0 : i32
    %c0_i32_1 = arith.constant 0 : i32
    %c0_i32_2 = arith.constant 0 : i32
    %c0_i32_3 = arith.constant 0 : i32
    return %c0_i32, %c0_i32_0, %c0_i32_1, %c0_i32_2 : i32, i32, i32, i32
  }
  func.func @transform_2(%arg0: i32) -> (i32, i32) {
    %c0_i32 = arith.constant 0 : i32
    %c0_i32_0 = arith.constant 0 : i32
    %c0_i32_1 = arith.constant 0 : i32
    return %c0_i32, %c0_i32_0 : i32, i32
  }
  func.func @transform_3(%arg0: i32) -> (i32, i32, i32, i32) {
    %c0_i32 = arith.constant 0 : i32
    %c0_i32_0 = arith.constant 0 : i32
    %c0_i32_1 = arith.constant 0 : i32
    %c0_i32_2 = arith.constant 0 : i32
    %c0_i32_3 = arith.constant 0 : i32
    return %c0_i32, %c0_i32_0, %c0_i32_1, %c0_i32_2 : i32, i32, i32, i32
  }
  func.func @transform_4(%arg0: i32) -> (i32, i32) {
    %c0_i32 = arith.constant 0 : i32
    %c0_i32_0 = arith.constant 0 : i32
    %c0_i32_1 = arith.constant 0 : i32
    return %c0_i32, %c0_i32_0 : i32, i32
  }
  func.func @transform_5(%arg0: i32) -> (i32, i32) {
    %c0_i32 = arith.constant 0 : i32
    %c0_i32_0 = arith.constant 0 : i32
    %c0_i32_1 = arith.constant 0 : i32
    return %c0_i32, %c0_i32_0 : i32, i32
  }
  func.func @transform_6(%arg0: i32) -> (i32, i32, i32, i32) {
    %c0_i32 = arith.constant 0 : i32
    %c0_i32_0 = arith.constant 0 : i32
    %c0_i32_1 = arith.constant 0 : i32
    %c0_i32_2 = arith.constant 0 : i32
    return %arg0, %c0_i32, %c0_i32_0, %c0_i32_1 : i32, i32, i32, i32
  }
}

</mosaic_0001>

<bundles_post_ra>
// kernel: residual_block_forward.1
= control target key start
LH: loop header
LB: loop body
LE: loop exit
PB: predicated region body
PF: predicated region fallthrough
CT: control target
= control target key end

     0   :  { %s13061_s21 = smov 0   ;;  %s18294_s0 = inlined_call_operand.vmem [shape: bf16[2,18,18,8], index: 0, kind: input, shape index: {}]   ;;  %s18295_s1 = inlined_call_operand.vmem [shape: bf16[3,3,8,128], index: 1, kind: input, shape index: {}]   ;;  %s18296_s2 = inlined_call_operand.vmem [shape: f32[1,128], index: 2, kind: input, shape index: {}]   ;;  %s18297_s3 = inlined_call_operand.vmem [shape: bf16[3,3,128,128], index: 3, kind: input, shape index: {}]   ;;  %s18298_s4 = inlined_call_operand.vmem [shape: f32[1,128], index: 4, kind: input, shape index: {}]   ;;  %s18299_s5 = inlined_call_operand.vmem [shape: bf16[8,128], index: 5, kind: input, shape index: {}]   ;;  %s18300_s6 = inlined_call_operand.vmem [shape: f32[2,16,16,128], index: 6, kind: output, shape index: {}]  }
   0x1 LB: > { %s10631_s22 = sadd.s32 4294967295, %s13023_s21   ;;  %p10635_p0 = scmp.ge.s32.totalorder %s13023_s21, 1  ;;  %s13023_s21 = sphi %s13061_s21, %s16_s21  }
   0x2   : > { %p212_p1 = scmp.lt.s32.totalorder %s13023_s21, 3 }
   0x4   : > { %p213_p2 = pnand %p10635_p0, %p212_p1 }
   0x6   : > { %216 = sbr.rel (%p213_p2) target bundleno = 1127 (0x467), region = 44 }
   0xb   : > { %v10639_v0 = vld [vmem:[%s18295_s1 + $0x4] sm:$0xf]  ;;  %vm788_vm0 = vcmask 1043456   ;;  %p242_p3 = scmp.lt.s32.totalorder %s10631_s22, 1  ;;  %v285_v2 = vld [vmem:[%s18295_s1] sm:$0xf] }
   0xc   : > { %12813 = vmatprep.subr.msk.bf16.mxu1 %vm788_vm0, %v10639_v0  ;;  %12812 = vmatprep.subr.msk.bf16.mxu0 %vm788_vm0, %v10639_v0  ;;  %v790_v1 = vsel %vm788_vm0, %v10639_v0, 0  ;;  %v10720_v3 = vld [vmem:[%s18295_s1 + $0x8] sm:$0xf]  ;;  %vm302_vm1 = vsmask.f32 3328  ;;  %v13087_v4 = vsel %vm788_vm0, %v285_v2, 0 }
   0xd   : > { %12811 = vmatpush3.bf16.msra.mxu1 %v790_v1  ;;  %12039 = vmatpush3.bf16.msra.mxu0 %v790_v1  ;;  %s18793_s22 = smov (!%p242_p3, %s10631_s22), 1  ;;  %vm303_vm2 = vsmask.f32 7440  ;;  %vm739_vm3 = vcmask 64512   ;;  %v13118_v16 = vsel %vm788_vm0, %v10720_v3, 0  ;;  %v18365_v31 = vmov 0 }
   0xe   : > { %12814 = vmatprep.subr.msk.bf16.mxu1 %vm788_vm0, %v285_v2  ;;  %12815 = vmatprep.subr.msk.bf16.mxu0 %vm788_vm0, %v10720_v3  ;;  %s12823_s29 = smul.u32 216, %s18793_s22  ;;  %vm13133_vm4 = vmor %vm302_vm1, %vm303_vm2  ;;  %vm1293_vm5 = vcmask 1042432   ;;  %vm1294_vm6 = vcmask 1046532   ;;  %vm5358_vm8 = vsmask.f32 7938  ;;  %vm5364_vm11 = vcmask 1040384  }
   0xf   : > { %v18366_v31 = vsel %vm13133_vm4, 4294967295, %v18365_v31  ;;  %vm13419_vm7 = vmor %vm1293_vm5, %vm1294_vm6  ;;  %vm5033_vm9 = vsmask.f32 256  ;;  %vm5034_vm10 = vsmask.f32 4368  ;;  %s11619_s25 = sshll.u32 %s18793_s22, 8 }
  0x10   : > { %s13092_s8 = scalar_lea.vmem %s18294_s0, %s12823_s29  ;;  %18367 = vst [vmem:[#allocation3_spill] sm:$0xff] %v18366_v31  ;;  %vm15760_vm12 = vmand %vm788_vm0, %vm5358_vm8  ;;  %s18148_s27 = scalar_lea.vmem %s18300_s6, %s11619_s25 }
  0x11   : > { %v13095_v5 = vld [vmem:[%s13092_s8] sm:$0xf]  ;;  %v13098_v6 = vld [vmem:[%s13092_s8 + $0x4] sm:$0xf]  ;;  %v13101_v7 = vld [vmem:[%s13092_s8 + $0x8] sm:$0x1] }
  0x12   : > { %v306_v8 = vshrl.u32 %v13095_v5, 16  ;;  %v309_v9 = vshll.u32 %v13095_v5, 16  ;;  %v315_v10 = vshll.u32 %v13098_v6, 16  ;;  %v319_v11 = vshrl.u32 %v13098_v6, 16  ;;  %v13108_v12 = vld [vmem:[%s13092_s8 + $0x60] sm:$0xf]  ;;  %vm15773_vm13 = vmor %vm5033_vm9, %vm5034_vm10 }
  0x13   : > { %v325_v13 = vshll.u32 %v13101_v7, 16  ;;  %v13112_v14 = vld [vmem:[%s13092_s8 + $0x64] sm:$0xf]  ;;  %v13115_v15 = vld [vmem:[%s13092_s8 + $0x68] sm:$0x1]  ;;  %v498_v22 = vshrl.u32 %v13108_v12, 16  ;;  %vm15779_vm14 = vmand %vm5364_vm11, %vm5033_vm9 }
  0x14   : > { %v308_v17 = vrot.slane %v306_v8, 4  ;;  %v311_v18 = vrot.slane %v309_v9, 5  ;;  %v317_v19 = vrot.slane %v315_v10, 5  ;;  %v321_v20 = vrot.slane %v319_v11, 4  ;;  %v13126_v29 = vld [vmem:[%s13092_s8 + $0xc] sm:$0xf] }
  0x15   : > { %v327_v21 = vrot.slane %v325_v13, 5  ;;  %v501_v23 = vshll.u32 %v13108_v12, 16  ;;  %v507_v24 = vshll.u32 %v13112_v14, 16  ;;  %v511_v27 = vshrl.u32 %v13112_v14, 16  ;;  %v13129_v30 = vld [vmem:[%s13092_s8 + $0x10] sm:$0xf] }
  0x16   : > { %v312_v25 = vor.u32 %v311_v18, %v308_v17  ;;  %v322_v26 = vor.u32 %v321_v20, %v317_v19  ;;  %v517_v28 = vshll.u32 %v13115_v15, 16  ;;  %v500_v33 = vrot.slane %v498_v22, 4  ;;  %v13139_v41 = vld [vmem:[%s13092_s8 + $0x14] sm:$0x1]  ;;  %v13150_v53 = vld [vmem:[%s13092_s8 + $0x6c] sm:$0xf] }
  0x17   : > { %v503_v34 = vrot.slane %v501_v23, 5  ;;  %v509_v35 = vrot.slane %v507_v24, 5  ;;  %v513_v38 = vrot.slane %v511_v27, 4  ;;  %v330_v42 = vshrl.u32 %v13126_v29, 16  ;;  %v13154_v58 = vld [vmem:[%s13092_s8 + $0x70] sm:$0xf] }
  0x18   : > { %v313_v36 = vrot.slane %v312_v25, 4  ;;  %v323_v37 = vrot.slane %v322_v26, 4  ;;  %v519_v39 = vrot.slane %v517_v28, 5  ;;  %v333_v43 = vshll.u32 %v13126_v29, 16  ;;  %v13162_v63 = vld [vmem:[%s13092_s8 + $0x74] sm:$0x1] }
  0x19   : > { %v504_v40 = vor.u32 %v503_v34, %v500_v33  ;;  %v339_v44 = vshll.u32 %v13129_v30, 16  ;;  %v514_v47 = vor.u32 %v513_v38, %v509_v35  ;;  %v343_v48 = vshrl.u32 %v13129_v30, 16  ;;  %v13168_v8 = vld [vmem:[%s13092_s8 + $0x18] sm:$0xf]  ;;  %v13181_v25 = vld [vmem:[%s13092_s8 + $0x20] sm:$0x1] }
  0x1a   : > { %v318_v45 = vsel %vm13133_vm4, %v313_v36, %v317_v19  ;;  %v328_v46 = vsel %vm13133_vm4, %v323_v37, %v327_v21  ;;  %v332_v51 = vrot.slane %v330_v42, 4  ;;  %v335_v52 = vrot.slane %v333_v43, 5  ;;  %v13175_v21 = vld [vmem:[%s13092_s8 + $0x1c] sm:$0xf] }
  0x1b   : > { %v10640_v49 = vcombine.low %v318_v45, %v328_v46  ;;  %v505_v50 = vrot.slane %v504_v40, 4  ;;  %v515_v54 = vrot.slane %v514_v47, 4  ;;  %v341_v55 = vrot.slane %v339_v44, 5  ;;  %v13194_v40 = vld [vmem:[%s18295_s1 + $0x10] sm:$0xf] }
  0x1c   : > { %v345_v56 = vrot.slane %v343_v48, 4  ;;  %v349_v57 = vshll.u32 %v13139_v41, 16  ;;  %v336_v60 = vor.u32 %v335_v52, %v332_v51  ;;  %v522_v3 = vshrl.u32 %v13150_v53, 16  ;;  %v13199_v46 = vld [vmem:[%s13092_s8 + $0x7c] sm:$0xf] }
  0x1d   : > { %12040 = vmatprep.mubr.msk.bf16.mxu0 %vm739_vm3, %v10640_v49  ;;  %v510_v59 = vsel %vm13133_vm4, %v505_v50, %v509_v35  ;;  %v520_v0 = vsel %vm13133_vm4, %v515_v54, %v519_v39  ;;  %v525_v11 = vshll.u32 %v13150_v53, 16  ;;  %v531_v13 = vshll.u32 %v13154_v58, 16  ;;  %v13188_v35 = vld [vmem:[%s13092_s8 + $0x78] sm:$0xf] }
  0x1e   : > { %v346_v1 = vor.u32 %v345_v56, %v341_v55  ;;  %v351_v2 = vrot.slane %v349_v57, 5  ;;  %v10648_v9 = vcombine.low %v510_v59, %v520_v0  ;;  %v337_v10 = vrot.slane %v336_v60, 4  ;;  %v13206_v56 = vld [vmem:[%s13092_s8 + $0x80] sm:$0x1] }
  0x1f   : > { %v524_v18 = vrot.slane %v522_v3, 4  ;;  %v535_v19 = vshrl.u32 %v13154_v58, 16  ;;  %v541_v20 = vshll.u32 %v13162_v63, 16  ;;  %v527_v23 = vrot.slane %v525_v11, 5  ;;  %18368 = vst [vmem:[#allocation4_spill] sm:$0xff] %v13206_v56 }
  0x20   : > { %v347_v17 = vrot.slane %v346_v1, 4  ;;  %12056 = vmatprep.mubr.msk.bf16.mxu1 %vm739_vm3, %v10648_v9  ;;  %v342_v22 = vsel %vm13133_vm4, %v337_v10, %v341_v55  ;;  %v533_v24 = vrot.slane %v531_v13, 5  ;;  %v354_v26 = vshrl.u32 %v13168_v8, 16  ;;  %v13212_v1 = vld [vmem:[%s13092_s8 + $0x24] sm:$0xf] }
  0x21   : > { %v537_v28 = vrot.slane %v535_v19, 4  ;;  %v543_v33 = vrot.slane %v541_v20, 5  ;;  %v357_v34 = vshll.u32 %v13168_v8, 16  ;;  %v528_v37 = vor.u32 %v527_v23, %v524_v18  ;;  %v13220_v10 = vld [vmem:[%s13092_s8 + $0x28] sm:$0xf] }
  0x22   : > { %v352_v27 = vsel %vm13133_vm4, %v347_v17, %v351_v2  ;;  %v356_v38 = vrot.slane %v354_v26, 4  ;;  %v363_v39 = vshll.u32 %v13175_v21, 16  ;;  %v367_v44 = vshrl.u32 %v13175_v21, 16  ;;  %v13226_v19 = vld [vmem:[%s18295_s1 + $0xc] sm:$0xf] }
  0x23   : > { %v10641_v36 = vcombine.low %v342_v22, %v352_v27  ;;  %v538_v42 = vor.u32 %v537_v28, %v533_v24  ;;  %v359_v43 = vrot.slane %v357_v34, 5  ;;  %v373_v45 = vshll.u32 %v13181_v25, 16 }
  0x24   : > { %v529_v47 = vrot.slane %v528_v37, 4  ;;  %v365_v48 = vrot.slane %v363_v39, 5  ;;  %v546_v49 = vshrl.u32 %v13188_v35, 16  ;;  %v549_v50 = vshll.u32 %v13188_v35, 16 }
  0x25   : > { %12041 = vmatmul.mubr.msk.bf16.vlgmr.msra.gmra.mxu0 %vm739_vm3, %v10641_v36  ;;  %v539_v51 = vrot.slane %v538_v42, 4  ;;  %v360_v52 = vor.u32 %v359_v43, %v356_v38  ;;  %v369_v54 = vrot.slane %v367_v44, 4  ;;  %v375_v55 = vrot.slane %v373_v45, 5  ;;  %v13238_v36 = vld [vmem:[%s13092_s8 + $0x84] sm:$0xf] }
  0x26   : > { %12107 = vmatpush3.bf16.msra.mxu0 %v13118_v16  ;;  %v534_v57 = vsel %vm13133_vm4, %v529_v47, %v533_v24  ;;  %v548_v59 = vrot.slane %v546_v49, 4  ;;  %v551_v60 = vrot.slane %v549_v50, 5  ;;  %v555_v0 = vshll.u32 %v13199_v46, 16  ;;  %v13231_v24 = vld [vmem:[%s13092_s8 + $0x2c] sm:$0x1] }
  0x27   : > { %12817 = vmatprep.subr.msk.bf16.mxu0 %vm788_vm0, %v13194_v40  ;;  %v544_v16 = vsel %vm13133_vm4, %v539_v51, %v543_v33  ;;  %v361_v2 = vrot.slane %v360_v52, 4  ;;  %v370_v3 = vor.u32 %v369_v54, %v365_v48  ;;  %v559_v9 = vshrl.u32 %v13199_v46, 16  ;;  %v13245_v43 = vld [vmem:[%s13092_s8 + $0x88] sm:$0xf]  ;;  %v13253_v51 = vld [vmem:[%s13092_s8 + $0x8c] sm:$0x1] }
  0x28   : > { %v10649_v11 = vcombine.low %v534_v57, %v544_v16  ;;  %v552_v13 = vor.u32 %v551_v60, %v548_v59  ;;  %v557_v17 = vrot.slane %v555_v0, 5  ;;  %v565_v18 = vshll.u32 %v13206_v56, 16  ;;  %18369 = vst [vmem:[#allocation5_spill] sm:$0xff] %v13253_v51  ;;  %v13261_v60 = vld [vmem:[%s13092_s8 + $0x30] sm:$0xf] }
  0x29   : > { %v366_v20 = vsel %vm13133_vm4, %v361_v2, %v365_v48  ;;  %v371_v22 = vrot.slane %v370_v3, 4  ;;  %v561_v23 = vrot.slane %v559_v9, 4  ;;  %v378_v26 = vshrl.u32 %v13212_v1, 16  ;;  %v13266_v9 = vld [vmem:[%s13092_s8 + $0x34] sm:$0xf] }
  0x2a   : > { %12057 = vmatmul.mubr.msk.bf16.vlgmr.msra.gmra.mxu1 %vm739_vm3, %v10649_v11  ;;  %v553_v27 = vrot.slane %v552_v13, 4  ;;  %v567_v28 = vrot.slane %v565_v18, 5  ;;  %v381_v33 = vshll.u32 %v13212_v1, 16  ;;  %v387_v34 = vshll.u32 %v13220_v10, 16 }
  0x2b   : > { %12073 = vmatpush3.bf16.msra.mxu1 %v13087_v4  ;;  %v376_v37 = vsel %vm13133_vm4, %v371_v22, %v375_v55  ;;  %v562_v38 = vor.u32 %v561_v23, %v557_v17  ;;  %v380_v39 = vrot.slane %v378_v26, 4  ;;  %v391_v42 = vshrl.u32 %v13220_v10, 16 }
  0x2c   : > { %v10642_v44 = vcombine.low %v366_v20, %v376_v37  ;;  %v558_v45 = vsel %vm13133_vm4, %v553_v27, %v557_v17  ;;  %v383_v47 = vrot.slane %v381_v33, 5  ;;  %v389_v48 = vrot.slane %v387_v34, 5  ;;  %12816 = vmatprep.subr.msk.bf16.mxu1 %vm788_vm0, %v13226_v19  ;;  %v13274_v33 = vld [vmem:[%s13092_s8 + $0x38] sm:$0x1] }
  0x2d   : > { %v563_v4 = vrot.slane %v562_v38, 4  ;;  %v393_v49 = vrot.slane %v391_v42, 4  ;;  %v397_v50 = vshll.u32 %v13231_v24, 16  ;;  %v570_v52 = vshrl.u32 %v13238_v36, 16  ;;  %v13279_v38 = vld [vmem:[%s13092_s8 + $0x90] sm:$0xf] }
  0x2e   : > { %12044 = vmatprep.mubr.msk.bf16.mxu0 %vm739_vm3, %v10642_v44  ;;  %v384_v54 = vor.u32 %v383_v47, %v380_v39  ;;  %v573_v55 = vshll.u32 %v13238_v36, 16  ;;  %v579_v57 = vshll.u32 %v13245_v43, 16  ;;  %v583_v59 = vshrl.u32 %v13245_v43, 16  ;;  %18370 = vst [vmem:[#allocation6_spill] sm:$0xff] %v13279_v38  ;;  %v13284_v47 = vld [vmem:[%s13092_s8 + $0x94] sm:$0xf] }
  0x2f   : > { %v568_v0 = vsel %vm13133_vm4, %v563_v4, %v567_v28  ;;  %v394_v16 = vor.u32 %v393_v49, %v389_v48  ;;  %v399_v2 = vrot.slane %v397_v50, 5  ;;  %v572_v3 = vrot.slane %v570_v52, 4  ;;  %18371 = vst [vmem:[#allocation7_spill] sm:$0xff] %v13284_v47 }
  0x30   : > { %v10650_v11 = vcombine.low %v558_v45, %v568_v0  ;;  %v385_v13 = vrot.slane %v384_v54, 4  ;;  %v575_v17 = vrot.slane %v573_v55, 5  ;;  %v581_v18 = vrot.slane %v579_v57, 5 }
  0x31   : > { %v395_v20 = vrot.slane %v394_v16, 4  ;;  %v585_v22 = vrot.slane %v583_v59, 4  ;;  %v589_v23 = vshll.u32 %v13253_v51, 16  ;;  %v402_v26 = vshrl.u32 %v13261_v60, 16  ;;  %v13293_v16 = vld [vmem:[%s13092_s8 + $0x98] sm:$0x1] }
  0x32   : > { %12060 = vmatprep.mubr.msk.bf16.mxu1 %vm739_vm3, %v10650_v11  ;;  %v390_v27 = vsel %vm13133_vm4, %v385_v13, %v389_v48  ;;  %v576_v28 = vor.u32 %v575_v17, %v572_v3  ;;  %v405_v34 = vshll.u32 %v13261_v60, 16  ;;  %v411_v37 = vshll.u32 %v13266_v9, 16  ;;  %18372 = vst [vmem:[#allocation8_spill] sm:$0xff] %v13293_v16  ;;  %v13298_v11 = vld [vmem:[%s13092_s8 + $0x3c] sm:$0xf] }
  0x33   : > { %v400_v39 = vsel %vm13133_vm4, %v395_v20, %v399_v2  ;;  %v586_v42 = vor.u32 %v585_v22, %v581_v18  ;;  %v591_v44 = vrot.slane %v589_v23, 5  ;;  %v404_v45 = vrot.slane %v402_v26, 4  ;;  %v13303_v23 = vld [vmem:[%s13092_s8 + $0x40] sm:$0xf]  ;;  %v1246_v51 = vld [vmem:[%s13092_s8 + $0xc] sm:$0xe] }
  0x34   : > { %v10643_v48 = vcombine.low %v390_v27, %v400_v39  ;;  %v577_v4 = vrot.slane %v576_v28, 4  ;;  %v407_v49 = vrot.slane %v405_v34, 5  ;;  %v413_v50 = vrot.slane %v411_v37, 5 }
  0x35   : > { %v587_v52 = vrot.slane %v586_v42, 4  ;;  %v415_v54 = vshrl.u32 %v13266_v9, 16  ;;  %v421_v55 = vshll.u32 %v13274_v33, 16  ;;  %v594_v57 = vshrl.u32 %v13279_v38, 16 }
  0x36   : > { %12045 = vmatmul.mubr.msk.bf16.gmra.mxu0 %vm739_vm3, %v10643_v48  ;;  %v582_v59 = vsel %vm13133_vm4, %v577_v4, %v581_v18  ;;  %v408_v0 = vor.u32 %v407_v49, %v404_v45  ;;  %v597_v2 = vshll.u32 %v13279_v38, 16  ;;  %v603_v3 = vshll.u32 %v13284_v47, 16  ;;  %v13312_v48 = vld [vmem:[%s13092_s8 + $0x44] sm:$0x1] }
  0x37   : > { %v592_v13 = vsel %vm13133_vm4, %v587_v52, %v591_v44  ;;  %v417_v17 = vrot.slane %v415_v54, 4  ;;  %v423_v20 = vrot.slane %v421_v55, 5  ;;  %v596_v22 = vrot.slane %v594_v57, 4  ;;  %v13317_v52 = vld [vmem:[%s13092_s8 + $0x9c] sm:$0xf] }
  0x38   : > { %v10651_v18 = vcombine.low %v582_v59, %v592_v13  ;;  %v409_v26 = vrot.slane %v408_v0, 4  ;;  %v599_v27 = vrot.slane %v597_v2, 5  ;;  %v605_v28 = vrot.slane %v603_v3, 5  ;;  %18373 = vst [vmem:[#allocation9_spill] sm:$0xff] %v13317_v52  ;;  %v13321_v13 = vld [vmem:[%s13092_s8 + $0xa0] sm:$0xf] }
  0x39   : > { %v418_v34 = vor.u32 %v417_v17, %v413_v50  ;;  %v607_v37 = vshrl.u32 %v13284_v47, 16  ;;  %v613_v39 = vshll.u32 %v13293_v16, 16  ;;  %v426_v42 = vshrl.u32 %v13298_v11, 16  ;;  %18374 = vst [vmem:[#allocation10_spill] sm:$0xff] %v13321_v13 }
  0x3a   : > { %12061 = vmatmul.mubr.msk.bf16.gmra.mxu1 %vm739_vm3, %v10651_v18  ;;  %v414_v44 = vsel %vm13133_vm4, %v409_v26, %v413_v50  ;;  %v600_v45 = vor.u32 %v599_v27, %v596_v22  ;;  %v429_v4 = vshll.u32 %v13298_v11, 16  ;;  %v435_v49 = vshll.u32 %v13303_v23, 16  ;;  %v13327_v26 = vld [vmem:[%s13092_s8 + $0xa4] sm:$0x1] }
  0x3b   : > { %v419_v54 = vrot.slane %v418_v34, 4  ;;  %v609_v55 = vrot.slane %v607_v37, 4  ;;  %v615_v57 = vrot.slane %v613_v39, 5  ;;  %v428_v59 = vrot.slane %v426_v42, 4  ;;  %18375 = vst [vmem:[#allocation11_spill] sm:$0xff] %v13327_v26 }
  0x3c   : > { %v601_v0 = vrot.slane %v600_v45, 4  ;;  %v431_v2 = vrot.slane %v429_v4, 5  ;;  %v437_v3 = vrot.slane %v435_v49, 5  ;;  %v439_v50 = vshrl.u32 %v13303_v23, 16  ;;  %v13331_v34 = vld [vmem:[%s13092_s8 + $0x48] sm:$0xf] }
  0x3d   : > { %v424_v17 = vsel %vm13133_vm4, %v419_v54, %v423_v20  ;;  %v610_v22 = vor.u32 %v609_v55, %v605_v28  ;;  %v445_v18 = vshll.u32 %v13312_v48, 16  ;;  %v618_v27 = vshrl.u32 %v13317_v52, 16 }
  0x3e   : > { %v10644_v37 = vcombine.low %v414_v44, %v424_v17  ;;  %v606_v39 = vsel %vm13133_vm4, %v601_v0, %v605_v28  ;;  %v432_v42 = vor.u32 %v431_v2, %v428_v59  ;;  %v441_v45 = vrot.slane %v439_v50, 4  ;;  %v13340_v17 = vld [vmem:[%s13092_s8 + $0x4c] sm:$0xf]  ;;  %v13346_v2 = vld [vmem:[%s13092_s8 + $0x50] sm:$0x1] }
  0x3f   : > { %v611_v4 = vrot.slane %v610_v22, 4  ;;  %v447_v49 = vrot.slane %v445_v18, 5  ;;  %v620_v20 = vrot.slane %v618_v27, 4  ;;  %v621_v54 = vshll.u32 %v13317_v52, 16 }
  0x40   : > { %12048 = vmatprep.mubr.msk.bf16.mxu0 %vm739_vm3, %v10644_v37  ;;  %v433_v55 = vrot.slane %v432_v42, 4  ;;  %v442_v62 = vor.u32 %v441_v45, %v437_v3  ;;  %v627_v32 = vshll.u32 %v13321_v13, 16  ;;  %v631_v44 = vshrl.u32 %v13321_v13, 16  ;;  %v13352_v42 = vld [vmem:[%s13092_s8 + $0xa8] sm:$0xf] }
  0x41   : > { %v616_v28 = vsel %vm13133_vm4, %v611_v4, %v615_v57  ;;  %v623_v59 = vrot.slane %v621_v54, 5  ;;  %v637_v0 = vshll.u32 %v13327_v26, 16  ;;  %v450_v50 = vshrl.u32 %v13331_v34, 16  ;;  %18376 = vst [vmem:[#allocation12_spill] sm:$0xff] %v13352_v42 }
  0x42   : > { %v10652_v22 = vcombine.low %v606_v39, %v616_v28  ;;  %v438_v18 = vsel %vm13133_vm4, %v433_v55, %v437_v3  ;;  %v443_v27 = vrot.slane %v442_v62, 4  ;;  %v629_v37 = vrot.slane %v627_v32, 5 }
  0x43   : > { %v624_v45 = vor.u32 %v623_v59, %v620_v20  ;;  %v633_v61 = vrot.slane %v631_v44, 4  ;;  %v639_v57 = vrot.slane %v637_v0, 5  ;;  %v452_v4 = vrot.slane %v450_v50, 4  ;;  %v13362_v44 = vld [vmem:[%s13092_s8 + $0xac] sm:$0xf] }
  0x44   : > { %12064 = vmatprep.mubr.msk.bf16.mxu1 %vm739_vm3, %v10652_v22  ;;  %v448_v54 = vsel %vm13133_vm4, %v443_v27, %v447_v49  ;;  %v453_v39 = vshll.u32 %v13331_v34, 16  ;;  %v459_v28 = vshll.u32 %v13340_v17, 16  ;;  %v463_v62 = vshrl.u32 %v13340_v17, 16  ;;  %18377 = vst [vmem:[#allocation13_spill] sm:$0xff] %v13362_v44  ;;  %v13365_v22 = vld [vmem:[%s13092_s8 + $0xb0] sm:$0x1] }
  0x45   : > { %v10645_v3 = vcombine.low %v438_v18, %v448_v54  ;;  %v625_v32 = vrot.slane %v624_v45, 4  ;;  %v634_v55 = vor.u32 %v633_v61, %v629_v37  ;;  %v469_v20 = vshll.u32 %v13346_v2, 16  ;;  %18378 = vst [vmem:[#allocation14_spill] sm:$0xff] %v13365_v22 }
  0x46   : > { %v455_v59 = vrot.slane %v453_v39, 5  ;;  %v461_v0 = vrot.slane %v459_v28, 5  ;;  %v465_v50 = vrot.slane %v463_v62, 4  ;;  %v642_v49 = vshrl.u32 %v13352_v42, 16  ;;  %v13374_v62 = vld [vmem:[%s13092_s8 + $0x54] sm:$0xf] }
  0x47   : > { %12049 = vmatmul.mubr.msk.bf16.gmra.mxu0 %vm739_vm3, %v10645_v3  ;;  %v630_v18 = vsel %vm13133_vm4, %v625_v32, %v629_v37  ;;  %v635_v27 = vrot.slane %v634_v55, 4  ;;  %v471_v61 = vrot.slane %v469_v20, 5  ;;  %v645_v45 = vshll.u32 %v13352_v42, 16  ;;  %v13381_v55 = vld [vmem:[%s13092_s8 + $0x58] sm:$0xf] }
  0x48   : > { %v456_v54 = vor.u32 %v455_v59, %v452_v4  ;;  %v466_v56 = vor.u32 %v465_v50, %v461_v0  ;;  %v644_v39 = vrot.slane %v642_v49, 4  ;;  %v651_v28 = vshll.u32 %v13362_v44, 16  ;;  %v13384_v49 = vld [vmem:[%s13092_s8 + $0x5c] sm:$0x1] }
  0x49   : > { %v640_v3 = vsel %vm13133_vm4, %v635_v27, %v639_v57  ;;  %v647_v26 = vrot.slane %v645_v45, 5  ;;  %v655_v37 = vshrl.u32 %v13362_v44, 16  ;;  %v661_v32 = vshll.u32 %v13365_v22, 16  ;;  %v1245_v22 = vld [vmem:[%s13092_s8] sm:$0xe] }
  0x4a   : > { %v10653_v4 = vcombine.low %v630_v18, %v640_v3  ;;  %v457_v20 = vrot.slane %v456_v54, 4  ;;  %v467_v59 = vrot.slane %v466_v56, 4  ;;  %v653_v50 = vrot.slane %v651_v28, 5  ;;  %v13395_v54 = vld [vmem:[%s13092_s8 + $0xb4] sm:$0xf] }
  0x4b   : > { %v648_v42 = vor.u32 %v647_v26, %v644_v39  ;;  %v657_v52 = vrot.slane %v655_v37, 4  ;;  %v663_v13 = vrot.slane %v661_v32, 5  ;;  %v474_v57 = vshrl.u32 %v13374_v62, 16  ;;  %18379 = vst [vmem:[#allocation15_spill] sm:$0xff] %v13395_v54  ;;  %v13398_v37 = vld [vmem:[%s13092_s8 + $0xb8] sm:$0xf] }
  0x4c   : > { %12065 = vmatmul.mubr.msk.bf16.gmra.mxu1 %vm739_vm3, %v10653_v4  ;;  %v462_v27 = vsel %vm13133_vm4, %v457_v20, %v461_v0  ;;  %v472_v18 = vsel %vm13133_vm4, %v467_v59, %v471_v61  ;;  %v477_v56 = vshll.u32 %v13374_v62, 16  ;;  %v483_v45 = vshll.u32 %v13381_v55, 16  ;;  %v13403_v61 = vld [vmem:[%s13092_s8 + $0xbc] sm:$0x1] }
  0x4d   : > { %v10646_v26 = vcombine.low %v462_v27, %v472_v18  ;;  %v649_v39 = vrot.slane %v648_v42, 4  ;;  %v658_v28 = vor.u32 %v657_v52, %v653_v50  ;;  %v476_v3 = vrot.slane %v474_v57, 4 }
  0x4e   : > { %v479_v32 = vrot.slane %v477_v56, 5  ;;  %v485_v4 = vrot.slane %v483_v45, 5  ;;  %v487_v0 = vshrl.u32 %v13381_v55, 16  ;;  %v493_v20 = vshll.u32 %v13384_v49, 16 }
  0x4f   : > { %12052 = vmatprep.mubr.msk.bf16.mxu0 %vm739_vm3, %v10646_v26  ;;  %v654_v59 = vsel %vm13133_vm4, %v649_v39, %v653_v50  ;;  %v659_v27 = vrot.slane %v658_v28, 4  ;;  %v666_v52 = vshrl.u32 %v13395_v54, 16  ;;  %v669_v42 = vshll.u32 %v13395_v54, 16 }
  0x50   : > { %v480_v57 = vor.u32 %v479_v32, %v476_v3  ;;  %v489_v18 = vrot.slane %v487_v0, 4  ;;  %v495_v56 = vrot.slane %v493_v20, 5  ;;  %v675_v45 = vshll.u32 %v13398_v37, 16 }
  0x51   : > { %v664_v44 = vsel %vm13133_vm4, %v659_v27, %v663_v13  ;;  %v668_v16 = vrot.slane %v666_v52, 4  ;;  %v671_v26 = vrot.slane %v669_v42, 5  ;;  %v679_v38 = vshrl.u32 %v13398_v37, 16 }
  0x52   : > { %v10654_v50 = vcombine.low %v654_v59, %v664_v44  ;;  %v481_v39 = vrot.slane %v480_v57, 4  ;;  %v490_v28 = vor.u32 %v489_v18, %v485_v4  ;;  %v677_v47 = vrot.slane %v675_v45, 5  ;;  %v1247_v57 = vld [vmem:[%s13092_s8 + $0x18] sm:$0xe] }
  0x53   : > { %v672_v54 = vor.u32 %v671_v26, %v668_v16  ;;  %v681_v3 = vrot.slane %v679_v38, 4  ;;  %v685_v32 = vshll.u32 %v13403_v61, 16  ;;  %v18380_v0 = vmov 0 }
  0x54   : > { %v18381_v0 = vsel %vm13419_vm7, 4294967295, %v18380_v0  ;;  %v10704_v13 = vrot.slane %v1245_v22, 9  ;;  %12068 = vmatprep.mubr.msk.bf16.mxu1 %vm739_vm3, %v10654_v50  ;;  %v486_v44 = vsel %vm13133_vm4, %v481_v39, %v485_v4  ;;  %v491_v20 = vrot.slane %v490_v28, 4 }
  0x55   : > { %18382 = vst [vmem:[#allocation16_spill] sm:$0xff] %v18381_v0  ;;  %v1298_v59 = vrot.slane %v13098_v6, 5  ;;  %v10673_v38 = vcombine.low %v13126_v29, %v13129_v30  ;;  %v673_v16 = vrot.slane %v672_v54, 4  ;;  %v682_v27 = vor.u32 %v681_v3, %v677_v47 }
  0x56   : > { %v687_v52 = vrot.slane %v685_v32, 5  ;;  %v10705_v42 = vrot.slane %v1246_v51, 9  ;;  %v496_v18 = vsel %vm13133_vm4, %v491_v20, %v495_v56  ;;  %v18383_v4 = vrot.slane %v13129_v30, 5 }
  0x57   : > { %v1299_v22 = vsel %vm13419_vm7, %v10704_v13, %v1298_v59  ;;  %v1300_v45 = vrot.slane %v1298_v59, 4  ;;  %v10647_v50 = vcombine.low %v486_v44, %v496_v18  ;;  %v678_v54 = vsel %vm13133_vm4, %v673_v16, %v677_v47 }
  0x58   : > { %v1307_v26 = vrot.slane %v18383_v4, 4  ;;  %v683_v39 = vrot.slane %v682_v27, 4  ;;  %v10672_v51 = vcombine.low %v13095_v5, %v13098_v6  ;;  %v18384_v28 = vrot.slane %v13101_v7, 5  ;;  %v1248_v27 = vld [vmem:[%s13092_s8 + $0x24] sm:$0xe] }
  0x59   : > { %v18385_v3 = vmov %v18383_v4  ;;  %v10674_v13 = vcombine.low %v13168_v8, %v13175_v21  ;;  %v10706_v44 = vrot.slane %v1247_v57, 9  ;;  %12053 = vmatmul.mubr.msk.bf16.gmra.mxu0 %vm739_vm3, %v10647_v50  ;;  %v18386_v6 = vrot.slane %v13139_v41, 5  ;;  %v1250_v4 = vld [vmem:[%s13092_s8 + $0x3c] sm:$0xe] }
  0x5a   : > { %v1302_v56 = vsel %vm13419_vm7, %v1300_v45, %v18384_v28  ;;  %v1306_v32 = vsel %vm13419_vm7, %v10705_v42, %v18385_v3  ;;  %v688_v47 = vsel %vm13133_vm4, %v683_v39, %v687_v52  ;;  %v1312_v20 = vrot.slane %v13175_v21, 5  ;;  %v1249_v42 = vld [vmem:[%s13092_s8 + $0x30] sm:$0xe]  ;;  %v1251_v39 = vld [vmem:[%s13092_s8 + $0x48] sm:$0xe] }
  0x5b   : > { %v10721_v5 = vcombine.low %v1299_v22, %v1302_v56  ;;  %v1309_v7 = vsel %vm13419_vm7, %v1307_v26, %v18386_v6  ;;  %v10655_v59 = vcombine.low %v678_v54, %v688_v47  ;;  %v1315_v16 = vrot.slane %v13181_v25, 5  ;;  %v1252_v47 = vld [vmem:[%s13092_s8 + $0x54] sm:$0xe]  ;;  %v13714_v21 = vld [vmem:[%s13092_s8 + $0x2c] sm:$0x1] }
  0x5c   : > { %v1866_v52 = vsel %vm788_vm0, %v13226_v19, 0  ;;  %v1313_v41 = vsel %vm13419_vm7, %v10706_v44, %v1312_v20  ;;  %v1314_v57 = vrot.slane %v1312_v20, 4  ;;  %v1319_v18 = vrot.slane %v13220_v10, 5 }
  0x5d   : > { %12108 = vmatprep.mubr.msk.bf16.mxu0 %vm739_vm3, %v10721_v5  ;;  %12069 = vmatmul.mubr.msk.bf16.gmra.mxu1 %vm739_vm3, %v10655_v59  ;;  %v10722_v22 = vcombine.low %v1306_v32, %v1309_v7  ;;  %v2592_v25 = vsel %vm788_vm0, %v13194_v40, 0  ;;  %v1326_v45 = vrot.slane %v13266_v9, 5  ;;  %v10707_v26 = vrot.slane %v1248_v27, 9 }
  0x5e   : > { %12074 = vmatprep.mubr.msk.bf16.mxu1 %vm739_vm3, %v10672_v51  ;;  %v1316_v19 = vsel %vm13419_vm7, %v1314_v57, %v1315_v16  ;;  %v1322_v50 = vrot.slane %v13231_v24, 5  ;;  %v10708_v54 = vrot.slane %v1249_v42, 9  ;;  %v1321_v56 = vrot.slane %v1319_v18, 4  ;;  %v13486_v24 = vld [vmem:[%s18295_s1 + $0x18] sm:$0xf] }
  0x5f   : > { %v10723_v28 = vcombine.low %v1313_v41, %v1316_v19  ;;  %v1328_v3 = vrot.slane %v1326_v45, 4  ;;  %v1329_v32 = vrot.slane %v13274_v33, 5  ;;  %v10709_v44 = vrot.slane %v1250_v4, 9 }
  0x60   : > { %v1333_v40 = vrot.slane %v13303_v23, 5  ;;  %v1357_v5 = vrot.slane %v13115_v15, 5  ;;  %v1336_v51 = vrot.slane %v13312_v48, 5  ;;  %v10710_v6 = vrot.slane %v1251_v39, 9  ;;  %v1256_v39 = vld [vmem:[%s13092_s8 + $0x84] sm:$0xe] }
  0x61   : > { %v1340_v7 = vrot.slane %v13340_v17, 5  ;;  %12109 = vmatmul.mubr.msk.bf16.vlgmr.msra.gmra.mxu0 %vm739_vm3, %v10722_v22  ;;  %v10675_v33 = vcombine.low %v13212_v1, %v13220_v10  ;;  %v1320_v20 = vsel %vm13419_vm7, %v10707_v26, %v1319_v18  ;;  %v1343_v16 = vrot.slane %v13346_v2, 5  ;;  %v1253_v1 = vld [vmem:[%s13092_s8 + $0x60] sm:$0xe]  ;;  %v13514_v22 = vld [vmem:[%s18295_s1 + $0x14] sm:$0xf] }
  0x62   : > { %v1335_v59 = vrot.slane %v1333_v40, 4  ;;  %12175 = vmatpush3.bf16.msra.mxu0 %v2592_v25  ;;  %12112 = vmatprep.mubr.msk.bf16.mxu0 %vm739_vm3, %v10723_v28  ;;  %v1323_v48 = vsel %vm13419_vm7, %v1321_v56, %v1322_v50  ;;  %v1327_v27 = vsel %vm13419_vm7, %v10708_v54, %v1326_v45  ;;  %v1330_v42 = vsel %vm13419_vm7, %v1328_v3, %v1329_v32  ;;  %v13539_v50 = vld [vmem:[%s13092_s8 + $0x6c] sm:$0xe] }
  0x63   : > { %v1342_v41 = vrot.slane %v1340_v7, 4  ;;  %v13504_v10 = vsel %vm13419_vm7, %v10709_v44, %v1333_v40  ;;  %v13508_v2 = vsel %vm13419_vm7, %v10710_v6, %v1340_v7  ;;  %v10711_v57 = vrot.slane %v1252_v47, 9  ;;  %12819 = vmatprep.subr.msk.bf16.mxu0 %vm788_vm0, %v13486_v24  ;;  %v13568_v44 = vld [vmem:[%s13092_s8 + $0x78] sm:$0xe]  ;;  %v1257_v40 = vld [vmem:[%s13092_s8 + $0x90] sm:$0xe] }
  0x64   : > { %v1347_v18 = vrot.slane %v13381_v55, 5  ;;  %v13524_v25 = vsel %vm13419_vm7, %v1335_v59, %v1336_v51  ;;  %v1350_v4 = vrot.slane %v13384_v49, 5  ;;  %v1354_v19 = vrot.slane %v13112_v14, 5 }
  0x65   : > { %12075 = vmatmul.mubr.msk.bf16.vlgmr.msra.gmra.mxu1 %vm739_vm3, %v10673_v38  ;;  %v13528_v45 = vsel %vm13419_vm7, %v1342_v41, %v1343_v16  ;;  %v10724_v29 = vcombine.low %v1320_v20, %v1323_v48  ;;  %v10676_v30 = vcombine.low %v13261_v60, %v13266_v9  ;;  %v10712_v26 = vrot.slane %v1253_v1, 9  ;;  %v18387_v48 = vld [vmem:[#allocation5_spill] sm:$0xff] }
  0x66   : > { %12141 = vmatpush3.bf16.msra.mxu1 %v1866_v52  ;;  %12078 = vmatprep.mubr.msk.bf16.mxu1 %vm739_vm3, %v10674_v13  ;;  %v1349_v38 = vrot.slane %v1347_v18, 4  ;;  %v10725_v49 = vcombine.low %v1327_v27, %v1330_v42  ;;  %v10677_v52 = vcombine.low %v13298_v11, %v13303_v23  ;;  %v10678_v8 = vcombine.low %v13331_v34, %v13340_v17  ;;  %v1258_v42 = vld [vmem:[%s13092_s8 + $0x9c] sm:$0xe] }
  0x67   : > { %12818 = vmatprep.subr.msk.bf16.mxu1 %vm788_vm0, %v13514_v22  ;;  %v10726_v60 = vcombine.low %v13504_v10, %v13524_v25  ;;  %v10727_v9 = vcombine.low %v13508_v2, %v13528_v45  ;;  %v1356_v54 = vrot.slane %v1354_v19, 4  ;;  %v13558_v28 = vsel %vm13419_vm7, %v10711_v57, %v1347_v18  ;;  %v18388_v10 = vld [vmem:[#allocation7_spill] sm:$0xff]  ;;  %v18389_v2 = vld [vmem:[#allocation6_spill] sm:$0xff]  ;;  %v1259_v18 = vld [vmem:[%s13092_s8 + $0xa8] sm:$0xe] }
  0x68   : > { %v13562_v56 = vsel %vm13419_vm7, %v1349_v38, %v1350_v4  ;;  %v10713_v32 = vrot.slane %v13539_v50, 9  ;;  %v13574_v47 = vsel %vm13419_vm7, %v10712_v26, %v1354_v19  ;;  %v1361_v51 = vrot.slane %v13154_v58, 5  ;;  %v18390_v19 = vld [vmem:[#allocation8_spill] sm:$0xff]  ;;  %v18391_v38 = vld [vmem:[#allocation10_spill] sm:$0xff]  ;;  %v18392_v26 = vld [vmem:[#allocation9_spill] sm:$0xff] }
  0x69   : > { %12113 = vmatmul.mubr.msk.bf16.gmra.mxu0 %vm739_vm3, %v10724_v29  ;;  %v1364_v6 = vrot.slane %v13162_v63, 5  ;;  %v10715_v59 = vrot.slane %v1256_v39, 9  ;;  %v1375_v16 = vrot.slane %v13245_v43, 5  ;;  %v1378_v27 = vrot.slane %v18387_v48, 5  ;;  %v18394_v48 = vld [vmem:[#allocation13_spill] sm:$0xff] }
  0x6a   : > { %12116 = vmatprep.mubr.msk.bf16.mxu0 %vm739_vm3, %v10725_v49  ;;  %v10728_v41 = vcombine.low %v13558_v28, %v13562_v56  ;;  %v13592_v63 = vsel %vm13419_vm7, %v1356_v54, %v1357_v5  ;;  %v10714_v1 = vrot.slane %v13568_v44, 9  ;;  %v10716_v4 = vrot.slane %v1257_v40, 9  ;;  %v10818_v57 = vld [vmem:[%s13092_s8 + $0xc] sm:$0xf] }
  0x6b   : > { %v13601_v25 = vsel %vm13419_vm7, %v10715_v59, %v1375_v16  ;;  %v1377_v45 = vrot.slane %v1375_v16, 4  ;;  %v1382_v15 = vrot.slane %v18388_v10, 5  ;;  %v1363_v5 = vrot.slane %v1361_v51, 4  ;;  %v18393_v59 = vld [vmem:[#allocation11_spill] sm:$0xff] }
  0x6c   : > { %v1385_v29 = vrot.slane %v18390_v19, 5  ;;  %v10717_v49 = vrot.slane %v1258_v42, 9  ;;  %v1389_v40 = vrot.slane %v18391_v38, 5  ;;  %v1392_v16 = vrot.slane %v18393_v59, 5  ;;  %v18395_v42 = vld [vmem:[#allocation12_spill] sm:$0xff] }
  0x6d   : > { %12079 = vmatmul.mubr.msk.bf16.gmra.mxu1 %vm739_vm3, %v10675_v33  ;;  %v1368_v33 = vrot.slane %v13199_v46, 5  ;;  %v13611_v54 = vsel %vm13419_vm7, %v1377_v45, %v1378_v27  ;;  %v13615_v39 = vsel %vm13419_vm7, %v10716_v4, %v1382_v15  ;;  %v1384_v44 = vrot.slane %v1382_v15, 4  ;;  %v18396_v15 = vld [vmem:[#allocation14_spill] sm:$0xff] }
  0x6e   : > { %12082 = vmatprep.mubr.msk.bf16.mxu1 %vm739_vm3, %v10676_v30  ;;  %v10718_v45 = vrot.slane %v1259_v18, 9  ;;  %v1396_v4 = vrot.slane %v18394_v48, 5  ;;  %v1399_v50 = vrot.slane %v18396_v15, 5  ;;  %v13635_v19 = vsel %vm13419_vm7, %v10717_v49, %v1389_v40  ;;  %v18398_v15 = vld [vmem:[#allocation4_spill] sm:$0xff]  ;;  %v13650_v49 = vld [vmem:[%s13092_s8 + $0x10] sm:$0xf] }
  0x6f   : > { %v13625_v27 = vsel %vm13419_vm7, %v1384_v44, %v1385_v29  ;;  %v1391_v7 = vrot.slane %v1389_v40, 4  ;;  %v18397_v29 = vld [vmem:[#allocation15_spill] sm:$0xff]  ;;  %v13642_v18 = vsel %vm13419_vm7, %v10713_v32, %v1361_v51  ;;  %v1370_v20 = vrot.slane %v1368_v33, 4 }
  0x70   : > { %v13647_v59 = vsel %vm13419_vm7, %v10718_v45, %v1396_v4  ;;  %v1398_v30 = vrot.slane %v1396_v4, 4  ;;  %v10821_v40 = vld [vmem:[%s13092_s8 + $0x18] sm:$0xf]  ;;  %v2110_v44 = vshrl.u32 %v10818_v57, 16  ;;  %v2113_v32 = vshll.u32 %v10818_v57, 16 }
  0x71   : > { %12117 = vmatmul.mubr.msk.bf16.gmra.mxu0 %vm739_vm3, %v10726_v60  ;;  %v1371_v60 = vrot.slane %v18398_v15, 5  ;;  %v10729_v51 = vcombine.low %v13574_v47, %v13592_v63  ;;  %v13665_v45 = vsel %vm13419_vm7, %v1363_v5, %v1364_v6  ;;  %v1260_v57 = vld [vmem:[%s13092_s8 + $0xb4] sm:$0xe]  ;;  %v13680_v11 = vsel %vm13419_vm7, %v10714_v1, %v1368_v33  ;;  %v13686_v47 = vld [vmem:[%s13092_s8 + $0x14] sm:$0x1] }
  0x72   : > { %12120 = vmatprep.mubr.msk.bf16.mxu0 %vm739_vm3, %v10727_v9  ;;  %v13655_v9 = vsel %vm13419_vm7, %v1391_v7, %v1392_v16  ;;  %v13671_v7 = vsel %vm13419_vm7, %v1398_v30, %v1399_v50  ;;  %v2119_v6 = vshll.u32 %v13650_v49, 16  ;;  %v10822_v63 = vld [vmem:[%s13092_s8 + $0x1c] sm:$0xf]  ;;  %v2112_v5 = vrot.slane %v2110_v44, 4  ;;  %v10824_v15 = vld [vmem:[%s13092_s8 + $0x24] sm:$0xf] }
  0x73   : > { %v2115_v34 = vrot.slane %v2113_v32, 5  ;;  %v2123_v17 = vshrl.u32 %v13650_v49, 16  ;;  %v2134_v50 = vshrl.u32 %v10821_v40, 16  ;;  %v1372_v1 = vsel %vm13419_vm7, %v1370_v20, %v1371_v60  ;;  %v13699_v44 = vld [vmem:[%s13092_s8 + $0x28] sm:$0xf] }
  0x74   : > { %v10719_v33 = vrot.slane %v1260_v57, 9  ;;  %v13694_v30 = vrot.slane %v2119_v6, 5  ;;  %v2137_v16 = vshll.u32 %v10821_v40, 16  ;;  %v1406_v23 = vrot.slane %v13403_v61, 5 }
  0x75   : > { %12083 = vmatmul.mubr.msk.bf16.gmra.mxu1 %vm739_vm3, %v10677_v52  ;;  %v1403_v52 = vrot.slane %v13398_v37, 5  ;;  %v2125_v4 = vrot.slane %v2123_v17, 4  ;;  %v2136_v3 = vrot.slane %v2134_v50, 4  ;;  %v2143_v13 = vshll.u32 %v10822_v63, 16 }
  0x76   : > { %12086 = vmatprep.mubr.msk.bf16.mxu1 %vm739_vm3, %v10678_v8  ;;  %v10823_v8 = vld [vmem:[%s13092_s8 + $0x20] sm:$0x1]  ;;  %v2129_v20 = vshll.u32 %v13686_v47, 16  ;;  %v2139_v60 = vrot.slane %v2137_v16, 5  ;;  %v2147_v57 = vshrl.u32 %v10822_v63, 16  ;;  %v10730_v61 = vcombine.low %v13642_v18, %v13665_v45 }
  0x77   : > { %v1405_v32 = vrot.slane %v1403_v52, 4  ;;  %v10731_v40 = vcombine.low %v13680_v11, %v1372_v1  ;;  %v2116_v6 = vor.u32 %v2115_v34, %v2112_v5  ;;  %v13710_v17 = vrot.slane %v2143_v13, 5  ;;  %v13737_v5 = vld [vmem:[%s13092_s8 + $0x34] sm:$0xf] }
  0x78   : > { %v2126_v28 = vor.u32 %v2125_v4, %v13694_v30  ;;  %v2140_v56 = vor.u32 %v2139_v60, %v2136_v3  ;;  %v2153_v50 = vshll.u32 %v10823_v8, 16  ;;  %v13722_v18 = vsel %vm13419_vm7, %v10719_v33, %v1403_v52  ;;  %v10827_v52 = vld [vmem:[%s13092_s8 + $0x30] sm:$0xf] }
  0x79   : > { %12121 = vmatmul.mubr.msk.bf16.gmra.mxu0 %vm739_vm3, %v10728_v41  ;;  %v2149_v41 = vrot.slane %v2147_v57, 4  ;;  %v2158_v13 = vshrl.u32 %v10824_v15, 16  ;;  %v2161_v45 = vshll.u32 %v10824_v15, 16  ;;  %v2167_v11 = vshll.u32 %v13699_v44, 16 }
  0x7a   : > { %12124 = vmatprep.mubr.msk.bf16.mxu0 %vm739_vm3, %v10729_v51  ;;  %v18399_v51 = vcombine.low %v13374_v62, %v13381_v55  ;;  %v18400_v3 = vcombine.low %v13108_v12, %v13112_v14  ;;  %v13731_v4 = vsel %vm13419_vm7, %v1405_v32, %v1406_v23  ;;  %v2131_v62 = vrot.slane %v2129_v20, 5 }
  0x7b   : > { %v2150_v55 = vor.u32 %v2149_v41, %v13710_v17  ;;  %v2171_v63 = vshrl.u32 %v13699_v44, 16  ;;  %v2117_v34 = vrot.slane %v2116_v6, 4  ;;  %v2160_v8 = vrot.slane %v2158_v13, 4  ;;  %v13745_v41 = vld [vmem:[%s13092_s8 + $0x38] sm:$0x1] }
  0x7c   : > { %v2163_v1 = vrot.slane %v2161_v45, 5  ;;  %v13739_v33 = vrot.slane %v2167_v11, 5  ;;  %v2127_v12 = vrot.slane %v2126_v28, 4  ;;  %v2141_v14 = vrot.slane %v2140_v56, 4  ;;  %v10830_v13 = vld [vmem:[%s13092_s8 + $0x3c] sm:$0xf] }
  0x7d   : > { %12087 = vmatmul.mubr.msk.bf16.gmra.mxu1 %vm739_vm3, %v18399_v51  ;;  %v2155_v16 = vrot.slane %v2153_v50, 5  ;;  %v2173_v23 = vrot.slane %v2171_v63, 4  ;;  %v2151_v15 = vrot.slane %v2150_v55, 4  ;;  %v2177_v32 = vshll.u32 %v13714_v21, 16 }
  0x7e   : > { %12090 = vmatprep.mubr.msk.bf16.mxu1 %vm739_vm3, %v18400_v3  ;;  %v2182_v20 = vshrl.u32 %v10827_v52, 16  ;;  %v2185_v60 = vshll.u32 %v10827_v52, 16  ;;  %v2164_v57 = vor.u32 %v2163_v1, %v2160_v8  ;;  %v2191_v28 = vshll.u32 %v13737_v5, 16  ;;  %v10833_v8 = vld [vmem:[%s13092_s8 + $0x48] sm:$0xf] }
  0x7f   : > { %v2174_v6 = vor.u32 %v2173_v23, %v13739_v33  ;;  %v2195_v56 = vshrl.u32 %v13737_v5, 16  ;;  %v18401_v3 = vcombine.low %v13150_v53, %v13154_v58  ;;  %v10736_v55 = vcombine.low %v13722_v18, %v13731_v4  ;;  %v13772_v1 = vld [vmem:[%s13092_s8 + $0x4c] sm:$0xf] }
  0x80   : > { %v2184_v50 = vrot.slane %v2182_v20, 4  ;;  %v2187_v51 = vrot.slane %v2185_v60, 5  ;;  %v13751_v45 = vrot.slane %v2191_v28, 5  ;;  %v2132_v63 = vsel %vm13133_vm4, %v2127_v12, %v2131_v62 }
  0x81   : > { %12125 = vmatmul.mubr.msk.bf16.gmra.mxu0 %vm739_vm3, %v10730_v61  ;;  %v2197_v11 = vrot.slane %v2195_v56, 4  ;;  %v13754_v61 = vld [vmem:[%s13092_s8 + $0x40] sm:$0xf]  ;;  %v2146_v52 = vsel %vm13133_vm4, %v2141_v14, %v13710_v17  ;;  %v18402_v53 = vcombine.low %v13188_v35, %v13199_v46  ;;  %v2156_v58 = vsel %vm13133_vm4, %v2151_v15, %v2155_v16 }
  0x82   : > { %12128 = vmatprep.mubr.msk.bf16.mxu0 %vm739_vm3, %v10731_v40  ;;  %v2122_v40 = vsel %vm13133_vm4, %v2117_v34, %v13694_v30  ;;  %v2165_v23 = vrot.slane %v2164_v57, 4  ;;  %v2175_v30 = vrot.slane %v2174_v6, 4  ;;  %v2179_v34 = vrot.slane %v2177_v32, 5 }
  0x83   : > { %v2188_v20 = vor.u32 %v2187_v51, %v2184_v50  ;;  %v2201_v62 = vshll.u32 %v13745_v41, 16  ;;  %v2206_v12 = vshrl.u32 %v10830_v13, 16  ;;  %v2209_v17 = vshll.u32 %v10830_v13, 16  ;;  %v13806_v50 = vld [vmem:[%s13092_s8 + $0x44] sm:$0x1] }
  0x84   : > { %v13783_v14 = vsel %vm788_vm0, %v13514_v22, 0  ;;  %v2198_v35 = vor.u32 %v2197_v11, %v13751_v45  ;;  %v2215_v46 = vshll.u32 %v13754_v61, 16  ;;  %v2219_v16 = vshrl.u32 %v13754_v61, 16  ;;  %v10836_v51 = vld [vmem:[%s13092_s8 + $0x54] sm:$0xf] }
  0x85   : > { %12091 = vmatmul.mubr.msk.bf16.gmra.mxu1 %vm739_vm3, %v18401_v3  ;;  %v13788_v15 = vcombine.low %v2122_v40, %v2132_v63  ;;  %v13792_v32 = vsel %vm788_vm0, %v13486_v24, 0  ;;  %v2230_v60 = vshrl.u32 %v10833_v8, 16  ;;  %v2233_v57 = vshll.u32 %v10833_v8, 16  ;;  %v13815_v40 = vld [vmem:[%s13092_s8 + $0x58] sm:$0xf] }
  0x86   : > { %12094 = vmatprep.mubr.msk.bf16.mxu1 %vm739_vm3, %v18402_v53  ;;  %v18404_v6 = vcombine.low %v13601_v25, %v13611_v54  ;;  %v13798_v22 = vcombine.low %v2146_v52, %v2156_v58  ;;  %v2170_v28 = vsel %vm13133_vm4, %v2165_v23, %v13739_v33  ;;  %v2180_v56 = vsel %vm13133_vm4, %v2175_v30, %v2179_v34  ;;  %v13820_v8 = vld [vmem:[%s13092_s8 + $0x50] sm:$0x1]  ;;  %v10839_v34 = vld [vmem:[%s13092_s8 + $0x60] sm:$0xf] }
  0x87   : > { %18403 = vst [vmem:[#allocation5_spill] sm:$0xff] %v13788_v15  ;;  %v2239_v24 = vshll.u32 %v13772_v1, 16  ;;  %v18406_v25 = vcombine.low %v13615_v39, %v13625_v27  ;;  %v2189_v54 = vrot.slane %v2188_v20, 4  ;;  %v2203_v13 = vrot.slane %v2201_v62, 5 }
  0x88   : > { %18405 = vst [vmem:[#allocation7_spill] sm:$0xff] %v13798_v22  ;;  %v2208_v11 = vrot.slane %v2206_v12, 4  ;;  %v2211_v3 = vrot.slane %v2209_v17, 5  ;;  %v2199_v33 = vrot.slane %v2198_v35, 4  ;;  %v13817_v63 = vrot.slane %v2215_v46, 5 }
  0x89   : > { %12129 = vmatmul.mubr.msk.bf16.gmra.mxu0 %vm739_vm3, %v18404_v6  ;;  %v2221_v52 = vrot.slane %v2219_v16, 4  ;;  %v2243_v53 = vshrl.u32 %v13772_v1, 16  ;;  %v18407_v39 = vcombine.low %v13238_v36, %v13245_v43  ;;  %v2232_v27 = vrot.slane %v2230_v60, 4  ;;  %v13837_v35 = vld [vmem:[%s13092_s8 + $0x5c] sm:$0x1] }
  0x8a   : > { %12132 = vmatprep.mubr.msk.bf16.mxu0 %vm739_vm3, %v18406_v25  ;;  %v2235_v58 = vrot.slane %v2233_v57, 5  ;;  %v2254_v23 = vshrl.u32 %v10836_v51, 16  ;;  %v2257_v30 = vshll.u32 %v10836_v51, 16  ;;  %v18408_v20 = vcombine.low %v18389_v2, %v18388_v10 }
  0x8b   : > { %v13832_v62 = vcombine.low %v2170_v28, %v2180_v56  ;;  %v13834_v12 = vrot.slane %v2239_v24, 5  ;;  %v2245_v17 = vrot.slane %v2243_v53, 4  ;;  %v2263_v36 = vshll.u32 %v13815_v40, 16  ;;  %v13850_v28 = vld [vmem:[%s13092_s8 + $0x64] sm:$0xf] }
  0x8c   : > { %v2225_v43 = vshll.u32 %v13806_v50, 16  ;;  %v2256_v46 = vrot.slane %v2254_v23, 4  ;;  %v2259_v16 = vrot.slane %v2257_v30, 5  ;;  %v2267_v60 = vshrl.u32 %v13815_v40, 16  ;;  %v13872_v30 = vld [vmem:[%s13092_s8 + $0x68] sm:$0x1] }
  0x8d   : > { %12095 = vmatmul.mubr.msk.bf16.gmra.mxu1 %vm739_vm3, %v18407_v39  ;;  %18409 = vst [vmem:[#allocation6_spill] sm:$0xff] %v13832_v62  ;;  %v2194_v10 = vsel %vm13133_vm4, %v2189_v54, %v13751_v45  ;;  %v2204_v2 = vsel %vm13133_vm4, %v2199_v33, %v2203_v13  ;;  %v2212_v57 = vor.u32 %v2211_v3, %v2208_v11  ;;  %v13847_v6 = vrot.slane %v2263_v36, 5  ;;  %v10842_v3 = vld [vmem:[%s13092_s8 + $0x6c] sm:$0xf] }
  0x8e   : > { %12098 = vmatprep.mubr.msk.bf16.mxu1 %vm739_vm3, %v18408_v20  ;;  %v2222_v56 = vor.u32 %v2221_v52, %v13817_v63  ;;  %v2236_v24 = vor.u32 %v2235_v58, %v2232_v27  ;;  %v2249_v51 = vshll.u32 %v13820_v8, 16  ;;  %v2269_v25 = vrot.slane %v2267_v60, 4  ;;  %v13869_v27 = vld [vmem:[%s13092_s8 + $0x70] sm:$0xf] }
  0x8f   : > { %v18410_v53 = vcombine.low %v13635_v19, %v13655_v9  ;;  %v2246_v45 = vor.u32 %v2245_v17, %v13834_v12  ;;  %v2260_v54 = vor.u32 %v2259_v16, %v2256_v46  ;;  %v2278_v13 = vshrl.u32 %v10839_v34, 16  ;;  %v10845_v16 = vld [vmem:[%s13092_s8 + $0x78] sm:$0xf] }
  0x90   : > { %v2281_v11 = vshll.u32 %v10839_v34, 16  ;;  %v18411_v33 = vcombine.low %v13647_v59, %v13671_v7  ;;  %v2270_v52 = vor.u32 %v2269_v25, %v13847_v6  ;;  %v2273_v39 = vshll.u32 %v13837_v35, 16 }
  0x91   : > { %12133 = vmatmul.mubr.msk.bf16.gmra.mxu0 %vm739_vm3, %v18410_v53  ;;  %v2287_v19 = vshll.u32 %v13850_v28, 16  ;;  %v2291_v9 = vshrl.u32 %v13850_v28, 16  ;;  %v2213_v58 = vrot.slane %v2212_v57, 4  ;;  %v2227_v23 = vrot.slane %v2225_v43, 5 }
  0x92   : > { %12136 = vmatprep.mubr.msk.bf16.mxu0 %vm739_vm3, %v18411_v33  ;;  %v2280_v34 = vrot.slane %v2278_v13, 4  ;;  %v2283_v20 = vrot.slane %v2281_v11, 5  ;;  %v18412_v59 = vcombine.low %v18392_v26, %v18391_v38  ;;  %v13878_v7 = vcombine.low %v2194_v10, %v2204_v2  ;;  %v13888_v2 = vld [vmem:[%s13092_s8 + $0x7c] sm:$0xf] }
  0x93   : > { %v2223_v17 = vrot.slane %v2222_v56, 4  ;;  %v2237_v36 = vrot.slane %v2236_v24, 4  ;;  %v13880_v46 = vrot.slane %v2287_v19, 5  ;;  %v18414_v43 = vcombine.low %v18395_v42, %v18394_v48  ;;  %18415 = vst [vmem:[#allocation10_spill] sm:$0xff] %v13888_v2  ;;  %v10848_v19 = vld [vmem:[%s13092_s8 + $0x84] sm:$0xf] }
  0x94   : > { %18413 = vst [vmem:[#allocation8_spill] sm:$0xff] %v13878_v7  ;;  %v2247_v60 = vrot.slane %v2246_v45, 4  ;;  %v2251_v57 = vrot.slane %v2249_v51, 5  ;;  %v2261_v25 = vrot.slane %v2260_v54, 4  ;;  %v2293_v38 = vrot.slane %v2291_v9, 4 }
  0x95   : > { %12099 = vmatmul.mubr.msk.bf16.gmra.mxu1 %vm739_vm3, %v18412_v59  ;;  %v2271_v26 = vrot.slane %v2270_v52, 4  ;;  %v2275_v53 = vrot.slane %v2273_v39, 5  ;;  %v2284_v13 = vor.u32 %v2283_v20, %v2280_v34  ;;  %v2302_v10 = vshrl.u32 %v10842_v3, 16  ;;  %v13922_v34 = vld [vmem:[%s13092_s8 + $0x88] sm:$0xf] }
  0x96   : > { %12102 = vmatprep.mubr.msk.bf16.mxu1 %vm739_vm3, %v18414_v43  ;;  %v2218_v56 = vsel %vm13133_vm4, %v2213_v58, %v13817_v63  ;;  %v2305_v24 = vshll.u32 %v10842_v3, 16  ;;  %v2311_v48 = vshll.u32 %v13869_v27, 16  ;;  %v2315_v42 = vshrl.u32 %v13869_v27, 16  ;;  %v12849_v63 = vld [vmem:[%s13092_s8 + $0xc] sm:$0xff]   ;;  %18416 = vst [vmem:[#allocation9_spill] sm:$0xff] %v13922_v34 }
  0x97   : > { %v2228_v51 = vsel %vm13133_vm4, %v2223_v17, %v2227_v23  ;;  %v2242_v45 = vsel %vm13133_vm4, %v2237_v36, %v13834_v12  ;;  %v2294_v54 = vor.u32 %v2293_v38, %v13880_v46  ;;  %v2297_v11 = vshll.u32 %v13872_v30, 16 }
  0x98   : > { %v2252_v3 = vsel %vm13133_vm4, %v2247_v60, %v2251_v57  ;;  %v2266_v33 = vsel %vm13133_vm4, %v2261_v25, %v13847_v6  ;;  %v2326_v52 = vshrl.u32 %v10845_v16, 16  ;;  %v2329_v12 = vshll.u32 %v10845_v16, 16  ;;  %v13931_v16 = vld [vmem:[%s13092_s8 + $0x74] sm:$0x1]  ;;  %v13935_v60 = vld [vmem:[%s13092_s8 + $0x80] sm:$0x1] }
  0x99   : > { %12137 = vmatmul.mubr.msk.bf16.gmra.mxu0 %vm739_vm3, %v10736_v55  ;;  %v2276_v18 = vsel %vm13133_vm4, %v2271_v26, %v2275_v53  ;;  %v2285_v4 = vrot.slane %v2284_v13, 4  ;;  %v2304_v55 = vrot.slane %v2302_v10, 4  ;;  %v2335_v39 = vshll.u32 %v13888_v2, 16  ;;  %18419 = vst [vmem:[#allocation13_spill] sm:$0xff] %v13931_v16  ;;  %18420 = vst [vmem:[#allocation12_spill] sm:$0xff] %v13935_v60 }
  0x9a   : > { %12176 = vmatprep.mubr.msk.bf16.mxu0 %vm739_vm3, %v13788_v15  ;;  %v2307_v9 = vrot.slane %v2305_v24, 5  ;;  %v13918_v58 = vrot.slane %v2311_v48, 5  ;;  %v2317_v23 = vrot.slane %v2315_v42, 4  ;;  %v2339_v6 = vshrl.u32 %v13888_v2, 16  ;;  %v13944_v53 = vld [vmem:[%s13092_s8 + $0x8c] sm:$0x1] }
  0x9b   : > { %v18417_v20 = vcombine.low %v18397_v29, %v13398_v37  ;;  %v13928_v59 = vcombine.low %v2218_v56, %v2228_v51  ;;  %v2295_v17 = vrot.slane %v2294_v54, 4  ;;  %v2299_v36 = vrot.slane %v2297_v11, 5  ;;  %18423 = vst [vmem:[#allocation4_spill] sm:$0xff] %v13944_v53  ;;  %v12850_v56 = vld [vmem:[%s13092_s8 + $0x18] sm:$0xff]   ;;  %v13955_v54 = vld [vmem:[%s13092_s8 + $0x94] sm:$0xf] }
  0x9c   : > { %v2328_v43 = vrot.slane %v2326_v52, 4  ;;  %v2331_v57 = vrot.slane %v2329_v12, 5  ;;  %v13937_v25 = vrot.slane %v2335_v39, 5  ;;  %v2341_v37 = vrot.slane %v2339_v6, 4  ;;  %18424 = vst [vmem:[#allocation17_spill] sm:$0xff] %v13955_v54 }
  0x9d   : > { %12103 = vmatmul.mubr.msk.bf16.gmra.mxu1 %vm739_vm3, %v18417_v20  ;;  %18418 = vst [vmem:[#allocation11_spill] sm:$0xff] %v13928_v59  ;;  %v2350_v29 = vshrl.u32 %v10848_v19, 16  ;;  %v13939_v38 = vcombine.low %v2242_v45, %v2252_v3  ;;  %v13941_v26 = vcombine.low %v2266_v33, %v2276_v18  ;;  %v2353_v13 = vshll.u32 %v10848_v19, 16  ;;  %v10851_v45 = vld [vmem:[%s13092_s8 + $0x90] sm:$0xf] }
  0x9e   : > { %12142 = vmatprep.mubr.msk.bf16.mxu1 %vm739_vm3, %v12849_v63  ;;  %v2359_v10 = vshll.u32 %v13922_v34, 16  ;;  %v2290_v24 = vsel %vm13133_vm4, %v2285_v4, %v13880_v46  ;;  %v2308_v48 = vor.u32 %v2307_v9, %v2304_v55  ;;  %v2318_v42 = vor.u32 %v2317_v23, %v13918_v58  ;;  %v13963_v52 = vld [vmem:[%s18295_s1 + $0x20] sm:$0xf]  ;;  %v12851_v46 = vld [vmem:[%s13092_s8 + $0x24] sm:$0xff]   ;;  %v10854_v39 = vld [vmem:[%s13092_s8 + $0x9c] sm:$0xf] }
  0x9f   : > { %18421 = vst [vmem:[#allocation14_spill] sm:$0xff] %v13939_v38  ;;  %18422 = vst [vmem:[#allocation15_spill] sm:$0xff] %v13941_v26  ;;  %v2321_v51 = vshll.u32 %v13931_v16, 16  ;;  %v2352_v11 = vrot.slane %v2350_v29, 4  ;;  %v2355_v63 = vrot.slane %v2353_v13, 5  ;;  %v2363_v33 = vshrl.u32 %v13922_v34, 16 }
  0xa0   : > { %v13957_v3 = vrot.slane %v2359_v10, 5  ;;  %18425 = vst [vmem:[#allocation18_spill] sm:$0xff] %v13963_v52  ;;  %v2300_v12 = vsel %vm13133_vm4, %v2295_v17, %v2299_v36  ;;  %v2332_v18 = vor.u32 %v2331_v57, %v2328_v43  ;;  %v2342_v4 = vor.u32 %v2341_v37, %v13937_v25  ;;  %v13997_v10 = vld [vmem:[%s13092_s8 + $0xa0] sm:$0xf] }
  0xa1   : > { %12177 = vmatmul.mubr.msk.bf16.vlgmr.msra.gmra.mxu0 %vm739_vm3, %v13798_v22  ;;  %v2345_v55 = vshll.u32 %v13935_v60, 16  ;;  %v2356_v19 = vor.u32 %v2355_v63, %v2352_v11  ;;  %v2365_v9 = vrot.slane %v2363_v33, 4  ;;  %v2374_v23 = vshrl.u32 %v10851_v45, 16  ;;  %18428 = vst [vmem:[#allocation21_spill] sm:$0xff] %v13997_v10 }
  0xa2   : > { %12243 = vmatpush3.bf16.msra.mxu0 %v13792_v32  ;;  %12180 = vmatprep.mubr.msk.bf16.mxu0 %vm739_vm3, %v13832_v62  ;;  %v2377_v6 = vshll.u32 %v10851_v45, 16  ;;  %v13976_v20 = vrot.slane %v2308_v48, 4  ;;  %v13978_v29 = vrot.slane %v2321_v51, 5  ;;  %v2369_v17 = vshll.u32 %v13944_v53, 16  ;;  %v13985_v32 = vld [vmem:[%s18295_s1 + $0x1c] sm:$0xf] }
  0xa3   : > { %v2383_v36 = vshll.u32 %v13955_v54, 16  ;;  %18426 = vst [vmem:[#allocation19_spill] sm:$0xff] %v13985_v32  ;;  %12821 = vmatprep.subr.msk.bf16.mxu0 %vm788_vm0, %v13963_v52  ;;  %v13990_v43 = vcombine.low %v2290_v24, %v2300_v12  ;;  %v13992_v57 = vrot.slane %v2318_v42, 4  ;;  %v2366_v37 = vor.u32 %v2365_v9, %v13957_v3  ;;  %v14010_v42 = vld [vmem:[%s13092_s8 + $0x98] sm:$0x1] }
  0xa4   : > { %v2387_v13 = vshrl.u32 %v13955_v54, 16  ;;  %v14001_v48 = vrot.slane %v2332_v18, 4  ;;  %v14003_v51 = vrot.slane %v2342_v4, 4  ;;  %v14007_v24 = vrot.slane %v2356_v19, 4  ;;  %18429 = vst [vmem:[#allocation22_spill] sm:$0xff] %v14010_v42 }
  0xa5   : > { %12143 = vmatmul.mubr.msk.bf16.vlgmr.msra.gmra.mxu1 %vm739_vm3, %v12850_v56  ;;  %18427 = vst [vmem:[#allocation20_spill] sm:$0xff] %v13990_v43  ;;  %v14005_v56 = vrot.slane %v2345_v55, 5  ;;  %v2376_v45 = vrot.slane %v2374_v23, 4  ;;  %v2379_v11 = vrot.slane %v2377_v6, 5  ;;  %v2398_v63 = vshrl.u32 %v10854_v39, 16 }
  0xa6   : > { %12209 = vmatpush3.bf16.msra.mxu1 %v13783_v14  ;;  %12146 = vmatprep.mubr.msk.bf16.mxu1 %vm739_vm3, %v12851_v46  ;;  %v2401_v33 = vshll.u32 %v10854_v39, 16  ;;  %v12852_v14 = vld [vmem:[%s13092_s8 + $0x30] sm:$0xff]   ;;  %v14019_v12 = vrot.slane %v2369_v17, 5  ;;  %v14021_v18 = vrot.slane %v2383_v36, 5  ;;  %v2407_v4 = vshll.u32 %v13997_v10, 16  ;;  %v12853_v17 = vld [vmem:[%s13092_s8 + $0x3c] sm:$0xff]  }
  0xa7   : > { %12820 = vmatprep.subr.msk.bf16.mxu1 %vm788_vm0, %v13985_v32  ;;  %v10857_v55 = vld [vmem:[%s13092_s8 + $0xa8] sm:$0xf]  ;;  %v14025_v19 = vrot.slane %v2366_v37, 4  ;;  %v2389_v39 = vrot.slane %v2387_v13, 4  ;;  %v2393_v9 = vshll.u32 %v14010_v42, 16  ;;  %v2411_v23 = vshrl.u32 %v13997_v10, 16 }
  0xa8   : > { %v14030_v6 = vld [vmem:[%s13092_s8 + $0xac] sm:$0xf]  ;;  %v2380_v36 = vor.u32 %v2379_v11, %v2376_v45  ;;  %v2400_v62 = vrot.slane %v2398_v63, 4  ;;  %v2403_v22 = vrot.slane %v2401_v33, 5  ;;  %v14057_v37 = vld [vmem:[%s13092_s8 + $0xb0] sm:$0x1] }
  0xa9   : > { %18430 = vst [vmem:[#allocation23_spill] sm:$0xff] %v14030_v6  ;;  %12181 = vmatmul.mubr.msk.bf16.gmra.mxu0 %vm739_vm3, %v13878_v7  ;;  %v14052_v7 = vld [vmem:[%s13092_s8 + $0xa4] sm:$0x1]  ;;  %18432 = vst [vmem:[#allocation25_spill] sm:$0xff] %v14057_v37  ;;  %v2422_v15 = vshrl.u32 %v10857_v55, 16  ;;  %v14059_v32 = vrot.slane %v2407_v4, 5  ;;  %v2372_v45 = vsel %vm13133_vm4, %v14025_v19, %v14019_v12  ;;  %v2390_v11 = vor.u32 %v2389_v39, %v14021_v18 }
  0xaa   : > { %18431 = vst [vmem:[#allocation24_spill] sm:$0xff] %v14052_v7  ;;  %12184 = vmatprep.mubr.msk.bf16.mxu0 %vm739_vm3, %v13928_v59  ;;  %v2413_v13 = vrot.slane %v2411_v23, 4  ;;  %v2425_v52 = vshll.u32 %v10857_v55, 16  ;;  %v2431_v10 = vshll.u32 %v14030_v6, 16  ;;  %v10860_v46 = vld [vmem:[%s13092_s8 + $0xb4] sm:$0xf]  ;;  %v2404_v19 = vor.u32 %v2403_v22, %v2400_v62 }
  0xab   : > { %v14069_v63 = vrot.slane %v2393_v9, 5  ;;  %v2424_v33 = vrot.slane %v2422_v15, 4  ;;  %v14072_v4 = vld [vmem:[%s13092_s8 + $0xb8] sm:$0xf]  ;;  %v2417_v55 = vshll.u32 %v14052_v7, 16  ;;  %v2435_v59 = vshrl.u32 %v14030_v6, 16 }
  0xac   : > { %18433 = vst [vmem:[#allocation26_spill] sm:$0xff] %v14072_v4  ;;  %v2427_v23 = vrot.slane %v2425_v52, 5  ;;  %v14079_v12 = vrot.slane %v2380_v36, 4  ;;  %v14082_v39 = vld [vmem:[%s13092_s8 + $0xbc] sm:$0x1]  ;;  %v2446_v15 = vshrl.u32 %v10860_v46, 16  ;;  %v2414_v42 = vor.u32 %v2413_v13, %v14059_v32 }
  0xad   : > { %12147 = vmatmul.mubr.msk.bf16.gmra.mxu1 %vm739_vm3, %v12852_v14  ;;  %v14076_v14 = vrot.slane %v2431_v10, 5  ;;  %v2449_v9 = vshll.u32 %v10860_v46, 16  ;;  %v2437_v54 = vrot.slane %v2435_v59, 4  ;;  %v2455_v52 = vshll.u32 %v14072_v4, 16  ;;  %v10863_v10 = vld [vmem:[%s13092_s8 + $0xc0] sm:$0xf] }
  0xae   : > { %12150 = vmatprep.mubr.msk.bf16.mxu1 %vm739_vm3, %v12853_v17  ;;  %v2441_v17 = vshll.u32 %v14057_v37, 16  ;;  %v12854_v7 = vld [vmem:[%s13092_s8 + $0x48] sm:$0xff]   ;;  %v2428_v53 = vor.u32 %v2427_v23, %v2424_v33  ;;  %v2448_v6 = vrot.slane %v2446_v15, 4  ;;  %v2459_v36 = vshrl.u32 %v14072_v4, 16  ;;  %v14091_v22 = vld [vmem:[%s13092_s8 + $0xc4] sm:$0xf] }
  0xaf   : > { %v2451_v34 = vrot.slane %v2449_v9, 5  ;;  %v12855_v62 = vld [vmem:[%s13092_s8 + $0x54] sm:$0xff]   ;;  %v2391_v46 = vrot.slane %v2390_v11, 4  ;;  %v2419_v13 = vrot.slane %v2417_v55, 5  ;;  %v2438_v59 = vor.u32 %v2437_v54, %v14076_v14  ;;  %v14103_v54 = vld [vmem:[%s13092_s8 + $0xc8] sm:$0x1] }
  0xb0   : > { %v2457_v37 = vrot.slane %v2455_v52, 5  ;;  %v2461_v23 = vrot.slane %v2459_v36, 4  ;;  %v2465_v15 = vshll.u32 %v14082_v39, 16  ;;  %v2470_v9 = vshrl.u32 %v10863_v10, 16 }
  0xb1   : > { %12185 = vmatmul.mubr.msk.bf16.gmra.mxu0 %vm739_vm3, %v13939_v38  ;;  %v2452_v33 = vor.u32 %v2451_v34, %v2448_v6  ;;  %v2405_v4 = vrot.slane %v2404_v19, 4  ;;  %v2415_v60 = vrot.slane %v2414_v42, 4  ;;  %v2473_v2 = vshll.u32 %v10863_v10, 16 }
  0xb2   : > { %12188 = vmatprep.mubr.msk.bf16.mxu0 %vm739_vm3, %v13941_v26  ;;  %v2479_v38 = vshll.u32 %v14091_v22, 16  ;;  %v2429_v11 = vrot.slane %v2428_v53, 4  ;;  %v2443_v55 = vrot.slane %v2441_v17, 5  ;;  %v2462_v16 = vor.u32 %v2461_v23, %v2457_v37 }
  0xb3   : > { %v2472_v52 = vrot.slane %v2470_v9, 4  ;;  %v2439_v34 = vrot.slane %v2438_v59, 4  ;;  %v2475_v6 = vrot.slane %v2473_v2, 5  ;;  %v2483_v42 = vshrl.u32 %v14091_v22, 16  ;;  %v12856_v59 = vld [vmem:[%s13092_s8 + $0x60] sm:$0xff]  }
  0xb4   : > { %v14106_v36 = vrot.slane %v2479_v38, 5  ;;  %v18435_v53 = vsel %vm13133_vm4, %v13976_v20, %v13918_v58  ;;  %v2453_v17 = vrot.slane %v2452_v33, 4  ;;  %v2463_v2 = vrot.slane %v2462_v16, 4 }
  0xb5   : > { %12151 = vmatmul.mubr.msk.bf16.gmra.mxu1 %vm739_vm3, %v12854_v7  ;;  %v18434_v7 = vsel %vm13133_vm4, %v13992_v57, %v13978_v29  ;;  %v2467_v10 = vrot.slane %v2465_v15, 5  ;;  %v18437_v38 = vsel %vm13133_vm4, %v14003_v51, %v14005_v56  ;;  %v18438_v29 = vsel %vm13133_vm4, %v14001_v48, %v13937_v25  ;;  %v10901_v56 = vld [vmem:[%s13092_s8 + $0x24] sm:$0xe] }
  0xb6   : > { %12154 = vmatprep.mubr.msk.bf16.mxu1 %vm739_vm3, %v12855_v62  ;;  %v14119_v19 = vcombine.low %v18435_v53, %v18434_v7  ;;  %v14131_v57 = vcombine.low %v18438_v29, %v18437_v38  ;;  %v2476_v58 = vor.u32 %v2475_v6, %v2472_v52  ;;  %v2485_v20 = vrot.slane %v2483_v42, 4  ;;  %v10904_v6 = vld [vmem:[%s13092_s8 + $0x48] sm:$0xe]  ;;  %v18457_v52 = vld [vmem:[#allocation26_spill] sm:$0xff] }
  0xb7   : > { %v2489_v62 = vshll.u32 %v14103_v54, 16  ;;  %v18440_v16 = vsel %vm13133_vm4, %v14007_v24, %v13957_v3  ;;  %v2386_v25 = vsel %vm13133_vm4, %v14079_v12, %v14021_v18  ;;  %v2396_v48 = vsel %vm13133_vm4, %v2391_v46, %v14069_v63  ;;  %v12857_v3 = vld [vmem:[%s13092_s8 + $0x6c] sm:$0xff]  }
  0xb8   : > { %18436 = vst [vmem:[#allocation27_spill] sm:$0xff] %v14119_v19  ;;  %18439 = vst [vmem:[#allocation28_spill] sm:$0xff] %v14131_v57  ;;  %v14140_v33 = vcombine.low %v18440_v16, %v2372_v45  ;;  %v2410_v51 = vsel %vm13133_vm4, %v2405_v4, %v14059_v32  ;;  %v2420_v24 = vsel %vm13133_vm4, %v2415_v60, %v2419_v13  ;;  %v14165_v12 = vld [vmem:[%s13092_s8 + $0xc] sm:$0xe]  ;;  %v14173_v4 = vrot.slane %v2476_v58, 4 }
  0xb9   : > { %12189 = vmatmul.mubr.msk.bf16.gmra.mxu0 %vm739_vm3, %v13990_v43  ;;  %v2434_v18 = vsel %vm13133_vm4, %v2429_v11, %v14076_v14  ;;  %v2444_v45 = vsel %vm13133_vm4, %v2439_v34, %v2443_v55  ;;  %v2486_v63 = vor.u32 %v2485_v20, %v14106_v36  ;;  %v2458_v32 = vsel %vm13133_vm4, %v2453_v17, %v2457_v37  ;;  %v10902_v46 = vld [vmem:[%s13092_s8 + $0x30] sm:$0xe]  ;;  %v10903_v11 = vld [vmem:[%s13092_s8 + $0x3c] sm:$0xe]  ;;  %v12862_v7 = vld [vmem:[%s13092_s8 + $0xa8] sm:$0xff]  }
  0xba   : > { %18441 = vst [vmem:[#allocation29_spill] sm:$0xff] %v14140_v33  ;;  %12192 = vmatprep.mubr.msk.bf16.mxu0 %vm739_vm3, %v14119_v19  ;;  %v2468_v60 = vsel %vm13133_vm4, %v2463_v2, %v2467_v10  ;;  %v2853_v14 = vrot.slane %v13650_v49, 5  ;;  %v14177_v13 = vcombine.low %v2386_v25, %v2396_v48  ;;  %v14181_v15 = vrot.slane %v2489_v62, 5  ;;  %v10905_v62 = vld [vmem:[%s13092_s8 + $0x54] sm:$0xe]  ;;  %v12865_v49 = vld [vmem:[%s13092_s8 + $0x18] sm:$0xff]  }
  0xbb   : > { %v14179_v23 = vrot.slane %v2486_v63, 4  ;;  %v10917_v9 = vrot.slane %v10901_v56, 9  ;;  %v14185_v55 = vcombine.low %v2410_v51, %v2420_v24  ;;  %v14187_v37 = vcombine.low %v2434_v18, %v2444_v45  ;;  %v12859_v56 = vld [vmem:[%s13092_s8 + $0x84] sm:$0xff]   ;;  %v10906_v18 = vld [vmem:[%s13092_s8 + $0x60] sm:$0xe] }
  0xbc   : > { %18442 = vst [vmem:[#allocation30_spill] sm:$0xff] %v14177_v13  ;;  %v2867_v34 = vrot.slane %v13699_v44, 5  ;;  %v14193_v42 = vcombine.low %v2458_v32, %v2468_v60  ;;  %v2870_v53 = vrot.slane %v13714_v21, 5  ;;  %v10918_v17 = vrot.slane %v10902_v46, 9 }
  0xbd   : > { %12155 = vmatmul.mubr.msk.bf16.gmra.mxu1 %vm739_vm3, %v12856_v59  ;;  %18443 = vst [vmem:[#allocation31_spill] sm:$0xff] %v14185_v55  ;;  %18444 = vst [vmem:[#allocation32_spill] sm:$0xff] %v14187_v37  ;;  %v2482_v2 = vsel %vm13133_vm4, %v14173_v4, %v14106_v36  ;;  %v14203_v44 = vrot.slane %v2853_v14, 4  ;;  %v2492_v21 = vsel %vm13133_vm4, %v14179_v23, %v14181_v15  ;;  %v2874_v29 = vrot.slane %v13737_v5, 5  ;;  %v12858_v59 = vld [vmem:[%s13092_s8 + $0x78] sm:$0xff]  }
  0xbe   : > { %12158 = vmatprep.mubr.msk.bf16.mxu1 %vm739_vm3, %v12857_v3  ;;  %18445 = vst [vmem:[#allocation33_spill] sm:$0xff] %v14193_v42  ;;  %v14207_v10 = vsel %vm13419_vm7, %v10917_v9, %v2867_v34  ;;  %v2869_v38 = vrot.slane %v2867_v34, 4  ;;  %v2877_v58 = vrot.slane %v13745_v41, 5  ;;  %v10919_v20 = vrot.slane %v10903_v11, 9  ;;  %v10907_v9 = vld [vmem:[%s13092_s8 + $0x6c] sm:$0xe] }
  0xbf   : > { %v2881_v25 = vrot.slane %v13754_v61, 5  ;;  %v2884_v48 = vrot.slane %v13806_v50, 5  ;;  %v10920_v51 = vrot.slane %v10904_v6, 9  ;;  %v14230_v41 = vsel %vm13419_vm7, %v10918_v17, %v2874_v29  ;;  %v10914_v5 = vld [vmem:[%s13092_s8 + $0xc0] sm:$0xe] }
  0xc0   : > { %v14219_v16 = vsel %vm13419_vm7, %v2869_v38, %v2870_v53  ;;  %v2876_v3 = vrot.slane %v2874_v29, 4  ;;  %v2888_v24 = vrot.slane %v13772_v1, 5  ;;  %v2891_v45 = vrot.slane %v13820_v8, 5  ;;  %v10908_v53 = vld [vmem:[%s13092_s8 + $0x78] sm:$0xe] }
  0xc1   : > { %12193 = vmatmul.mubr.msk.bf16.gmra.mxu0 %vm739_vm3, %v14131_v57  ;;  %v14238_v61 = vsel %vm13419_vm7, %v10919_v20, %v2881_v25  ;;  %v2883_v50 = vrot.slane %v2881_v25, 4  ;;  %v10921_v63 = vrot.slane %v10905_v62, 9  ;;  %v2895_v46 = vrot.slane %v13815_v40, 5  ;;  %v12872_v57 = vld [vmem:[%s13092_s8 + $0x6c] sm:$0xff]  }
  0xc2   : > { %12196 = vmatprep.mubr.msk.bf16.mxu0 %vm739_vm3, %v14140_v33  ;;  %v14243_v32 = vsel %vm13419_vm7, %v2876_v3, %v2877_v58  ;;  %v14247_v1 = vsel %vm13419_vm7, %v10920_v51, %v2888_v24  ;;  %v2890_v60 = vrot.slane %v2888_v24, 4  ;;  %v2898_v34 = vrot.slane %v13837_v35, 5  ;;  %v18446_v51 = vld [vmem:[#allocation13_spill] sm:$0xff]  ;;  %v12860_v24 = vld [vmem:[%s13092_s8 + $0x90] sm:$0xff]  }
  0xc3   : > { %v14256_v8 = vsel %vm13419_vm7, %v2883_v50, %v2884_v48  ;;  %v10922_v6 = vrot.slane %v10906_v18, 9  ;;  %v14269_v38 = vsel %vm13419_vm7, %v10921_v63, %v2895_v46  ;;  %v2897_v29 = vrot.slane %v2895_v46, 4  ;;  %v18447_v50 = vld [vmem:[#allocation10_spill] sm:$0xff]  ;;  %v11041_v33 = vld [vmem:[%s13092_s8 + $0x48] sm:$0xf] }
  0xc4   : > { %v14265_v17 = vsel %vm13419_vm7, %v2890_v60, %v2891_v45  ;;  %v2902_v58 = vrot.slane %v13850_v28, 5  ;;  %v2905_v20 = vrot.slane %v13872_v30, 5  ;;  %v10923_v62 = vrot.slane %v10907_v9, 9  ;;  %v10910_v63 = vld [vmem:[%s13092_s8 + $0x90] sm:$0xe]  ;;  %v18448_v9 = vld [vmem:[#allocation12_spill] sm:$0xff] }
  0xc5   : > { %12159 = vmatmul.mubr.msk.bf16.gmra.mxu1 %vm739_vm3, %v12858_v59  ;;  %v10909_v59 = vld [vmem:[%s13092_s8 + $0x84] sm:$0xe]  ;;  %v14278_v25 = vsel %vm13419_vm7, %v2897_v29, %v2898_v34  ;;  %v2909_v48 = vrot.slane %v13869_v27, 5  ;;  %v10924_v3 = vrot.slane %v10908_v53, 9  ;;  %v2916_v45 = vrot.slane %v18447_v50, 5  ;;  %v12861_v27 = vld [vmem:[%s13092_s8 + $0x9c] sm:$0xff]  }
  0xc6   : > { %12162 = vmatprep.mubr.msk.bf16.mxu1 %vm739_vm3, %v12859_v56  ;;  %v2912_v56 = vrot.slane %v18446_v51, 5  ;;  %v14287_v28 = vsel %vm13419_vm7, %v10922_v6, %v2902_v58  ;;  %v2904_v30 = vrot.slane %v2902_v58, 4  ;;  %v2919_v34 = vrot.slane %v18448_v9, 5  ;;  %v10911_v29 = vld [vmem:[%s13092_s8 + $0x9c] sm:$0xe]  ;;  %v18449_v50 = vld [vmem:[#allocation9_spill] sm:$0xff] }
  0xc7   : > { %v14296_v60 = vsel %vm13419_vm7, %v10923_v62, %v2909_v48  ;;  %v2911_v46 = vrot.slane %v2909_v48, 4  ;;  %v10925_v53 = vrot.slane %v10909_v59, 9  ;;  %v14308_v58 = vsel %vm13419_vm7, %v10924_v3, %v2916_v45  ;;  %v18450_v9 = vld [vmem:[#allocation4_spill] sm:$0xff]  ;;  %v10913_v48 = vld [vmem:[%s13092_s8 + $0xb4] sm:$0xe] }
  0xc8   : > { %v14304_v6 = vsel %vm13419_vm7, %v2904_v30, %v2905_v20  ;;  %v2918_v51 = vrot.slane %v2916_v45, 4  ;;  %v2923_v62 = vrot.slane %v18449_v50, 5  ;;  %v2926_v18 = vrot.slane %v18450_v9, 5  ;;  %v10912_v20 = vld [vmem:[%s13092_s8 + $0xa8] sm:$0xe]  ;;  %v18452_v50 = vld [vmem:[#allocation22_spill] sm:$0xff] }
  0xc9   : > { %12197 = vmatmul.mubr.msk.bf16.gmra.mxu0 %vm739_vm3, %v14177_v13  ;;  %v14315_v59 = vsel %vm13419_vm7, %v2911_v46, %v2912_v56  ;;  %v10926_v35 = vrot.slane %v10910_v63, 9  ;;  %v2933_v9 = vrot.slane %v18452_v50, 5  ;;  %v10927_v3 = vrot.slane %v10911_v29, 9  ;;  %v18455_v29 = vld [vmem:[#allocation23_spill] sm:$0xff]  ;;  %v14539_v13 = vld [vmem:[%s13092_s8 + $0x30] sm:$0xe] }
  0xca   : > { %12200 = vmatprep.mubr.msk.bf16.mxu0 %vm739_vm3, %v14185_v55  ;;  %v14324_v30 = vsel %vm13419_vm7, %v2918_v51, %v2919_v34  ;;  %v14328_v45 = vsel %vm13419_vm7, %v10925_v53, %v2923_v62  ;;  %v2925_v56 = vrot.slane %v2923_v62, 4  ;;  %v18453_v53 = vld [vmem:[#allocation21_spill] sm:$0xff]  ;;  %v18454_v62 = vld [vmem:[#allocation24_spill] sm:$0xff]  ;;  %v10928_v11 = vrot.slane %v10912_v20, 9 }
  0xcb   : > { %v2937_v51 = vrot.slane %v18453_v53, 5  ;;  %v2940_v40 = vrot.slane %v18454_v62, 5  ;;  %v2944_v63 = vrot.slane %v18455_v29, 5  ;;  %v18456_v53 = vld [vmem:[#allocation25_spill] sm:$0xff]  ;;  %v10929_v20 = vrot.slane %v10913_v48, 9 }
  0xcc   : > { %v14338_v34 = vsel %vm13419_vm7, %v2925_v56, %v2926_v18  ;;  %v2947_v62 = vrot.slane %v18456_v53, 5  ;;  %v18460_v15 = vrot.slane %v13686_v47, 5 }
  0xcd   : > { %12163 = vmatmul.mubr.msk.bf16.gmra.mxu1 %vm739_vm3, %v12860_v24  ;;  %v18451_v24 = vld [vmem:[#allocation17_spill] sm:$0xff]  ;;  %v14353_v18 = vsel %vm13419_vm7, %v10927_v3, %v2937_v51  ;;  %v2939_v56 = vrot.slane %v2937_v51, 4  ;;  %v2946_v29 = vrot.slane %v2944_v63, 4  ;;  %v2951_v3 = vrot.slane %v18457_v52, 5 }
  0xce   : > { %12166 = vmatprep.mubr.msk.bf16.mxu1 %vm739_vm3, %v12861_v27  ;;  %v2930_v46 = vrot.slane %v18451_v24, 5  ;;  %v12863_v27 = vld [vmem:[%s13092_s8 + $0xb4] sm:$0xff]   ;;  %v2857_v36 = vsel %vm13419_vm7, %v14203_v44, %v18460_v15 }
  0xcf   : > { %v14374_v51 = vsel %vm13419_vm7, %v2939_v56, %v2940_v40  ;;  %v14381_v52 = vsel %vm13419_vm7, %v2946_v29, %v2947_v62  ;;  %v2953_v53 = vrot.slane %v2951_v3, 4  ;;  %v2961_v40 = vrot.slane %v14103_v54, 5  ;;  %v13001_v56 = vld [vmem:[%s13092_s8 + $0x1c] sm:$0xf]  ;;  %v13002_v29 = vld [vmem:[%s13092_s8 + $0x20] sm:$0x1] }
  0xd0   : > { %v14346_v24 = vsel %vm13419_vm7, %v10926_v35, %v2930_v46  ;;  %v2932_v50 = vrot.slane %v2930_v46, 4  ;;  %v14365_v46 = vsel %vm13419_vm7, %v10928_v11, %v2944_v63  ;;  %v14385_v63 = vsel %vm13419_vm7, %v10929_v20, %v2951_v3 }
  0xd1   : > { %12201 = vmatmul.mubr.msk.bf16.gmra.mxu0 %vm739_vm3, %v14187_v37  ;;  %v2860_v62 = vrot.slane %v13001_v56, 5  ;;  %v2863_v3 = vrot.slane %v13002_v29, 5  ;;  %v12868_v29 = vld [vmem:[%s13092_s8 + $0x3c] sm:$0xff]  }
  0xd2   : > { %v14361_v35 = vsel %vm13419_vm7, %v2932_v50, %v2933_v9  ;;  %12204 = vmatprep.mubr.msk.bf16.mxu0 %vm739_vm3, %v14193_v42  ;;  %v2954_v9 = vrot.slane %v14082_v39, 5  ;;  %v10930_v50 = vrot.slane %v10914_v5, 9  ;;  %v2958_v5 = vrot.slane %v14091_v22, 5  ;;  %v11035_v39 = vld [vmem:[%s13092_s8 + $0x30] sm:$0xf] }
  0xd3   : > { %v18459_v22 = vrot.slane %v14165_v12, 9  ;;  %v2862_v20 = vrot.slane %v2860_v62, 4 }
  0xd4   : > { %v14415_v23 = vsel %vm13419_vm7, %v2953_v53, %v2954_v9  ;;  %v14427_v4 = vsel %vm13419_vm7, %v10930_v50, %v2958_v5  ;;  %v12866_v50 = vld [vmem:[%s13092_s8 + $0x24] sm:$0xff]   ;;  %v11029_v53 = vld [vmem:[%s13092_s8 + $0x18] sm:$0xf] }
  0xd5   : > { %12167 = vmatmul.mubr.msk.bf16.gmra.mxu1 %vm739_vm3, %v12862_v7  ;;  %v14403_v7 = vcombine.low %v2482_v2, %v2492_v21  ;;  %v2854_v54 = vsel %vm13419_vm7, %v18459_v22, %v2853_v14  ;;  %v2960_v14 = vrot.slane %v2958_v5, 4  ;;  %v12864_v2 = vld [vmem:[%s13092_s8 + $0xc0] sm:$0xff]   ;;  %v14449_v22 = vld [vmem:[%s13092_s8 + $0x1c] sm:$0xf]  ;;  %v3665_v15 = vshrl.u32 %v11029_v53, 16 }
  0xd6   : > { %12170 = vmatprep.mubr.msk.bf16.mxu1 %vm739_vm3, %v12863_v27  ;;  %v10900_v27 = vld [vmem:[%s13092_s8 + $0x18] sm:$0xe]  ;;  %v10932_v44 = vcombine.low %v2854_v54, %v2857_v36  ;;  %v12867_v54 = vld [vmem:[%s13092_s8 + $0x30] sm:$0xff]   ;;  %v3668_v36 = vshll.u32 %v11029_v53, 16 }
  0xd7   : > { %18458 = vst [vmem:[#allocation13_spill] sm:$0xff] %v14403_v7  ;;  %v10916_v21 = vrot.slane %v10900_v27, 9  ;;  %v14432_v47 = vsel %vm13419_vm7, %v2960_v14, %v2961_v40  ;;  %v2864_v40 = vsel %vm13419_vm7, %v2862_v20, %v2863_v3  ;;  %v18461_v27 = vld [vmem:[#allocation18_spill] sm:$0xff]  ;;  %v3674_v14 = vshll.u32 %v14449_v22, 16  ;;  %v14462_v20 = vld [vmem:[%s13092_s8 + $0x28] sm:$0xf] }
  0xd8   : > { %v4617_v56 = vsel %vm788_vm0, %v18461_v27, 0  ;;  %v11031_v3 = vld [vmem:[%s13092_s8 + $0x20] sm:$0x1]  ;;  %v3667_v53 = vrot.slane %v3665_v15, 4  ;;  %v18463_v27 = vcombine.low %v14207_v10, %v14219_v16  ;;  %v3698_v9 = vshll.u32 %v14462_v20, 16 }
  0xd9   : > { %12205 = vmatmul.mubr.msk.bf16.gmra.mxu0 %vm739_vm3, %v14403_v7  ;;  %v2861_v5 = vsel %vm13419_vm7, %v10916_v21, %v2860_v62  ;;  %v11032_v62 = vld [vmem:[%s13092_s8 + $0x24] sm:$0xf]  ;;  %v18462_v21 = vld [vmem:[#allocation19_spill] sm:$0xff]  ;;  %v3702_v15 = vshrl.u32 %v14462_v20, 16  ;;  %v14483_v16 = vld [vmem:[%s13092_s8 + $0x2c] sm:$0x1] }
  0xda   : > { %12244 = vmatprep.mubr.msk.bf16.mxu0 %vm739_vm3, %v12865_v49  ;;  %v10933_v49 = vcombine.low %v2861_v5, %v2864_v40  ;;  %v3670_v5 = vrot.slane %v3668_v36, 5  ;;  %v14467_v40 = vrot.slane %v3674_v14, 5  ;;  %v11110_v36 = vld [vmem:[%s13092_s8 + $0x18] sm:$0xe]  ;;  %v14486_v12 = vrot.slane %v3698_v9, 5 }
  0xdb   : > { %v4411_v11 = vrot.slane %v11031_v3, 5  ;;  %v4418_v37 = vrot.slane %v14483_v16, 5 }
  0xdd   : > { %12171 = vmatmul.mubr.msk.bf16.gmra.mxu1 %vm739_vm3, %v12864_v2  ;;  %v3678_v2 = vshrl.u32 %v14449_v22, 16 }
  0xde   : > { %12210 = vmatprep.mubr.msk.bf16.mxu1 %vm739_vm3, %v10932_v44  ;;  %v4147_v44 = vsel %vm788_vm0, %v18462_v21, 0  ;;  %v12869_v21 = vld [vmem:[%s13092_s8 + $0x48] sm:$0xff]  }
  0xe1   : > { %12245 = vmatmul.mubr.msk.bf16.vlgmr.msra.gmra.mxu0 %vm739_vm3, %v12866_v50  ;;  %v3680_v50 = vrot.slane %v3678_v2, 4  ;;  %v3684_v2 = vshll.u32 %v11031_v3, 16  ;;  %v12870_v3 = vld [vmem:[%s13092_s8 + $0x54] sm:$0xff]  }
  0xe2   : > { %12311 = vmatpush3.bf16.msra.mxu0 %v4617_v56  ;;  %12248 = vmatprep.mubr.msk.bf16.mxu0 %vm739_vm3, %v12867_v54  ;;  %v3689_v54 = vshrl.u32 %v11032_v62, 16  ;;  %v3692_v56 = vshll.u32 %v11032_v62, 16 }
  0xe3   : > { %v3681_v14 = vor.u32 %v3680_v50, %v14467_v40  ;;  %v11126_v50 = vrot.slane %v11110_v36, 9  ;;  %v3686_v9 = vrot.slane %v3684_v2, 5  ;;  %v3708_v2 = vshll.u32 %v14483_v16, 16 }
  0xe4   : > { %v3691_v62 = vrot.slane %v3689_v54, 4 }
  0xe5   : > { %12211 = vmatmul.mubr.msk.bf16.vlgmr.msra.gmra.mxu1 %vm739_vm3, %v10933_v49  ;;  %v3671_v49 = vor.u32 %v3670_v5, %v3667_v53  ;;  %v14480_v10 = vpop.f32.mrf.mxu0  ;;  %v3704_v53 = vrot.slane %v3702_v15, 4  ;;  %v11111_v5 = vld [vmem:[%s13092_s8 + $0x24] sm:$0xe]  ;;  %v18467_v15 = vcombine.low %v14238_v61, %v14256_v8  ;;  %v11038_v8 = vld [vmem:[%s13092_s8 + $0x3c] sm:$0xf] }
  0xe6   : > { %12277 = vmatpush3.bf16.msra.mxu1 %v4147_v44  ;;  %12214 = vmatprep.mubr.msk.bf16.mxu1 %vm739_vm3, %v18463_v27  ;;  %v4408_v44 = vrot.slane %v14449_v22, 5  ;;  %18464 = vst [vmem:[#allocation10_spill] sm:$0xff] %v14480_v10  ;;  %v3694_v27 = vrot.slane %v3692_v56, 5  ;;  %v14491_v22 = vld [vmem:[%s13092_s8 + $0x34] sm:$0xf]  ;;  %v3737_v19 = vshrl.u32 %v11038_v8, 16 }
  0xe7   : > { %v3672_v56 = vrot.slane %v3671_v49, 4  ;;  %v14504_v36 = vpop.f32.mrf.mxu0  ;;  %v12871_v49 = vld [vmem:[%s13092_s8 + $0x60] sm:$0xff]   ;;  %v3722_v42 = vshll.u32 %v14491_v22, 16  ;;  %v3726_v61 = vshrl.u32 %v14491_v22, 16 }
  0xe8   : > { %v4410_v48 = vrot.slane %v4408_v44, 4  ;;  %18468 = vst [vmem:[#allocation9_spill] sm:$0xff] %v14504_v36  ;;  %v3695_v7 = vor.u32 %v3694_v27, %v3691_v62  ;;  %v14515_v62 = vld [vmem:[%s13092_s8 + $0x40] sm:$0xf] }
  0xe9   : > { %12249 = vmatmul.mubr.msk.bf16.gmra.mxu0 %vm739_vm3, %v12868_v29  ;;  %v18465_v29 = vcombine.low %v14230_v41, %v14243_v32  ;;  %v4415_v41 = vrot.slane %v14462_v20, 5  ;;  %v3713_v32 = vshrl.u32 %v11035_v39, 16  ;;  %v14536_v55 = vpop.f32.mrf.mxu0 }
  0xea   : > { %12252 = vmatprep.mubr.msk.bf16.mxu0 %vm739_vm3, %v12869_v21  ;;  %v14497_v54 = vpop.f32.mrf.mxu1  ;;  %v3682_v21 = vrot.slane %v3681_v14, 4  ;;  %v3705_v14 = vor.u32 %v3704_v53, %v14486_v12  ;;  %v14526_v53 = vsel %vm13419_vm7, %v11126_v50, %v4408_v44  ;;  %v14530_v16 = vsel %vm13419_vm7, %v4410_v48, %v4411_v11  ;;  %18470 = vst [vmem:[#allocation17_spill] sm:$0xff] %v14536_v55 }
  0xeb   : > { %18466 = vst [vmem:[#allocation12_spill] sm:$0xff] %v14497_v54  ;;  %v3710_v50 = vrot.slane %v3708_v2, 5  ;;  %v14542_v48 = vrot.slane %v3722_v42, 5  ;;  %v3728_v11 = vrot.slane %v3726_v61, 4  ;;  %v3746_v2 = vshll.u32 %v14515_v62, 16 }
  0xec   : > { %v14517_v20 = vpop.f32.mrf.mxu1  ;;  %v3687_v27 = vsel %vm13133_vm4, %v3682_v21, %v3686_v9  ;;  %v3715_v21 = vrot.slane %v3713_v32, 4  ;;  %v3706_v44 = vrot.slane %v3705_v14, 4  ;;  %v14549_v32 = vld [vmem:[%s13092_s8 + $0x4c] sm:$0xf]  ;;  %v3750_v61 = vshrl.u32 %v14515_v62, 16 }
  0xed   : > { %12215 = vmatmul.mubr.msk.bf16.gmra.mxu1 %vm739_vm3, %v18465_v29  ;;  %v3716_v29 = vshll.u32 %v11035_v39, 16  ;;  %18469 = vst [vmem:[#allocation4_spill] sm:$0xff] %v14517_v20  ;;  %v3677_v39 = vsel %vm13133_vm4, %v3672_v56, %v14467_v40  ;;  %v3696_v40 = vrot.slane %v3695_v7, 4  ;;  %v4417_v56 = vrot.slane %v4415_v41, 4  ;;  %v12874_v20 = vld [vmem:[%s13092_s8 + $0x84] sm:$0xff]  }
  0xee   : > { %12218 = vmatprep.mubr.msk.bf16.mxu1 %vm739_vm3, %v18467_v15  ;;  %v11127_v15 = vrot.slane %v11111_v5, 9  ;;  %v14533_v5 = vld [vmem:[%s13092_s8 + $0x38] sm:$0x1]  ;;  %v3740_v7 = vshll.u32 %v11038_v8, 16  ;;  %v14557_v42 = vcombine.low %v3677_v39, %v3687_v27  ;;  %v18473_v8 = vcombine.low %v14269_v38, %v14278_v25 }
  0xef   : > { %v3718_v9 = vrot.slane %v3716_v29, 5  ;;  %v18471_v29 = vcombine.low %v14247_v1, %v14265_v17  ;;  %v12873_v1 = vld [vmem:[%s13092_s8 + $0x78] sm:$0xff]   ;;  %v14570_v17 = vpop.f32.mrf.mxu0  ;;  %v3701_v39 = vsel %vm13133_vm4, %v3696_v40, %v14486_v12  ;;  %v3732_v27 = vshll.u32 %v14533_v5, 16 }
  0xf0   : > { %v14561_v14 = vsel %vm13419_vm7, %v11127_v15, %v4415_v41  ;;  %18474 = vst [vmem:[#allocation21_spill] sm:$0xff] %v14570_v17  ;;  %v14577_v41 = vsel %vm13419_vm7, %v4417_v56, %v4418_v37  ;;  %v3711_v38 = vsel %vm13133_vm4, %v3706_v44, %v3710_v50  ;;  %v3729_v25 = vor.u32 %v3728_v11, %v14542_v48  ;;  %v11044_v50 = vld [vmem:[%s13092_s8 + $0x54] sm:$0xf]  ;;  %v14596_v11 = vld [vmem:[%s13092_s8 + $0x58] sm:$0xf] }
  0xf1   : > { %12253 = vmatmul.mubr.msk.bf16.gmra.mxu0 %vm739_vm3, %v12870_v3  ;;  %v3719_v15 = vor.u32 %v3718_v9, %v3715_v21  ;;  %v4422_v12 = vrot.slane %v14491_v22, 5  ;;  %v3739_v40 = vrot.slane %v3737_v19, 4  ;;  %v3742_v3 = vrot.slane %v3740_v7, 5 }
  0xf2   : > { %12256 = vmatprep.mubr.msk.bf16.mxu0 %vm739_vm3, %v12871_v49  ;;  %v14555_v49 = vpop.f32.mrf.mxu1  ;;  %v3761_v37 = vshrl.u32 %v11041_v33, 16  ;;  %v3764_v56 = vshll.u32 %v11041_v33, 16  ;;  %v14590_v9 = vrot.slane %v3746_v2, 5  ;;  %v3752_v43 = vrot.slane %v3750_v61, 4  ;;  %v11113_v2 = vld [vmem:[%s13092_s8 + $0x3c] sm:$0xe] }
  0xf3   : > { %18472 = vst [vmem:[#allocation22_spill] sm:$0xff] %v14555_v49  ;;  %v3770_v26 = vshll.u32 %v14549_v32, 16  ;;  %v3774_v44 = vshrl.u32 %v14549_v32, 16  ;;  %v14605_v22 = vrot.slane %v3732_v27, 5  ;;  %v4425_v7 = vrot.slane %v14533_v5, 5 }
  0xf4   : > { %v14588_v21 = vpop.f32.mrf.mxu1  ;;  %v14610_v61 = vrot.slane %v3729_v25, 4  ;;  %v4429_v49 = vrot.slane %v14515_v62, 5  ;;  %v14615_v54 = vcombine.low %v3701_v39, %v3711_v38  ;;  %v14618_v33 = vld [vmem:[%s13092_s8 + $0x50] sm:$0x1]  ;;  %v3763_v27 = vrot.slane %v3761_v37, 4 }
  0xf5   : > { %12219 = vmatmul.mubr.msk.bf16.gmra.mxu1 %vm739_vm3, %v18471_v29  ;;  %v14581_v29 = vld [vmem:[%s13092_s8 + $0x44] sm:$0x1]  ;;  %18475 = vst [vmem:[#allocation24_spill] sm:$0xff] %v14588_v21  ;;  %v4424_v21 = vrot.slane %v4422_v12, 4  ;;  %v18478_v5 = vcombine.low %v14287_v28, %v14304_v6  ;;  %v14632_v39 = vrot.slane %v3770_v26, 5  ;;  %v3776_v38 = vrot.slane %v3774_v44, 4 }
  0xf6   : > { %12222 = vmatprep.mubr.msk.bf16.mxu1 %vm739_vm3, %v18473_v8  ;;  %v11128_v8 = vrot.slane %v14539_v13, 9  ;;  %v14599_v19 = vpop.f32.mrf.mxu0  ;;  %v14603_v13 = vrot.slane %v3719_v15, 4  ;;  %18477 = vst [vmem:[#allocation25_spill] sm:$0xff] %v14615_v54  ;;  %v3743_v15 = vor.u32 %v3742_v3, %v3739_v40  ;;  %v3753_v3 = vor.u32 %v3752_v43, %v14590_v9 }
  0xf7   : > { %18476 = vst [vmem:[#allocation23_spill] sm:$0xff] %v14599_v19  ;;  %v3766_v19 = vrot.slane %v3764_v56, 5  ;;  %v18480_v40 = vcombine.low %v14296_v60, %v14315_v59  ;;  %v3785_v6 = vshrl.u32 %v11044_v50, 16  ;;  %v3788_v37 = vshll.u32 %v11044_v50, 16 }
  0xf8   : > { %v14629_v62 = vsel %vm13419_vm7, %v11128_v8, %v4422_v12  ;;  %v14638_v28 = vpop.f32.mrf.mxu0  ;;  %v3794_v56 = vshll.u32 %v14596_v11, 16  ;;  %v14648_v43 = vsel %vm13419_vm7, %v4424_v21, %v4425_v7  ;;  %v11129_v59 = vrot.slane %v11113_v2, 9  ;;  %v11114_v8 = vld [vmem:[%s13092_s8 + $0x48] sm:$0xe]  ;;  %v11047_v12 = vld [vmem:[%s13092_s8 + $0x60] sm:$0xf] }
  0xf9   : > { %12257 = vmatmul.mubr.msk.bf16.gmra.mxu0 %vm739_vm3, %v12872_v57  ;;  %v3756_v57 = vshll.u32 %v14581_v29, 16  ;;  %18481 = vst [vmem:[#allocation18_spill] sm:$0xff] %v14638_v28  ;;  %v14654_v44 = vrot.slane %v3743_v15, 4  ;;  %v4431_v50 = vrot.slane %v4429_v49, 4  ;;  %v14659_v26 = vrot.slane %v3753_v3, 4 }
  0xfa   : > { %12260 = vmatprep.mubr.msk.bf16.mxu0 %vm739_vm3, %v12873_v1  ;;  %v12875_v1 = vld [vmem:[%s13092_s8 + $0x90] sm:$0xff]   ;;  %v14625_v25 = vpop.f32.mrf.mxu1  ;;  %v3777_v17 = vor.u32 %v3776_v38, %v14632_v39  ;;  %v3780_v21 = vshll.u32 %v14618_v33, 16  ;;  %v4436_v7 = vrot.slane %v14549_v32, 5  ;;  %v14665_v2 = vld [vmem:[%s13092_s8 + $0x5c] sm:$0x1]  ;;  %v3790_v15 = vrot.slane %v3788_v37, 5 }
  0xfb   : > { %18479 = vst [vmem:[#allocation26_spill] sm:$0xff] %v14625_v25  ;;  %v14650_v60 = vrot.slane %v3756_v57, 5  ;;  %v3767_v25 = vor.u32 %v3766_v19, %v3763_v27  ;;  %v14668_v57 = vld [vmem:[%s13092_s8 + $0x64] sm:$0xf]  ;;  %v3787_v19 = vrot.slane %v3785_v6, 4  ;;  %v14673_v27 = vrot.slane %v3794_v56, 5 }
  0xfc   : > { %v14657_v28 = vpop.f32.mrf.mxu1  ;;  %v14682_v38 = vsel %vm13419_vm7, %v11129_v59, %v4429_v49  ;;  %v3812_v6 = vshll.u32 %v11047_v12, 16  ;;  %v12876_v37 = vld [vmem:[%s13092_s8 + $0x9c] sm:$0xff]   ;;  %v11130_v49 = vrot.slane %v11114_v8, 9  ;;  %v11050_v59 = vld [vmem:[%s13092_s8 + $0x6c] sm:$0xf]  ;;  %v18484_v32 = vcombine.low %v14308_v58, %v14324_v30 }
  0xfd   : > { %12223 = vmatmul.mubr.msk.bf16.gmra.mxu1 %vm739_vm3, %v18478_v5  ;;  %v3798_v5 = vshrl.u32 %v14596_v11, 16  ;;  %18482 = vst [vmem:[#allocation19_spill] sm:$0xff] %v14657_v28  ;;  %v3809_v28 = vshrl.u32 %v11047_v12, 16  ;;  %v14707_v55 = vrot.slane %v3780_v21, 5  ;;  %v18486_v8 = vcombine.low %v14328_v45, %v14338_v34  ;;  %v12877_v30 = vld [vmem:[%s13092_s8 + $0xa8] sm:$0xff]  }
  0xfe   : > { %12226 = vmatprep.mubr.msk.bf16.mxu1 %vm739_vm3, %v18480_v40  ;;  %v4432_v40 = vrot.slane %v14581_v29, 5  ;;  %v14671_v29 = vpop.f32.mrf.mxu0  ;;  %v14703_v12 = vpop.f32.mrf.mxu1  ;;  %v3759_v45 = vsel %vm13133_vm4, %v14659_v26, %v14650_v60  ;;  %v3822_v21 = vshrl.u32 %v14668_v57, 16  ;;  %v18494_v54 = vcombine.low %v14353_v18, %v14374_v51 }
  0xff   : > { %18483 = vst [vmem:[#allocation34_spill] sm:$0xff] %v14671_v29  ;;  %v3800_v3 = vrot.slane %v3798_v5, 4  ;;  %v14696_v5 = vrot.slane %v3767_v25, 4  ;;  %18485 = vst [vmem:[#allocation35_spill] sm:$0xff] %v14703_v12  ;;  %v14705_v29 = vrot.slane %v3777_v17, 4  ;;  %v3804_v17 = vshll.u32 %v14665_v2, 16 }
 0x100   : > { %v14694_v56 = vsel %vm13419_vm7, %v4431_v50, %v4432_v40  ;;  %v4439_v50 = vrot.slane %v14618_v33, 5  ;;  %v14711_v25 = vld [vmem:[%s13092_s8 + $0x54] sm:$0xe]  ;;  %v14717_v58 = vpop.f32.mrf.mxu0  ;;  %v3791_v40 = vor.u32 %v3790_v15, %v3787_v19  ;;  %v14724_v12 = vld [vmem:[%s13092_s8 + $0x60] sm:$0xe]  ;;  %v3811_v33 = vrot.slane %v3809_v28, 4  ;;  %v14744_v26 = vpop.f32.mrf.mxu1 }
 0x101   : > { %12261 = vmatmul.mubr.msk.bf16.gmra.mxu0 %vm739_vm3, %v12874_v20  ;;  %v14685_v20 = vld [vmem:[%s13092_s8 + $0x68] sm:$0x1]  ;;  %18487 = vst [vmem:[#allocation36_spill] sm:$0xff] %v14717_v58  ;;  %v3801_v34 = vor.u32 %v3800_v3, %v14673_v27  ;;  %v14732_v58 = vld [vmem:[%s13092_s8 + $0x70] sm:$0xf]  ;;  %v3773_v19 = vsel %vm13133_vm4, %v14696_v5, %v14632_v39  ;;  %v14740_v15 = vsel %vm13419_vm7, %v11130_v49, %v4436_v7  ;;  %18488 = vst [vmem:[#allocation37_spill] sm:$0xff] %v14744_v26 }
 0x102   : > { %12264 = vmatprep.mubr.msk.bf16.mxu0 %vm739_vm3, %v12875_v1  ;;  %v4438_v1 = vrot.slane %v4436_v7, 4  ;;  %v3828_v36 = vshll.u32 %v14685_v20, 16  ;;  %v3783_v28 = vsel %vm13133_vm4, %v14705_v29, %v14707_v55  ;;  %v3833_v39 = vshrl.u32 %v11050_v59, 16  ;;  %v11053_v7 = vld [vmem:[%s13092_s8 + $0x78] sm:$0xf] }
 0x103   : > { %v3836_v3 = vshll.u32 %v11050_v59, 16  ;;  %v14758_v5 = vrot.slane %v3791_v40, 4  ;;  %v14760_v49 = vrot.slane %v3804_v17, 5  ;;  %v11131_v55 = vrot.slane %v14711_v25, 9  ;;  %v12878_v26 = vld [vmem:[%s13092_s8 + $0xb4] sm:$0xff]  }
 0x104   : > { %v14752_v60 = vsel %vm13419_vm7, %v4438_v1, %v4439_v50  ;;  %v4446_v29 = vrot.slane %v14665_v2, 5  ;;  %v14765_v1 = vrot.slane %v3801_v34, 4  ;;  %v18491_v59 = vrot.slane %v14596_v11, 5  ;;  %v14776_v25 = vld [vmem:[%s13092_s8 + $0x74] sm:$0x1] }
 0x105   : > { %12227 = vmatmul.mubr.msk.bf16.gmra.mxu1 %vm739_vm3, %v18484_v32  ;;  %v3818_v32 = vshll.u32 %v14668_v57, 16  ;;  %18489 = vst [vmem:[#allocation38_spill] sm:$0xff] %v14752_v60  ;;  %v14773_v10 = vrot.slane %v3828_v36, 5  ;;  %v3842_v2 = vshll.u32 %v14732_v58, 16  ;;  %v18492_v34 = vcombine.low %v14346_v24, %v14361_v35  ;;  %v14792_v40 = vld [vmem:[%s13092_s8 + $0x80] sm:$0x1] }
 0x106   : > { %12230 = vmatprep.mubr.msk.bf16.mxu1 %vm739_vm3, %v18486_v8  ;;  %v3814_v8 = vrot.slane %v3812_v6, 5  ;;  %v4445_v50 = vrot.slane %v18491_v59, 4  ;;  %v12879_v59 = vld [vmem:[%s13092_s8 + $0xc0] sm:$0xff]   ;;  %v3835_v36 = vrot.slane %v3833_v39, 4  ;;  %v18496_v35 = vsel %vm13133_vm4, %v14610_v61, %v14605_v22  ;;  %v14913_v60 = vld [vmem:[%s13092_s8 + $0x94] sm:$0xf] }
 0x107   : > { %v14756_v6 = vpop.f32.mrf.mxu0  ;;  %v18497_v39 = vsel %vm13133_vm4, %v14603_v13, %v14542_v48  ;;  %v3857_v18 = vshrl.u32 %v11053_v7, 16  ;;  %v3860_v51 = vshll.u32 %v11053_v7, 16  ;;  %v14824_v48 = vcombine.low %v3773_v19, %v3783_v28  ;;  %v14841_v19 = vld [vmem:[%s13092_s8 + $0x6c] sm:$0xe] }
 0x108   : > { %18490 = vst [vmem:[#allocation39_spill] sm:$0xff] %v14756_v6  ;;  %v3815_v17 = vor.u32 %v3814_v8, %v3811_v33  ;;  %v3824_v6 = vrot.slane %v3822_v21, 4  ;;  %v3838_v21 = vrot.slane %v3836_v3, 5  ;;  %v3846_v8 = vshrl.u32 %v14732_v58, 16 }
 0x109   : > { %12265 = vmatmul.mubr.msk.bf16.gmra.mxu0 %vm739_vm3, %v12876_v37  ;;  %v14769_v37 = vrot.slane %v3818_v32, 5  ;;  %v14798_v24 = vpop.f32.mrf.mxu0  ;;  %v14810_v3 = vcombine.low %v18497_v39, %v18496_v35  ;;  %v18498_v33 = vsel %vm13133_vm4, %v14654_v44, %v14590_v9  ;;  %18500 = vst [vmem:[#allocation43_spill] sm:$0xff] %v14824_v48  ;;  %v14829_v35 = vld [vmem:[%s13092_s8 + $0x88] sm:$0xf]  ;;  %v3876_v13 = vshll.u32 %v14792_v40, 16  ;;  %v12880_v48 = vld [vmem:[%s13092_s8 + $0xcc] sm:$0xff]  }
 0x10a   : > { %12268 = vmatprep.mubr.msk.bf16.mxu0 %vm739_vm3, %v12877_v30  ;;  %v14780_v30 = vld [vmem:[%s13092_s8 + $0x7c] sm:$0xf]  ;;  %18495 = vst [vmem:[#allocation41_spill] sm:$0xff] %v14798_v24  ;;  %v14820_v22 = vcombine.low %v18498_v33, %v3759_v45  ;;  %v14831_v39 = vrot.slane %v3815_v17, 4  ;;  %v3848_v44 = vrot.slane %v3846_v8, 4  ;;  %v3852_v45 = vshll.u32 %v14776_v25, 16 }
 0x10b   : > { %v3825_v7 = vor.u32 %v3824_v6, %v14769_v37  ;;  %v3866_v28 = vshll.u32 %v14780_v30, 16  ;;  %v3870_v33 = vshrl.u32 %v14780_v30, 16  ;;  %v14846_v17 = vpop.f32.mrf.mxu0  ;;  %v3859_v6 = vrot.slane %v3857_v18, 4 }
 0x10c   : > { %v14786_v32 = vpop.f32.mrf.mxu1  ;;  %18499 = vst [vmem:[#allocation42_spill] sm:$0xff] %v14820_v22  ;;  %18502 = vst [vmem:[#allocation45_spill] sm:$0xff] %v14846_v17  ;;  %v18503_v8 = vrot.slane %v14596_v11, 5  ;;  %v3797_v18 = vsel %vm13133_vm4, %v14758_v5, %v14673_v27  ;;  %v3890_v11 = vshll.u32 %v14829_v35, 16  ;;  %v14876_v27 = vsel %vm13419_vm7, %v4445_v50, %v4446_v29 }
 0x10d   : > { %12231 = vmatmul.mubr.msk.bf16.gmra.mxu1 %vm739_vm3, %v18492_v34  ;;  %18493 = vst [vmem:[#allocation40_spill] sm:$0xff] %v14786_v32  ;;  %v4453_v34 = vrot.slane %v14685_v20, 5  ;;  %v14835_v32 = vrot.slane %v3842_v2, 5  ;;  %v18351_v20 = vrot.slane %v14732_v58, 5  ;;  %v3862_v2 = vrot.slane %v3860_v51, 5 }
 0x10e   : > { %12234 = vmatprep.mubr.msk.bf16.mxu1 %vm739_vm3, %v18494_v54  ;;  %v11056_v54 = vld [vmem:[%s13092_s8 + $0x84] sm:$0xf]  ;;  %v14837_v9 = vpop.f32.mrf.mxu1  ;;  %v14855_v61 = vsel %vm13419_vm7, %v11131_v55, %v18503_v8  ;;  %v3894_v55 = vshrl.u32 %v14829_v35, 16  ;;  %v11118_v51 = vld [vmem:[%s13092_s8 + $0x78] sm:$0xe]  ;;  %v18508_v8 = vrot.slane %v14668_v57, 5 }
 0x10f   : > { %18501 = vst [vmem:[#allocation44_spill] sm:$0xff] %v14837_v9  ;;  %v3839_v9 = vor.u32 %v3838_v21, %v3835_v36  ;;  %v3881_v24 = vshrl.u32 %v11056_v54, 16  ;;  %v18504_v36 = vcombine.low %v14365_v46, %v14381_v52  ;;  %v3849_v5 = vor.u32 %v3848_v44, %v14835_v32 }
 0x110   : > { %v14872_v21 = vpop.f32.mrf.mxu1  ;;  %v18507_v46 = vcombine.low %v14385_v63, %v14415_v23  ;;  %v14888_v52 = vrot.slane %v3825_v7, 4  ;;  %v4452_v29 = vrot.slane %v18508_v8, 4  ;;  %v14892_v50 = vrot.slane %v3852_v45, 5  ;;  %v11059_v7 = vld [vmem:[%s13092_s8 + $0x90] sm:$0xf] }
 0x111   : > { %12269 = vmatmul.mubr.msk.bf16.gmra.mxu0 %vm739_vm3, %v12878_v26  ;;  %v3884_v26 = vshll.u32 %v11056_v54, 16  ;;  %18505 = vst [vmem:[#allocation46_spill] sm:$0xff] %v14872_v21  ;;  %v14882_v54 = vpop.f32.mrf.mxu0  ;;  %v11133_v44 = vrot.slane %v14841_v19, 9  ;;  %v4460_v63 = vrot.slane %v14776_v25, 5  ;;  %v4464_v23 = vrot.slane %v14780_v30, 5 }
 0x112   : > { %12272 = vmatprep.mubr.msk.bf16.mxu0 %vm739_vm3, %v12879_v59  ;;  %v3807_v59 = vsel %vm13133_vm4, %v14765_v1, %v14760_v49  ;;  %v14879_v49 = vrot.slane %v3866_v28, 5  ;;  %v3872_v1 = vrot.slane %v3870_v33, 4  ;;  %18506 = vst [vmem:[#allocation47_spill] sm:$0xff] %v14882_v54  ;;  %v14896_v28 = vld [vmem:[%s13092_s8 + $0x8c] sm:$0x1]  ;;  %v14898_v33 = vrot.slane %v3839_v9, 4  ;;  %v14907_v54 = vpop.f32.mrf.mxu1 }
 0x113   : > { %v3886_v21 = vrot.slane %v3884_v26, 5  ;;  %v14905_v8 = vrot.slane %v3890_v11, 5  ;;  %v3896_v45 = vrot.slane %v3894_v55, 4  ;;  %18509 = vst [vmem:[#allocation48_spill] sm:$0xff] %v14907_v54  ;;  %v3850_v19 = vrot.slane %v3849_v5, 4 }
 0x114   : > { %v3863_v17 = vor.u32 %v3862_v2, %v3859_v6  ;;  %v3873_v9 = vor.u32 %v3872_v1, %v14879_v49  ;;  %v14910_v22 = vrot.slane %v3876_v13, 5  ;;  %v14918_v25 = vcombine.low %v3797_v18, %v3807_v59 }
 0x115   : > { %12235 = vmatmul.mubr.msk.bf16.gmra.mxu1 %vm739_vm3, %v18504_v36  ;;  %v4459_v36 = vrot.slane %v18351_v20, 4  ;;  %v18510_v30 = vrot.slane %v14668_v57, 5  ;;  %v11134_v6 = vrot.slane %v11118_v51, 9  ;;  %v4467_v13 = vrot.slane %v14792_v40, 5 }
 0x116   : > { %12238 = vmatprep.mubr.msk.bf16.mxu1 %vm739_vm3, %v18507_v46  ;;  %v3883_v46 = vrot.slane %v3881_v24, 4  ;;  %v18511_v24 = vrot.slane %v14724_v12, 9  ;;  %v18512_v2 = vcombine.low %v14526_v53, %v14530_v16  ;;  %v14939_v57 = vsel %vm13419_vm7, %v4452_v29, %v4453_v34  ;;  %v11119_v29 = vld [vmem:[%s13092_s8 + $0x84] sm:$0xe] }
 0x117   : > { %v4466_v12 = vrot.slane %v4464_v23, 4  ;;  %v3900_v18 = vshll.u32 %v14896_v28, 16  ;;  %v3897_v53 = vor.u32 %v3896_v45, %v14905_v8  ;;  %v3905_v16 = vshrl.u32 %v11059_v7, 16 }
 0x118   : > { %v14926_v26 = vsel %vm13419_vm7, %v18511_v24, %v18510_v30  ;;  %v3887_v40 = vor.u32 %v3886_v21, %v3883_v46  ;;  %v3908_v11 = vshll.u32 %v11059_v7, 16  ;;  %v3864_v34 = vrot.slane %v3863_v17, 4 }
 0x119   : > { %v14915_v20 = vpop.f32.mrf.mxu0  ;;  %12273 = vmatmul.mubr.msk.bf16.gmra.mxu0 %vm739_vm3, %v12880_v48  ;;  %v3821_v48 = vsel %vm13133_vm4, %v14831_v39, %v14769_v37  ;;  %v18513_v37 = vcombine.low %v14427_v4, %v14432_v47  ;;  %v3874_v39 = vrot.slane %v3873_v9, 4  ;;  %v3914_v5 = vshll.u32 %v14913_v60, 16  ;;  %v11062_v9 = vld [vmem:[%s13092_s8 + $0x9c] sm:$0xf] }
 0x11a   : > { %12312 = vmatprep.mubr.msk.bf16.mxu0 %vm739_vm3, %v18512_v2  ;;  %v3918_v1 = vshrl.u32 %v14913_v60, 16  ;;  %v3831_v51 = vsel %vm13133_vm4, %v14888_v52, %v14773_v10  ;;  %v3845_v4 = vsel %vm13133_vm4, %v14898_v33, %v14835_v32  ;;  %v18514_v47 = vrot.slane %v14732_v58, 5 }
 0x11b   : > { %v14942_v59 = vpop.f32.mrf.mxu0  ;;  %v3855_v10 = vsel %vm13133_vm4, %v3850_v19, %v14892_v50  ;;  %v14983_v32 = vsel %vm13419_vm7, %v11134_v6, %v4464_v23  ;;  %v14987_v58 = vsel %vm13419_vm7, %v4466_v12, %v4467_v13  ;;  %v3902_v52 = vrot.slane %v3900_v18, 5 }
 0x11c   : > { %v14969_v17 = vsel %vm13419_vm7, %v11133_v44, %v18514_v47  ;;  %v14990_v44 = vld [vmem:[%s13092_s8 + $0x98] sm:$0x1]  ;;  %v3907_v46 = vrot.slane %v3905_v16, 4  ;;  %v3910_v45 = vrot.slane %v3908_v11, 5  ;;  %v3869_v50 = vsel %vm13133_vm4, %v3864_v34, %v14879_v49  ;;  %v15029_v11 = vld [vmem:[%s13092_s8 + $0xa0] sm:$0xf] }
 0x11d   : > { %v14945_v55 = vpop.f32.mrf.mxu1  ;;  %12239 = vmatmul.mubr.msk.bf16.gmra.mxu1 %vm739_vm3, %v18513_v37  ;;  %v14953_v21 = vpop.f32.mrf.mxu0  ;;  %v3879_v23 = vsel %vm13133_vm4, %v3874_v39, %v14910_v22  ;;  %v15003_v19 = vrot.slane %v3914_v5, 5  ;;  %v3920_v24 = vrot.slane %v3918_v1, 4  ;;  %v18515_v13 = vcombine.low %v14561_v14, %v14577_v41  ;;  %v11120_v34 = vld [vmem:[%s13092_s8 + $0x90] sm:$0xe]  ;;  %v18518_v5 = vld [vmem:[#allocation25_spill] sm:$0xff] }
 0x11e   : > { %12278 = vmatprep.mubr.msk.bf16.mxu1 %vm739_vm3, %v14557_v42  ;;  %v14973_v42 = vsel %vm13419_vm7, %v4459_v36, %v4460_v63  ;;  %v3888_v36 = vrot.slane %v3887_v40, 4  ;;  %v3898_v63 = vrot.slane %v3897_v53, 4  ;;  %v11135_v12 = vrot.slane %v11119_v29, 9  ;;  %v18519_v29 = vld [vmem:[#allocation10_spill] sm:$0xff]  ;;  %v18521_v16 = vld [vmem:[#allocation17_spill] sm:$0xff] }
 0x11f   : > { %v14976_v7 = vpop.f32.mrf.mxu1  ;;  %v14992_v33 = vpop.f32.mrf.mxu0  ;;  %v4471_v18 = vrot.slane %v14829_v35, 5  ;;  %v18517_v40 = vcombine.low %v14629_v62, %v14648_v43  ;;  %v15020_v14 = vcombine.low %v3821_v48, %v3831_v51  ;;  %v15022_v41 = vcombine.low %v3845_v4, %v3855_v10 }
 0x120   : > { %v15031_v37 = vcombine.low %v3869_v50, %v3879_v23  ;;  %v3893_v62 = vsel %vm13133_vm4, %v3888_v36, %v14905_v8  ;;  %v3911_v43 = vor.u32 %v3910_v45, %v3907_v46  ;;  %v3924_v48 = vshll.u32 %v14990_v44, 16 }
 0x121   : > { %v14995_v30 = vpop.f32.mrf.mxu1  ;;  %v12110_v6 = vpop.f32.mrf.mxu0  ;;  %12313 = vmatmul.mubr.msk.bf16.vlgmr.msra.gmra.mxu0 %vm739_vm3, %v18515_v13  ;;  %v3903_v1 = vsel %vm13133_vm4, %v3898_v63, %v3902_v52  ;;  %v3921_v51 = vor.u32 %v3920_v24, %v15003_v19  ;;  %v3929_v4 = vshrl.u32 %v11062_v9, 16  ;;  %v3932_v47 = vshll.u32 %v11062_v9, 16  ;;  %v18520_v13 = vld [vmem:[#allocation9_spill] sm:$0xff] }
 0x122   : > { %12316 = vmatprep.mubr.msk.bf16.mxu0 %vm739_vm3, %v18517_v40  ;;  %v15048_v8 = vsel %vm13419_vm7, %v11135_v12, %v4471_v18  ;;  %v4473_v36 = vrot.slane %v4471_v18, 4  ;;  %v4474_v46 = vrot.slane %v14896_v28, 5  ;;  %v11136_v23 = vrot.slane %v11120_v34, 9 }
 0x123   : > { %v15014_v22 = vpop.f32.mrf.mxu1  ;;  %v1543_v35 = vpop.f32.mrf.mxu0  ;;  %v4478_v52 = vrot.slane %v14913_v60, 5  ;;  %v3938_v63 = vshll.u32 %v15029_v11, 16  ;;  %v3942_v9 = vshrl.u32 %v15029_v11, 16  ;;  %v15059_v12 = vrot.slane %v3911_v43, 4 }
 0x124   : > { %18516 = vst [vmem:[#allocation49_spill] sm:$0xff] %v15014_v22  ;;  %v3922_v28 = vrot.slane %v3921_v51, 4  ;;  %v3931_v34 = vrot.slane %v3929_v4, 4  ;;  %v3934_v60 = vrot.slane %v3932_v47, 5  ;;  %v4481_v43 = vrot.slane %v14990_v44, 5  ;;  %v18525_v44 = vld [vmem:[#allocation21_spill] sm:$0xff] }
 0x125   : > { %v12076_v39 = vpop.f32.mrf.mxu1  ;;  %12279 = vmatmul.mubr.msk.bf16.vlgmr.msra.gmra.mxu1 %vm739_vm3, %v18518_v5  ;;  %v12111_v50 = vpop.f32.mrf.mxu0  ;;  %v3926_v5 = vrot.slane %v3924_v48, 5  ;;  %v11065_v48 = vld [vmem:[%s13092_s8 + $0xa8] sm:$0xf]  ;;  %v3944_v4 = vrot.slane %v3942_v9, 4  ;;  %v15085_v47 = vld [vmem:[%s13092_s8 + $0xac] sm:$0xf] }
 0x126   : > { %v1127_v10 = vadd.f32 %v12076_v39, %v18519_v29  ;;  %12282 = vmatprep.mubr.msk.bf16.mxu1 %vm739_vm3, %v14810_v3  ;;  %v15057_v39 = vcombine.low %v3893_v62, %v3903_v1  ;;  %v15070_v62 = vsel %vm13419_vm7, %v4473_v36, %v4474_v46  ;;  %v3953_v9 = vshrl.u32 %v11065_v48, 16 }
 0x127   : > { %v1118_v45 = vpop.f32.mrf.mxu1  ;;  %v1546_v40 = vpop.f32.mrf.mxu0 }
 0x128   : > { %v15054_v24 = vadd.f32 %v12110_v6, %v1127_v10  ;;  %v1119_v3 = vadd.f32 %v1118_v45, %v18520_v13  ;;  %v18522_v10 = vcombine.low %v14682_v38, %v14694_v56  ;;  %v15080_v38 = vsel %vm13419_vm7, %v11136_v23, %v4478_v52  ;;  %v11064_v13 = vld [vmem:[%s13092_s8 + $0xa4] sm:$0x1] }
 0x129   : > { %v12077_v18 = vpop.f32.mrf.mxu1  ;;  %v12114_v6 = vpop.f32.mrf.mxu0  ;;  %v4480_v56 = vrot.slane %v4478_v52, 4  ;;  %v4485_v23 = vrot.slane %v15029_v11, 5  ;;  %v3962_v11 = vshll.u32 %v15085_v47, 16 }
 0x12a   : > { %v15061_v29 = vadd.f32 %v1543_v35, %v1119_v3  ;;  %v1130_v53 = vadd.f32 %v12077_v18, %v18521_v16  ;;  %12317 = vmatmul.mubr.msk.bf16.gmra.mxu0 %vm739_vm3, %v18522_v10  ;;  %v18523_v35 = vld [vmem:[#allocation38_spill] sm:$0xff]  ;;  %v15082_v16 = vrot.slane %v3938_v63, 5  ;;  %v11121_v3 = vld [vmem:[%s13092_s8 + $0x9c] sm:$0xe]  ;;  %v3956_v18 = vshll.u32 %v11065_v48, 16 }
 0x12b   : > { %v1121_v1 = vpop.f32.mrf.mxu1  ;;  %v18524_v51 = vcombine.low %v14740_v15, %v18523_v35  ;;  %v1559_v45 = vpop.f32.mrf.mxu0  ;;  %v3917_v15 = vsel %vm13133_vm4, %v15059_v12, %v15003_v19  ;;  %v18526_v63 = vld [vmem:[#allocation42_spill] sm:$0xff]  ;;  %v18529_v19 = vld [vmem:[#allocation43_spill] sm:$0xff]  ;;  %v3966_v12 = vshrl.u32 %v15085_v47, 16 }
 0x12c   : > { %v15087_v36 = vadd.f32 %v12111_v50, %v1130_v53  ;;  %v1122_v46 = vadd.f32 %v1121_v1, %v18525_v44  ;;  %v3927_v53 = vsel %vm13133_vm4, %v3922_v28, %v3926_v5  ;;  %v3935_v50 = vor.u32 %v3934_v60, %v3931_v34  ;;  %v18528_v1 = vld [vmem:[#allocation23_spill] sm:$0xff]  ;;  %v18530_v60 = vld [vmem:[#allocation18_spill] sm:$0xff] }
 0x12d   : > { %12320 = vmatprep.mubr.msk.bf16.mxu0 %vm739_vm3, %v18524_v51  ;;  %v12080_v52 = vpop.f32.mrf.mxu1  ;;  %12283 = vmatmul.mubr.msk.bf16.gmra.mxu1 %vm739_vm3, %v18526_v63  ;;  %v12115_v51 = vpop.f32.mrf.mxu0  ;;  %v15110_v63 = vsel %vm13419_vm7, %v4480_v56, %v4481_v43  ;;  %v3945_v28 = vor.u32 %v3944_v4, %v15082_v16  ;;  %v3948_v5 = vshll.u32 %v11064_v13, 16  ;;  %v3955_v43 = vrot.slane %v3953_v9, 4 }
 0x12e   : > { %v15101_v10 = vadd.f32 %v1546_v40, %v1122_v46  ;;  %v1143_v35 = vadd.f32 %v12080_v52, %v18528_v1  ;;  %12286 = vmatprep.mubr.msk.bf16.mxu1 %vm739_vm3, %v18529_v19  ;;  %v11137_v40 = vrot.slane %v11121_v3, 9  ;;  %v4487_v52 = vrot.slane %v4485_v23, 4 }
 0x12f   : > { %v1134_v44 = vpop.f32.mrf.mxu1  ;;  %v1562_v46 = vpop.f32.mrf.mxu0  ;;  %v4488_v1 = vrot.slane %v11064_v13, 5  ;;  %v15118_v2 = vrot.slane %v3935_v50, 4  ;;  %v3958_v56 = vrot.slane %v3956_v18, 5  ;;  %v15128_v13 = vld [vmem:[%s13092_s8 + $0xb0] sm:$0x1]  ;;  %v3968_v50 = vrot.slane %v3966_v12, 4 }
 0x130   : > { %18527 = vst [vmem:[#allocation25_spill] sm:$0xff] %v15101_v10  ;;  %v15113_v34 = vadd.f32 %v12114_v6, %v1143_v35  ;;  %v1135_v48 = vadd.f32 %v1134_v44, %v18530_v60  ;;  %v18531_v10 = vld [vmem:[#allocation34_spill] sm:$0xff]  ;;  %v18532_v35 = vcombine.low %v14855_v61, %v14876_v27  ;;  %v15130_v44 = vrot.slane %v3962_v11, 5  ;;  %v18534_v12 = vld [vmem:[#allocation36_spill] sm:$0xff] }
 0x131   : > { %v12081_v19 = vpop.f32.mrf.mxu1  ;;  %v12118_v6 = vpop.f32.mrf.mxu0  ;;  %v18533_v9 = vcombine.low %v14926_v26, %v14939_v57  ;;  %v15140_v61 = vrot.slane %v3945_v28, 4  ;;  %v15142_v27 = vrot.slane %v3948_v5, 5  ;;  %v15150_v26 = vsel %vm13419_vm7, %v11137_v40, %v4485_v23  ;;  %v15166_v40 = vld [vmem:[%s13092_s8 + $0xb8] sm:$0xf] }
 0x132   : > { %v15120_v4 = vadd.f32 %v1559_v45, %v1135_v48  ;;  %v1146_v3 = vadd.f32 %v12081_v19, %v18531_v10  ;;  %12321 = vmatmul.mubr.msk.bf16.gmra.mxu0 %vm739_vm3, %v18532_v35  ;;  %v15136_v45 = vcombine.low %v3917_v15, %v3927_v53  ;;  %v11122_v10 = vld [vmem:[%s13092_s8 + $0xa8] sm:$0xe]  ;;  %v15154_v57 = vsel %vm13419_vm7, %v4487_v52, %v4488_v1  ;;  %v11068_v15 = vld [vmem:[%s13092_s8 + $0xb4] sm:$0xf]  ;;  %v18536_v52 = vld [vmem:[#allocation39_spill] sm:$0xff] }
 0x133   : > { %v1137_v60 = vpop.f32.mrf.mxu1  ;;  %12324 = vmatprep.mubr.msk.bf16.mxu0 %vm739_vm3, %v18533_v9  ;;  %v1575_v19 = vpop.f32.mrf.mxu0  ;;  %v3959_v28 = vor.u32 %v3958_v56, %v3955_v43  ;;  %v3972_v5 = vshll.u32 %v15128_v13, 16  ;;  %v4492_v23 = vrot.slane %v15085_v47, 5  ;;  %v3951_v47 = vsel %vm13133_vm4, %v15140_v61, %v15142_v27 }
 0x134   : > { %v15145_v11 = vadd.f32 %v12115_v51, %v1146_v3  ;;  %v1138_v48 = vadd.f32 %v1137_v60, %v18534_v12  ;;  %v11138_v60 = vrot.slane %v11122_v10, 9  ;;  %v3977_v43 = vshrl.u32 %v11068_v15, 16 }
 0x135   : > { %v12084_v53 = vpop.f32.mrf.mxu1  ;;  %12287 = vmatmul.mubr.msk.bf16.gmra.mxu1 %vm739_vm3, %v14918_v25  ;;  %v12119_v35 = vpop.f32.mrf.mxu0  ;;  %v3969_v25 = vor.u32 %v3968_v50, %v15130_v44  ;;  %v3980_v56 = vshll.u32 %v11068_v15, 16  ;;  %v3986_v50 = vshll.u32 %v15166_v40, 16  ;;  %v3990_v10 = vshrl.u32 %v15166_v40, 16 }
 0x136   : > { %v15168_v3 = vadd.f32 %v1562_v46, %v1138_v48  ;;  %v1159_v1 = vadd.f32 %v12084_v53, %v18536_v52  ;;  %12290 = vmatprep.mubr.msk.bf16.mxu1 %vm739_vm3, %v15020_v14  ;;  %v18537_v48 = vld [vmem:[#allocation41_spill] sm:$0xff]  ;;  %v11071_v52 = vld [vmem:[%s13092_s8 + $0xc0] sm:$0xf]  ;;  %v3960_v49 = vrot.slane %v3959_v28, 4  ;;  %v3974_v61 = vrot.slane %v3972_v5, 5 }
 0x137   : > { %v1150_v9 = vpop.f32.mrf.mxu1  ;;  %v1578_v14 = vpop.f32.mrf.mxu0  ;;  %v4494_v27 = vrot.slane %v4492_v23, 4  ;;  %v4495_v46 = vrot.slane %v15128_v13, 5  ;;  %v15199_v28 = vld [vmem:[%s13092_s8 + $0xc4] sm:$0xf]  ;;  %v18540_v13 = vcombine.low %v14983_v32, %v14987_v58  ;;  %v3992_v22 = vrot.slane %v3990_v10, 4 }
 0x138   : > { %18535 = vst [vmem:[#allocation10_spill] sm:$0xff] %v15168_v3  ;;  %v15180_v12 = vadd.f32 %v12118_v6, %v1159_v1  ;;  %v1151_v53 = vadd.f32 %v1150_v9, %v18537_v48  ;;  %v18538_v6 = vld [vmem:[#allocation45_spill] sm:$0xff]  ;;  %v18539_v9 = vcombine.low %v14969_v17, %v14973_v42  ;;  %v3970_v48 = vrot.slane %v3969_v25, 4  ;;  %v18541_v25 = vld [vmem:[#allocation47_spill] sm:$0xff] }
 0x139   : > { %v12085_v18 = vpop.f32.mrf.mxu1  ;;  %v12122_v1 = vpop.f32.mrf.mxu0  ;;  %v15196_v3 = vsel %vm13419_vm7, %v11138_v60, %v4492_v23  ;;  %v4001_v17 = vshrl.u32 %v11071_v52, 16  ;;  %v4004_v42 = vshll.u32 %v11071_v52, 16  ;;  %v15211_v60 = vrot.slane %v3986_v50, 5  ;;  %v11123_v52 = vld [vmem:[%s13092_s8 + $0xb4] sm:$0xe] }
 0x13a   : > { %v15187_v51 = vadd.f32 %v1575_v19, %v1151_v53  ;;  %v1162_v15 = vadd.f32 %v12085_v18, %v18538_v6  ;;  %12325 = vmatmul.mubr.msk.bf16.gmra.mxu0 %vm739_vm3, %v18539_v9  ;;  %v15206_v18 = vld [vmem:[%s13092_s8 + $0xbc] sm:$0x1]  ;;  %v3979_v19 = vrot.slane %v3977_v43, 4  ;;  %v3982_v53 = vrot.slane %v3980_v56, 5 }
 0x13b   : > { %v1153_v5 = vpop.f32.mrf.mxu1  ;;  %12328 = vmatprep.mubr.msk.bf16.mxu0 %vm739_vm3, %v18540_v13  ;;  %v1591_v23 = vpop.f32.mrf.mxu0  ;;  %v3965_v32 = vsel %vm13133_vm4, %v3960_v49, %v15130_v44  ;;  %v15220_v58 = vsel %vm13419_vm7, %v4494_v27, %v4495_v46  ;;  %v4014_v43 = vshrl.u32 %v15199_v28, 16  ;;  %v3996_v49 = vshll.u32 %v15206_v18, 16 }
 0x13c   : > { %v15208_v6 = vadd.f32 %v12119_v35, %v1162_v15  ;;  %v1154_v9 = vadd.f32 %v1153_v5, %v18541_v25  ;;  %v4010_v35 = vshll.u32 %v15199_v28, 16  ;;  %v3983_v46 = vor.u32 %v3982_v53, %v3979_v19 }
 0x13d   : > { %v12088_v54 = vpop.f32.mrf.mxu1  ;;  %12291 = vmatmul.mubr.msk.bf16.gmra.mxu1 %vm739_vm3, %v15022_v41  ;;  %v12123_v10 = vpop.f32.mrf.mxu0  ;;  %v3975_v41 = vsel %vm13133_vm4, %v3970_v48, %v3974_v61  ;;  %v4499_v27 = vrot.slane %v15166_v40, 5  ;;  %v4003_v15 = vrot.slane %v4001_v17, 4  ;;  %v4006_v5 = vrot.slane %v4004_v42, 5 }
 0x13e   : > { %v15224_v56 = vadd.f32 %v1578_v14, %v1154_v9  ;;  %v1175_v50 = vadd.f32 %v12088_v54, %v14915_v20  ;;  %12294 = vmatprep.mubr.msk.bf16.mxu1 %vm739_vm3, %v15031_v37  ;;  %v18542_v37 = vsel %vm13133_vm4, %v15118_v2, %v15082_v16  ;;  %v3993_v48 = vor.u32 %v3992_v22, %v15211_v60 }
 0x13f   : > { %v1166_v44 = vpop.f32.mrf.mxu1  ;;  %v1594_v54 = vpop.f32.mrf.mxu0  ;;  %v15242_v61 = vcombine.low %v18542_v37, %v3951_v47  ;;  %v15245_v40 = vcombine.low %v3965_v32, %v3975_v41  ;;  %v15249_v19 = vrot.slane %v4010_v35, 5  ;;  %v18543_v2 = vcombine.low %v15048_v8, %v15070_v62  ;;  %v11073_v47 = vld [vmem:[%s13092_s8 + $0xc8] sm:$0x1]  ;;  %v15270_v62 = vld [vmem:[%s13092_s8 + $0xd0] sm:$0xf] }
 0x140   : > { %v15234_v14 = vadd.f32 %v12122_v1, %v1175_v50  ;;  %v1167_v20 = vadd.f32 %v1166_v44, %v14942_v59  ;;  %v11155_v1 = vcombine.low %v15196_v3, %v15220_v58  ;;  %v4016_v59 = vrot.slane %v4014_v43, 4  ;;  %v11074_v3 = vld [vmem:[%s13092_s8 + $0xcc] sm:$0xf]  ;;  %v11124_v41 = vld [vmem:[%s13092_s8 + $0xc0] sm:$0xe] }
 0x141   : > { %v12089_v13 = vpop.f32.mrf.mxu1  ;;  %v12126_v42 = vpop.f32.mrf.mxu0  ;;  %v15258_v22 = vrot.slane %v3996_v49, 5  ;;  %v11139_v16 = vrot.slane %v11123_v52, 9  ;;  %v18544_v9 = vcombine.low %v15080_v38, %v15110_v63  ;;  %v4502_v32 = vrot.slane %v15206_v18, 5 }
 0x142   : > { %v15251_v53 = vadd.f32 %v1591_v23, %v1167_v20  ;;  %v1178_v17 = vadd.f32 %v12089_v13, %v14953_v21  ;;  %12329 = vmatmul.mubr.msk.bf16.gmra.mxu0 %vm739_vm3, %v18543_v2  ;;  %v15266_v23 = vrot.slane %v3983_v46, 4  ;;  %v4501_v21 = vrot.slane %v4499_v27, 4 }
 0x143   : > { %v1169_v25 = vpop.f32.mrf.mxu1  ;;  %12332 = vmatprep.mubr.msk.bf16.mxu0 %vm739_vm3, %v18544_v9  ;;  %v4007_v8 = vor.u32 %v4006_v5, %v4003_v15  ;;  %v1607_v43 = vpop.f32.mrf.mxu0  ;;  %v15275_v50 = vrot.slane %v3993_v48, 4  ;;  %v4506_v38 = vrot.slane %v15199_v28, 5  ;;  %v4017_v49 = vor.u32 %v4016_v59, %v15249_v19  ;;  %v18546_v59 = vld [vmem:[#allocation4_spill] sm:$0xff] }
 0x144   : > { %v15272_v58 = vadd.f32 %v12123_v10, %v1178_v17  ;;  %v1170_v35 = vadd.f32 %v1169_v25, %v14992_v33  ;;  %v4020_v18 = vshll.u32 %v11073_v47, 16  ;;  %v4025_v44 = vshrl.u32 %v11074_v3, 16  ;;  %v18545_v10 = vld [vmem:[#allocation12_spill] sm:$0xff] }
 0x145   : > { %v12092_v63 = vpop.f32.mrf.mxu1  ;;  %12295 = vmatmul.mubr.msk.bf16.gmra.mxu1 %vm739_vm3, %v15057_v39  ;;  %v4028_v46 = vshll.u32 %v11074_v3, 16  ;;  %v12127_v33 = vpop.f32.mrf.mxu0  ;;  %v4034_v5 = vshll.u32 %v15270_v62, 16  ;;  %v4038_v28 = vshrl.u32 %v15270_v62, 16  ;;  %v4500_v39 = vsel %vm13419_vm7, %v11139_v16, %v4499_v27  ;;  %v18547_v16 = vld [vmem:[#allocation22_spill] sm:$0xff] }
 0x146   : > { %v15282_v52 = vadd.f32 %v1594_v54, %v1170_v35  ;;  %v1191_v15 = vadd.f32 %v12092_v63, %v18545_v10  ;;  %12298 = vmatprep.mubr.msk.bf16.mxu1 %vm739_vm3, %v15136_v45  ;;  %v4503_v37 = vsel %vm13419_vm7, %v4501_v21, %v4502_v32  ;;  %v4008_v48 = vrot.slane %v4007_v8, 4 }
 0x147   : > { %v1182_v20 = vpop.f32.mrf.mxu1  ;;  %v11140_v54 = vrot.slane %v11124_v41, 9  ;;  %v15296_v2 = vpop.f32.mrf.mxu0  ;;  %v4508_v45 = vrot.slane %v4506_v38, 4  ;;  %v4509_v3 = vrot.slane %v11073_v47, 5  ;;  %v4018_v9 = vrot.slane %v4017_v49, 4  ;;  %v11076_v49 = vld [vmem:[%s13092_s8 + $0xd4] sm:$0x1] }
 0x148   : > { %v15293_v13 = vadd.f32 %v12126_v42, %v1191_v15  ;;  %v1183_v17 = vadd.f32 %v1182_v20, %v18546_v59  ;;  %v4022_v35 = vrot.slane %v4020_v18, 5  ;;  %v4027_v63 = vrot.slane %v4025_v44, 4  ;;  %v11125_v15 = vld [vmem:[%s13092_s8 + $0xcc] sm:$0xe] }
 0x149   : > { %v12093_v25 = vpop.f32.mrf.mxu1  ;;  %v4030_v10 = vrot.slane %v4028_v46, 5  ;;  %v12130_v32 = vpop.f32.mrf.mxu0  ;;  %v18548_v42 = vcombine.low %v15150_v26, %v15154_v57  ;;  %v15305_v8 = vrot.slane %v4034_v5, 5  ;;  %v4040_v41 = vrot.slane %v4038_v28, 4 }
 0x14a   : > { %v15298_v27 = vadd.f32 %v1607_v43, %v1183_v17  ;;  %v1194_v21 = vadd.f32 %v12093_v25, %v18547_v16  ;;  %v4513_v18 = vrot.slane %v15270_v62, 5  ;;  %v3989_v26 = vsel %vm13133_vm4, %v15266_v23, %v15211_v60 }
 0x14b   : > { %12333 = vmatmul.mubr.msk.bf16.gmra.mxu0 %vm739_vm3, %v18548_v42  ;;  %v15307_v47 = vpop.f32.mrf.mxu1  ;;  %v1623_v44 = vpop.f32.mrf.mxu0  ;;  %v4507_v57 = vsel %vm13419_vm7, %v11140_v54, %v4506_v38  ;;  %v4510_v46 = vsel %vm13419_vm7, %v4508_v45, %v4509_v3  ;;  %v11156_v62 = vcombine.low %v4500_v39, %v4503_v37  ;;  %v4013_v60 = vsel %vm13133_vm4, %v4008_v48, %v15249_v19  ;;  %v18549_v38 = vld [vmem:[#allocation26_spill] sm:$0xff]  ;;  %v18550_v19 = vld [vmem:[#allocation19_spill] sm:$0xff] }
 0x14c   : > { %12336 = vmatprep.mubr.msk.bf16.mxu0 %vm739_vm3, %v11155_v1  ;;  %v15312_v43 = vadd.f32 %v12127_v33, %v1194_v21  ;;  %v3999_v1 = vsel %vm13133_vm4, %v15275_v50, %v15258_v22  ;;  %v4031_v23 = vor.u32 %v4030_v10, %v4027_v63  ;;  %v4041_v20 = vor.u32 %v4040_v41, %v15305_v8 }
 0x14d   : > { %v12096_v5 = vpop.f32.mrf.mxu1  ;;  %12299 = vmatmul.mubr.msk.bf16.gmra.mxu1 %vm739_vm3, %v15242_v61  ;;  %v12131_v28 = vpop.f32.mrf.mxu0  ;;  %v4023_v61 = vsel %vm13133_vm4, %v4018_v9, %v4022_v35  ;;  %v4044_v54 = vshll.u32 %v11076_v49, 16  ;;  %v11157_v22 = vcombine.low %v4507_v57, %v4510_v46  ;;  %v11141_v50 = vrot.slane %v11125_v15, 9  ;;  %v18551_v9 = vld [vmem:[#allocation35_spill] sm:$0xff] }
 0x14e   : > { %v1207_v33 = vadd.f32 %v12096_v5, %v18549_v38  ;;  %12302 = vmatprep.mubr.msk.bf16.mxu1 %vm739_vm3, %v15245_v40  ;;  %v4515_v39 = vrot.slane %v4513_v18, 4  ;;  %v4516_v37 = vrot.slane %v11076_v49, 5  ;;  %v11091_v25 = vcombine.low %v3989_v26, %v3999_v1  ;;  %v12882_v46 = vld [vmem:[%s18297_s3 + $0x38] sm:$0xff]   ;;  %v18552_v1 = vld [vmem:[#allocation40_spill] sm:$0xff] }
 0x14f   : > { %v1198_v59 = vpop.f32.mrf.mxu1  ;;  %v15341_v45 = vpop.f32.mrf.mxu0  ;;  %v11092_v40 = vcombine.low %v4013_v60, %v4023_v61  ;;  %v4032_v63 = vrot.slane %v4031_v23, 4  ;;  %v4042_v21 = vrot.slane %v4041_v20, 4  ;;  %v4046_v42 = vrot.slane %v4044_v54, 5  ;;  %12392 = vmatprep.subr.bf16.mxu0 %v12882_v46 }
 0x150   : > { %v15338_v17 = vadd.f32 %v12130_v32, %v1207_v33  ;;  %v1199_v48 = vadd.f32 %v1198_v59, %v18550_v19  ;;  %v12881_v32 = vld [vmem:[%s18297_s3 + $0x78] sm:$0xff]   ;;  %v4514_v49 = vsel %vm13419_vm7, %v11141_v50, %v4513_v18  ;;  %12393 = vmatpush3.bf16.msra.mxu0 %v12882_v46 }
 0x151   : > { %v12097_v3 = vpop.f32.mrf.mxu1  ;;  %v12134_v16 = vpop.f32.mrf.mxu0  ;;  %12344 = vmatprep.subr.bf16.mxu1 %v12881_v32  ;;  %v4037_v5 = vsel %vm13133_vm4, %v4032_v63, %v15305_v8  ;;  %v4047_v60 = vsel %vm13133_vm4, %v4042_v21, %v4046_v42 }
 0x152   : > { %v15343_v10 = vadd.f32 %v1623_v44, %v1199_v48  ;;  %v1210_v35 = vadd.f32 %v12097_v3, %v18551_v9  ;;  %v4517_v44 = vsel %vm13419_vm7, %v4515_v39, %v4516_v37  ;;  %12345 = vmatpush3.bf16.msra.mxu1 %v12881_v32  ;;  %v11093_v54 = vcombine.low %v4037_v5, %v4047_v60  ;;  %v12883_v37 = vld [vmem:[%s18297_s3 + $0x70] sm:$0xff]  }
 0x153   : > { %12337 = vmatmul.mubr.msk.bf16.gmra.mxu0 %vm739_vm3, %v11156_v62  ;;  %v15350_v41 = vpop.f32.mrf.mxu1  ;;  %v1639_v57 = vpop.f32.mrf.mxu0  ;;  %v11158_v23 = vcombine.low %v4514_v49, %v4517_v44  ;;  %12346 = vmatprep.subr.bf16.mxu1 %v12883_v37 }
 0x154   : > { %12340 = vmatprep.mubr.msk.bf16.mxu0 %vm739_vm3, %v11157_v22  ;;  %v15357_v26 = vadd.f32 %v12131_v28, %v1210_v35  ;;  %v18553_v28 = vld [vmem:[#allocation44_spill] sm:$0xff]  ;;  %v18554_v22 = vld [vmem:[#allocation46_spill] sm:$0xff] }
 0x155   : > { %v12100_v15 = vpop.f32.mrf.mxu1  ;;  %12303 = vmatmul.mubr.msk.bf16.gmra.mxu1 %vm739_vm3, %v11091_v25  ;;  %v12135_v62 = vpop.f32.mrf.mxu0  ;;  %v12884_v25 = vld [vmem:[%s18297_s3 + $0x30] sm:$0xff]  }
 0x156   : > { %v1223_v18 = vadd.f32 %v12100_v15, %v18552_v1  ;;  %12306 = vmatprep.mubr.msk.bf16.mxu1 %vm739_vm3, %v11092_v40  ;;  %12347 = vmatpush3.bf16.msra.mxu1 %v12883_v37  ;;  %v13025_v37 = vmov 0  }
 0x157   : > { %v1214_v38 = vpop.f32.mrf.mxu1  ;;  %v15373_v20 = vpop.f32.mrf.mxu0  ;;  %12394 = vmatprep.subr.bf16.mxu0 %v12884_v25  ;;  %4905 = vst [vmem:[#allocation2 + $0x18] sm:$0xf] %v13025_v37  ;;  %4899 = vst [vmem:[#allocation2] sm:$0xf] %v13025_v37 }
 0x158   : > { %v15370_v33 = vadd.f32 %v12134_v16, %v1223_v18  ;;  %v1215_v61 = vadd.f32 %v1214_v38, %v18553_v28  ;;  %12395 = vmatpush3.bf16.msra.mxu0 %v12884_v25  ;;  %4900 = vst [vmem:[#allocation2 + $0x4] sm:$0xf] %v13025_v37  ;;  %4901 = vst [vmem:[#allocation2 + $0x8] sm:$0x1] %v13025_v37 }
 0x159   : > { %v12101_v8 = vpop.f32.mrf.mxu1  ;;  %v12138_v39 = vpop.f32.mrf.mxu0  ;;  %4902 = vst [vmem:[#allocation2 + $0xc] sm:$0xf] %v13025_v37  ;;  %4903 = vst [vmem:[#allocation2 + $0x10] sm:$0xf] %v13025_v37 }
 0x15a   : > { %v15375_v59 = vadd.f32 %v1639_v57, %v1215_v61  ;;  %v1226_v50 = vadd.f32 %v12101_v8, %v18554_v22  ;;  %4904 = vst [vmem:[#allocation2 + $0x14] sm:$0x1] %v13025_v37  ;;  %4906 = vst [vmem:[#allocation2 + $0x1c] sm:$0xf] %v13025_v37 }
 0x15b   : > { %12341 = vmatmul.mubr.msk.bf16.gmra.mxu0 %vm739_vm3, %v11158_v23  ;;  %v15382_v19 = vpop.f32.mrf.mxu1  ;;  %v1655_v3 = vpop.f32.mrf.mxu0  ;;  %4907 = vst [vmem:[#allocation2 + $0x20] sm:$0x1] %v13025_v37  ;;  %4908 = vst [vmem:[#allocation2 + $0x24] sm:$0xf] %v13025_v37 }
 0x15c   : > { %v15384_v48 = vadd.f32 %v12135_v62, %v1226_v50  ;;  %4909 = vst [vmem:[#allocation2 + $0x28] sm:$0xf] %v13025_v37  ;;  %4910 = vst [vmem:[#allocation2 + $0x2c] sm:$0x1] %v13025_v37 }
 0x15d   : > { %v12104_v40 = vpop.f32.mrf.mxu1  ;;  %12307 = vmatmul.mubr.msk.bf16.gmra.mxu1 %vm739_vm3, %v11093_v54  ;;  %v12139_v9 = vpop.f32.mrf.mxu0  ;;  %4911 = vst [vmem:[#allocation2 + $0x30] sm:$0xf] %v13025_v37  ;;  %4912 = vst [vmem:[#allocation2 + $0x34] sm:$0xf] %v13025_v37 }
 0x15e   : > { %v1239_v63 = vadd.f32 %v12104_v40, %v14945_v55  ;;  %v12885_v55 = vld [vmem:[%s18297_s3 + $0x68] sm:$0xff]   ;;  %4913 = vst [vmem:[#allocation2 + $0x38] sm:$0x1] %v13025_v37  ;;  %4914 = vst [vmem:[#allocation2 + $0x3c] sm:$0xf] %v13025_v37 }
 0x15f   : > { %v1230_v35 = vpop.f32.mrf.mxu1  ;;  %v15394_v42 = vpop.f32.mrf.mxu0  ;;  %12348 = vmatprep.subr.bf16.mxu1 %v12885_v55  ;;  %4915 = vst [vmem:[#allocation2 + $0x40] sm:$0xf] %v13025_v37  ;;  %4916 = vst [vmem:[#allocation2 + $0x44] sm:$0x1] %v13025_v37 }
 0x160   : > { %v15391_v16 = vadd.f32 %v12138_v39, %v1239_v63  ;;  %v1231_v21 = vadd.f32 %v1230_v35, %v14976_v7  ;;  %v12886_v7 = vld [vmem:[%s18297_s3 + $0x28] sm:$0xff]   ;;  %12349 = vmatpush3.bf16.msra.mxu1 %v12885_v55  ;;  %4917 = vst [vmem:[#allocation2 + $0x48] sm:$0xf] %v13025_v37  ;;  %4918 = vst [vmem:[#allocation2 + $0x4c] sm:$0xf] %v13025_v37 }
 0x161   : > { %v12105_v32 = vpop.f32.mrf.mxu1  ;;  %v12178_v57 = vpop.f32.mrf.mxu0  ;;  %12396 = vmatprep.subr.bf16.mxu0 %v12886_v7  ;;  %4919 = vst [vmem:[#allocation2 + $0x50] sm:$0x1] %v13025_v37  ;;  %4920 = vst [vmem:[#allocation2 + $0x54] sm:$0xf] %v13025_v37 }
 0x162   : > { %v15396_v49 = vadd.f32 %v1655_v3, %v1231_v21  ;;  %v1242_v44 = vadd.f32 %v12105_v32, %v14995_v30  ;;  %12397 = vmatpush3.bf16.msra.mxu0 %v12886_v7  ;;  %4921 = vst [vmem:[#allocation2 + $0x58] sm:$0xf] %v13025_v37  ;;  %4922 = vst [vmem:[#allocation2 + $0x5c] sm:$0x1] %v13025_v37 }
 0x163   : > { %v15402_v46 = vpop.f32.mrf.mxu1  ;;  %v2628_v5 = vpop.f32.mrf.mxu0  ;;  %4923 = vst [vmem:[#allocation2 + $0x60] sm:$0xf] %v13025_v37  ;;  %4924 = vst [vmem:[#allocation2 + $0x64] sm:$0xf] %v13025_v37 }
 0x164   : > { %v15404_v15 = vadd.f32 %v12139_v9, %v1242_v44  ;;  %4925 = vst [vmem:[#allocation2 + $0x68] sm:$0x1] %v13025_v37  ;;  %4926 = vst [vmem:[#allocation2 + $0x6c] sm:$0xf] %v13025_v37 }
 0x165   : > { %v12144_v1 = vpop.f32.mrf.mxu1  ;;  %v12179_v30 = vpop.f32.mrf.mxu0  ;;  %4927 = vst [vmem:[#allocation2 + $0x70] sm:$0xf] %v13025_v37  ;;  %4928 = vst [vmem:[#allocation2 + $0x74] sm:$0x1] %v13025_v37 }
 0x166   : > { %v2031_v18 = vadd.f32 %v12144_v1, %v15054_v24  ;;  %4929 = vst [vmem:[#allocation2 + $0x78] sm:$0xf] %v13025_v37  ;;  %4930 = vst [vmem:[#allocation2 + $0x7c] sm:$0xf] %v13025_v37 }
 0x167   : > { %v1902_v62 = vpop.f32.mrf.mxu1  ;;  %v15413_v38 = vpop.f32.mrf.mxu0  ;;  %4931 = vst [vmem:[#allocation2 + $0x80] sm:$0x1] %v13025_v37  ;;  %4932 = vst [vmem:[#allocation2 + $0x84] sm:$0xf] %v13025_v37 }
 0x168   : > { %v15410_v60 = vadd.f32 %v12178_v57, %v2031_v18  ;;  %v2029_v23 = vadd.f32 %v1902_v62, %v15061_v29  ;;  %4933 = vst [vmem:[#allocation2 + $0x88] sm:$0xf] %v13025_v37  ;;  %4934 = vst [vmem:[#allocation2 + $0x8c] sm:$0x1] %v13025_v37 }
 0x169   : > { %v12145_v28 = vpop.f32.mrf.mxu1  ;;  %v15418_v54 = vpop.f32.mrf.mxu0  ;;  %4935 = vst [vmem:[#allocation2 + $0x90] sm:$0xf] %v13025_v37  ;;  %4936 = vst [vmem:[#allocation2 + $0x94] sm:$0xf] %v13025_v37 }
 0x16a   : > { %v15415_v61 = vadd.f32 %v2628_v5, %v2029_v23  ;;  %v2032_v8 = vadd.f32 %v12145_v28, %v15087_v36  ;;  %4937 = vst [vmem:[#allocation2 + $0x98] sm:$0x1] %v13025_v37  ;;  %4938 = vst [vmem:[#allocation2 + $0x9c] sm:$0xf] %v13025_v37  ;;  %v12887_v23 = vld [vmem:[%s18297_s3 + $0x60] sm:$0xff]   ;;  %v12890_v28 = vld [vmem:[%s18297_s3 + $0x18] sm:$0xff]  }
 0x16b   : > { %v15420_v22 = vpop.f32.mrf.mxu1  ;;  %v15424_v50 = vpop.f32.mrf.mxu0  ;;  %4939 = vst [vmem:[#allocation2 + $0xa0] sm:$0xf] %v13025_v37  ;;  %4940 = vst [vmem:[#allocation2 + $0xa4] sm:$0x1] %v13025_v37  ;;  %12350 = vmatprep.subr.bf16.mxu1 %v12887_v23 }
 0x16c   : > { %v15422_v24 = vadd.f32 %v12179_v30, %v2032_v8  ;;  %4941 = vst [vmem:[#allocation2 + $0xa8] sm:$0xf] %v13025_v37  ;;  %4942 = vst [vmem:[#allocation2 + $0xac] sm:$0xf] %v13025_v37  ;;  %12351 = vmatpush3.bf16.msra.mxu1 %v12887_v23 }
 0x16d   : > { %v12148_v39 = vpop.f32.mrf.mxu1  ;;  %4943 = vst [vmem:[#allocation2 + $0xb0] sm:$0x1] %v13025_v37  ;;  %4944 = vst [vmem:[#allocation2 + $0xb4] sm:$0xf] %v13025_v37  ;;  %v12183_v36 = vpop.f32.mrf.mxu0 }
 0x16e   : > { %4945 = vst [vmem:[#allocation2 + $0xb8] sm:$0xf] %v13025_v37  ;;  %4946 = vst [vmem:[#allocation2 + $0xbc] sm:$0x1] %v13025_v37  ;;  %v2035_v29 = vadd.f32 %v12148_v39, %v15113_v34  ;;  %v12888_v34 = vld [vmem:[%s18297_s3 + $0x20] sm:$0xff]  }
 0x16f   : > { %4947 = vst [vmem:[#allocation2 + $0xc0] sm:$0xf] %v13025_v37  ;;  %4948 = vst [vmem:[#allocation2 + $0xc4] sm:$0xf] %v13025_v37  ;;  %v1918_v3 = vpop.f32.mrf.mxu1  ;;  %v15431_v63 = vpop.f32.mrf.mxu0  ;;  %12398 = vmatprep.subr.bf16.mxu0 %v12888_v34 }
 0x170   : > { %4949 = vst [vmem:[#allocation2 + $0xc8] sm:$0x1] %v13025_v37  ;;  %4950 = vst [vmem:[#allocation2 + $0xcc] sm:$0xf] %v13025_v37  ;;  %v15428_v25 = vadd.f32 %v15418_v54, %v2035_v29  ;;  %v2033_v40 = vadd.f32 %v1918_v3, %v15120_v4  ;;  %12399 = vmatpush3.bf16.msra.mxu0 %v12888_v34  ;;  %v12892_v34 = vld [vmem:[%s18297_s3 + $0x10] sm:$0xff]  }
 0x171   : > { %4951 = vst [vmem:[#allocation2 + $0xd0] sm:$0xf] %v13025_v37  ;;  %4952 = vst [vmem:[#allocation2 + $0xd4] sm:$0x1] %v13025_v37  ;;  %v12149_v9 = vpop.f32.mrf.mxu1  ;;  %v12186_v32 = vpop.f32.mrf.mxu0  ;;  %12400 = vmatprep.subr.bf16.mxu0 %v12890_v28 }
 0x172   : > { %18555 = vst [vmem:[#allocation9_spill] sm:$0xff] %v15428_v25  ;;  %v15434_v35 = vadd.f32 %v15424_v50, %v2033_v40  ;;  %v2036_v21 = vadd.f32 %v12149_v9, %v15145_v11 }
 0x173   : > { %v15440_v44 = vpop.f32.mrf.mxu1  ;;  %v2660_v55 = vpop.f32.mrf.mxu0 }
 0x174   : > { %18556 = vst [vmem:[#allocation17_spill] sm:$0xff] %v15434_v35  ;;  %v15442_v57 = vadd.f32 %v12183_v36, %v2036_v21  ;;  %12401 = vmatpush3.bf16.msra.mxu0 %v12890_v28  ;;  %v12889_v21 = vld [vmem:[%s18297_s3 + $0x58] sm:$0xff]  }
 0x175   : > { %v12152_v4 = vpop.f32.mrf.mxu1  ;;  %v12187_v7 = vpop.f32.mrf.mxu0  ;;  %12352 = vmatprep.subr.bf16.mxu1 %v12889_v21  ;;  %12402 = vmatprep.subr.bf16.mxu0 %v12892_v34 }
 0x176   : > { %v2039_v5 = vadd.f32 %v12152_v4, %v15180_v12  ;;  %12353 = vmatpush3.bf16.msra.mxu1 %v12889_v21 }
 0x177   : > { %v1934_v1 = vpop.f32.mrf.mxu1  ;;  %v15448_v30 = vpop.f32.mrf.mxu0 }
 0x178   : > { %v15445_v18 = vadd.f32 %v12186_v32, %v2039_v5  ;;  %v2037_v11 = vadd.f32 %v1934_v1, %v15187_v51  ;;  %12403 = vmatpush3.bf16.msra.mxu0 %v12892_v34 }
 0x179   : > { %v12153_v62 = vpop.f32.mrf.mxu1  ;;  %v12190_v54 = vpop.f32.mrf.mxu0 }
 0x17a   : > { %v15456_v8 = vadd.f32 %v2660_v55, %v2037_v11  ;;  %v2040_v12 = vadd.f32 %v12153_v62, %v15208_v6 }
 0x17b   : > { %v15459_v50 = vpop.f32.mrf.mxu1  ;;  %v2676_v39 = vpop.f32.mrf.mxu0 }
 0x17c   : > { %v15461_v51 = vadd.f32 %v12187_v7, %v2040_v12 }
 0x17d   : > { %v12156_v37 = vpop.f32.mrf.mxu1  ;;  %v12191_v36 = vpop.f32.mrf.mxu0 }
 0x17e   : > { %v2043_v29 = vadd.f32 %v12156_v37, %v15234_v14 }
 0x17f   : > { %v1950_v3 = vpop.f32.mrf.mxu1  ;;  %v15467_v6 = vpop.f32.mrf.mxu0 }
 0x180   : > { %v15464_v40 = vadd.f32 %v12190_v54, %v2043_v29  ;;  %v2041_v9 = vadd.f32 %v1950_v3, %v15251_v53  ;;  %18557 = vst [vmem:[#allocation38_spill] sm:$0xff] %v15467_v6 }
 0x181   : > { %v12157_v32 = vpop.f32.mrf.mxu1  ;;  %v12194_v4 = vpop.f32.mrf.mxu0 }
 0x182   : > { %v15475_v55 = vadd.f32 %v2676_v39, %v2041_v9  ;;  %v2044_v14 = vadd.f32 %v12157_v32, %v15272_v58  ;;  %v12894_v39 = vld [vmem:[%s18297_s3 + $0x8] sm:$0xff]  }
 0x183   : > { %v15478_v5 = vpop.f32.mrf.mxu1  ;;  %v2692_v7 = vpop.f32.mrf.mxu0  ;;  %12404 = vmatprep.subr.bf16.mxu0 %v12894_v39 }
 0x184   : > { %v15480_v53 = vadd.f32 %v12191_v36, %v2044_v14  ;;  %12405 = vmatpush3.bf16.msra.mxu0 %v12894_v39 }
 0x185   : > { %v12160_v1 = vpop.f32.mrf.mxu1  ;;  %v12195_v62 = vpop.f32.mrf.mxu0 }
 0x186   : > { %v2047_v11 = vadd.f32 %v12160_v1, %v15293_v13  ;;  %v12891_v13 = vld [vmem:[%s18297_s3 + $0x50] sm:$0xff]   ;;  %v12895_v1 = vld [vmem:[%s18297_s3] sm:$0xff]  }
 0x187   : > { %v1966_v23 = vpop.f32.mrf.mxu1  ;;  %v15486_v58 = vpop.f32.mrf.mxu0  ;;  %12354 = vmatprep.subr.bf16.mxu1 %v12891_v13  ;;  %12406 = vmatprep.subr.bf16.mxu0 %v12895_v1 }
 0x188   : > { %v15483_v28 = vadd.f32 %v12194_v4, %v2047_v11  ;;  %v2045_v12 = vadd.f32 %v1966_v23, %v15298_v27  ;;  %18558 = vst [vmem:[#allocation21_spill] sm:$0xff] %v15486_v58  ;;  %12355 = vmatpush3.bf16.msra.mxu1 %v12891_v13  ;;  %12407 = vmatpush3.bf16.msra.mxu0 %v12895_v1 }
 0x189   : > { %v12161_v54 = vpop.f32.mrf.mxu1  ;;  %v12198_v36 = vpop.f32.mrf.mxu0 }
 0x18a   : > { %v15491_v37 = vadd.f32 %v2692_v7, %v2045_v12  ;;  %v2048_v29 = vadd.f32 %v12161_v54, %v15312_v43  ;;  %v5474_v54 = vld [vmem:[#allocation2] sm:$0xf] }
 0x18b   : > { %v15497_v3 = vpop.f32.mrf.mxu1  ;;  %v2708_v9 = vpop.f32.mrf.mxu0  ;;  %v5542_v35 = vshll.u32 %v5474_v54, 16 }
 0x18c   : > { %v15499_v27 = vadd.f32 %v12195_v62, %v2048_v29 }
 0x18d   : > { %v12164_v21 = vpop.f32.mrf.mxu1  ;;  %v12199_v34 = vpop.f32.mrf.mxu0  ;;  %v5544_v25 = vrot.slane %v5542_v35, 5 }
 0x18e   : > { %v2051_v32 = vadd.f32 %v12164_v21, %v15338_v17  ;;  %v12893_v17 = vld [vmem:[%s18297_s3 + $0x48] sm:$0xff]  }
 0x18f   : > { %v1982_v14 = vpop.f32.mrf.mxu1  ;;  %v15505_v7 = vpop.f32.mrf.mxu0  ;;  %12356 = vmatprep.subr.bf16.mxu1 %v12893_v17 }
 0x190   : > { %v15502_v43 = vadd.f32 %v12198_v36, %v2051_v32  ;;  %v2049_v4 = vadd.f32 %v1982_v14, %v15343_v10  ;;  %18559 = vst [vmem:[#allocation42_spill] sm:$0xff] %v15505_v7  ;;  %v5475_v10 = vld [vmem:[#allocation2 + $0x4] sm:$0xf]  ;;  %12357 = vmatpush3.bf16.msra.mxu1 %v12893_v17 }
 0x191   : > { %v12165_v11 = vpop.f32.mrf.mxu1  ;;  %v12202_v12 = vpop.f32.mrf.mxu0  ;;  %v11248_v13 = vcombine.low %v5474_v54, %v5475_v10 }
 0x192   : > { %v15510_v62 = vadd.f32 %v2708_v9, %v2049_v4  ;;  %v2052_v23 = vadd.f32 %v12165_v11, %v15357_v26 }
 0x193   : > { %v15516_v39 = vpop.f32.mrf.mxu1  ;;  %v2724_v36 = vpop.f32.mrf.mxu0  ;;  %12408 = vmatprep.mubr.bf16.mxu0 %v11248_v13 }
 0x194   : > { %v15518_v29 = vadd.f32 %v12199_v34, %v2052_v23  ;;  %v12897_v34 = vld [vmem:[%s18297_s3 + $0x40] sm:$0xff]  }
 0x195   : > { %v12168_v9 = vpop.f32.mrf.mxu1  ;;  %v12203_v21 = vpop.f32.mrf.mxu0  ;;  %12358 = vmatprep.subr.bf16.mxu1 %v12897_v34 }
 0x196   : > { %v2055_v26 = vadd.f32 %v12168_v9, %v15370_v33  ;;  %12359 = vmatpush3.bf16.msra.mxu1 %v12897_v34  ;;  %v5539_v9 = vshrl.u32 %v5474_v54, 16 }
 0x197   : > { %v1998_v32 = vpop.f32.mrf.mxu1  ;;  %v15524_v11 = vpop.f32.mrf.mxu0 }
 0x198   : > { %v15521_v14 = vadd.f32 %v12202_v12, %v2055_v26  ;;  %v2053_v4 = vadd.f32 %v1998_v32, %v15375_v59  ;;  %18560 = vst [vmem:[#allocation23_spill] sm:$0xff] %v15524_v11  ;;  %v5541_v58 = vrot.slane %v5539_v9, 4 }
 0x199   : > { %v12169_v1 = vpop.f32.mrf.mxu1  ;;  %v12206_v0 = vpop.f32.mrf.mxu0 }
 0x19a   : > { %v15529_v23 = vadd.f32 %v2724_v36, %v2053_v4  ;;  %v2056_v17 = vadd.f32 %v12169_v1, %v15384_v48  ;;  %v5552_v4 = vshrl.u32 %v5475_v10, 16 }
 0x19b   : > { %v15532_v33 = vpop.f32.mrf.mxu1  ;;  %v2740_v12 = vpop.f32.mrf.mxu0 }
 0x19c   : > { %v15534_v13 = vadd.f32 %v12203_v21, %v2056_v17 }
 0x19d   : > { %v12172_v59 = vpop.f32.mrf.mxu1  ;;  %v12207_v32 = vpop.f32.mrf.mxu0 }
 0x19e   : > { %v2059_v26 = vadd.f32 %v12172_v59, %v15391_v16  ;;  %v5548_v16 = vshll.u32 %v5475_v10, 16 }
 0x19f   : > { %v2014_v11 = vpop.f32.mrf.mxu1  ;;  %v15540_v48 = vpop.f32.mrf.mxu0 }
 0x1a0   : > { %v15537_v7 = vadd.f32 %v12206_v0, %v2059_v26  ;;  %v2057_v36 = vadd.f32 %v2014_v11, %v15396_v49  ;;  %18561 = vst [vmem:[#allocation43_spill] sm:$0xff] %v15540_v48  ;;  %v5550_v49 = vrot.slane %v5548_v16, 5  ;;  %v5554_v11 = vrot.slane %v5552_v4, 4  ;;  %v5522_v48 = vld [vmem:[#allocation2 + $0x8] sm:$0x1] }
 0x1a1   : > { %v12173_v1 = vpop.f32.mrf.mxu1  ;;  %v15545_v17 = vpop.f32.mrf.mxu0 }
 0x1a2   : > { %v15542_v21 = vadd.f32 %v2740_v12, %v2057_v36  ;;  %v2060_v34 = vadd.f32 %v12173_v1, %v15404_v15  ;;  %v5545_v12 = vor.u32 %v5544_v25, %v5541_v58  ;;  %v5555_v36 = vor.u32 %v5554_v11, %v5550_v49 }
 0x1a3   : > { %v15547_v59 = vpop.f32.mrf.mxu1  ;;  %v15551_v0 = vpop.f32.mrf.mxu0  ;;  %v5558_v1 = vshll.u32 %v5522_v48, 16 }
 0x1a4   : > { %v15549_v54 = vadd.f32 %v12207_v32, %v2060_v34  ;;  %18562 = vst [vmem:[#allocation18_spill] sm:$0xff] %v15551_v0  ;;  %v5546_v10 = vrot.slane %v5545_v12, 4  ;;  %v5556_v6 = vrot.slane %v5555_v36, 4 }
 0x1a5   : > { %v15553_v26 = vpop.f32.mrf.mxu1  ;;  %v15555_v9 = vpop.f32.mrf.mxu0  ;;  %v5560_v34 = vrot.slane %v5558_v1, 5 }
 0x1a6   : > { %18563 = vst [vmem:[#allocation34_spill] sm:$0xff] %v15555_v9  ;;  %v5551_v4 = vsel %vm13133_vm4, %v5546_v10, %v5550_v49 }
 0x1a7   : > { %v15557_v15 = vpop.f32.mrf.mxu1  ;;  %v15559_v35 = vpop.f32.mrf.mxu0  ;;  %v5561_v25 = vsel %vm13133_vm4, %v5556_v6, %v5560_v34  ;;  %v12901_v34 = vld [vmem:[%s18297_s3 + $0xb8] sm:$0xff]  }
 0x1a8   : > { %18564 = vst [vmem:[#allocation36_spill] sm:$0xff] %v15559_v35  ;;  %v11224_v48 = vcombine.low %v5551_v4, %v5561_v25  ;;  %12440 = vmatprep.subr.bf16.mxu1 %v12901_v34 }
 0x1a9   : > { %v15561_v32 = vpop.f32.mrf.mxu1  ;;  %v15563_v0 = vpop.f32.mrf.mxu0 }
 0x1aa   : > { %18565 = vst [vmem:[#allocation39_spill] sm:$0xff] %v15563_v0  ;;  %12360 = vmatprep.mubr.bf16.mxu1 %v11224_v48 }
 0x1ab   : > { %v15567_v16 = vpop.f32.mrf.mxu1  ;;  %v15571_v58 = vpop.f32.mrf.mxu0 }
 0x1ac   : > { %18566 = vst [vmem:[#allocation41_spill] sm:$0xff] %v15571_v58 }
 0x1ad   : > { %v15573_v11 = vpop.f32.mrf.mxu1  ;;  %v12251_v12 = vpop.f32.mrf.mxu0 }
 0x1af   : > { %v15575_v36 = vpop.f32.mrf.mxu1  ;;  %v15577_v1 = vpop.f32.mrf.mxu0 }
 0x1b0   : > { %18567 = vst [vmem:[#allocation45_spill] sm:$0xff] %v15575_v36  ;;  %18568 = vst [vmem:[#allocation47_spill] sm:$0xff] %v15577_v1 }
 0x1b1   : > { %v12217_v0 = vpop.f32.mrf.mxu1  ;;  %v12254_v49 = vpop.f32.mrf.mxu0 }
 0x1b2   : > { %v3232_v35 = vadd.f32 %v12217_v0, %v15442_v57 }
 0x1b3   : > { %v15580_v10 = vpop.f32.mrf.mxu1  ;;  %v3489_v6 = vpop.f32.mrf.mxu0 }
 0x1b4   : > { %18569 = vst [vmem:[#allocation12_spill] sm:$0xff] %v15580_v10  ;;  %v15582_v9 = vadd.f32 %v12251_v12, %v3232_v35 }
 0x1b5   : > { %v12220_v4 = vpop.f32.mrf.mxu1  ;;  %v12255_v48 = vpop.f32.mrf.mxu0 }
 0x1b6   : > { %18570 = vst [vmem:[#allocation4_spill] sm:$0xff] %v15582_v9  ;;  %v3235_v25 = vadd.f32 %v12220_v4, %v15445_v18 }
 0x1b7   : > { %v3130_v31 = vpop.f32.mrf.mxu1  ;;  %v15591_v0 = vpop.f32.mrf.mxu0 }
 0x1b8   : > { %v15588_v1 = vadd.f32 %v12254_v49, %v3235_v25  ;;  %v3233_v57 = vadd.f32 %v3130_v31, %v15456_v8 }
 0x1b9   : > { %v12221_v58 = vpop.f32.mrf.mxu1  ;;  %v12258_v9 = vpop.f32.mrf.mxu0 }
 0x1ba   : > { %18571 = vst [vmem:[#allocation22_spill] sm:$0xff] %v15588_v1  ;;  %v15593_v35 = vadd.f32 %v3489_v6, %v3233_v57  ;;  %v3236_v12 = vadd.f32 %v12221_v58, %v15461_v51 }
 0x1bb   : > { %v15596_v10 = vpop.f32.mrf.mxu1  ;;  %v3505_v18 = vpop.f32.mrf.mxu0 }
 0x1bc   : > { %v15598_v36 = vadd.f32 %v12255_v48, %v3236_v12 }
 0x1bd   : > { %v12224_v4 = vpop.f32.mrf.mxu1  ;;  %v12259_v49 = vpop.f32.mrf.mxu0 }
 0x1be   : > { %18572 = vst [vmem:[#allocation26_spill] sm:$0xff] %v15598_v36  ;;  %v3239_v34 = vadd.f32 %v12224_v4, %v15464_v40 }
 0x1bf   : > { %v3146_v25 = vpop.f32.mrf.mxu1  ;;  %v15604_v8 = vpop.f32.mrf.mxu0 }
 0x1c0   : > { %v15601_v1 = vadd.f32 %v12258_v9, %v3239_v34  ;;  %v3237_v31 = vadd.f32 %v3146_v25, %v15475_v55  ;;  %v15616_v9 = vld [vmem:[%s18297_s3 + $0xf8] sm:$0xff]  }
 0x1c1   : > { %v12225_v6 = vpop.f32.mrf.mxu1  ;;  %v12262_v58 = vpop.f32.mrf.mxu0  ;;  %18575 = vst [vmem:[#allocation40_spill] sm:$0xff] %v15616_v9  ;;  %12488 = vmatprep.subr.bf16.mxu0 %v15616_v9 }
 0x1c2   : > { %v15606_v57 = vadd.f32 %v3505_v18, %v3237_v31  ;;  %v3240_v51 = vadd.f32 %v12225_v6, %v15480_v53 }
 0x1c3   : > { %v15609_v48 = vpop.f32.mrf.mxu1  ;;  %v3521_v36 = vpop.f32.mrf.mxu0 }
 0x1c4   : > { %18573 = vst [vmem:[#allocation19_spill] sm:$0xff] %v15606_v57  ;;  %v15611_v12 = vadd.f32 %v12259_v49, %v3240_v51 }
 0x1c5   : > { %v12228_v40 = vpop.f32.mrf.mxu1  ;;  %v12263_v4 = vpop.f32.mrf.mxu0 }
 0x1c6   : > { %18574 = vst [vmem:[#allocation35_spill] sm:$0xff] %v15611_v12  ;;  %v3243_v55 = vadd.f32 %v12228_v40, %v15483_v28 }
 0x1c7   : > { %v3162_v34 = vpop.f32.mrf.mxu1  ;;  %v15623_v25 = vpop.f32.mrf.mxu0 }
 0x1c8   : > { %v15620_v18 = vadd.f32 %v12262_v58, %v3243_v55  ;;  %v3241_v53 = vadd.f32 %v3162_v34, %v15491_v37 }
 0x1c9   : > { %v12229_v49 = vpop.f32.mrf.mxu1  ;;  %v12266_v51 = vpop.f32.mrf.mxu0 }
 0x1ca   : > { %18576 = vst [vmem:[#allocation44_spill] sm:$0xff] %v15620_v18  ;;  %v15625_v31 = vadd.f32 %v3521_v36, %v3241_v53  ;;  %v3244_v6 = vadd.f32 %v12229_v49, %v15499_v27 }
 0x1cb   : > { %v15628_v12 = vpop.f32.mrf.mxu1  ;;  %v3537_v28 = vpop.f32.mrf.mxu0 }
 0x1cc   : > { %v15630_v57 = vadd.f32 %v12263_v4, %v3244_v6 }
 0x1cd   : > { %v12232_v40 = vpop.f32.mrf.mxu1  ;;  %v12267_v58 = vpop.f32.mrf.mxu0 }
 0x1ce   : > { %18577 = vst [vmem:[#allocation46_spill] sm:$0xff] %v15630_v57  ;;  %v3247_v9 = vadd.f32 %v12232_v40, %v15502_v43 }
 0x1cf   : > { %v3178_v55 = vpop.f32.mrf.mxu1  ;;  %v15636_v34 = vpop.f32.mrf.mxu0 }
 0x1d0   : > { %v15633_v18 = vadd.f32 %v12266_v51, %v3247_v9  ;;  %v3245_v37 = vadd.f32 %v3178_v55, %v15510_v62 }
 0x1d1   : > { %v12233_v36 = vpop.f32.mrf.mxu1  ;;  %v12270_v49 = vpop.f32.mrf.mxu0 }
 0x1d2   : > { %18578 = vst [vmem:[#allocation50_spill] sm:$0xff] %v15633_v18  ;;  %v15638_v53 = vadd.f32 %v3537_v28, %v3245_v37  ;;  %v3248_v27 = vadd.f32 %v12233_v36, %v15518_v29 }
 0x1d3   : > { %v15641_v4 = vpop.f32.mrf.mxu1  ;;  %v3553_v57 = vpop.f32.mrf.mxu0 }
 0x1d4   : > { %v15643_v6 = vadd.f32 %v12267_v58, %v3248_v27  ;;  %v18582_v58 = vld [vmem:[#allocation24_spill] sm:$0xff] }
 0x1d5   : > { %v12236_v43 = vpop.f32.mrf.mxu1  ;;  %v12271_v9 = vpop.f32.mrf.mxu0  ;;  %v1186_v27 = vadd.f32 %v15307_v47, %v18582_v58 }
 0x1d6   : > { %18579 = vst [vmem:[#allocation51_spill] sm:$0xff] %v15643_v6  ;;  %v3251_v40 = vadd.f32 %v12236_v43, %v15521_v14  ;;  %v18583_v6 = vld [vmem:[#allocation37_spill] sm:$0xff] }
 0x1d7   : > { %v3194_v51 = vpop.f32.mrf.mxu1  ;;  %v15649_v55 = vpop.f32.mrf.mxu0  ;;  %v1202_v14 = vadd.f32 %v15350_v41, %v18583_v6  ;;  %v1687_v41 = vadd.f32 %v15296_v2, %v1186_v27 }
 0x1d8   : > { %v15646_v18 = vadd.f32 %v12270_v49, %v3251_v40  ;;  %v3249_v62 = vadd.f32 %v3194_v51, %v15529_v23  ;;  %v18584_v49 = vld [vmem:[#allocation48_spill] sm:$0xff] }
 0x1d9   : > { %v12237_v28 = vpop.f32.mrf.mxu1  ;;  %v12274_v36 = vpop.f32.mrf.mxu0  ;;  %v1218_v40 = vadd.f32 %v15382_v19, %v18584_v49  ;;  %v1691_v6 = vadd.f32 %v15341_v45, %v1202_v14  ;;  %v18587_v49 = vld [vmem:[#allocation10_spill] sm:$0xff]  ;;  %v2038_v45 = vadd.f32 %v15459_v50, %v15224_v56 }
 0x1da   : > { %18580 = vst [vmem:[#allocation52_spill] sm:$0xff] %v15646_v18  ;;  %v15651_v37 = vadd.f32 %v3553_v57, %v3249_v62  ;;  %v3252_v29 = vadd.f32 %v12237_v28, %v15534_v13  ;;  %v18585_v18 = vld [vmem:[#allocation49_spill] sm:$0xff]  ;;  %v2034_v2 = vadd.f32 %v15440_v44, %v18587_v49  ;;  %v18588_v14 = vld [vmem:[#allocation38_spill] sm:$0xff] }
 0x1db   : > { %v15658_v43 = vpop.f32.mrf.mxu1  ;;  %v3569_v51 = vpop.f32.mrf.mxu0  ;;  %v1234_v57 = vadd.f32 %v15402_v46, %v18585_v18  ;;  %v18586_v62 = vld [vmem:[#allocation25_spill] sm:$0xff]  ;;  %v1695_v19 = vadd.f32 %v15373_v20, %v1218_v40  ;;  %v18589_v40 = vld [vmem:[#allocation18_spill] sm:$0xff] }
 0x1dc   : > { %18581 = vst [vmem:[#allocation53_spill] sm:$0xff] %v15651_v37  ;;  %v15662_v23 = vadd.f32 %v12271_v9, %v3252_v29  ;;  %v2030_v13 = vadd.f32 %v15420_v22, %v18586_v62  ;;  %v3227_v9 = vadd.f32 %v15553_v26, %v15410_v60  ;;  %v2042_v60 = vadd.f32 %v15478_v5, %v15282_v52  ;;  %v18597_v49 = vld [vmem:[#allocation17_spill] sm:$0xff] }
 0x1dd   : > { %v12240_v28 = vpop.f32.mrf.mxu1  ;;  %v12275_v58 = vpop.f32.mrf.mxu0  ;;  %v1699_v22 = vadd.f32 %v15394_v42, %v1234_v57  ;;  %v3225_v26 = vadd.f32 %v15557_v15, %v15415_v61  ;;  %v2054_v44 = vadd.f32 %v15532_v33, %v1695_v19  ;;  %v3228_v52 = vadd.f32 %v15561_v32, %v15422_v24  ;;  %v18591_v24 = vld [vmem:[#allocation21_spill] sm:$0xff] }
 0x1de   : > { %v3255_v47 = vadd.f32 %v12240_v28, %v15537_v7  ;;  %v2756_v7 = vadd.f32 %v15413_v38, %v2030_v13  ;;  %v2046_v38 = vadd.f32 %v15497_v3, %v1687_v41  ;;  %v3586_v27 = vadd.f32 %v15545_v17, %v3227_v9  ;;  %v18593_v28 = vld [vmem:[#allocation23_spill] sm:$0xff]  ;;  %v18596_v9 = vld [vmem:[#allocation36_spill] sm:$0xff] }
 0x1df   : > { %v3210_v37 = vpop.f32.mrf.mxu1  ;;  %v15677_v18 = vpop.f32.mrf.mxu0  ;;  %v2058_v56 = vadd.f32 %v15547_v59, %v1699_v22  ;;  %v2760_v15 = vadd.f32 %v15431_v63, %v2034_v2  ;;  %v2764_v3 = vadd.f32 %v15448_v30, %v2038_v45  ;;  %v2768_v33 = vadd.f32 %v18588_v14, %v2042_v60  ;;  %v15715_v30 = vld [vmem:[%s18296_s2] ss:$0 sm:$0xff]  ;;  %v18598_v2 = vld [vmem:[#allocation45_spill] sm:$0xff] }
 0x1e0   : > { %v15674_v29 = vadd.f32 %v12274_v36, %v3255_v47  ;;  %v3253_v46 = vadd.f32 %v3210_v37, %v15542_v21  ;;  %v2050_v36 = vadd.f32 %v15516_v39, %v1691_v6  ;;  %v3226_v61 = vadd.f32 %v15567_v16, %v2756_v7  ;;  %v18592_v16 = vld [vmem:[#allocation42_spill] sm:$0xff] }
 0x1e1   : > { %v12241_v20 = vpop.f32.mrf.mxu1  ;;  %v12314_v42 = vpop.f32.mrf.mxu0  ;;  %v3584_v59 = vadd.f32 %v18589_v40, %v3225_v26  ;;  %v2772_v32 = vadd.f32 %v18591_v24, %v2046_v38  ;;  %v2780_v47 = vadd.f32 %v18593_v28, %v2054_v44  ;;  %v18595_v6 = vld [vmem:[#allocation34_spill] sm:$0xff]  ;;  %v3229_v45 = vadd.f32 %v18598_v2, %v18597_v49 }
 0x1e2   : > { %v15689_v21 = vadd.f32 %v3569_v51, %v3253_v46  ;;  %v3256_v37 = vadd.f32 %v12241_v20, %v15549_v54  ;;  %v18590_v51 = vld [vmem:[#allocation9_spill] sm:$0xff]  ;;  %v2776_v13 = vadd.f32 %v18592_v16, %v2050_v36  ;;  %v3587_v19 = vadd.f32 %v18595_v6, %v3228_v52  ;;  %v18599_v20 = vld [vmem:[#allocation12_spill] sm:$0xff]  ;;  %v18600_v36 = vld [vmem:[#allocation39_spill] sm:$0xff] }
 0x1e3   : > { %v3213_v50 = vpop.f32.mrf.mxu1  ;;  %v4653_v54 = vpop.f32.mrf.mxu0  ;;  %v3231_v17 = vadd.f32 %v15573_v11, %v18590_v51  ;;  %v3585_v11 = vadd.f32 %v18596_v9, %v3226_v61  ;;  %v3230_v60 = vadd.f32 %v18599_v20, %v2760_v15  ;;  %v3234_v26 = vadd.f32 %v15596_v10, %v2764_v3 }
 0x1e4   : > { %v15700_v5 = vadd.f32 %v12275_v58, %v3256_v37  ;;  %v18594_v58 = vld [vmem:[#allocation43_spill] sm:$0xff]  ;;  %v3238_v37 = vadd.f32 %v15609_v48, %v2768_v33  ;;  %v3242_v61 = vadd.f32 %v15628_v12, %v2772_v32  ;;  %v3250_v14 = vadd.f32 %v15658_v43, %v2780_v47 }
 0x1e5   : > { %v12280_v39 = vpop.f32.mrf.mxu1  ;;  %v12315_v62 = vpop.f32.mrf.mxu0  ;;  %v2784_v63 = vadd.f32 %v18594_v58, %v2058_v56  ;;  %v3590_v44 = vadd.f32 %v18600_v36, %v3231_v17  ;;  %v18602_v17 = vld [vmem:[#allocation47_spill] sm:$0xff]  ;;  %v15735_v12 = vadd.f32 %v15591_v0, %v3234_v26 }
 0x1e6   : > { %v4312_v57 = vadd.f32 %v12280_v39, %v3586_v27  ;;  %v3246_v39 = vadd.f32 %v15641_v4, %v2776_v13  ;;  %v15738_v4 = vadd.f32 %v15604_v8, %v3238_v37  ;;  %v15742_v13 = vadd.f32 %v15623_v25, %v3242_v61  ;;  %v18605_v37 = vld [vmem:[#allocation4_spill] sm:$0xff]  ;;  %v5360_v61 = vld [vmem:[#allocation2 + $0xc] sm:$0xf] }
 0x1e7   : > { %v4183_v41 = vpop.f32.mrf.mxu1  ;;  %v4656_v7 = vpop.f32.mrf.mxu0  ;;  %v3254_v40 = vadd.f32 %v3213_v50, %v2784_v63  ;;  %v15748_v47 = vadd.f32 %v15649_v55, %v3250_v14 }
 0x1e8   : > { %v4782_v46 = vadd.f32 %v12314_v42, %v4312_v57  ;;  %v4310_v22 = vadd.f32 %v4183_v41, %v3584_v59  ;;  %v15732_v57 = vadd.f32 %v18602_v17, %v3230_v60  ;;  %v15745_v28 = vadd.f32 %v15636_v34, %v3246_v39  ;;  %v5373_v17 = vld [vmem:[#allocation2 + $0x20] sm:$0x1] }
 0x1e9   : > { %v12281_v38 = vpop.f32.mrf.mxu1  ;;  %v15751_v8 = vadd.f32 %v15677_v18, %v3254_v40 }
 0x1ea   : > { %v4821_v56 = vadd.f32 %v15715_v30, %v4782_v46  ;;  %v4780_v27 = vadd.f32 %v4653_v54, %v4310_v22  ;;  %v4313_v52 = vadd.f32 %v12281_v38, %v3587_v19  ;;  %v12318_v42 = vpop.f32.mrf.mxu0  ;;  %v18601_v54 = vld [vmem:[#allocation41_spill] sm:$0xff] }
 0x1eb   : > { %v4186_v10 = vpop.f32.mrf.mxu1  ;;  %v3588_v51 = vadd.f32 %v18601_v54, %v3229_v45  ;;  %v5369_v45 = vld [vmem:[#allocation2 + $0x18] sm:$0xf] }
 0x1ec   : > { %v4853_v15 = vmax.f32 %v4821_v56, 0.0  ;;  %v4819_v48 = vadd.f32 %v15715_v30, %v4780_v27  ;;  %v4783_v3 = vadd.f32 %v12315_v62, %v4313_v52  ;;  %v4311_v33 = vadd.f32 %v4186_v10, %v3585_v11  ;;  %v4669_v59 = vpop.f32.mrf.mxu0 }
 0x1ed   : > { %v12284_v43 = vpop.f32.mrf.mxu1 }
 0x1ee   : > { %v11622_v50 = vpack.c.bf16 %v4853_v15, %v4853_v15  ;;  %v4851_v24 = vmax.f32 %v4819_v48, 0.0  ;;  %v4822_v32 = vadd.f32 %v15715_v30, %v4783_v3  ;;  %v4781_v62 = vadd.f32 %v4656_v7, %v4311_v33  ;;  %v12319_v16 = vpop.f32.mrf.mxu0 }
 0x1ef   : > { %v4316_v0 = vadd.f32 %v12284_v43, %v3590_v44  ;;  %v4199_v58 = vpop.f32.mrf.mxu1 }
 0x1f0   : > { %v5054_v63 = vshrl.u32 %v11622_v50, 16  ;;  %v11620_v41 = vpack.c.bf16 %v4851_v24, %v4851_v24  ;;  %v4854_v6 = vmax.f32 %v4822_v32, 0.0  ;;  %v15753_v19 = vpop.f32.mrf.mxu0  ;;  %v5057_v9 = vshll.u32 %v11622_v50, 16 }
 0x1f1   : > { %v4820_v25 = vadd.f32 %v15715_v30, %v4781_v62  ;;  %v4786_v11 = vadd.f32 %v12318_v42, %v4316_v0  ;;  %v4314_v46 = vadd.f32 %v4199_v58, %v3588_v51  ;;  %v12285_v34 = vpop.f32.mrf.mxu1 }
 0x1f2   : > { %v5056_v22 = vrot.slane %v5054_v63, 7  ;;  %v5037_v7 = vshrl.u32 %v11620_v41, 16  ;;  %v5040_v55 = vshll.u32 %v11620_v41, 16  ;;  %v11623_v49 = vpack.c.bf16 %v4854_v6, %v4854_v6  ;;  %v15756_v2 = vpop.f32.mrf.mxu0 }
 0x1f3   : > { %v4852_v20 = vmax.f32 %v4820_v25, 0.0  ;;  %v4825_v60 = vadd.f32 %v15715_v30, %v4786_v11  ;;  %v4784_v26 = vadd.f32 %v4669_v59, %v4314_v46  ;;  %v4317_v38 = vadd.f32 %v12285_v34, %v18605_v37  ;;  %v4202_v36 = vpop.f32.mrf.mxu1 }
 0x1f4   : > { %v5059_v44 = vor.u32 %v5057_v9, %v5056_v22  ;;  %v5060_v56 = vrot.slane %v5056_v22, 4  ;;  %v5039_v27 = vrot.slane %v5037_v7, 7  ;;  %v5062_v52 = vshrl.u32 %v11623_v49, 16  ;;  %v15766_v42 = vpop.f32.mrf.mxu0 }
 0x1f5   : > { %v5065_v39 = vshll.u32 %v11623_v49, 16  ;;  %v11621_v14 = vpack.c.bf16 %v4852_v20, %v4852_v20  ;;  %v4857_v40 = vmax.f32 %v4825_v60, 0.0  ;;  %v4823_v10 = vadd.f32 %v15715_v30, %v4784_v26  ;;  %v12288_v15 = vpop.f32.mrf.mxu1 }
 0x1f6   : > { %v5370_v48 = vsel %vm15760_vm12, %v5059_v44, %v5369_v45  ;;  %v5042_v3 = vor.u32 %v5040_v55, %v5039_v27  ;;  %v5043_v33 = vrot.slane %v5039_v27, 4  ;;  %v5064_v54 = vrot.slane %v5062_v52, 7  ;;  %v12323_v6 = vpop.f32.mrf.mxu0  ;;  %v5366_v55 = vld [vmem:[#allocation2 + $0x14] sm:$0x1] }
 0x1f7   : > { %5371 = vst [vmem:[#allocation2 + $0x18] sm:$0xf] %v5370_v48  ;;  %v5045_v43 = vshrl.u32 %v11621_v14, 16  ;;  %v5048_v50 = vshll.u32 %v11621_v14, 16  ;;  %v11626_v24 = vpack.c.bf16 %v4857_v40, %v4857_v40  ;;  %v4855_v32 = vmax.f32 %v4823_v10, 0.0  ;;  %v4215_v62 = vpop.f32.mrf.mxu1  ;;  %v18610_v52 = vld [vmem:[#allocation22_spill] sm:$0xff] }
 0x1f8   : > { %v5361_v0 = vsel %vm15760_vm12, %v5042_v3, %v5360_v61  ;;  %v5067_v58 = vor.u32 %v5065_v39, %v5064_v54  ;;  %v5069_v63 = vrot.slane %v5064_v54, 4  ;;  %v4787_v41 = vadd.f32 %v12319_v16, %v4317_v38  ;;  %v5383_v38 = vld [vmem:[#allocation2 + $0x30] sm:$0xf]  ;;  %v4688_v39 = vpop.f32.mrf.mxu0 }
 0x1f9   : > { %5362 = vst [vmem:[#allocation2 + $0xc] sm:$0xf] %v5361_v0  ;;  %v5047_v9 = vrot.slane %v5045_v43, 7  ;;  %v5088_v25 = vshrl.u32 %v11626_v24, 16  ;;  %v5091_v11 = vshll.u32 %v11626_v24, 16  ;;  %v11624_v46 = vpack.c.bf16 %v4855_v32, %v4855_v32  ;;  %v12289_v34 = vpop.f32.mrf.mxu1  ;;  %v18611_v43 = vld [vmem:[#allocation26_spill] sm:$0xff] }
 0x1fa   : > { %v5068_v22 = vsel %vm15773_vm13, %v5060_v56, %v5067_v58  ;;  %v5374_v7 = vsel %vm15779_vm14, %v5069_v63, %v5373_v17  ;;  %v4826_v49 = vadd.f32 %v15715_v30, %v4787_v41  ;;  %v4315_v45 = vadd.f32 %v4202_v36, %v15732_v57  ;;  %v5376_v17 = vld [vmem:[#allocation2 + $0x24] sm:$0xf]  ;;  %v12326_v41 = vpop.f32.mrf.mxu0 }
 0x1fb   : > { %5372 = vst [vmem:[#allocation2 + $0x1c] sm:$0xf] %v5068_v22  ;;  %5375 = vst [vmem:[#allocation2 + $0x20] sm:$0x1] %v5374_v7  ;;  %v5050_v16 = vor.u32 %v5048_v50, %v5047_v9  ;;  %v5052_v20 = vrot.slane %v5047_v9, 4  ;;  %v5090_v60 = vrot.slane %v5088_v25, 7  ;;  %v4218_v37 = vpop.f32.mrf.mxu1  ;;  %v4320_v61 = vadd.f32 %v12288_v15, %v18610_v52 }
 0x1fc   : > { %v5071_v26 = vshrl.u32 %v11624_v46, 16  ;;  %v5074_v44 = vshll.u32 %v11624_v46, 16  ;;  %v4858_v27 = vmax.f32 %v4826_v49, 0.0  ;;  %v4785_v56 = vadd.f32 %v15753_v19, %v4315_v45 }
 0x1fd   : > { %v5051_v14 = vsel %vm15773_vm13, %v5043_v33, %v5050_v16  ;;  %v5367_v57 = vsel %vm15779_vm14, %v5052_v20, %v5366_v55  ;;  %v5093_v36 = vor.u32 %v5091_v11, %v5090_v60  ;;  %v5094_v40 = vrot.slane %v5090_v60, 4  ;;  %v12292_v10 = vpop.f32.mrf.mxu1  ;;  %v4701_v60 = vpop.f32.mrf.mxu0 }
 0x1fe   : > { %5363 = vst [vmem:[#allocation2 + $0x10] sm:$0xf] %v5051_v14  ;;  %5368 = vst [vmem:[#allocation2 + $0x14] sm:$0x1] %v5367_v57  ;;  %v15797_v48 = vrot.slane %v5071_v26, 7  ;;  %v11627_v3 = vpack.c.bf16 %v4858_v27, %v4858_v27  ;;  %v4824_v54 = vadd.f32 %v15715_v30, %v4785_v56  ;;  %v4790_v19 = vadd.f32 %v15756_v2, %v4320_v61 }
 0x1ff   : > { %v5384_v15 = vsel %vm15760_vm12, %v5093_v36, %v5383_v38  ;;  %v4318_v33 = vadd.f32 %v4215_v62, %v15593_v35  ;;  %v4321_v50 = vadd.f32 %v12289_v34, %v18611_v43  ;;  %v4319_v24 = vadd.f32 %v4218_v37, %v15735_v12  ;;  %v4231_v9 = vpop.f32.mrf.mxu1  ;;  %v5387_v12 = vld [vmem:[#allocation2 + $0x38] sm:$0x1] }
 0x200   : > { %5385 = vst [vmem:[#allocation2 + $0x30] sm:$0xf] %v5384_v15  ;;  %v5076_v32 = vor.u32 %v5074_v44, %v15797_v48  ;;  %v5077_v0 = vrot.slane %v15797_v48, 4  ;;  %v5096_v58 = vshrl.u32 %v11627_v3, 16  ;;  %v5099_v63 = vshll.u32 %v11627_v3, 16 }
 0x201   : > { %v4856_v2 = vmax.f32 %v4824_v54, 0.0  ;;  %v4829_v25 = vadd.f32 %v15715_v30, %v4790_v19  ;;  %v4788_v11 = vadd.f32 %v15766_v42, %v4318_v33  ;;  %v4791_v46 = vadd.f32 %v12323_v6, %v4321_v50  ;;  %v12293_v26 = vpop.f32.mrf.mxu1  ;;  %v18612_v19 = vld [vmem:[#allocation19_spill] sm:$0xff] }
 0x202   : > { %v5377_v35 = vsel %vm15760_vm12, %v5076_v32, %v5376_v17  ;;  %v5098_v62 = vrot.slane %v5096_v58, 7  ;;  %v4789_v34 = vadd.f32 %v4688_v39, %v4319_v24  ;;  %v4324_v22 = vadd.f32 %v12292_v10, %v15601_v1  ;;  %v5380_v10 = vld [vmem:[#allocation2 + $0x2c] sm:$0x1]  ;;  %v12327_v17 = vpop.f32.mrf.mxu0  ;;  %v5397_v32 = vld [vmem:[#allocation2 + $0x48] sm:$0xf] }
 0x203   : > { %5378 = vst [vmem:[#allocation2 + $0x24] sm:$0xf] %v5377_v35  ;;  %v11625_v7 = vpack.c.bf16 %v4856_v2, %v4856_v2  ;;  %v4861_v55 = vmax.f32 %v4829_v25, 0.0  ;;  %v4827_v49 = vadd.f32 %v15715_v30, %v4788_v11  ;;  %v4830_v45 = vadd.f32 %v15715_v30, %v4791_v46 }
 0x204   : > { %v5101_v16 = vor.u32 %v5099_v63, %v5098_v62  ;;  %v5103_v20 = vrot.slane %v5098_v62, 4  ;;  %v4828_v42 = vadd.f32 %v15715_v30, %v4789_v34  ;;  %v4794_v6 = vadd.f32 %v12326_v41, %v4324_v22 }
 0x205   : > { %v5079_v37 = vshrl.u32 %v11625_v7, 16  ;;  %v5082_v38 = vshll.u32 %v11625_v7, 16  ;;  %v11630_v44 = vpack.c.bf16 %v4861_v55, %v4861_v55  ;;  %v4859_v27 = vmax.f32 %v4827_v49, 0.0  ;;  %v4704_v7 = vpop.f32.mrf.mxu0 }
 0x206   : > { %v5102_v1 = vsel %vm15773_vm13, %v5094_v40, %v5101_v16  ;;  %v5388_v56 = vsel %vm15779_vm14, %v5103_v20, %v5387_v12  ;;  %v4862_v52 = vmax.f32 %v4830_v45, 0.0  ;;  %v4860_v61 = vmax.f32 %v4828_v42, 0.0  ;;  %v4234_v40 = vpop.f32.mrf.mxu1  ;;  %v5401_v45 = vld [vmem:[#allocation2 + $0x50] sm:$0x1]  ;;  %v18613_v20 = vld [vmem:[#allocation35_spill] sm:$0xff] }
 0x207   : > { %5386 = vst [vmem:[#allocation2 + $0x34] sm:$0xf] %v5102_v1  ;;  %5389 = vst [vmem:[#allocation2 + $0x38] sm:$0x1] %v5388_v56  ;;  %v5081_v39 = vrot.slane %v5079_v37, 7  ;;  %v5122_v14 = vshrl.u32 %v11630_v44, 16  ;;  %v11628_v36 = vpack.c.bf16 %v4859_v27, %v4859_v27  ;;  %v4833_v54 = vadd.f32 %v15715_v30, %v4794_v6 }
 0x208   : > { %v5125_v57 = vshll.u32 %v11630_v44, 16  ;;  %v11631_v48 = vpack.c.bf16 %v4862_v52, %v4862_v52  ;;  %v11629_v3 = vpack.c.bf16 %v4860_v61, %v4860_v61  ;;  %v4322_v15 = vadd.f32 %v4231_v9, %v18612_v19  ;;  %v5390_v9 = vld [vmem:[#allocation2 + $0x3c] sm:$0xf]  ;;  %v12296_v55 = vpop.f32.mrf.mxu1  ;;  %v5394_v27 = vld [vmem:[#allocation2 + $0x44] sm:$0x1] }
 0x209   : > { %v5084_v33 = vor.u32 %v5082_v38, %v5081_v39  ;;  %v5086_v43 = vrot.slane %v5081_v39, 4  ;;  %v5124_v50 = vrot.slane %v5122_v14, 7  ;;  %v5105_v24 = vshrl.u32 %v11628_v36, 16 }
 0x20a   : > { %v5108_v58 = vshll.u32 %v11628_v36, 16  ;;  %v5130_v63 = vshrl.u32 %v11631_v48, 16  ;;  %v5133_v41 = vshll.u32 %v11631_v48, 16  ;;  %v5113_v2 = vshrl.u32 %v11629_v3, 16  ;;  %v4247_v36 = vpop.f32.mrf.mxu1 }
 0x20b   : > { %v5085_v25 = vsel %vm15773_vm13, %v5077_v0, %v5084_v33  ;;  %v5381_v11 = vsel %vm15779_vm14, %v5086_v43, %v5380_v10  ;;  %v5127_v46 = vor.u32 %v5125_v57, %v5124_v50  ;;  %v5128_v35 = vrot.slane %v5124_v50, 4  ;;  %v12330_v57 = vpop.f32.mrf.mxu0  ;;  %v5476_v10 = vld [vmem:[#allocation2 + $0xc] sm:$0xf]  ;;  %v18614_v43 = vld [vmem:[#allocation44_spill] sm:$0xff] }
 0x20c   : > { %5379 = vst [vmem:[#allocation2 + $0x28] sm:$0xf] %v5085_v25  ;;  %5382 = vst [vmem:[#allocation2 + $0x2c] sm:$0x1] %v5381_v11  ;;  %v5107_v62 = vrot.slane %v5105_v24, 7  ;;  %v5132_v12 = vrot.slane %v5130_v63, 7  ;;  %v4792_v0 = vadd.f32 %v4701_v60, %v4322_v15  ;;  %v4325_v42 = vadd.f32 %v12293_v26, %v18613_v20 }
 0x20d   : > { %v5115_v34 = vrot.slane %v5113_v2, 7  ;;  %v5116_v22 = vshll.u32 %v11629_v3, 16  ;;  %v5398_v49 = vsel %vm15760_vm12, %v5127_v46, %v5397_v32  ;;  %v4865_v16 = vmax.f32 %v4833_v54, 0.0 }
 0x20e   : > { %5399 = vst [vmem:[#allocation2 + $0x48] sm:$0xf] %v5398_v49  ;;  %v5110_v6 = vor.u32 %v5108_v58, %v5107_v62  ;;  %v5111_v37 = vrot.slane %v5107_v62, 4  ;;  %v5135_v38 = vor.u32 %v5133_v41, %v5132_v12  ;;  %v5137_v44 = vrot.slane %v5132_v12, 4  ;;  %v5411_v41 = vld [vmem:[#allocation2 + $0x60] sm:$0xf] }
 0x20f   : > { %v5118_v1 = vor.u32 %v5116_v22, %v5115_v34  ;;  %v5120_v56 = vrot.slane %v5115_v34, 4  ;;  %v11634_v52 = vpack.c.bf16 %v4865_v16, %v4865_v16  ;;  %v4831_v61 = vadd.f32 %v15715_v30, %v4792_v0  ;;  %v15853_v49 = vld [vmem:[#allocation2 + $0x10] sm:$0xf] }
 0x210   : > { %v5391_v39 = vsel %vm15760_vm12, %v5110_v6, %v5390_v9  ;;  %v5136_v14 = vsel %vm15773_vm13, %v5128_v35, %v5135_v38  ;;  %v5402_v60 = vsel %vm15779_vm14, %v5137_v44, %v5401_v45  ;;  %v4795_v26 = vadd.f32 %v12327_v17, %v4325_v42  ;;  %v4717_v35 = vpop.f32.mrf.mxu0  ;;  %v15846_v9 = vpop.f32.mrf.mxu1  ;;  %v15863_v38 = vld [vmem:[#allocation2 + $0x18] sm:$0xf] }
 0x211   : > { %5392 = vst [vmem:[#allocation2 + $0x3c] sm:$0xf] %v5391_v39  ;;  %5400 = vst [vmem:[#allocation2 + $0x4c] sm:$0xf] %v5136_v14  ;;  %v5119_v48 = vsel %vm15773_vm13, %v5111_v37, %v5118_v1  ;;  %v5395_v3 = vsel %vm15779_vm14, %v5120_v56, %v5394_v27  ;;  %v5156_v54 = vshrl.u32 %v11634_v52, 16  ;;  %v5159_v19 = vshll.u32 %v11634_v52, 16 }
 0x212   : > { %5403 = vst [vmem:[#allocation2 + $0x50] sm:$0x1] %v5402_v60  ;;  %5393 = vst [vmem:[#allocation2 + $0x40] sm:$0xf] %v5119_v48  ;;  %v4863_v15 = vmax.f32 %v4831_v61, 0.0  ;;  %v4834_v33 = vadd.f32 %v15715_v30, %v4795_v26  ;;  %v4323_v17 = vadd.f32 %v4234_v40, %v15738_v4  ;;  %v4328_v50 = vadd.f32 %v12296_v55, %v18614_v43  ;;  %v15865_v44 = vpop.f32.mrf.mxu0  ;;  %v15867_v27 = vpop.f32.mrf.mxu1  ;;  %v12907_v14 = vld [vmem:[%s18297_s3 + $0xf0] sm:$0xff]  }
 0x213   : > { %5396 = vst [vmem:[#allocation2 + $0x44] sm:$0x1] %v5395_v3  ;;  %v15843_v24 = vrot.slane %v5156_v54, 7  ;;  %v4326_v32 = vadd.f32 %v4247_v36, %v15625_v31  ;;  %v5563_v58 = vshrl.u32 %v5476_v10, 16  ;;  %v5566_v63 = vshll.u32 %v5476_v10, 16 }
 0x214   : > { %v11632_v2 = vpack.c.bf16 %v4863_v15, %v4863_v15  ;;  %v4866_v25 = vmax.f32 %v4834_v33, 0.0  ;;  %v4793_v11 = vadd.f32 %v4704_v7, %v4323_v17  ;;  %v4798_v46 = vadd.f32 %v12330_v57, %v4328_v50  ;;  %v5404_v1 = vld [vmem:[#allocation2 + $0x54] sm:$0xf]  ;;  %v5415_v36 = vld [vmem:[#allocation2 + $0x68] sm:$0x1] }
 0x215   : > { %v5161_v62 = vor.u32 %v5159_v19, %v15843_v24  ;;  %v5162_v4 = vrot.slane %v15843_v24, 4  ;;  %v4796_v40 = vadd.f32 %v4717_v35, %v4326_v32  ;;  %v15850_v12 = vrot.slane %v5563_v58, 4  ;;  %v4720_v24 = vpop.f32.mrf.mxu0  ;;  %v12300_v32 = vpop.f32.mrf.mxu1  ;;  %v18615_v58 = vld [vmem:[#allocation40_spill] sm:$0xff] }
 0x216   : > { %v5139_v34 = vshrl.u32 %v11632_v2, 16  ;;  %v5142_v22 = vshll.u32 %v11632_v2, 16  ;;  %v11635_v31 = vpack.c.bf16 %v4866_v25, %v4866_v25  ;;  %v4832_v55 = vadd.f32 %v15715_v30, %v4793_v11  ;;  %v15884_v11 = vld [vmem:[#allocation2 + $0x1c] sm:$0xf] }
 0x217   : > { %v5412_v7 = vsel %vm15760_vm12, %v5161_v62, %v5411_v41  ;;  %v4837_v45 = vadd.f32 %v15715_v30, %v4798_v46  ;;  %v4835_v16 = vadd.f32 %v15715_v30, %v4796_v40  ;;  %v15859_v0 = vrot.slane %v5566_v63, 5  ;;  %v5408_v40 = vld [vmem:[#allocation2 + $0x5c] sm:$0x1] }
 0x218   : > { %5413 = vst [vmem:[#allocation2 + $0x60] sm:$0xf] %v5412_v7  ;;  %v15861_v20 = vrot.slane %v5139_v34, 7  ;;  %v5164_v42 = vshrl.u32 %v11635_v31, 16  ;;  %v5167_v6 = vshll.u32 %v11635_v31, 16  ;;  %v4864_v37 = vmax.f32 %v4832_v55, 0.0 }
 0x219   : > { %v4869_v56 = vmax.f32 %v4837_v45, 0.0  ;;  %v4867_v52 = vmax.f32 %v4835_v16, 0.0  ;;  %v5576_v61 = vshrl.u32 %v15853_v49, 16  ;;  %v11249_v39 = vcombine.low %v5476_v10, %v15853_v49  ;;  %v12911_v10 = vld [vmem:[%s18297_s3 + $0xe8] sm:$0xff]   ;;  %v5425_v34 = vld [vmem:[#allocation2 + $0x78] sm:$0xf] }
 0x21a   : > { %v5144_v60 = vor.u32 %v5142_v22, %v15861_v20  ;;  %v5145_v26 = vrot.slane %v15861_v20, 4  ;;  %v5166_v57 = vrot.slane %v5164_v42, 7  ;;  %v11633_v48 = vpack.c.bf16 %v4864_v37, %v4864_v37  ;;  %v5418_v7 = vld [vmem:[#allocation2 + $0x6c] sm:$0xf]  ;;  %v12334_v37 = vpop.f32.mrf.mxu0 }
 0x21b   : > { %v11638_v3 = vpack.c.bf16 %v4869_v56, %v4869_v56  ;;  %v11636_v54 = vpack.c.bf16 %v4867_v52, %v4867_v52  ;;  %12409 = vmatmul.mubr.bf16.vlgmr.msra.gmra.mxu0 %v11249_v39  ;;  %v5587_v19 = vshrl.u32 %v15863_v38, 16  ;;  %v5590_v15 = vshll.u32 %v15863_v38, 16  ;;  %v12915_v56 = vld [vmem:[%s18297_s3 + $0xe0] sm:$0xff]  }
 0x21c   : > { %v5405_v33 = vsel %vm15760_vm12, %v5144_v60, %v5404_v1  ;;  %v5169_v17 = vor.u32 %v5167_v6, %v5166_v57  ;;  %v5171_v43 = vrot.slane %v5166_v57, 4  ;;  %v5147_v50 = vshrl.u32 %v11633_v48, 16  ;;  %12489 = vmatpush3.bf16.msra.mxu0 %v18615_v58  ;;  %v4263_v1 = vpop.f32.mrf.mxu1  ;;  %v4733_v58 = vpop.f32.mrf.mxu0 }
 0x21d   : > { %5406 = vst [vmem:[#allocation2 + $0x54] sm:$0xf] %v5405_v33  ;;  %v5150_v63 = vshll.u32 %v11633_v48, 16  ;;  %v5190_v41 = vshrl.u32 %v11638_v3, 16  ;;  %v5193_v2 = vshll.u32 %v11638_v3, 16  ;;  %v5173_v25 = vshrl.u32 %v11636_v54, 16  ;;  %12490 = vmatprep.subr.bf16.mxu0 %v12907_v14 }
 0x21e   : > { %v5170_v46 = vsel %vm15773_vm13, %v5162_v4, %v5169_v17  ;;  %v5416_v35 = vsel %vm15779_vm14, %v5171_v43, %v5415_v36  ;;  %v5149_v62 = vrot.slane %v5147_v50, 7  ;;  %v5176_v22 = vshll.u32 %v11636_v54, 16  ;;  %v5480_v36 = vld [vmem:[#allocation2 + $0x24] sm:$0xf]  ;;  %v15908_v48 = vld [vmem:[#allocation2 + $0x28] sm:$0xf] }
 0x21f   : > { %5414 = vst [vmem:[#allocation2 + $0x64] sm:$0xf] %v5170_v46  ;;  %5417 = vst [vmem:[#allocation2 + $0x68] sm:$0x1] %v5416_v35  ;;  %v15890_v31 = vrot.slane %v5190_v41, 7  ;;  %v15892_v55 = vrot.slane %v5173_v25, 7  ;;  %v11250_v6 = vcombine.low %v15863_v38, %v15884_v11  ;;  %v4330_v43 = vadd.f32 %v4263_v1, %v15638_v53 }
 0x220   : > { %v15894_v45 = vrot.slane %v5587_v19, 4  ;;  %v15896_v16 = vrot.slane %v5590_v15, 5  ;;  %v5152_v20 = vor.u32 %v5150_v63, %v5149_v62  ;;  %v5154_v4 = vrot.slane %v5149_v62, 4  ;;  %12491 = vmatpush3.bf16.msra.mxu0 %v12907_v14  ;;  %v18616_v3 = vld [vmem:[#allocation46_spill] sm:$0xff]  ;;  %v12919_v53 = vld [vmem:[%s18297_s3 + $0xd8] sm:$0xff]  }
 0x221   : > { %v5600_v42 = vshrl.u32 %v15884_v11, 16  ;;  %v5195_v52 = vor.u32 %v5193_v2, %v15890_v31  ;;  %v5196_v39 = vrot.slane %v15890_v31, 4  ;;  %v5178_v60 = vor.u32 %v5176_v22, %v15892_v55  ;;  %12492 = vmatprep.subr.bf16.mxu0 %v12911_v10  ;;  %12412 = vmatprep.mubr.bf16.mxu0 %v11250_v6  ;;  %v18617_v17 = vld [vmem:[#allocation50_spill] sm:$0xff] }
 0x222   : > { %v5179_v57 = vrot.slane %v15892_v55, 4  ;;  %v5153_v38 = vsel %vm15773_vm13, %v5145_v26, %v5152_v20  ;;  %v5409_v14 = vsel %vm15779_vm14, %v5154_v4, %v5408_v40  ;;  %v4329_v54 = vadd.f32 %v15846_v9, %v18616_v3  ;;  %v5523_v46 = vld [vmem:[#allocation2 + $0x14] sm:$0x1]  ;;  %v15941_v22 = vld [vmem:[#allocation2 + $0x30] sm:$0xf] }
 0x223   : > { %v4327_v19 = vadd.f32 %v15867_v27, %v15742_v13  ;;  %5407 = vst [vmem:[#allocation2 + $0x58] sm:$0xf] %v5153_v38  ;;  %5410 = vst [vmem:[#allocation2 + $0x5c] sm:$0x1] %v5409_v14  ;;  %v5426_v15 = vsel %vm15760_vm12, %v5195_v52, %v5425_v34  ;;  %v5419_v33 = vsel %vm15760_vm12, %v5178_v60, %v5418_v7  ;;  %v5611_v63 = vshrl.u32 %v5480_v36, 16  ;;  %v15943_v7 = vpop.f32.mrf.mxu1 }
 0x224   : > { %v4332_v26 = vadd.f32 %v12300_v32, %v18617_v17  ;;  %5427 = vst [vmem:[#allocation2 + $0x78] sm:$0xf] %v5426_v15  ;;  %5420 = vst [vmem:[#allocation2 + $0x6c] sm:$0xf] %v5419_v33  ;;  %v4799_v50 = vadd.f32 %v15865_v44, %v4329_v54  ;;  %v5614_v13 = vshll.u32 %v5480_v36, 16  ;;  %12493 = vmatpush3.bf16.msra.mxu0 %v12911_v10  ;;  %v5624_v2 = vshrl.u32 %v15908_v48, 16  ;;  %v15962_v15 = vpop.f32.mrf.mxu0 }
 0x225   : > { %v4797_v9 = vadd.f32 %v4720_v24, %v4327_v19  ;;  %v4800_v41 = vadd.f32 %v4733_v58, %v4330_v43  ;;  %v11251_v25 = vcombine.low %v5480_v36, %v15908_v48  ;;  %12494 = vmatprep.subr.bf16.mxu0 %v12915_v56  ;;  %v15932_v24 = vrot.slane %v5611_v63, 4  ;;  %v15964_v33 = vpop.f32.mrf.mxu1  ;;  %v12926_v17 = vld [vmem:[%s18297_s3 + $0xc8] sm:$0xff]   ;;  %v15969_v58 = vld [vmem:[#allocation2 + $0x34] sm:$0xf]  ;;  %v5429_v63 = vld [vmem:[#allocation2 + $0x80] sm:$0x1] }
 0x226   : > { %v4802_v27 = vadd.f32 %v12334_v37, %v4332_v26  ;;  %v4838_v32 = vadd.f32 %v15715_v30, %v4799_v50  ;;  %v15934_v35 = vrot.slane %v5614_v13, 5  ;;  %v5569_v40 = vor.u32 %v15859_v0, %v15850_v12  ;;  %v12923_v12 = vld [vmem:[%s18297_s3 + $0xd0] sm:$0xff]  }
 0x227   : > { %v4836_v44 = vadd.f32 %v15715_v30, %v4797_v9  ;;  %v4839_v62 = vadd.f32 %v15715_v30, %v4800_v41  ;;  %12413 = vmatmul.mubr.bf16.gmra.mxu0 %v11251_v25  ;;  %v5572_v34 = vshll.u32 %v15853_v49, 16  ;;  %v5578_v6 = vrot.slane %v5576_v61, 4 }
 0x228   : > { %v4841_v10 = vadd.f32 %v15715_v30, %v4802_v27  ;;  %v4870_v20 = vmax.f32 %v4838_v32, 0.0  ;;  %v5582_v37 = vshll.u32 %v5523_v46, 16  ;;  %12495 = vmatpush3.bf16.msra.mxu0 %v12915_v56  ;;  %v15947_v60 = vrot.slane %v5569_v40, 4 }
 0x229   : > { %v4868_v4 = vmax.f32 %v4836_v44, 0.0  ;;  %v4871_v52 = vmax.f32 %v4839_v62, 0.0  ;;  %v15949_v36 = vrot.slane %v5572_v34, 5  ;;  %12496 = vmatprep.subr.bf16.mxu0 %v12919_v53  ;;  %v5635_v49 = vshrl.u32 %v15941_v22, 16  ;;  %v5422_v44 = vld [vmem:[#allocation2 + $0x74] sm:$0x1] }
 0x22a   : > { %v4873_v1 = vmax.f32 %v4841_v10, 0.0  ;;  %v11639_v0 = vpack.c.bf16 %v4870_v20, %v4870_v20  ;;  %v15954_v14 = vrot.slane %v5582_v37, 5  ;;  %v5638_v20 = vshll.u32 %v15941_v22, 16 }
 0x22b   : > { %v11637_v38 = vpack.c.bf16 %v4868_v4, %v4868_v4  ;;  %v11640_v3 = vpack.c.bf16 %v4871_v52, %v4871_v52  ;;  %v5575_v54 = vsel %vm13133_vm4, %v15947_v60, %v15949_v36  ;;  %v5579_v19 = vor.u32 %v5578_v6, %v15949_v36  ;;  %v4736_v4 = vpop.f32.mrf.mxu0  ;;  %v12304_v6 = vpop.f32.mrf.mxu1  ;;  %v5439_v36 = vld [vmem:[#allocation2 + $0x90] sm:$0xf] }
 0x22c   : > { %v11642_v61 = vpack.c.bf16 %v4873_v1, %v4873_v1  ;;  %v5198_v26 = vshrl.u32 %v11639_v0, 16  ;;  %v5201_v43 = vshll.u32 %v11639_v0, 16  ;;  %12497 = vmatpush3.bf16.msra.mxu0 %v12919_v53  ;;  %v15971_v62 = vrot.slane %v5635_v49, 4  ;;  %v5432_v0 = vld [vmem:[#allocation2 + $0x84] sm:$0xf] }
 0x22d   : > { %v5181_v50 = vshrl.u32 %v11637_v38, 16  ;;  %v5184_v9 = vshll.u32 %v11637_v38, 16  ;;  %v5207_v41 = vshrl.u32 %v11640_v3, 16  ;;  %v5210_v25 = vshll.u32 %v11640_v3, 16  ;;  %12498 = vmatprep.subr.bf16.mxu0 %v12923_v12 }
 0x22e   : > { %v5224_v13 = vshrl.u32 %v11642_v61, 16  ;;  %v5227_v27 = vshll.u32 %v11642_v61, 16  ;;  %v5200_v46 = vrot.slane %v5198_v26, 7  ;;  %v5580_v10 = vrot.slane %v5579_v19, 4  ;;  %v12928_v19 = vld [vmem:[%s18297_s3 + $0xc0] sm:$0xff]  }
 0x22f   : > { %v5183_v32 = vrot.slane %v5181_v50, 7  ;;  %v15975_v34 = vrot.slane %v5207_v41, 7  ;;  %v5648_v53 = vshrl.u32 %v15969_v58, 16  ;;  %v11252_v41 = vcombine.low %v15941_v22, %v15969_v58 }
 0x230   : > { %v15973_v40 = vrot.slane %v5224_v13, 7  ;;  %v5203_v37 = vor.u32 %v5201_v43, %v5200_v46  ;;  %v5205_v1 = vrot.slane %v5200_v46, 4  ;;  %12499 = vmatpush3.bf16.msra.mxu0 %v12923_v12  ;;  %v5585_v55 = vsel %vm13133_vm4, %v5580_v10, %v15954_v14  ;;  %v4279_v13 = vpop.f32.mrf.mxu1  ;;  %v12905_v14 = vld [vmem:[%s18297_s3 + $0xb0] sm:$0xff]  }
 0x231   : > { %v5186_v52 = vor.u32 %v5184_v9, %v5183_v32  ;;  %v5188_v60 = vrot.slane %v5183_v32, 4  ;;  %v5212_v61 = vor.u32 %v5210_v25, %v15975_v34  ;;  %v5213_v3 = vrot.slane %v15975_v34, 4  ;;  %12500 = vmatprep.subr.bf16.mxu0 %v12926_v17  ;;  %v5524_v9 = vld [vmem:[#allocation2 + $0x20] sm:$0x1]  ;;  %v18619_v25 = vld [vmem:[#allocation51_spill] sm:$0xff]  ;;  %12416 = vmatprep.mubr.bf16.mxu0 %v11252_v41 }
 0x232   : > { %v5229_v38 = vor.u32 %v5227_v27, %v15973_v40  ;;  %v5230_v49 = vrot.slane %v15973_v40, 4  ;;  %v5204_v26 = vsel %vm15773_vm13, %v5196_v39, %v5203_v37  ;;  %v5430_v12 = vsel %vm15779_vm14, %v5205_v1, %v5429_v63  ;;  %v18621_v1 = vld [vmem:[#allocation53_spill] sm:$0xff]  ;;  %v12921_v40 = vld [vmem:[%s18297_s3 + $0x90] sm:$0xff]  }
 0x233   : > { %v5187_v43 = vsel %vm15773_vm13, %v5179_v57, %v5186_v52  ;;  %v5423_v50 = vsel %vm15779_vm14, %v5188_v60, %v5422_v44  ;;  %5428 = vst [vmem:[#allocation2 + $0x7c] sm:$0xf] %v5204_v26  ;;  %5431 = vst [vmem:[#allocation2 + $0x80] sm:$0x1] %v5430_v12  ;;  %v5433_v39 = vsel %vm15760_vm12, %v5212_v61, %v5432_v0  ;;  %v16005_v63 = vrot.slane %v5638_v20, 5  ;;  %v12338_v57 = vpop.f32.mrf.mxu0 }
 0x234   : > { %5421 = vst [vmem:[#allocation2 + $0x70] sm:$0xf] %v5187_v43  ;;  %5424 = vst [vmem:[#allocation2 + $0x74] sm:$0x1] %v5423_v50  ;;  %v5440_v31 = vsel %vm15760_vm12, %v5229_v38, %v5439_v36  ;;  %v11225_v27 = vcombine.low %v5575_v54, %v5585_v55  ;;  %v4333_v46 = vadd.f32 %v15943_v7, %v18619_v25  ;;  %v5484_v44 = vld [vmem:[#allocation2 + $0x3c] sm:$0xf]  ;;  %12501 = vmatpush3.bf16.msra.mxu0 %v12926_v17 }
 0x235   : > { %5441 = vst [vmem:[#allocation2 + $0x90] sm:$0xf] %v5440_v31  ;;  %5434 = vst [vmem:[#allocation2 + $0x84] sm:$0xf] %v5433_v39  ;;  %v5593_v32 = vor.u32 %v15896_v16, %v15894_v45  ;;  %v5596_v10 = vshll.u32 %v15884_v11, 16  ;;  %v5602_v54 = vrot.slane %v5600_v42, 4  ;;  %v4331_v22 = vadd.f32 %v15964_v33, %v15745_v28  ;;  %12502 = vmatprep.subr.bf16.mxu0 %v12928_v19  ;;  %v4749_v60 = vpop.f32.mrf.mxu0 }
 0x236   : > { %v5606_v20 = vshll.u32 %v5524_v9, 16  ;;  %v12935_v45 = vld [vmem:[%s18297_s3 + $0x178] sm:$0xff]   ;;  %12361 = vmatmul.mubr.bf16.vlgmr.msra.gmra.mxu1 %v11225_v27  ;;  %v4803_v16 = vadd.f32 %v15962_v15, %v4333_v46  ;;  %v18620_v17 = vld [vmem:[#allocation52_spill] sm:$0xff]  ;;  %v4334_v52 = vadd.f32 %v4279_v13, %v18621_v1  ;;  %v5659_v36 = vshrl.u32 %v5484_v44, 16 }
 0x237   : > { %v5594_v7 = vrot.slane %v5593_v32, 4  ;;  %v4336_v37 = vadd.f32 %v12304_v6, %v18620_v17  ;;  %v13003_v11 = vld [vmem:[%s18297_s3 + $0xb8] sm:$0xff]   ;;  %v5598_v28 = vrot.slane %v5596_v10, 5  ;;  %v4801_v33 = vadd.f32 %v4736_v4, %v4331_v22  ;;  %v16031_v15 = vld [vmem:[#allocation2 + $0x40] sm:$0xf]  ;;  %v12909_v6 = vld [vmem:[%s18297_s3 + $0xa8] sm:$0xff]   ;;  %v16054_v10 = vpop.f32.mrf.mxu1 }
 0x238   : > { %12441 = vmatpush3.bf16.msra.mxu1 %v13003_v11  ;;  %v5608_v42 = vrot.slane %v5606_v20, 5  ;;  %v4842_v0 = vadd.f32 %v15715_v30, %v4803_v16  ;;  %v4804_v61 = vadd.f32 %v4749_v60, %v4334_v52  ;;  %v5662_v26 = vshll.u32 %v5484_v44, 16  ;;  %12503 = vmatpush3.bf16.msra.mxu0 %v12928_v19  ;;  %v16041_v4 = vld [vmem:[%s18296_s2] ss:$0 sm:$0xff]  ;;  %v12917_v11 = vld [vmem:[%s18297_s3 + $0x98] sm:$0xff]  }
 0x239   : > { %v4806_v38 = vadd.f32 %v12338_v57, %v4336_v37  ;;  %12442 = vmatprep.subr.bf16.mxu1 %v12905_v14  ;;  %v5599_v12 = vsel %vm13133_vm4, %v5594_v7, %v5598_v28  ;;  %v5603_v43 = vor.u32 %v5602_v54, %v5598_v28  ;;  %v4840_v30 = vadd.f32 %v16041_v4, %v4801_v33  ;;  %v12913_v54 = vld [vmem:[%s18297_s3 + $0xa0] sm:$0xff]   ;;  %v16064_v7 = vld [vmem:[#allocation2 + $0x2c] sm:$0x1]  ;;  %v16071_v33 = vpop.f32.mrf.mxu0  ;;  %v16073_v60 = vpop.f32.mrf.mxu1 }
 0x23a   : > { %v16044_v50 = vrot.slane %v5659_v36, 4  ;;  %12584 = vmatprep.subr.bf16.mxu0 %v12935_v45  ;;  %v4874_v9 = vmax.f32 %v4842_v0, 0.0  ;;  %v4843_v39 = vadd.f32 %v16041_v4, %v4804_v61  ;;  %v16048_v19 = vrot.slane %v5662_v26, 5  ;;  %v5443_v36 = vld [vmem:[#allocation2 + $0x98] sm:$0x1] }
 0x23b   : > { %v4845_v31 = vadd.f32 %v16041_v4, %v4806_v38  ;;  %v5604_v55 = vrot.slane %v5603_v43, 4  ;;  %v4872_v57 = vmax.f32 %v4840_v30, 0.0  ;;  %v5672_v13 = vshrl.u32 %v16031_v15, 16  ;;  %v5436_v43 = vld [vmem:[#allocation2 + $0x8c] sm:$0x1] }
 0x23c   : > { %v11253_v27 = vcombine.low %v5484_v44, %v16031_v15  ;;  %12443 = vmatpush3.bf16.msra.mxu1 %v12905_v14  ;;  %v11643_v41 = vpack.c.bf16 %v4874_v9, %v4874_v9  ;;  %v4875_v46 = vmax.f32 %v4843_v39, 0.0  ;;  %v5617_v32 = vor.u32 %v15934_v35, %v15932_v24 }
 0x23d   : > { %v4877_v25 = vmax.f32 %v4845_v31, 0.0  ;;  %12444 = vmatprep.subr.bf16.mxu1 %v12909_v6  ;;  %v5609_v20 = vsel %vm13133_vm4, %v5604_v55, %v5608_v42  ;;  %v11641_v22 = vpack.c.bf16 %v4872_v57, %v4872_v57  ;;  %v5620_v44 = vshll.u32 %v15908_v48, 16  ;;  %v5453_v55 = vld [vmem:[#allocation2 + $0xa8] sm:$0xf] }
 0x23e   : > { %12417 = vmatmul.mubr.bf16.gmra.mxu0 %v11253_v27  ;;  %v5626_v14 = vrot.slane %v5624_v2, 4  ;;  %v5232_v45 = vshrl.u32 %v11643_v41, 16  ;;  %v5235_v16 = vshll.u32 %v11643_v41, 16  ;;  %v11226_v24 = vcombine.low %v5599_v12, %v5609_v20  ;;  %v5486_v41 = vld [vmem:[#allocation2 + $0x48] sm:$0xf] }
 0x23f   : > { %v11646_v35 = vpack.c.bf16 %v4877_v25, %v4877_v25  ;;  %v5215_v17 = vshrl.u32 %v11641_v22, 16  ;;  %v5218_v37 = vshll.u32 %v11641_v22, 16  ;;  %v11644_v1 = vpack.c.bf16 %v4875_v46, %v4875_v46  ;;  %v5446_v22 = vld [vmem:[#allocation2 + $0x9c] sm:$0xf] }
 0x240   : > { %v16066_v52 = vrot.slane %v5617_v32, 4  ;;  %12445 = vmatpush3.bf16.msra.mxu1 %v12909_v6  ;;  %v5234_v28 = vrot.slane %v5232_v45, 7  ;;  %12364 = vmatprep.mubr.bf16.mxu1 %v11226_v24  ;;  %v5622_v42 = vrot.slane %v5620_v44, 5  ;;  %v5630_v26 = vshll.u32 %v16064_v7, 16  ;;  %v16091_v44 = vld [vmem:[#allocation2 + $0x4c] sm:$0xf]  ;;  %v4752_v45 = vpop.f32.mrf.mxu0 }
 0x241   : > { %v5258_v48 = vshrl.u32 %v11646_v35, 16  ;;  %v5261_v2 = vshll.u32 %v11646_v35, 16  ;;  %12446 = vmatprep.subr.bf16.mxu1 %v12913_v54  ;;  %v5217_v0 = vrot.slane %v5215_v17, 7  ;;  %v5241_v38 = vshrl.u32 %v11644_v1, 16 }
 0x242   : > { %v5244_v61 = vshll.u32 %v11644_v1, 16  ;;  %v5237_v6 = vor.u32 %v5235_v16, %v5234_v28  ;;  %v5239_v12 = vrot.slane %v5234_v28, 4  ;;  %v5623_v9 = vsel %vm13133_vm4, %v16066_v52, %v5622_v42  ;;  %v12308_v16 = vpop.f32.mrf.mxu1 }
 0x243   : > { %v16076_v30 = vrot.slane %v5258_v48, 7  ;;  %v5220_v31 = vor.u32 %v5218_v37, %v5217_v0  ;;  %v5222_v39 = vrot.slane %v5217_v0, 4  ;;  %v16081_v57 = vrot.slane %v5241_v38, 7  ;;  %v16110_v48 = vld [vmem:[#allocation2 + $0x38] sm:$0x1]  ;;  %v12342_v38 = vpop.f32.mrf.mxu0 }
 0x244   : > { %v5627_v27 = vor.u32 %v5626_v14, %v5622_v42  ;;  %12447 = vmatpush3.bf16.msra.mxu1 %v12913_v54  ;;  %v5238_v25 = vsel %vm15773_vm13, %v5230_v49, %v5237_v6  ;;  %v5444_v46 = vsel %vm15779_vm14, %v5239_v12, %v5443_v36  ;;  %v5632_v37 = vrot.slane %v5630_v26, 5  ;;  %v5488_v26 = vld [vmem:[#allocation2 + $0x54] sm:$0xf] }
 0x245   : > { %v5263_v32 = vor.u32 %v5261_v2, %v16076_v30  ;;  %v5264_v20 = vrot.slane %v16076_v30, 4  ;;  %12448 = vmatprep.subr.bf16.mxu1 %v12917_v11  ;;  %5442 = vst [vmem:[#allocation2 + $0x94] sm:$0xf] %v5238_v25  ;;  %5445 = vst [vmem:[#allocation2 + $0x98] sm:$0x1] %v5444_v46  ;;  %v5221_v49 = vsel %vm15773_vm13, %v5213_v3, %v5220_v31  ;;  %v5247_v24 = vrot.slane %v16081_v57, 4  ;;  %v4765_v25 = vpop.f32.mrf.mxu0 }
 0x246   : > { %v5437_v54 = vsel %vm15779_vm14, %v5222_v39, %v5436_v43  ;;  %v5246_v14 = vor.u32 %v5244_v61, %v16081_v57  ;;  %5435 = vst [vmem:[#allocation2 + $0x88] sm:$0xf] %v5221_v49  ;;  %v5628_v17 = vrot.slane %v5627_v27, 4  ;;  %v5683_v1 = vshrl.u32 %v5486_v41, 16  ;;  %v4295_v61 = vpop.f32.mrf.mxu1  ;;  %v16135_v46 = vld [vmem:[#allocation2 + $0x58] sm:$0xf] }
 0x247   : > { %5438 = vst [vmem:[#allocation2 + $0x8c] sm:$0x1] %v5437_v54  ;;  %v5454_v35 = vsel %vm15760_vm12, %v5263_v32, %v5453_v55  ;;  %v5686_v3 = vshll.u32 %v5486_v41, 16  ;;  %v5696_v52 = vshrl.u32 %v16091_v44, 16  ;;  %v11254_v28 = vcombine.low %v5486_v41, %v16091_v44 }
 0x248   : > { %5455 = vst [vmem:[#allocation2 + $0xa8] sm:$0xf] %v5454_v35  ;;  %v5447_v34 = vsel %vm15760_vm12, %v5246_v14, %v5446_v22  ;;  %12449 = vmatpush3.bf16.msra.mxu1 %v12917_v11  ;;  %v5633_v2 = vsel %vm13133_vm4, %v5628_v17, %v5632_v37  ;;  %v16114_v42 = vrot.slane %v5683_v1, 4  ;;  %v4337_v36 = vadd.f32 %v16054_v10, %v15662_v23  ;;  %v12925_v23 = vld [vmem:[%s18297_s3 + $0x88] sm:$0xff]  }
 0x249   : > { %5448 = vst [vmem:[#allocation2 + $0x9c] sm:$0xf] %v5447_v34  ;;  %v5641_v0 = vor.u32 %v16005_v63, %v15971_v62  ;;  %12450 = vmatprep.subr.bf16.mxu1 %v12921_v40  ;;  %v11227_v6 = vcombine.low %v5623_v9, %v5633_v2  ;;  %v16120_v12 = vrot.slane %v5686_v3, 5  ;;  %12420 = vmatprep.mubr.bf16.mxu0 %v11254_v28  ;;  %v5644_v11 = vshll.u32 %v15969_v58, 16 }
 0x24a   : > { %v5650_v43 = vrot.slane %v5648_v53, 4  ;;  %v4807_v10 = vadd.f32 %v16071_v33, %v4337_v36  ;;  %v5654_v63 = vshll.u32 %v16110_v48, 16  ;;  %v4335_v9 = vadd.f32 %v16073_v60, %v15748_v47 }
 0x24b   : > { %v5642_v62 = vrot.slane %v5641_v0, 4  ;;  %12365 = vmatmul.mubr.bf16.gmra.mxu1 %v11227_v6  ;;  %v5646_v31 = vrot.slane %v5644_v11, 5  ;;  %v4340_v39 = vadd.f32 %v12308_v16, %v15674_v29  ;;  %v4338_v55 = vadd.f32 %v4295_v61, %v15689_v21  ;;  %v12929_v29 = vld [vmem:[%s18297_s3 + $0x80] sm:$0xff]   ;;  %v16159_v0 = vld [vmem:[%s18297_s3 + $0x138] sm:$0xff]  }
 0x24c   : > { %v5707_v58 = vshrl.u32 %v5488_v26, 16  ;;  %v4846_v53 = vadd.f32 %v16041_v4, %v4807_v10  ;;  %v5656_v27 = vrot.slane %v5654_v63, 5  ;;  %v4805_v41 = vadd.f32 %v4752_v45, %v4335_v9  ;;  %12451 = vmatpush3.bf16.msra.mxu1 %v12921_v40  ;;  %v16161_v63 = vld [vmem:[#allocation2 + $0x44] sm:$0x1] }
 0x24d   : > { %v5710_v33 = vshll.u32 %v5488_v26, 16  ;;  %v5647_v32 = vsel %vm13133_vm4, %v5642_v62, %v5646_v31  ;;  %v5651_v47 = vor.u32 %v5650_v43, %v5646_v31  ;;  %v4810_v60 = vadd.f32 %v12342_v38, %v4340_v39  ;;  %12452 = vmatprep.subr.bf16.mxu1 %v12925_v23  ;;  %v5457_v31 = vld [vmem:[#allocation2 + $0xb0] sm:$0x1] }
 0x24e   : > { %v4808_v22 = vadd.f32 %v4765_v25, %v4338_v55  ;;  %v4878_v21 = vmax.f32 %v4846_v53, 0.0  ;;  %v4844_v16 = vadd.f32 %v16041_v4, %v4805_v41  ;;  %v16143_v45 = vrot.slane %v5707_v58, 4 }
 0x24f   : > { %v16145_v49 = vrot.slane %v5710_v33, 5  ;;  %v5652_v54 = vrot.slane %v5651_v47, 4  ;;  %v4849_v40 = vadd.f32 %v16041_v4, %v4810_v60  ;;  %v5720_v35 = vshrl.u32 %v16135_v46, 16  ;;  %v5450_v33 = vld [vmem:[#allocation2 + $0xa4] sm:$0x1] }
 0x250   : > { %v4847_v14 = vadd.f32 %v16041_v4, %v4808_v22  ;;  %v11647_v17 = vpack.c.bf16 %v4878_v21, %v4878_v21  ;;  %v4876_v37 = vmax.f32 %v4844_v16, 0.0  ;;  %v11255_v1 = vcombine.low %v5488_v26, %v16135_v46  ;;  %12453 = vmatpush3.bf16.msra.mxu1 %v12925_v23  ;;  %v5467_v60 = vld [vmem:[#allocation2 + $0xc0] sm:$0xf]  ;;  %v5500_v59 = vld [vmem:[#allocation2 + $0x9c] sm:$0xf] }
 0x251   : > { %v5665_v34 = vor.u32 %v16048_v19, %v16044_v50  ;;  %v5657_v3 = vsel %vm13133_vm4, %v5652_v54, %v5656_v27  ;;  %v4881_v28 = vmax.f32 %v4849_v40, 0.0  ;;  %v5668_v36 = vshll.u32 %v16031_v15, 16  ;;  %12454 = vmatprep.subr.bf16.mxu1 %v12929_v29  ;;  %v5460_v40 = vld [vmem:[#allocation2 + $0xb4] sm:$0xf] }
 0x252   : > { %v4879_v2 = vmax.f32 %v4847_v14, 0.0  ;;  %v5266_v38 = vshrl.u32 %v11647_v17, 16  ;;  %v5269_v61 = vshll.u32 %v11647_v17, 16  ;;  %v11228_v26 = vcombine.low %v5647_v32, %v5657_v3  ;;  %12421 = vmatmul.mubr.bf16.gmra.mxu0 %v11255_v1  ;;  %v5490_v14 = vld [vmem:[#allocation2 + $0x60] sm:$0xf]  ;;  %v12309_v17 = vpop.f32.mrf.mxu1 }
 0x253   : > { %v11645_v6 = vpack.c.bf16 %v4876_v37, %v4876_v37  ;;  %v11650_v50 = vpack.c.bf16 %v4881_v28, %v4881_v28  ;;  %v5666_v11 = vrot.slane %v5665_v34, 4  ;;  %v5670_v43 = vrot.slane %v5668_v36, 5  ;;  %v16183_v3 = vld [vmem:[#allocation2 + $0x64] sm:$0xf] }
 0x254   : > { %v11648_v19 = vpack.c.bf16 %v4879_v2, %v4879_v2  ;;  %v5268_v23 = vrot.slane %v5266_v38, 7  ;;  %12368 = vmatprep.mubr.bf16.mxu1 %v11228_v26  ;;  %v5674_v9 = vrot.slane %v5672_v13, 4  ;;  %12455 = vmatpush3.bf16.msra.mxu1 %v12929_v29  ;;  %v5678_v22 = vshll.u32 %v16161_v63, 16  ;;  %v16191_v38 = vld [vmem:[#allocation2 + $0x50] sm:$0x1] }
 0x255   : > { %v5249_v10 = vshrl.u32 %v11645_v6, 16  ;;  %v5252_v62 = vshll.u32 %v11645_v6, 16  ;;  %v5292_v39 = vshrl.u32 %v11650_v50, 16  ;;  %v5295_v55 = vshll.u32 %v11650_v50, 16  ;;  %12536 = vmatprep.subr.bf16.mxu1 %v16159_v0 }
 0x256   : > { %v5275_v58 = vshrl.u32 %v11648_v19, 16  ;;  %v5278_v53 = vshll.u32 %v11648_v19, 16  ;;  %v5271_v27 = vor.u32 %v5269_v61, %v5268_v23  ;;  %v5273_v41 = vrot.slane %v5268_v23, 4  ;;  %v4298_v23 = vpop.f32.mrf.mxu1 }
 0x257   : > { %v5251_v25 = vrot.slane %v5249_v10, 7  ;;  %v5671_v32 = vsel %vm13133_vm4, %v5666_v11, %v5670_v43  ;;  %v16168_v47 = vrot.slane %v5292_v39, 7  ;;  %v5675_v13 = vor.u32 %v5674_v9, %v5670_v43  ;;  %v12343_v43 = vpop.f32.mrf.mxu0  ;;  %v5492_v10 = vld [vmem:[#allocation2 + $0x6c] sm:$0xf]  ;;  %v16208_v39 = vld [vmem:[#allocation2 + $0x70] sm:$0xf] }
 0x258   : > { %v16170_v15 = vrot.slane %v5275_v58, 7  ;;  %v5272_v29 = vsel %vm15773_vm13, %v5264_v20, %v5271_v27  ;;  %v5458_v21 = vsel %vm15779_vm14, %v5273_v41, %v5457_v31  ;;  %v5680_v36 = vrot.slane %v5678_v22, 5  ;;  %v16217_v22 = vld [vmem:[#allocation2 + $0x5c] sm:$0x1] }
 0x259   : > { %v5254_v16 = vor.u32 %v5252_v62, %v5251_v25  ;;  %v5256_v54 = vrot.slane %v5251_v25, 4  ;;  %5456 = vst [vmem:[#allocation2 + $0xac] sm:$0xf] %v5272_v29  ;;  %5459 = vst [vmem:[#allocation2 + $0xb0] sm:$0x1] %v5458_v21  ;;  %v5297_v37 = vor.u32 %v5295_v55, %v16168_v47  ;;  %v5298_v1 = vrot.slane %v16168_v47, 4 }
 0x25a   : > { %v5280_v34 = vor.u32 %v5278_v53, %v16170_v15  ;;  %v5281_v30 = vrot.slane %v16170_v15, 4  ;;  %v5676_v2 = vrot.slane %v5675_v13, 4  ;;  %v5731_v6 = vshrl.u32 %v5490_v14, 16 }
 0x25b   : > { %v5255_v20 = vsel %vm15773_vm13, %v5247_v24, %v5254_v16  ;;  %v5451_v28 = vsel %vm15779_vm14, %v5256_v54, %v5450_v33  ;;  %v5468_v61 = vsel %vm15760_vm12, %v5297_v37, %v5467_v60  ;;  %v5734_v57 = vshll.u32 %v5490_v14, 16  ;;  %v4768_v60 = vpop.f32.mrf.mxu0  ;;  %v5494_v54 = vld [vmem:[#allocation2 + $0x78] sm:$0xf] }
 0x25c   : > { %5449 = vst [vmem:[#allocation2 + $0xa0] sm:$0xf] %v5255_v20  ;;  %5452 = vst [vmem:[#allocation2 + $0xa4] sm:$0x1] %v5451_v28  ;;  %v5461_v26 = vsel %vm15760_vm12, %v5280_v34, %v5460_v40  ;;  %v5681_v24 = vsel %vm13133_vm4, %v5676_v2, %v5680_v36  ;;  %v5744_v50 = vshrl.u32 %v16183_v3, 16  ;;  %v11256_v19 = vcombine.low %v5490_v14, %v16183_v3 }
 0x25d   : > { %5469 = vst [vmem:[#allocation2 + $0xc0] sm:$0xf] %v5468_v61  ;;  %5462 = vst [vmem:[#allocation2 + $0xb4] sm:$0xf] %v5461_v26  ;;  %v4341_v11 = vadd.f32 %v12309_v17, %v15700_v5  ;;  %v11229_v62 = vcombine.low %v5671_v32, %v5681_v24  ;;  %v16202_v9 = vrot.slane %v5731_v6, 4  ;;  %v16204_v18 = vrot.slane %v5734_v57, 5 }
 0x25e   : > { %v5689_v31 = vor.u32 %v16120_v12, %v16114_v42  ;;  %12424 = vmatprep.mubr.bf16.mxu0 %v11256_v19  ;;  %v5692_v58 = vshll.u32 %v16091_v44, 16  ;;  %v5698_v5 = vrot.slane %v5696_v52, 4  ;;  %v5702_v53 = vshll.u32 %v16191_v38, 16  ;;  %v16233_v2 = vld [vmem:[#allocation2 + $0x7c] sm:$0xf] }
 0x25f   : > { %v4811_v55 = vadd.f32 %v12343_v43, %v4341_v11  ;;  %12369 = vmatmul.mubr.bf16.gmra.mxu1 %v11229_v62  ;;  %v4339_v41 = vadd.f32 %v4298_v23, %v15751_v8  ;;  %v5755_v25 = vshrl.u32 %v5492_v10, 16  ;;  %v5758_v33 = vshll.u32 %v5492_v10, 16 }
 0x260   : > { %v5690_v27 = vrot.slane %v5689_v31, 4  ;;  %v5694_v42 = vrot.slane %v5692_v58, 5  ;;  %v5704_v12 = vrot.slane %v5702_v53, 5  ;;  %v5768_v13 = vshrl.u32 %v16208_v39, 16  ;;  %v16245_v53 = vld [vmem:[#allocation2 + $0x68] sm:$0x1] }
 0x261   : > { %v4850_v32 = vadd.f32 %v16041_v4, %v4811_v55  ;;  %v4809_v29 = vadd.f32 %v4768_v60, %v4339_v41  ;;  %v16219_v21 = vrot.slane %v5755_v25, 4  ;;  %v16221_v52 = vrot.slane %v5758_v33, 5 }
 0x262   : > { %v11257_v16 = vcombine.low %v5492_v10, %v16208_v39  ;;  %v5695_v40 = vsel %vm13133_vm4, %v5690_v27, %v5694_v42  ;;  %v5699_v14 = vor.u32 %v5698_v5, %v5694_v42  ;;  %v5713_v17 = vor.u32 %v16145_v49, %v16143_v45  ;;  %v5471_v27 = vld [vmem:[#allocation2 + $0xc8] sm:$0x1] }
 0x263   : > { %v4882_v8 = vmax.f32 %v4850_v32, 0.0  ;;  %v4848_v37 = vadd.f32 %v16041_v4, %v4809_v29  ;;  %v5716_v34 = vshll.u32 %v16135_v46, 16  ;;  %v5722_v20 = vrot.slane %v5720_v35, 4 }
 0x264   : > { %12425 = vmatmul.mubr.bf16.gmra.mxu0 %v11257_v16  ;;  %v5726_v28 = vshll.u32 %v16217_v22, 16  ;;  %v5700_v61 = vrot.slane %v5699_v14, 4  ;;  %v5714_v26 = vrot.slane %v5713_v17, 4  ;;  %v5779_v6 = vshrl.u32 %v5494_v54, 16  ;;  %v5496_v16 = vld [vmem:[#allocation2 + $0x84] sm:$0xf] }
 0x265   : > { %v11651_v36 = vpack.c.bf16 %v4882_v8, %v4882_v8  ;;  %v4880_v57 = vmax.f32 %v4848_v37, 0.0  ;;  %v5718_v24 = vrot.slane %v5716_v34, 5  ;;  %v5782_v45 = vshll.u32 %v5494_v54, 16  ;;  %v16255_v17 = vld [vmem:[#allocation2 + $0x88] sm:$0xf] }
 0x266   : > { %v5728_v19 = vrot.slane %v5726_v28, 5  ;;  %v5705_v11 = vsel %vm13133_vm4, %v5700_v61, %v5704_v12  ;;  %v16237_v43 = vrot.slane %v5779_v6, 4  ;;  %v5792_v58 = vshrl.u32 %v16233_v2, 16  ;;  %v5464_v37 = vld [vmem:[#allocation2 + $0xbc] sm:$0x1] }
 0x267   : > { %v5300_v49 = vshrl.u32 %v11651_v36, 16  ;;  %v5303_v4 = vshll.u32 %v11651_v36, 16  ;;  %v11230_v35 = vcombine.low %v5695_v40, %v5705_v11  ;;  %v11649_v23 = vpack.c.bf16 %v4880_v57, %v4880_v57  ;;  %v16266_v57 = vld [vmem:[#allocation2 + $0x74] sm:$0x1] }
 0x268   : > { %v5719_v10 = vsel %vm13133_vm4, %v5714_v26, %v5718_v24  ;;  %v5723_v62 = vor.u32 %v5722_v20, %v5718_v24  ;;  %v16241_v55 = vrot.slane %v5782_v45, 5  ;;  %v11258_v5 = vcombine.low %v5494_v54, %v16233_v2  ;;  %v5498_v24 = vld [vmem:[#allocation2 + $0x90] sm:$0xf]  ;;  %v16275_v11 = vld [vmem:[#allocation2 + $0x94] sm:$0xf] }
 0x269   : > { %v5302_v31 = vrot.slane %v5300_v49, 7  ;;  %12372 = vmatprep.mubr.bf16.mxu1 %v11230_v35  ;;  %v5283_v41 = vshrl.u32 %v11649_v23, 16  ;;  %v5286_v25 = vshll.u32 %v11649_v23, 16  ;;  %v5737_v32 = vor.u32 %v16204_v18, %v16202_v9 }
 0x26a   : > { %v5724_v33 = vrot.slane %v5723_v62, 4  ;;  %12428 = vmatprep.mubr.bf16.mxu0 %v11258_v5  ;;  %v5740_v60 = vshll.u32 %v16183_v3, 16  ;;  %v5746_v29 = vrot.slane %v5744_v50, 4  ;;  %v5750_v14 = vshll.u32 %v16245_v53, 16  ;;  %v16280_v62 = vld [vmem:[#allocation2 + $0x80] sm:$0x1] }
 0x26b   : > { %v5305_v42 = vor.u32 %v5303_v4, %v5302_v31  ;;  %v5307_v12 = vrot.slane %v5302_v31, 4  ;;  %v5285_v54 = vrot.slane %v5283_v41, 7  ;;  %v5738_v40 = vrot.slane %v5737_v32, 4 }
 0x26c   : > { %v5729_v8 = vsel %vm13133_vm4, %v5724_v33, %v5728_v19  ;;  %v5742_v34 = vrot.slane %v5740_v60, 5  ;;  %v5752_v36 = vrot.slane %v5750_v14, 5  ;;  %v5803_v61 = vshrl.u32 %v5496_v16, 16 }
 0x26d   : > { %v5306_v9 = vsel %vm15773_vm13, %v5298_v1, %v5305_v42  ;;  %v5472_v18 = vsel %vm15779_vm14, %v5307_v12, %v5471_v27  ;;  %v11231_v50 = vcombine.low %v5719_v10, %v5729_v8  ;;  %v5288_v20 = vor.u32 %v5286_v25, %v5285_v54 }
 0x26e   : > { %5470 = vst [vmem:[#allocation2 + $0xc4] sm:$0xf] %v5306_v9  ;;  %5473 = vst [vmem:[#allocation2 + $0xc8] sm:$0x1] %v5472_v18  ;;  %v5290_v28 = vrot.slane %v5285_v54, 4  ;;  %v5743_v26 = vsel %vm13133_vm4, %v5738_v40, %v5742_v34  ;;  %v5747_v47 = vor.u32 %v5746_v29, %v5742_v34  ;;  %v5806_v6 = vshll.u32 %v5496_v16, 16 }
 0x26f   : > { %12373 = vmatmul.mubr.bf16.gmra.mxu1 %v11231_v50  ;;  %v5816_v1 = vshrl.u32 %v16255_v17, 16  ;;  %v5289_v19 = vsel %vm15773_vm13, %v5281_v30, %v5288_v20  ;;  %v5805_v49 = vrot.slane %v5803_v61, 4  ;;  %v11259_v4 = vcombine.low %v5496_v16, %v16255_v17  ;;  %v16300_v34 = vld [vmem:[#allocation2 + $0x8c] sm:$0x1] }
 0x270   : > { %v5465_v45 = vsel %vm15779_vm14, %v5290_v28, %v5464_v37  ;;  %5463 = vst [vmem:[#allocation2 + $0xb8] sm:$0xf] %v5289_v19  ;;  %v5748_v35 = vrot.slane %v5747_v47, 4  ;;  %v5808_v23 = vrot.slane %v5806_v6, 5  ;;  %v5761_v10 = vor.u32 %v16221_v52, %v16219_v21  ;;  %v16288_v52 = vld [vmem:[#allocation2 + $0xa0] sm:$0xf] }
 0x271   : > { %5466 = vst [vmem:[#allocation2 + $0xbc] sm:$0x1] %v5465_v45  ;;  %v5764_v15 = vshll.u32 %v16208_v39, 16  ;;  %12429 = vmatmul.mubr.bf16.gmra.mxu0 %v11259_v4  ;;  %v5770_v51 = vrot.slane %v5768_v13, 4  ;;  %v5774_v30 = vshll.u32 %v16266_v57, 16  ;;  %v5827_v31 = vshrl.u32 %v5498_v24, 16 }
 0x272   : > { %v5830_v5 = vshll.u32 %v5498_v24, 16  ;;  %v5753_v27 = vsel %vm13133_vm4, %v5748_v35, %v5752_v36  ;;  %v5762_v41 = vrot.slane %v5761_v10, 4  ;;  %v5840_v21 = vshrl.u32 %v16275_v11, 16  ;;  %v5502_v36 = vld [vmem:[#allocation2 + $0xa8] sm:$0xf] }
 0x273   : > { %v5766_v25 = vrot.slane %v5764_v15, 5  ;;  %v11232_v33 = vcombine.low %v5743_v26, %v5753_v27  ;;  %v5776_v32 = vrot.slane %v5774_v30, 5  ;;  %v5829_v42 = vrot.slane %v5827_v31, 4  ;;  %v16308_v6 = vld [vmem:[#allocation2 + $0xac] sm:$0xf] }
 0x274   : > { %v5832_v12 = vrot.slane %v5830_v5, 5  ;;  %v11260_v29 = vcombine.low %v5498_v24, %v16275_v11  ;;  %v5785_v16 = vor.u32 %v16241_v55, %v16237_v43  ;;  %v5788_v54 = vshll.u32 %v16233_v2, 16  ;;  %v5504_v5 = vld [vmem:[#allocation2 + $0xb4] sm:$0xf] }
 0x275   : > { %v5767_v13 = vsel %vm13133_vm4, %v5762_v41, %v5766_v25  ;;  %v5771_v60 = vor.u32 %v5770_v51, %v5766_v25  ;;  %12376 = vmatprep.mubr.bf16.mxu1 %v11232_v33  ;;  %v5794_v8 = vrot.slane %v5792_v58, 4  ;;  %v5798_v40 = vshll.u32 %v16280_v62, 16  ;;  %v16313_v51 = vld [vmem:[#allocation2 + $0x98] sm:$0x1] }
 0x276   : > { %v5851_v14 = vshrl.u32 %v5500_v59, 16  ;;  %12432 = vmatprep.mubr.bf16.mxu0 %v11260_v29  ;;  %v5786_v18 = vrot.slane %v5785_v16, 4  ;;  %v5854_v37 = vshll.u32 %v5500_v59, 16  ;;  %v5864_v50 = vshrl.u32 %v16288_v52, 16 }
 0x277   : > { %v5772_v9 = vrot.slane %v5771_v60, 4  ;;  %v5790_v20 = vrot.slane %v5788_v54, 5  ;;  %v5800_v28 = vrot.slane %v5798_v40, 5  ;;  %v11261_v55 = vcombine.low %v5500_v59, %v16288_v52  ;;  %v16319_v33 = vld [vmem:[#allocation2 + $0xb8] sm:$0xf] }
 0x278   : > { %v16302_v43 = vrot.slane %v5851_v14, 4  ;;  %v5856_v61 = vrot.slane %v5854_v37, 5  ;;  %v5809_v26 = vor.u32 %v5808_v23, %v5805_v49  ;;  %v5812_v47 = vshll.u32 %v16255_v17, 16 }
 0x279   : > { %v5777_v58 = vsel %vm13133_vm4, %v5772_v9, %v5776_v32  ;;  %v5791_v19 = vsel %vm13133_vm4, %v5786_v18, %v5790_v20  ;;  %v5795_v45 = vor.u32 %v5794_v8, %v5790_v20  ;;  %12433 = vmatmul.mubr.bf16.gmra.mxu0 %v11261_v55  ;;  %v5818_v4 = vrot.slane %v5816_v1, 4 }
 0x27a   : > { %v11233_v24 = vcombine.low %v5767_v13, %v5777_v58  ;;  %v5810_v35 = vrot.slane %v5809_v26, 4  ;;  %v5814_v10 = vrot.slane %v5812_v47, 5  ;;  %v5822_v15 = vshll.u32 %v16300_v34, 16  ;;  %v12927_v47 = vld [vmem:[#allocation2 + $0xc] sm:$0xff]  }
 0x27b   : > { %v5875_v59 = vshrl.u32 %v5502_v36, 16  ;;  %v5796_v49 = vrot.slane %v5795_v45, 4  ;;  %v5878_v23 = vshll.u32 %v5502_v36, 16  ;;  %v5888_v30 = vshrl.u32 %v16308_v6, 16 }
 0x27c   : > { %12377 = vmatmul.mubr.bf16.gmra.mxu1 %v11233_v24  ;;  %v11262_v31 = vcombine.low %v5502_v36, %v16308_v6  ;;  %v5815_v27 = vsel %vm13133_vm4, %v5810_v35, %v5814_v10  ;;  %v5819_v41 = vor.u32 %v5818_v4, %v5814_v10  ;;  %v5824_v1 = vrot.slane %v5822_v15, 5  ;;  %v16333_v24 = vld [vmem:[#allocation2 + $0xb0] sm:$0x1] }
 0x27d   : > { %v5877_v25 = vrot.slane %v5875_v59, 4  ;;  %v5801_v32 = vsel %vm13133_vm4, %v5796_v49, %v5800_v28  ;;  %v5880_v13 = vrot.slane %v5878_v23, 5  ;;  %v5833_v60 = vor.u32 %v5832_v12, %v5829_v42  ;;  %v16329_v12 = vld [vmem:[#allocation2 + $0xa4] sm:$0x1] }
 0x27e   : > { %12436 = vmatprep.mubr.bf16.mxu0 %v11262_v31  ;;  %v5836_v29 = vshll.u32 %v16275_v11, 16  ;;  %v11234_v16 = vcombine.low %v5791_v19, %v5801_v32  ;;  %v5820_v54 = vrot.slane %v5819_v41, 4  ;;  %v5842_v8 = vrot.slane %v5840_v21, 4  ;;  %v6517_v41 = vld [vmem:[#allocation2] sm:$0xe] }
 0x27f   : > { %v5846_v40 = vshll.u32 %v16313_v51, 16  ;;  %v5834_v14 = vrot.slane %v5833_v60, 4  ;;  %v5899_v18 = vshrl.u32 %v5504_v5, 16  ;;  %v5902_v37 = vshll.u32 %v5504_v5, 16  ;;  %v16342_v32 = vld [vmem:[#allocation2 + $0xbc] sm:$0x1] }
 0x280   : > { %v5838_v9 = vrot.slane %v5836_v29, 5  ;;  %12380 = vmatprep.mubr.bf16.mxu1 %v11234_v16  ;;  %v5825_v20 = vsel %vm13133_vm4, %v5820_v54, %v5824_v1  ;;  %v5912_v28 = vshrl.u32 %v16319_v33, 16  ;;  %v11263_v42 = vcombine.low %v5504_v5, %v16319_v33 }
 0x281   : > { %v5848_v55 = vrot.slane %v5846_v40, 5  ;;  %v11235_v36 = vcombine.low %v5815_v27, %v5825_v20  ;;  %v5901_v26 = vrot.slane %v5899_v18, 4  ;;  %v5904_v19 = vrot.slane %v5902_v37, 5  ;;  %v6518_v40 = vld [vmem:[#allocation2 + $0xc] sm:$0xe] }
 0x282   : > { %v5839_v21 = vsel %vm13133_vm4, %v5834_v14, %v5838_v9  ;;  %v5843_v58 = vor.u32 %v5842_v8, %v5838_v9  ;;  %12437 = vmatmul.mubr.bf16.gmra.mxu0 %v11263_v42  ;;  %v5857_v45 = vor.u32 %v5856_v61, %v16302_v43  ;;  %v5860_v4 = vshll.u32 %v16288_v52, 16  ;;  %v12930_v9 = vld [vmem:[#allocation2 + $0x18] sm:$0xff]  }
 0x283   : > { %v5866_v35 = vrot.slane %v5864_v50, 4  ;;  %v5870_v15 = vshll.u32 %v16329_v12, 16  ;;  %12504 = vmatprep.mubr.bf16.mxu0 %v12927_v47  ;;  %v5881_v59 = vor.u32 %v5880_v13, %v5877_v25  ;;  %v5884_v49 = vshll.u32 %v16308_v6, 16 }
 0x284   : > { %12381 = vmatmul.mubr.bf16.gmra.mxu1 %v11235_v36  ;;  %v5844_v10 = vrot.slane %v5843_v58, 4  ;;  %v5858_v23 = vrot.slane %v5857_v45, 4  ;;  %v5862_v31 = vrot.slane %v5860_v4, 5  ;;  %v5890_v5 = vrot.slane %v5888_v30, 4  ;;  %v13005_v58 = vld [vmem:[#allocation2 + $0x4] sm:$0xf] }
 0x285   : > { %v5894_v27 = vshll.u32 %v16333_v24, 16  ;;  %v5872_v61 = vrot.slane %v5870_v15, 5  ;;  %v5882_v1 = vrot.slane %v5881_v59, 4  ;;  %v5886_v50 = vrot.slane %v5884_v49, 5  ;;  %v13006_v4 = vld [vmem:[#allocation2 + $0x8] sm:$0x1] }
 0x286   : > { %v5849_v43 = vsel %vm13133_vm4, %v5844_v10, %v5848_v55  ;;  %v5863_v25 = vsel %vm13133_vm4, %v5858_v23, %v5862_v31  ;;  %v5867_v13 = vor.u32 %v5866_v35, %v5862_v31  ;;  %v5905_v54 = vor.u32 %v5904_v19, %v5901_v26  ;;  %v12939_v26 = vld [vmem:[%s18297_s3 + $0x170] sm:$0xff]   ;;  %v6519_v10 = vld [vmem:[#allocation2 + $0x18] sm:$0xe] }
 0x287   : > { %v11236_v60 = vcombine.low %v5839_v21, %v5849_v43  ;;  %v5896_v29 = vrot.slane %v5894_v27, 5  ;;  %v5887_v30 = vsel %vm13133_vm4, %v5882_v1, %v5886_v50  ;;  %v5891_v16 = vor.u32 %v5890_v5, %v5886_v50  ;;  %v12931_v21 = vld [vmem:[#allocation2 + $0x24] sm:$0xff]   ;;  %v13007_v43 = vld [vmem:[#allocation2 + $0x10] sm:$0xf]  ;;  %v13008_v1 = vld [vmem:[%s18297_s3 + $0x178] sm:$0xff]  }
 0x288   : > { %v5908_v8 = vshll.u32 %v16319_v33, 16  ;;  %v5868_v14 = vrot.slane %v5867_v13, 4  ;;  %v5914_v18 = vrot.slane %v5912_v28, 4  ;;  %v5918_v37 = vshll.u32 %v16342_v32, 16  ;;  %v6520_v50 = vld [vmem:[#allocation2 + $0x24] sm:$0xe] }
 0x289   : > { %12384 = vmatprep.mubr.bf16.mxu1 %v11236_v60  ;;  %v11272_v20 = vrot.slane %v6517_v41, 9  ;;  %v5892_v55 = vrot.slane %v5891_v16, 4  ;;  %v5906_v42 = vrot.slane %v5905_v54, 4  ;;  %v6567_v47 = vrot.slane %v13005_v58, 5  ;;  %v13010_v16 = vld [vmem:[#allocation2 + $0x1c] sm:$0xf] }
 0x28a   : > { %v5910_v36 = vrot.slane %v5908_v8, 5  ;;  %v5873_v19 = vsel %vm13133_vm4, %v5868_v14, %v5872_v61  ;;  %12505 = vmatmul.mubr.bf16.vlgmr.msra.gmra.mxu0 %v12930_v9  ;;  %v5920_v45 = vrot.slane %v5918_v37, 5  ;;  %v6570_v28 = vrot.slane %v13006_v4, 5  ;;  %v12943_v54 = vld [vmem:[%s18297_s3 + $0x168] sm:$0xff]   ;;  %v13011_v9 = vld [vmem:[#allocation2 + $0x20] sm:$0x1] }
 0x28b   : > { %v11273_v35 = vrot.slane %v6518_v40, 9  ;;  %v11237_v15 = vcombine.low %v5863_v25, %v5873_v19  ;;  %v5897_v59 = vsel %vm13133_vm4, %v5892_v55, %v5896_v29  ;;  %12508 = vmatprep.mubr.bf16.mxu0 %v12931_v21  ;;  %v16361_v27 = vsel %vm13419_vm7, %v11272_v20, %v6567_v47  ;;  %12585 = vmatpush3.bf16.msra.mxu0 %v13008_v1  ;;  %v13009_v25 = vld [vmem:[#allocation2 + $0x14] sm:$0x1]  ;;  %v6521_v37 = vld [vmem:[#allocation2 + $0x30] sm:$0xe]  ;;  %v18707_v5 = vld [vmem:[#allocation32_spill] sm:$0xff] }
 0x28c   : > { %v5911_v49 = vsel %vm13133_vm4, %v5906_v42, %v5910_v36  ;;  %v5915_v23 = vor.u32 %v5914_v18, %v5910_v36  ;;  %v11238_v31 = vcombine.low %v5887_v30, %v5897_v59  ;;  %v6569_v41 = vrot.slane %v6567_v47, 4  ;;  %12586 = vmatprep.subr.bf16.mxu0 %v12939_v26  ;;  %v12932_v58 = vld [vmem:[#allocation2 + $0x30] sm:$0xff]   ;;  %v13012_v4 = vld [vmem:[#allocation2 + $0x28] sm:$0xf] }
 0x28d   : > { %v6574_v61 = vrot.slane %v13007_v43, 5  ;;  %12385 = vmatmul.mubr.bf16.gmra.mxu1 %v11237_v15  ;;  %v6577_v13 = vrot.slane %v13009_v25, 5  ;;  %v11274_v29 = vrot.slane %v6519_v10, 9  ;;  %v6581_v30 = vrot.slane %v13010_v16, 5  ;;  %v12934_v10 = vld [vmem:[#allocation2 + $0x3c] sm:$0xff]  }
 0x28e   : > { %v5916_v60 = vrot.slane %v5915_v23, 4  ;;  %12388 = vmatprep.mubr.bf16.mxu1 %v11238_v31  ;;  %v6571_v8 = vsel %vm13419_vm7, %v6569_v41, %v6570_v28  ;;  %v6584_v18 = vrot.slane %v13011_v9, 5  ;;  %v11275_v19 = vrot.slane %v6520_v50, 9  ;;  %v6523_v23 = vld [vmem:[#allocation2 + $0x48] sm:$0xe]  ;;  %v12947_v31 = vld [vmem:[%s18297_s3 + $0x160] sm:$0xff]  }
 0x28f   : > { %v16373_v40 = vsel %vm13419_vm7, %v11273_v35, %v6574_v61  ;;  %v6576_v14 = vrot.slane %v6574_v61, 4  ;;  %v11304_v55 = vcombine.low %v16361_v27, %v6571_v8  ;;  %v16380_v42 = vsel %vm13419_vm7, %v11274_v29, %v6581_v30  ;;  %12587 = vmatpush3.bf16.msra.mxu0 %v12939_v26  ;;  %v6522_v35 = vld [vmem:[#allocation2 + $0x3c] sm:$0xe]  ;;  %v13013_v43 = vld [vmem:[#allocation2 + $0x34] sm:$0xf] }
 0x290   : > { %v5921_v20 = vsel %vm13133_vm4, %v5916_v60, %v5920_v45  ;;  %v6583_v36 = vrot.slane %v6581_v30, 4  ;;  %v6588_v28 = vrot.slane %v13012_v4, 5  ;;  %v6591_v59 = vrot.slane %v16064_v7, 5  ;;  %12588 = vmatprep.subr.bf16.mxu0 %v12943_v54  ;;  %v13014_v50 = vld [vmem:[#allocation2 + $0x40] sm:$0xf] }
 0x291   : > { %v11239_v21 = vcombine.low %v5911_v49, %v5921_v20  ;;  %v16384_v47 = vsel %vm13419_vm7, %v6576_v14, %v6577_v13  ;;  %v11276_v49 = vrot.slane %v6521_v37, 9  ;;  %v6595_v61 = vrot.slane %v13013_v43, 5  ;;  %v6524_v13 = vld [vmem:[#allocation2 + $0x54] sm:$0xe]  ;;  %v6526_v4 = vld [vmem:[#allocation2 + $0x6c] sm:$0xe] }
 0x292   : > { %v11305_v45 = vcombine.low %v16373_v40, %v16384_v47  ;;  %v16390_v15 = vsel %vm13419_vm7, %v6583_v36, %v6584_v18  ;;  %12509 = vmatmul.mubr.bf16.gmra.mxu0 %v12932_v58  ;;  %v16400_v27 = vsel %vm13419_vm7, %v11275_v19, %v6588_v28  ;;  %v6590_v41 = vrot.slane %v6588_v28, 4  ;;  %v12951_v18 = vld [vmem:[%s18297_s3 + $0x158] sm:$0xff]   ;;  %v12936_v28 = vld [vmem:[#allocation2 + $0x48] sm:$0xff]  }
 0x293   : > { %v11306_v26 = vcombine.low %v16380_v42, %v16390_v15  ;;  %12512 = vmatprep.mubr.bf16.mxu0 %v12934_v10  ;;  %v6598_v7 = vrot.slane %v16110_v48, 5  ;;  %v11277_v1 = vrot.slane %v6522_v35, 9  ;;  %v6602_v60 = vrot.slane %v13014_v50, 5  ;;  %12589 = vmatpush3.bf16.msra.mxu0 %v12943_v54  ;;  %v12938_v35 = vld [vmem:[#allocation2 + $0x54] sm:$0xff]  }
 0x294   : > { %v6605_v25 = vrot.slane %v16161_v63, 5  ;;  %v16406_v29 = vsel %vm13419_vm7, %v6590_v41, %v6591_v59  ;;  %v16410_v16 = vsel %vm13419_vm7, %v11276_v49, %v6595_v61  ;;  %v6597_v30 = vrot.slane %v6595_v61, 4  ;;  %12590 = vmatprep.subr.bf16.mxu0 %v12947_v31  ;;  %v6527_v61 = vld [vmem:[#allocation2 + $0x78] sm:$0xe] }
 0x295   : > { %v11278_v8 = vrot.slane %v6523_v23, 9  ;;  %12389 = vmatmul.mubr.bf16.gmra.mxu1 %v11239_v21  ;;  %v11307_v48 = vcombine.low %v16400_v27, %v16406_v29  ;;  %v16416_v14 = vsel %vm13419_vm7, %v11277_v1, %v6602_v60  ;;  %v6604_v63 = vrot.slane %v6602_v60, 4  ;;  %v6525_v21 = vld [vmem:[#allocation2 + $0x60] sm:$0xe] }
 0x296   : > { %v6609_v9 = vrot.slane %v16091_v44, 5  ;;  %12456 = vmatprep.mubr.bf16.mxu1 %v11304_v55  ;;  %v16424_v54 = vsel %vm13419_vm7, %v6597_v30, %v6598_v7  ;;  %v6612_v37 = vrot.slane %v16191_v38, 5  ;;  %v11279_v20 = vrot.slane %v6524_v13, 9  ;;  %v12955_v7 = vld [vmem:[%s18297_s3 + $0x150] sm:$0xff]  }
 0x297   : > { %v6616_v36 = vrot.slane %v16135_v46, 5  ;;  %v11308_v58 = vcombine.low %v16410_v16, %v16424_v54  ;;  %v16432_v44 = vsel %vm13419_vm7, %v6604_v63, %v6605_v25  ;;  %v6619_v59 = vrot.slane %v16217_v22, 5  ;;  %12591 = vmatpush3.bf16.msra.mxu0 %v12947_v31 }
 0x298   : > { %v16436_v55 = vsel %vm13419_vm7, %v11278_v8, %v6609_v9  ;;  %v6611_v19 = vrot.slane %v6609_v9, 4  ;;  %v11309_v38 = vcombine.low %v16416_v14, %v16432_v44  ;;  %v11280_v23 = vrot.slane %v6525_v21, 9  ;;  %12592 = vmatprep.subr.bf16.mxu0 %v12951_v18  ;;  %v6529_v21 = vld [vmem:[#allocation2 + $0x90] sm:$0xe] }
 0x299   : > { %v16442_v46 = vsel %vm13419_vm7, %v11279_v20, %v6616_v36  ;;  %v6618_v10 = vrot.slane %v6616_v36, 4  ;;  %v6623_v41 = vrot.slane %v16183_v3, 5  ;;  %v6626_v43 = vrot.slane %v16245_v53, 5  ;;  %v6528_v3 = vld [vmem:[#allocation2 + $0x84] sm:$0xe]  ;;  %v12937_v53 = vld [vmem:[%s18297_s3 + $0x130] sm:$0xff]  }
 0x29a   : > { %v16447_v49 = vsel %vm13419_vm7, %v6611_v19, %v6612_v37  ;;  %12513 = vmatmul.mubr.bf16.gmra.mxu0 %v12936_v28  ;;  %v11281_v1 = vrot.slane %v6526_v4, 9  ;;  %v6630_v50 = vrot.slane %v16208_v39, 5  ;;  %v6633_v30 = vrot.slane %v16266_v57, 5  ;;  %v16512_v4 = vld [vmem:[#allocation2 + $0x10] sm:$0xf]  ;;  %v12940_v28 = vld [vmem:[#allocation2 + $0x60] sm:$0xff]  }
 0x29b   : > { %v11310_v22 = vcombine.low %v16436_v55, %v16447_v49  ;;  %v16458_v31 = vsel %vm13419_vm7, %v6618_v10, %v6619_v59  ;;  %12516 = vmatprep.mubr.bf16.mxu0 %v12938_v35  ;;  %v16468_v25 = vsel %vm13419_vm7, %v11280_v23, %v6623_v41  ;;  %v6625_v13 = vrot.slane %v6623_v41, 4  ;;  %12593 = vmatpush3.bf16.msra.mxu0 %v12951_v18  ;;  %v8139_v18 = vld [vmem:[#allocation2 + $0xc] sm:$0xe]  ;;  %v16520_v41 = vld [vmem:[#allocation2 + $0x14] sm:$0x1] }
 0x29c   : > { %v11311_v60 = vcombine.low %v16442_v46, %v16458_v31  ;;  %v16473_v8 = vsel %vm13419_vm7, %v11281_v1, %v6630_v50  ;;  %v6632_v39 = vrot.slane %v6630_v50, 4  ;;  %v11282_v63 = vrot.slane %v6527_v61, 9  ;;  %12594 = vmatprep.subr.bf16.mxu0 %v12955_v7  ;;  %v16699_v31 = vld [vmem:[%s18297_s3 + $0x1b8] sm:$0xff]  }
 0x29d   : > { %v6637_v9 = vrot.slane %v16233_v2, 5  ;;  %12457 = vmatmul.mubr.bf16.vlgmr.msra.gmra.mxu1 %v11305_v45  ;;  %v16481_v37 = vsel %vm13419_vm7, %v6625_v13, %v6626_v43  ;;  %v6640_v20 = vrot.slane %v16280_v62, 5  ;;  %v11283_v57 = vrot.slane %v6528_v3, 9  ;;  %v12958_v2 = vld [vmem:[%s18297_s3 + $0x148] sm:$0xff]   ;;  %v6530_v45 = vld [vmem:[#allocation2 + $0x9c] sm:$0xe] }
 0x29e   : > { %v6644_v36 = vrot.slane %v16255_v17, 5  ;;  %12537 = vmatpush3.bf16.msra.mxu1 %v16159_v0  ;;  %12460 = vmatprep.mubr.bf16.mxu1 %v11306_v26  ;;  %v11312_v40 = vcombine.low %v16468_v25, %v16481_v37  ;;  %v16496_v62 = vsel %vm13419_vm7, %v6632_v39, %v6633_v30  ;;  %v12941_v0 = vld [vmem:[%s18297_s3 + $0x128] sm:$0xff]   ;;  %v6647_v19 = vrot.slane %v16300_v34, 5  ;;  %v8140_v39 = vld [vmem:[#allocation2 + $0x18] sm:$0xe] }
 0x29f   : > { %v16500_v17 = vsel %vm13419_vm7, %v11282_v63, %v6637_v9  ;;  %v6639_v47 = vrot.slane %v6637_v9, 4  ;;  %12538 = vmatprep.subr.bf16.mxu1 %v12937_v53  ;;  %v11313_v42 = vcombine.low %v16473_v8, %v16496_v62  ;;  %v11284_v10 = vrot.slane %v6529_v21, 9  ;;  %12595 = vmatpush3.bf16.msra.mxu0 %v12955_v7  ;;  %v12942_v43 = vld [vmem:[#allocation2 + $0x6c] sm:$0xff]   ;;  %v6531_v3 = vld [vmem:[#allocation2 + $0xa8] sm:$0xe] }
 0x2a0   : > { %v16509_v15 = vsel %vm13419_vm7, %v11283_v57, %v6644_v36  ;;  %v6646_v26 = vrot.slane %v6644_v36, 4  ;;  %v6651_v59 = vrot.slane %v16275_v11, 5  ;;  %v6654_v23 = vrot.slane %v16313_v51, 5  ;;  %12596 = vmatprep.subr.bf16.mxu0 %v12958_v2  ;;  %v12959_v11 = vld [vmem:[%s18297_s3 + $0x140] sm:$0xff]   ;;  %v16547_v57 = vld [vmem:[#allocation2 + $0x1c] sm:$0xf] }
 0x2a1   : > { %v16516_v35 = vsel %vm13419_vm7, %v6639_v47, %v6640_v20  ;;  %v11285_v1 = vrot.slane %v6530_v45, 9  ;;  %v6658_v50 = vrot.slane %v16288_v52, 5  ;;  %v6661_v30 = vrot.slane %v16329_v12, 5  ;;  %v12945_v52 = vld [vmem:[%s18297_s3 + $0x120] sm:$0xff]   ;;  %v16739_v8 = vld [vmem:[#allocation2 + $0x58] sm:$0xf] }
 0x2a2   : > { %v11314_v61 = vcombine.low %v16500_v17, %v16516_v35  ;;  %v16526_v34 = vsel %vm13419_vm7, %v6646_v26, %v6647_v19  ;;  %12539 = vmatpush3.bf16.msra.mxu1 %v12937_v53  ;;  %12517 = vmatmul.mubr.bf16.gmra.mxu0 %v12940_v28  ;;  %v16536_v7 = vsel %vm13419_vm7, %v11284_v10, %v6651_v59  ;;  %v6653_v13 = vrot.slane %v6651_v59, 4  ;;  %v16555_v45 = vld [vmem:[#allocation2 + $0x20] sm:$0x1]  ;;  %v16573_v28 = vld [vmem:[%s18297_s3 + $0x1f8] sm:$0xff]   ;;  %v8141_v59 = vld [vmem:[#allocation2 + $0x24] sm:$0xe] }
 0x2a3   : > { %v11315_v51 = vcombine.low %v16509_v15, %v16526_v34  ;;  %12540 = vmatprep.subr.bf16.mxu1 %v12941_v0  ;;  %12520 = vmatprep.mubr.bf16.mxu0 %v12942_v43  ;;  %v16544_v53 = vsel %vm13419_vm7, %v11285_v1, %v6658_v50  ;;  %v6660_v63 = vrot.slane %v6658_v50, 4  ;;  %v11408_v9 = vrot.slane %v8139_v18, 9  ;;  %v12949_v43 = vld [vmem:[%s18297_s3 + $0x118] sm:$0xff]   ;;  %v16594_v1 = vld [vmem:[#allocation2 + $0x28] sm:$0xf] }
 0x2a4   : > { %v8205_v20 = vrot.slane %v16512_v4, 5  ;;  %v16551_v12 = vsel %vm13419_vm7, %v6653_v13, %v6654_v23  ;;  %12597 = vmatpush3.bf16.msra.mxu0 %v12958_v2  ;;  %v8208_v36 = vrot.slane %v16520_v41, 5  ;;  %v11286_v21 = vrot.slane %v6531_v3, 9  ;;  %v7385_v23 = vld [vmem:[#allocation2 + $0xc] sm:$0xf]  ;;  %v12944_v50 = vld [vmem:[#allocation2 + $0x78] sm:$0xff]  }
 0x2a5   : > { %v6665_v47 = vrot.slane %v16308_v6, 5  ;;  %12461 = vmatmul.mubr.bf16.gmra.mxu1 %v11307_v48  ;;  %v16564_v26 = vsel %vm13419_vm7, %v6660_v63, %v6661_v30  ;;  %12598 = vmatprep.subr.bf16.mxu0 %v12959_v11  ;;  %v6532_v6 = vld [vmem:[#allocation2 + $0xb4] sm:$0xe]  ;;  %v6668_v10 = vrot.slane %v16333_v24, 5  ;;  %v11409_v54 = vrot.slane %v8140_v39, 9  ;;  %v12946_v39 = vld [vmem:[#allocation2 + $0x84] sm:$0xff]  }
 0x2a6   : > { %v16568_v2 = vsel %vm13419_vm7, %v11408_v9, %v8205_v20  ;;  %v8207_v19 = vrot.slane %v8205_v20, 4  ;;  %12464 = vmatprep.mubr.bf16.mxu1 %v11308_v58  ;;  %12541 = vmatpush3.bf16.msra.mxu1 %v12941_v0  ;;  %v8212_v58 = vrot.slane %v16547_v57, 5  ;;  %v8215_v0 = vrot.slane %v16555_v45, 5  ;;  %v16603_v63 = vld [vmem:[#allocation2 + $0x2c] sm:$0x1] }
 0x2a7   : > { %v16582_v29 = vsel %vm13419_vm7, %v11286_v21, %v6665_v47  ;;  %v6667_v48 = vrot.slane %v6665_v47, 4  ;;  %12542 = vmatprep.subr.bf16.mxu1 %v12945_v52  ;;  %v11287_v13 = vrot.slane %v6532_v6, 9  ;;  %v6672_v30 = vrot.slane %v16319_v33, 5  ;;  %v12953_v6 = vld [vmem:[%s18297_s3 + $0x110] sm:$0xff]  }
 0x2a8   : > { %v16590_v16 = vsel %vm13419_vm7, %v8207_v19, %v8208_v36  ;;  %12599 = vmatpush3.bf16.msra.mxu0 %v12959_v11  ;;  %v16609_v20 = vsel %vm13419_vm7, %v11409_v54, %v8212_v58  ;;  %v8214_v36 = vrot.slane %v8212_v58, 4  ;;  %v6675_v21 = vrot.slane %v16342_v32, 5  ;;  %v8142_v54 = vld [vmem:[#allocation2 + $0x30] sm:$0xe] }
 0x2a9   : > { %v11440_v24 = vcombine.low %v16568_v2, %v16590_v16  ;;  %v16600_v3 = vsel %vm13419_vm7, %v6667_v48, %v6668_v10  ;;  %12680 = vmatprep.subr.bf16.mxu0 %v16573_v28  ;;  %v16615_v33 = vsel %vm13419_vm7, %v11287_v13, %v6672_v30  ;;  %v6674_v11 = vrot.slane %v6672_v30, 4  ;;  %v16636_v30 = vld [vmem:[#allocation2 + $0x34] sm:$0xf] }
 0x2aa   : > { %12521 = vmatmul.mubr.bf16.gmra.mxu0 %v12944_v50  ;;  %12543 = vmatpush3.bf16.msra.mxu1 %v12945_v52  ;;  %v11410_v47 = vrot.slane %v8141_v59, 9  ;;  %v8219_v19 = vrot.slane %v16594_v1, 5  ;;  %v16623_v32 = vsel %vm13419_vm7, %v8214_v36, %v8215_v0  ;;  %v8222_v52 = vrot.slane %v16603_v63, 5  ;;  %v7388_v0 = vld [vmem:[#allocation2 + $0x18] sm:$0xf] }
 0x2ab   : > { %12524 = vmatprep.mubr.bf16.mxu0 %v12946_v39  ;;  %12544 = vmatprep.subr.bf16.mxu1 %v12949_v43  ;;  %v7434_v48 = vshrl.u32 %v7385_v23, 16  ;;  %v7437_v10 = vshll.u32 %v7385_v23, 16  ;;  %v16630_v58 = vsel %vm13419_vm7, %v6674_v11, %v6675_v21  ;;  %v7443_v21 = vshll.u32 %v16512_v4, 16  ;;  %v16644_v11 = vld [vmem:[#allocation2 + $0x38] sm:$0x1] }
 0x2ac   : > { %v16634_v50 = vsel %vm13419_vm7, %v11410_v47, %v8219_v19  ;;  %v8221_v13 = vrot.slane %v8219_v19, 4  ;;  %v7447_v14 = vshrl.u32 %v16512_v4, 16  ;;  %v7453_v44 = vshll.u32 %v16520_v41, 16  ;;  %v12957_v19 = vld [vmem:[%s18297_s3 + $0x108] sm:$0xff]   ;;  %v8143_v41 = vld [vmem:[#allocation2 + $0x3c] sm:$0xe] }
 0x2ad   : > { %12465 = vmatmul.mubr.bf16.gmra.mxu1 %v11309_v38  ;;  %v7436_v39 = vrot.slane %v7434_v48, 4  ;;  %v7439_v36 = vrot.slane %v7437_v10, 5  ;;  %v11411_v38 = vrot.slane %v8142_v54, 9  ;;  %v7445_v49 = vrot.slane %v7443_v21, 5  ;;  %v12950_v54 = vld [vmem:[#allocation2 + $0x9c] sm:$0xff]  }
 0x2ae   : > { %12468 = vmatprep.mubr.bf16.mxu1 %v11310_v22  ;;  %12545 = vmatpush3.bf16.msra.mxu1 %v12949_v43  ;;  %v16651_v47 = vsel %vm13419_vm7, %v8221_v13, %v8222_v52  ;;  %v8226_v22 = vrot.slane %v16636_v30, 5  ;;  %v12948_v43 = vld [vmem:[#allocation2 + $0x90] sm:$0xff]   ;;  %v7449_v52 = vrot.slane %v7447_v14, 4  ;;  %v7455_v10 = vrot.slane %v7453_v44, 5  ;;  %v7391_v48 = vld [vmem:[#allocation2 + $0x24] sm:$0xf] }
 0x2af   : > { %12546 = vmatprep.subr.bf16.mxu1 %v12953_v6  ;;  %v7440_v55 = vor.u32 %v7439_v36, %v7436_v39  ;;  %v8229_v4 = vrot.slane %v16644_v11, 5  ;;  %v7458_v13 = vshrl.u32 %v7388_v0, 16  ;;  %v7461_v59 = vshll.u32 %v7388_v0, 16  ;;  %v16668_v44 = vld [vmem:[#allocation2 + $0x40] sm:$0xf] }
 0x2b0   : > { %v16664_v9 = vsel %vm13419_vm7, %v11411_v38, %v8226_v22  ;;  %v8228_v27 = vrot.slane %v8226_v22, 4  ;;  %v7450_v39 = vor.u32 %v7449_v52, %v7445_v49  ;;  %v7467_v21 = vshll.u32 %v16547_v57, 16  ;;  %v12960_v38 = vld [vmem:[%s18297_s3 + $0x100] sm:$0xff]  }
 0x2b1   : > { %v7441_v23 = vrot.slane %v7440_v55, 4  ;;  %v7460_v36 = vrot.slane %v7458_v13, 4  ;;  %v7471_v14 = vshrl.u32 %v16547_v57, 16  ;;  %v7463_v55 = vrot.slane %v7461_v59, 5 }
 0x2b2   : > { %12525 = vmatmul.mubr.bf16.gmra.mxu0 %v12948_v43  ;;  %12547 = vmatpush3.bf16.msra.mxu1 %v12953_v6  ;;  %v16677_v6 = vsel %vm13419_vm7, %v8228_v27, %v8229_v4  ;;  %v7477_v22 = vshll.u32 %v16555_v45, 16  ;;  %v16680_v43 = vld [vmem:[#allocation2 + $0x44] sm:$0x1]  ;;  %v7451_v57 = vrot.slane %v7450_v39, 4  ;;  %v7469_v13 = vrot.slane %v7467_v21, 5 }
 0x2b3   : > { %12528 = vmatprep.mubr.bf16.mxu0 %v12950_v54  ;;  %12548 = vmatprep.subr.bf16.mxu1 %v12957_v19  ;;  %v7446_v0 = vsel %vm13133_vm4, %v7441_v23, %v7445_v49  ;;  %v11443_v52 = vcombine.low %v16664_v9, %v16677_v6  ;;  %v7473_v54 = vrot.slane %v7471_v14, 4  ;;  %v7464_v23 = vor.u32 %v7463_v55, %v7460_v36  ;;  %v8144_v21 = vld [vmem:[#allocation2 + $0x48] sm:$0xe]  ;;  %v12954_v55 = vld [vmem:[#allocation2 + $0xb4] sm:$0xff]  }
 0x2b4   : > { %v7479_v49 = vrot.slane %v7477_v22, 5  ;;  %v11412_v18 = vrot.slane %v8143_v41, 9  ;;  %v8233_v27 = vrot.slane %v16668_v44, 5  ;;  %v7456_v45 = vsel %vm13133_vm4, %v7451_v57, %v7455_v10  ;;  %v12952_v10 = vld [vmem:[#allocation2 + $0xa8] sm:$0xff]  }
 0x2b5   : > { %12469 = vmatmul.mubr.bf16.gmra.mxu1 %v11311_v60  ;;  %v7474_v59 = vor.u32 %v7473_v54, %v7469_v13  ;;  %v8236_v4 = vrot.slane %v16680_v43, 5  ;;  %v7482_v39 = vshrl.u32 %v7391_v48, 16  ;;  %v16694_v46 = vcombine.low %v7446_v0, %v7456_v45 }
 0x2b6   : > { %12472 = vmatprep.mubr.bf16.mxu1 %v11312_v40  ;;  %12549 = vmatpush3.bf16.msra.mxu1 %v12957_v19  ;;  %v7465_v60 = vrot.slane %v7464_v23, 4  ;;  %v16703_v25 = vsel %vm13419_vm7, %v11412_v18, %v8233_v27  ;;  %v8235_v37 = vrot.slane %v8233_v27, 4  ;;  %v16705_v40 = vld [vmem:[#allocation2 + $0x4c] sm:$0xf]  ;;  %v7394_v19 = vld [vmem:[#allocation2 + $0x30] sm:$0xf] }
 0x2b7   : > { %12550 = vmatprep.subr.bf16.mxu1 %v12960_v38  ;;  %v7475_v41 = vrot.slane %v7474_v59, 4  ;;  %v7484_v36 = vrot.slane %v7482_v39, 4  ;;  %v7485_v14 = vshll.u32 %v7391_v48, 16  ;;  %v7491_v0 = vshll.u32 %v16594_v1, 16  ;;  %v16716_v23 = vld [vmem:[#allocation2 + $0x50] sm:$0x1] }
 0x2b8   : > { %v7470_v22 = vsel %vm13133_vm4, %v7465_v60, %v7469_v13  ;;  %v16712_v57 = vsel %vm13419_vm7, %v8235_v37, %v8236_v4  ;;  %v7495_v18 = vshrl.u32 %v16594_v1, 16  ;;  %v7501_v54 = vshll.u32 %v16603_v63, 16 }
 0x2b9   : > { %v7480_v48 = vsel %vm13133_vm4, %v7475_v41, %v7479_v49  ;;  %v11444_v27 = vcombine.low %v16703_v25, %v16712_v57  ;;  %v7487_v45 = vrot.slane %v7485_v14, 5  ;;  %v7493_v13 = vrot.slane %v7491_v0, 5  ;;  %v8145_v0 = vld [vmem:[#allocation2 + $0x54] sm:$0xe]  ;;  %v12970_v25 = vld [vmem:[%s18297_s3 + $0x1d8] sm:$0xff]  }
 0x2ba   : > { %12529 = vmatmul.mubr.bf16.gmra.mxu0 %v12952_v10  ;;  %12551 = vmatpush3.bf16.msra.mxu1 %v12960_v38  ;;  %v16723_v59 = vcombine.low %v7470_v22, %v7480_v48  ;;  %v7497_v1 = vrot.slane %v7495_v18, 4  ;;  %v7503_v4 = vrot.slane %v7501_v54, 5  ;;  %v11413_v63 = vrot.slane %v8144_v21, 9  ;;  %v16741_v54 = vld [vmem:[#allocation2 + $0x5c] sm:$0x1] }
 0x2bb   : > { %12532 = vmatprep.mubr.bf16.mxu0 %v12954_v55  ;;  %12632 = vmatprep.subr.bf16.mxu1 %v16699_v31  ;;  %v7488_v39 = vor.u32 %v7487_v45, %v7484_v36  ;;  %v8240_v60 = vrot.slane %v16705_v40, 5  ;;  %v8243_v38 = vrot.slane %v16716_v23, 5  ;;  %v7506_v37 = vshrl.u32 %v7394_v19, 16  ;;  %v7397_v45 = vld [vmem:[#allocation2 + $0x3c] sm:$0xf] }
 0x2bc   : > { %v7498_v49 = vor.u32 %v7497_v1, %v7493_v13  ;;  %v7509_v10 = vshll.u32 %v7394_v19, 16  ;;  %v7515_v41 = vshll.u32 %v16636_v30, 16  ;;  %v7519_v14 = vshrl.u32 %v16636_v30, 16  ;;  %v12956_v30 = vld [vmem:[#allocation2 + $0xc0] sm:$0xff]  }
 0x2bd   : > { %12473 = vmatmul.mubr.bf16.gmra.mxu1 %v11313_v42  ;;  %v7489_v21 = vrot.slane %v7488_v39, 4  ;;  %v16737_v36 = vsel %vm13419_vm7, %v11413_v63, %v8240_v60  ;;  %v8242_v55 = vrot.slane %v8240_v60, 4  ;;  %v7508_v22 = vrot.slane %v7506_v37, 4 }
 0x2be   : > { %12476 = vmatprep.mubr.bf16.mxu1 %v11314_v61  ;;  %v7499_v62 = vrot.slane %v7498_v49, 4  ;;  %v7511_v42 = vrot.slane %v7509_v10, 5  ;;  %v7517_v19 = vrot.slane %v7515_v41, 5  ;;  %v7521_v18 = vrot.slane %v7519_v14, 4  ;;  %v7400_v14 = vld [vmem:[#allocation2 + $0x48] sm:$0xf] }
 0x2bf   : > { %v7494_v17 = vsel %vm13133_vm4, %v7489_v21, %v7493_v13  ;;  %v16747_v35 = vsel %vm13419_vm7, %v8242_v55, %v8243_v38  ;;  %v7525_v61 = vshll.u32 %v16644_v11, 16  ;;  %v11414_v48 = vrot.slane %v8145_v0, 9 }
 0x2c0   : > { %v7504_v1 = vsel %vm13133_vm4, %v7499_v62, %v7503_v4  ;;  %v11445_v63 = vcombine.low %v16737_v36, %v16747_v35  ;;  %v7512_v39 = vor.u32 %v7511_v42, %v7508_v22  ;;  %v7522_v60 = vor.u32 %v7521_v18, %v7517_v19  ;;  %v8146_v62 = vld [vmem:[#allocation2 + $0x60] sm:$0xe]  ;;  %v16774_v18 = vld [vmem:[#allocation2 + $0x64] sm:$0xf]  ;;  %v16916_v35 = vld [vmem:[#allocation2 + $0x94] sm:$0xf] }
 0x2c1   : > { %v16754_v37 = vcombine.low %v7494_v17, %v7504_v1  ;;  %v7527_v13 = vrot.slane %v7525_v61, 5  ;;  %v8247_v49 = vrot.slane %v16739_v8, 5  ;;  %v8250_v38 = vrot.slane %v16741_v54, 5 }
 0x2c2   : > { %12533 = vmatmul.mubr.bf16.gmra.mxu0 %v12956_v30  ;;  %v7513_v11 = vrot.slane %v7512_v39, 4  ;;  %v7523_v10 = vrot.slane %v7522_v60, 4  ;;  %v7530_v4 = vshrl.u32 %v7397_v45, 16  ;;  %v7533_v41 = vshll.u32 %v7397_v45, 16  ;;  %v16776_v30 = vld [vmem:[#allocation2 + $0x68] sm:$0x1] }
 0x2c3   : > { %12600 = vmatprep.mubr.bf16.mxu0 %v11440_v24  ;;  %v16763_v0 = vsel %vm13419_vm7, %v11414_v48, %v8247_v49  ;;  %v8249_v21 = vrot.slane %v8247_v49, 4  ;;  %v7539_v55 = vshll.u32 %v16668_v44, 16  ;;  %v7543_v22 = vshrl.u32 %v16668_v44, 16 }
 0x2c4   : > { %v7518_v2 = vsel %vm13133_vm4, %v7513_v11, %v7517_v19  ;;  %v7528_v16 = vsel %vm13133_vm4, %v7523_v10, %v7527_v13  ;;  %v7532_v24 = vrot.slane %v7530_v4, 4  ;;  %v7535_v42 = vrot.slane %v7533_v41, 5  ;;  %v8147_v10 = vld [vmem:[#allocation2 + $0x6c] sm:$0xe]  ;;  %v7403_v4 = vld [vmem:[#allocation2 + $0x54] sm:$0xf] }
 0x2c5   : > { %12477 = vmatmul.mubr.bf16.gmra.mxu1 %v11315_v51  ;;  %v18623_v44 = vcombine.low %v16536_v7, %v16551_v12  ;;  %v16781_v17 = vcombine.low %v7518_v2, %v7528_v16  ;;  %v16785_v15 = vsel %vm13419_vm7, %v8249_v21, %v8250_v38  ;;  %v7541_v34 = vrot.slane %v7539_v55, 5  ;;  %v12964_v7 = vld [vmem:[%s18297_s3 + $0x1f0] sm:$0xff]  }
 0x2c6   : > { %v7545_v51 = vrot.slane %v7543_v22, 4  ;;  %v11446_v19 = vcombine.low %v16763_v0, %v16785_v15  ;;  %v7536_v61 = vor.u32 %v7535_v42, %v7532_v24  ;;  %v7549_v48 = vshll.u32 %v16680_v43, 16  ;;  %v16812_v24 = vld [vmem:[#allocation2 + $0x74] sm:$0x1] }
 0x2c7   : > { %12480 = vmatprep.mubr.bf16.mxu1 %v18623_v44  ;;  %v11415_v45 = vrot.slane %v8146_v62, 9  ;;  %v8254_v12 = vrot.slane %v16774_v18, 5  ;;  %v8257_v39 = vrot.slane %v16776_v30, 5  ;;  %v7554_v60 = vshrl.u32 %v7400_v14, 16  ;;  %v16803_v62 = vld [vmem:[#allocation2 + $0x70] sm:$0xf] }
 0x2c8   : > { %v7546_v1 = vor.u32 %v7545_v51, %v7541_v34  ;;  %v7537_v13 = vrot.slane %v7536_v61, 4  ;;  %v7551_v49 = vrot.slane %v7549_v48, 5  ;;  %v7557_v38 = vshll.u32 %v7400_v14, 16 }
 0x2c9   : > { %v7563_v11 = vshll.u32 %v16705_v40, 16  ;;  %v18624_v43 = vcombine.low %v16609_v20, %v16623_v32  ;;  %v16801_v21 = vsel %vm13419_vm7, %v11415_v45, %v8254_v12  ;;  %v8256_v55 = vrot.slane %v8254_v12, 4 }
 0x2ca   : > { %v7547_v41 = vrot.slane %v7546_v1, 4  ;;  %v7556_v22 = vrot.slane %v7554_v60, 4  ;;  %v18625_v14 = vcombine.low %v16634_v50, %v16651_v47  ;;  %v7542_v2 = vsel %vm13133_vm4, %v7537_v13, %v7541_v34  ;;  %v12966_v47 = vld [vmem:[%s18297_s3 + $0x1e8] sm:$0xff]  }
 0x2cb   : > { %12601 = vmatmul.mubr.bf16.vlgmr.msra.gmra.mxu0 %v18624_v43  ;;  %v7559_v20 = vrot.slane %v7557_v38, 5  ;;  %v7565_v32 = vrot.slane %v7563_v11, 5  ;;  %v7567_v16 = vshrl.u32 %v16705_v40, 16  ;;  %v16818_v44 = vsel %vm13419_vm7, %v8256_v55, %v8257_v39 }
 0x2cc   : > { %12604 = vmatprep.mubr.bf16.mxu0 %v18625_v14  ;;  %12681 = vmatpush3.bf16.msra.mxu0 %v16573_v28  ;;  %v7552_v42 = vsel %vm13133_vm4, %v7547_v41, %v7551_v49  ;;  %v7573_v50 = vshll.u32 %v16716_v23, 16  ;;  %v11416_v28 = vrot.slane %v8147_v10, 9  ;;  %v18626_v40 = vcombine.low %v16544_v53, %v16564_v26  ;;  %v8148_v49 = vld [vmem:[#allocation2 + $0x78] sm:$0xe]  ;;  %v16842_v10 = vld [vmem:[#allocation2 + $0x7c] sm:$0xf] }
 0x2cd   : > { %12682 = vmatprep.subr.bf16.mxu0 %v12964_v7  ;;  %v16827_v34 = vcombine.low %v7542_v2, %v7552_v42  ;;  %v11447_v51 = vcombine.low %v16801_v21, %v16818_v44  ;;  %v7560_v61 = vor.u32 %v7559_v20, %v7556_v22  ;;  %v7569_v48 = vrot.slane %v7567_v16, 4  ;;  %v16849_v22 = vld [vmem:[#allocation2 + $0x80] sm:$0x1] }
 0x2ce   : > { %12481 = vmatmul.mubr.bf16.gmra.mxu1 %v18626_v40  ;;  %v18627_v45 = vcombine.low %v16582_v29, %v16600_v3  ;;  %v7575_v23 = vrot.slane %v7573_v50, 5  ;;  %v8261_v1 = vrot.slane %v16803_v62, 5  ;;  %v8264_v12 = vrot.slane %v16812_v24, 5  ;;  %v7406_v16 = vld [vmem:[#allocation2 + $0x60] sm:$0xf] }
 0x2cf   : > { %v7578_v39 = vshrl.u32 %v7403_v4, 16  ;;  %v7561_v53 = vrot.slane %v7560_v61, 4  ;;  %v7570_v26 = vor.u32 %v7569_v48, %v7565_v32  ;;  %v7581_v60 = vshll.u32 %v7403_v4, 16  ;;  %v8149_v48 = vld [vmem:[#allocation2 + $0x84] sm:$0xe] }
 0x2d0   : > { %12484 = vmatprep.mubr.bf16.mxu1 %v18627_v45  ;;  %12683 = vmatpush3.bf16.msra.mxu0 %v12964_v7  ;;  %v7587_v13 = vshll.u32 %v16739_v8, 16  ;;  %v16839_v38 = vsel %vm13419_vm7, %v11416_v28, %v8261_v1  ;;  %v8263_v11 = vrot.slane %v8261_v1, 4  ;;  %v7591_v3 = vshrl.u32 %v16739_v8, 16  ;;  %v12968_v7 = vld [vmem:[%s18297_s3 + $0x1e0] sm:$0xff]  }
 0x2d1   : > { %v7580_v29 = vrot.slane %v7578_v39, 4  ;;  %12684 = vmatprep.subr.bf16.mxu0 %v12966_v47  ;;  %v7566_v4 = vsel %vm13133_vm4, %v7561_v53, %v7565_v32  ;;  %v7571_v43 = vrot.slane %v7570_v26, 4  ;;  %v7583_v41 = vrot.slane %v7581_v60, 5  ;;  %v7409_v39 = vld [vmem:[#allocation2 + $0x6c] sm:$0xf] }
 0x2d2   : > { %v7589_v55 = vrot.slane %v7587_v13, 5  ;;  %v16856_v8 = vsel %vm13419_vm7, %v8263_v11, %v8264_v12  ;;  %v7593_v14 = vrot.slane %v7591_v3, 4  ;;  %v7597_v2 = vshll.u32 %v16741_v54, 16  ;;  %v16890_v60 = vld [vmem:[#allocation2 + $0x88] sm:$0xf] }
 0x2d3   : > { %12605 = vmatmul.mubr.bf16.gmra.mxu0 %v11443_v52  ;;  %v11417_v20 = vrot.slane %v8148_v49, 9  ;;  %v7576_v32 = vsel %vm13133_vm4, %v7571_v43, %v7575_v23  ;;  %v11448_v9 = vcombine.low %v16839_v38, %v16856_v8  ;;  %v7584_v6 = vor.u32 %v7583_v41, %v7580_v29  ;;  %v12972_v29 = vld [vmem:[%s18297_s3 + $0x1d0] sm:$0xff]  }
 0x2d4   : > { %12608 = vmatprep.mubr.bf16.mxu0 %v11444_v27  ;;  %12685 = vmatpush3.bf16.msra.mxu0 %v12966_v47  ;;  %v8268_v52 = vrot.slane %v16842_v10, 5  ;;  %v16867_v42 = vcombine.low %v7566_v4, %v7576_v32  ;;  %v7594_v50 = vor.u32 %v7593_v14, %v7589_v55  ;;  %v7599_v54 = vrot.slane %v7597_v2, 5  ;;  %v12963_v2 = vld [vmem:[%s18297_s3 + $0x1b0] sm:$0xff]  }
 0x2d5   : > { %v8271_v28 = vrot.slane %v16849_v22, 5  ;;  %12686 = vmatprep.subr.bf16.mxu0 %v12968_v7  ;;  %v18628_v57 = vcombine.low %v16615_v33, %v16630_v58  ;;  %v7585_v27 = vrot.slane %v7584_v6, 4  ;;  %v7602_v61 = vshrl.u32 %v7406_v16, 16 }
 0x2d6   : > { %v16878_v47 = vsel %vm13419_vm7, %v11417_v20, %v8268_v52  ;;  %v8270_v40 = vrot.slane %v8268_v52, 4  ;;  %v7595_v45 = vrot.slane %v7594_v50, 4  ;;  %v7605_v23 = vshll.u32 %v7406_v16, 16 }
 0x2d7   : > { %12485 = vmatmul.mubr.bf16.gmra.mxu1 %v18628_v57  ;;  %v7611_v1 = vshll.u32 %v16774_v18, 16  ;;  %v7615_v12 = vshrl.u32 %v16774_v18, 16  ;;  %v7590_v33 = vsel %vm13133_vm4, %v7585_v27, %v7589_v55  ;;  %v7604_v53 = vrot.slane %v7602_v61, 4  ;;  %v7412_v61 = vld [vmem:[#allocation2 + $0x78] sm:$0xf] }
 0x2d8   : > { %12552 = vmatprep.mubr.bf16.mxu1 %v16694_v46  ;;  %v16887_v58 = vsel %vm13419_vm7, %v8270_v40, %v8271_v28  ;;  %v7621_v26 = vshll.u32 %v16776_v30, 16  ;;  %v16892_v46 = vld [vmem:[#allocation2 + $0x8c] sm:$0x1]  ;;  %12687 = vmatpush3.bf16.msra.mxu0 %v12968_v7  ;;  %v7600_v13 = vsel %vm13133_vm4, %v7595_v45, %v7599_v54  ;;  %v7607_v49 = vrot.slane %v7605_v23, 5  ;;  %v16922_v28 = vld [vmem:[#allocation2 + $0x98] sm:$0x1] }
 0x2d9   : > { %v11449_v18 = vcombine.low %v16878_v47, %v16887_v58  ;;  %v7613_v11 = vrot.slane %v7611_v1, 5  ;;  %12688 = vmatprep.subr.bf16.mxu0 %v12970_v25  ;;  %v16901_v3 = vcombine.low %v7590_v33, %v7600_v13  ;;  %v7617_v30 = vrot.slane %v7615_v12, 4 }
 0x2da   : > { %v7623_v4 = vrot.slane %v7621_v26, 5  ;;  %v11418_v43 = vrot.slane %v8149_v48, 9  ;;  %v7608_v7 = vor.u32 %v7607_v49, %v7604_v53  ;;  %v8275_v41 = vrot.slane %v16890_v60, 5  ;;  %v12965_v48 = vld [vmem:[%s18297_s3 + $0x1a8] sm:$0xff]   ;;  %v7415_v49 = vld [vmem:[#allocation2 + $0x84] sm:$0xf] }
 0x2db   : > { %12609 = vmatmul.mubr.bf16.gmra.mxu0 %v11445_v63  ;;  %v8278_v55 = vrot.slane %v16892_v46, 5  ;;  %v7626_v14 = vshrl.u32 %v7409_v39, 16  ;;  %v7618_v20 = vor.u32 %v7617_v30, %v7613_v11  ;;  %v7629_v16 = vshll.u32 %v7409_v39, 16  ;;  %v8150_v63 = vld [vmem:[#allocation2 + $0x90] sm:$0xe]  ;;  %v12967_v30 = vld [vmem:[%s18297_s3 + $0x1a0] sm:$0xff]  }
 0x2dc   : > { %12612 = vmatprep.mubr.bf16.mxu0 %v11446_v19  ;;  %v7635_v32 = vshll.u32 %v16803_v62, 16  ;;  %v7639_v36 = vshrl.u32 %v16803_v62, 16  ;;  %12689 = vmatpush3.bf16.msra.mxu0 %v12970_v25  ;;  %v7609_v6 = vrot.slane %v7608_v7, 4  ;;  %v16920_v52 = vsel %vm13419_vm7, %v11418_v43, %v8275_v41  ;;  %v12974_v25 = vld [vmem:[%s18297_s3 + $0x1c8] sm:$0xff]  }
 0x2dd   : > { %v8277_v50 = vrot.slane %v8275_v41, 4  ;;  %v7628_v54 = vrot.slane %v7626_v14, 4  ;;  %12690 = vmatprep.subr.bf16.mxu0 %v12972_v29  ;;  %v7619_v0 = vrot.slane %v7618_v20, 4  ;;  %v7631_v15 = vrot.slane %v7629_v16, 5  ;;  %v8151_v41 = vld [vmem:[#allocation2 + $0x9c] sm:$0xe]  ;;  %v16974_v20 = vpop.f32.mrf.mxu0 }
 0x2de   : > { %v7637_v19 = vrot.slane %v7635_v32, 5  ;;  %v7641_v62 = vrot.slane %v7639_v36, 4  ;;  %v7614_v57 = vsel %vm13133_vm4, %v7609_v6, %v7613_v11  ;;  %v11419_v40 = vrot.slane %v8150_v63, 9  ;;  %v12975_v11 = vld [vmem:[%s18297_s3 + $0x1c0] sm:$0xff]   ;;  %v8152_v6 = vld [vmem:[#allocation2 + $0xa8] sm:$0xe] }
 0x2df   : > { %12553 = vmatmul.mubr.bf16.vlgmr.msra.gmra.mxu1 %v16723_v59  ;;  %v16934_v27 = vsel %vm13419_vm7, %v8277_v50, %v8278_v55  ;;  %v7645_v59 = vshll.u32 %v16812_v24, 16  ;;  %v7632_v45 = vor.u32 %v7631_v15, %v7628_v54  ;;  %v8282_v24 = vrot.slane %v16916_v35, 5  ;;  %v16970_v14 = vld [vmem:[#allocation2 + $0xa0] sm:$0xf] }
 0x2e0   : > { %12633 = vmatpush3.bf16.msra.mxu1 %v16699_v31  ;;  %12556 = vmatprep.mubr.bf16.mxu1 %v16754_v37  ;;  %v7624_v31 = vsel %vm13133_vm4, %v7619_v0, %v7623_v4  ;;  %v11450_v37 = vcombine.low %v16920_v52, %v16934_v27  ;;  %v7642_v23 = vor.u32 %v7641_v62, %v7637_v19  ;;  %v8285_v39 = vrot.slane %v16922_v28, 5 }
 0x2e1   : > { %12634 = vmatprep.subr.bf16.mxu1 %v12963_v2  ;;  %v16944_v1 = vcombine.low %v7614_v57, %v7624_v31  ;;  %v7647_v12 = vrot.slane %v7645_v59, 5  ;;  %12691 = vmatpush3.bf16.msra.mxu0 %v12972_v29  ;;  %v7633_v33 = vrot.slane %v7632_v45, 4  ;;  %v7650_v26 = vshrl.u32 %v7412_v61, 16  ;;  %v7418_v57 = vld [vmem:[#allocation2 + $0x90] sm:$0xf]  ;;  %v16998_v59 = vpop.f32.mrf.mxu0 }
 0x2e2   : > { %v7643_v53 = vrot.slane %v7642_v23, 4  ;;  %v7653_v13 = vshll.u32 %v7412_v61, 16  ;;  %12692 = vmatprep.subr.bf16.mxu0 %v12974_v25  ;;  %v16959_v29 = vsel %vm13419_vm7, %v11419_v40, %v8282_v24  ;;  %v8284_v4 = vrot.slane %v8282_v24, 4  ;;  %v17004_v45 = vld [vmem:[#allocation2 + $0xac] sm:$0xf] }
 0x2e3   : > { %12613 = vmatmul.mubr.bf16.gmra.mxu0 %v11447_v51  ;;  %v7659_v43 = vshll.u32 %v16842_v10, 16  ;;  %v7663_v7 = vshrl.u32 %v16842_v10, 16  ;;  %v7638_v21 = vsel %vm13133_vm4, %v7633_v33, %v7637_v19  ;;  %v7652_v51 = vrot.slane %v7650_v26, 4  ;;  %v17009_v33 = vld [vmem:[#allocation2 + $0xb0] sm:$0x1] }
 0x2e4   : > { %12635 = vmatpush3.bf16.msra.mxu1 %v12963_v2  ;;  %12616 = vmatprep.mubr.bf16.mxu0 %v11448_v9  ;;  %v7648_v44 = vsel %vm13133_vm4, %v7643_v53, %v7647_v12  ;;  %v7655_v55 = vrot.slane %v7653_v13, 5  ;;  %v16972_v2 = vld [vmem:[#allocation2 + $0xa4] sm:$0x1]  ;;  %v16980_v38 = vsel %vm13419_vm7, %v8284_v4, %v8285_v39  ;;  %v7669_v36 = vshll.u32 %v16849_v22, 16  ;;  %v12969_v22 = vld [vmem:[%s18297_s3 + $0x198] sm:$0xff]  }
 0x2e5   : > { %12636 = vmatprep.subr.bf16.mxu1 %v12965_v48  ;;  %v16976_v10 = vcombine.low %v7638_v21, %v7648_v44  ;;  %v7661_v8 = vrot.slane %v7659_v43, 5  ;;  %v7665_v9 = vrot.slane %v7663_v7, 4  ;;  %12693 = vmatpush3.bf16.msra.mxu0 %v12974_v25  ;;  %v11451_v16 = vcombine.low %v16959_v29, %v16980_v38  ;;  %v8153_v21 = vld [vmem:[#allocation2 + $0xb4] sm:$0xe]  ;;  %v12976_v29 = vld [vmem:[%s18297_s3 + $0x180] sm:$0xff]  }
 0x2e6   : > { %v7656_v32 = vor.u32 %v7655_v55, %v7652_v51  ;;  %v11420_v63 = vrot.slane %v8151_v41, 9  ;;  %12694 = vmatprep.subr.bf16.mxu0 %v12975_v11  ;;  %v8289_v54 = vrot.slane %v16970_v14, 5  ;;  %v8292_v0 = vrot.slane %v16972_v2, 5 }
 0x2e7   : > { %12557 = vmatmul.mubr.bf16.gmra.mxu1 %v16781_v17  ;;  %v7666_v50 = vor.u32 %v7665_v9, %v7661_v8  ;;  %v7674_v15 = vshrl.u32 %v7415_v49, 16  ;;  %v16992_v17 = vld [vmem:[%s18299_s5] sm:$0xf]  ;;  %v7671_v62 = vrot.slane %v7669_v36, 5  ;;  %v7683_v25 = vshll.u32 %v16890_v60, 16 }
 0x2e8   : > { %12560 = vmatprep.mubr.bf16.mxu1 %v16827_v34  ;;  %12637 = vmatpush3.bf16.msra.mxu1 %v12965_v48  ;;  %v7657_v19 = vrot.slane %v7656_v32, 4  ;;  %v7677_v34 = vshll.u32 %v7415_v49, 16  ;;  %v17002_v61 = vsel %vm13419_vm7, %v11420_v63, %v8289_v54  ;;  %v8291_v48 = vrot.slane %v8289_v54, 4  ;;  %v17042_v9 = vld [vmem:[#allocation2 + $0xb8] sm:$0xf] }
 0x2e9   : > { %12638 = vmatprep.subr.bf16.mxu1 %v12967_v30  ;;  %v7667_v40 = vrot.slane %v7666_v50, 4  ;;  %v7676_v31 = vrot.slane %v7674_v15, 4  ;;  %12695 = vmatpush3.bf16.msra.mxu0 %v12975_v11  ;;  %v7685_v24 = vrot.slane %v7683_v25, 5  ;;  %v7687_v39 = vshrl.u32 %v16890_v60, 16  ;;  %v12971_v11 = vld [vmem:[%s18297_s3 + $0x190] sm:$0xff]  }
 0x2ea   : > { %v7662_v23 = vsel %vm13133_vm4, %v7657_v19, %v7661_v8  ;;  %v7679_v12 = vrot.slane %v7677_v34, 5  ;;  %12822 = vmatprep.subr.msk.bf16.mxu0 %vm788_vm0, %v16992_v17  ;;  %v8293_v26 = vsel %vm13419_vm7, %v8291_v48, %v8292_v0  ;;  %v7693_v13 = vshll.u32 %v16892_v46, 16 }
 0x2eb   : > { %12617 = vmatmul.mubr.bf16.gmra.mxu0 %v11449_v18  ;;  %v7672_v53 = vsel %vm13133_vm4, %v7667_v40, %v7671_v62  ;;  %v11421_v49 = vrot.slane %v8152_v6, 9  ;;  %v11452_v47 = vcombine.low %v17002_v61, %v8293_v26  ;;  %v7689_v18 = vrot.slane %v7687_v39, 4  ;;  %v17046_v6 = vld [vmem:[#allocation2 + $0xbc] sm:$0x1] }
 0x2ec   : > { %12639 = vmatpush3.bf16.msra.mxu1 %v12967_v30  ;;  %12620 = vmatprep.mubr.bf16.mxu0 %v11450_v37  ;;  %v17024_v60 = vcombine.low %v7662_v23, %v7672_v53  ;;  %v7680_v58 = vor.u32 %v7679_v12, %v7676_v31  ;;  %v17030_v30 = vpop.f32.mrf.mxu0  ;;  %v7695_v4 = vrot.slane %v7693_v13, 5  ;;  %v8296_v46 = vrot.slane %v17004_v45, 5  ;;  %v8154_v13 = vld [vmem:[#allocation2 + $0xc0] sm:$0xe] }
 0x2ed   : > { %12640 = vmatprep.subr.bf16.mxu1 %v12969_v22  ;;  %v8299_v43 = vrot.slane %v17009_v33, 5  ;;  %v7698_v52 = vshrl.u32 %v7418_v57, 16  ;;  %v7690_v37 = vor.u32 %v7689_v18, %v7685_v24  ;;  %v7701_v7 = vshll.u32 %v7418_v57, 16 }
 0x2ee   : > { %v7681_v27 = vrot.slane %v7680_v58, 4  ;;  %v7707_v41 = vshll.u32 %v16916_v35, 16  ;;  %v17039_v44 = vsel %vm13419_vm7, %v11421_v49, %v8296_v46  ;;  %v8298_v51 = vrot.slane %v8296_v46, 4  ;;  %v17051_v50 = vpop.f32.mrf.mxu0 }
 0x2ef   : > { %12561 = vmatmul.mubr.bf16.gmra.mxu1 %v16867_v42  ;;  %v7700_v55 = vrot.slane %v7698_v52, 4  ;;  %v7711_v8 = vshrl.u32 %v16916_v35, 16  ;;  %v7691_v32 = vrot.slane %v7690_v37, 4  ;;  %v7703_v36 = vrot.slane %v7701_v7, 5 }
 0x2f0   : > { %12564 = vmatprep.mubr.bf16.mxu1 %v16901_v3  ;;  %12641 = vmatpush3.bf16.msra.mxu1 %v12969_v22  ;;  %v7686_v42 = vsel %vm13133_vm4, %v7681_v27, %v7685_v24  ;;  %v7709_v63 = vrot.slane %v7707_v41, 5  ;;  %v12973_v3 = vld [vmem:[%s18297_s3 + $0x188] sm:$0xff]   ;;  %v8300_v35 = vsel %vm13419_vm7, %v8298_v51, %v8299_v43  ;;  %v7717_v0 = vshll.u32 %v16922_v28, 16  ;;  %v7421_v22 = vld [vmem:[#allocation2 + $0x9c] sm:$0xf]  ;;  %v17071_v38 = vpop.f32.mrf.mxu0 }
 0x2f1   : > { %12642 = vmatprep.subr.bf16.mxu1 %v12971_v11  ;;  %v7713_v54 = vrot.slane %v7711_v8, 4  ;;  %v11422_v15 = vrot.slane %v8153_v21, 9  ;;  %v7696_v19 = vsel %vm13133_vm4, %v7691_v32, %v7695_v4  ;;  %v11453_v62 = vcombine.low %v17039_v44, %v8300_v35  ;;  %v7424_v24 = vld [vmem:[#allocation2 + $0xa8] sm:$0xf] }
 0x2f2   : > { %v7704_v34 = vor.u32 %v7703_v36, %v7700_v55  ;;  %v8303_v25 = vrot.slane %v17042_v9, 5  ;;  %v17063_v57 = vcombine.low %v7686_v42, %v7696_v19  ;;  %v7719_v61 = vrot.slane %v7717_v0, 5  ;;  %v17083_v4 = vld [vmem:[#allocation2 + $0xc8] sm:$0x1]  ;;  %v17095_v41 = vpop.f32.mrf.mxu0  ;;  %v9024_v36 = vld [vmem:[#allocation2 + $0x18] sm:$0xf] }
 0x2f3   : > { %12621 = vmatmul.mubr.bf16.gmra.mxu0 %v11451_v16  ;;  %v7714_v40 = vor.u32 %v7713_v54, %v7709_v63  ;;  %v8306_v28 = vrot.slane %v17046_v6, 5  ;;  %v7722_v12 = vshrl.u32 %v7421_v22, 16  ;;  %v7725_v39 = vshll.u32 %v7421_v22, 16 }
 0x2f4   : > { %12643 = vmatpush3.bf16.msra.mxu1 %v12971_v11  ;;  %12624 = vmatprep.mubr.bf16.mxu0 %v11452_v47  ;;  %v7705_v48 = vrot.slane %v7704_v34, 4  ;;  %v8304_v31 = vsel %vm13419_vm7, %v11422_v15, %v8303_v25  ;;  %v8305_v23 = vrot.slane %v8303_v25, 4  ;;  %v7731_v53 = vshll.u32 %v16970_v14, 16  ;;  %v17081_v11 = vld [vmem:[#allocation2 + $0xc4] sm:$0xf]  ;;  %v17104_v34 = vpop.f32.mrf.mxu0 }
 0x2f5   : > { %12644 = vmatprep.subr.bf16.mxu1 %v12973_v3  ;;  %v7715_v16 = vrot.slane %v7714_v40, 4  ;;  %v7735_v26 = vshrl.u32 %v16970_v14, 16  ;;  %v7724_v58 = vrot.slane %v7722_v12, 4  ;;  %v7741_v18 = vshll.u32 %v16972_v2, 16  ;;  %v17093_v2 = vld [vmem:[%s18297_s3 + $0x238] sm:$0xff]  }
 0x2f6   : > { %v7710_v49 = vsel %vm13133_vm4, %v7705_v48, %v7709_v63  ;;  %v8307_v47 = vsel %vm13419_vm7, %v8305_v23, %v8306_v28  ;;  %v7733_v43 = vrot.slane %v7731_v53, 5  ;;  %v11423_v7 = vrot.slane %v8154_v13, 9  ;;  %v9025_v40 = vld [vmem:[#allocation2 + $0x1c] sm:$0xf]  ;;  %v9026_v12 = vld [vmem:[#allocation2 + $0x20] sm:$0x1] }
 0x2f7   : > { %12565 = vmatmul.mubr.bf16.gmra.mxu1 %v16944_v1  ;;  %v7720_v14 = vsel %vm13133_vm4, %v7715_v16, %v7719_v61  ;;  %v11454_v46 = vcombine.low %v8304_v31, %v8307_v47  ;;  %v7727_v1 = vrot.slane %v7725_v39, 5  ;;  %v7737_v27 = vrot.slane %v7735_v26, 4  ;;  %v17115_v47 = vpop.f32.mrf.mxu1 }
 0x2f8   : > { %12568 = vmatprep.mubr.bf16.mxu1 %v16976_v10  ;;  %12645 = vmatpush3.bf16.msra.mxu1 %v12973_v3  ;;  %v17088_v52 = vcombine.low %v7710_v49, %v7720_v14  ;;  %v7743_v37 = vrot.slane %v7741_v18, 5  ;;  %v8310_v21 = vrot.slane %v17081_v11, 5  ;;  %v8313_v44 = vrot.slane %v17083_v4, 5 }
 0x2f9   : > { %12646 = vmatprep.subr.bf16.mxu1 %v12976_v29  ;;  %v7728_v10 = vor.u32 %v7727_v1, %v7724_v58  ;;  %v7746_v51 = vshrl.u32 %v7424_v24, 16  ;;  %v7738_v55 = vor.u32 %v7737_v27, %v7733_v43  ;;  %v7749_v8 = vshll.u32 %v7424_v24, 16  ;;  %v7427_v24 = vld [vmem:[#allocation2 + $0xb4] sm:$0xf] }
 0x2fa   : > { %v7755_v42 = vshll.u32 %v17004_v45, 16  ;;  %v7759_v32 = vshrl.u32 %v17004_v45, 16  ;;  %v8311_v3 = vsel %vm13419_vm7, %v11423_v7, %v8310_v21  ;;  %v8312_v35 = vrot.slane %v8310_v21, 4 }
 0x2fb   : > { %12625 = vmatmul.mubr.bf16.gmra.mxu0 %v11453_v62  ;;  %v7729_v63 = vrot.slane %v7728_v10, 4  ;;  %v7748_v54 = vrot.slane %v7746_v51, 4  ;;  %v7739_v0 = vrot.slane %v7738_v55, 4  ;;  %v7751_v15 = vrot.slane %v7749_v8, 5 }
 0x2fc   : > { %12647 = vmatpush3.bf16.msra.mxu1 %v12976_v29  ;;  %12628 = vmatprep.mubr.bf16.mxu0 %v11454_v46  ;;  %v7757_v22 = vrot.slane %v7755_v42, 5  ;;  %v7761_v19 = vrot.slane %v7759_v32, 4  ;;  %v8314_v62 = vsel %vm13419_vm7, %v8312_v35, %v8313_v44  ;;  %v7765_v25 = vshll.u32 %v17009_v33, 16  ;;  %v17125_v32 = vpop.f32.mrf.mxu1  ;;  %v17130_v35 = vld [vmem:[#allocation2 + $0x28] sm:$0xf] }
 0x2fd   : > { %12728 = vmatprep.subr.bf16.mxu1 %v17093_v2  ;;  %v7734_v45 = vsel %vm13133_vm4, %v7729_v63, %v7733_v43  ;;  %v9073_v61 = vshrl.u32 %v9024_v36, 16  ;;  %v7744_v28 = vsel %vm13133_vm4, %v7739_v0, %v7743_v37  ;;  %v11455_v48 = vcombine.low %v8311_v3, %v8314_v62  ;;  %v9027_v37 = vld [vmem:[#allocation2 + $0x24] sm:$0xf]  ;;  %v17133_v62 = vld [vmem:[#allocation2 + $0x2c] sm:$0x1] }
 0x2fe   : > { %v7752_v31 = vor.u32 %v7751_v15, %v7748_v54  ;;  %v7762_v23 = vor.u32 %v7761_v19, %v7757_v22  ;;  %v11396_v29 = vcombine.low %v7734_v45, %v7744_v28  ;;  %v7767_v16 = vrot.slane %v7765_v25, 5 }
 0x2ff   : > { %12569 = vmatmul.mubr.bf16.gmra.mxu1 %v17024_v60  ;;  %v9075_v39 = vrot.slane %v9073_v61, 4  ;;  %v9076_v53 = vshll.u32 %v9024_v36, 16  ;;  %v9082_v13 = vshll.u32 %v9025_v40, 16  ;;  %v9086_v49 = vshrl.u32 %v9025_v40, 16  ;;  %v17117_v60 = vpop.f32.mrf.mxu0 }
 0x300   : > { %12572 = vmatprep.mubr.bf16.mxu1 %v17063_v57  ;;  %v7753_v26 = vrot.slane %v7752_v31, 4  ;;  %v7763_v33 = vrot.slane %v7762_v23, 4  ;;  %18629 = vst [vmem:[#allocation24_spill] sm:$0xff] %v17117_v60  ;;  %v9092_v18 = vshll.u32 %v9026_v12, 16  ;;  %v7770_v14 = vshrl.u32 %v7427_v24, 16  ;;  %v17140_v23 = vpop.f32.mrf.mxu1 }
 0x301   : > { %v9078_v58 = vrot.slane %v9076_v53, 5  ;;  %v7773_v46 = vshll.u32 %v7427_v24, 16  ;;  %v9084_v43 = vrot.slane %v9082_v13, 5  ;;  %v9088_v27 = vrot.slane %v9086_v49, 4  ;;  %v17127_v36 = vpop.f32.mrf.mxu0 }
 0x302   : > { %v7758_v1 = vsel %vm13133_vm4, %v7753_v26, %v7757_v22  ;;  %v7768_v57 = vsel %vm13133_vm4, %v7763_v33, %v7767_v16  ;;  %v9094_v21 = vrot.slane %v9092_v18, 5  ;;  %v7772_v44 = vrot.slane %v7770_v14, 4 }
 0x303   : > { %12629 = vmatmul.mubr.bf16.gmra.mxu0 %v11455_v48  ;;  %v11397_v7 = vcombine.low %v7758_v1, %v7768_v57  ;;  %v9079_v10 = vor.u32 %v9078_v58, %v9075_v39  ;;  %v9089_v51 = vor.u32 %v9088_v27, %v9084_v43  ;;  %v7775_v55 = vrot.slane %v7773_v46, 5  ;;  %v17142_v12 = vpop.f32.mrf.mxu0  ;;  %v9030_v46 = vld [vmem:[#allocation2 + $0x30] sm:$0xf] }
 0x304   : > { %v7779_v8 = vshll.u32 %v17042_v9, 16  ;;  %v7783_v42 = vshrl.u32 %v17042_v9, 16  ;;  %v7789_v3 = vshll.u32 %v17046_v6, 16  ;;  %v9097_v54 = vshrl.u32 %v9027_v37, 16  ;;  %v7430_v6 = vld [vmem:[#allocation2 + $0xc0] sm:$0xf] }
 0x305   : > { %v9080_v63 = vrot.slane %v9079_v10, 4  ;;  %v9100_v0 = vshll.u32 %v9027_v37, 16  ;;  %v9090_v15 = vrot.slane %v9089_v51, 4  ;;  %v7776_v22 = vor.u32 %v7775_v55, %v7772_v44  ;;  %v17152_v37 = vld [vmem:[#allocation2 + $0x34] sm:$0xf]  ;;  %v17154_v10 = vpop.f32.mrf.mxu1 }
 0x306   : > { %v7781_v19 = vrot.slane %v7779_v8, 5  ;;  %v7785_v45 = vrot.slane %v7783_v42, 4  ;;  %v7791_v25 = vrot.slane %v7789_v3, 5  ;;  %v9099_v40 = vrot.slane %v9097_v54, 4 }
 0x307   : > { %12573 = vmatmul.mubr.bf16.gmra.mxu1 %v17088_v52  ;;  %v9085_v9 = vsel %vm13133_vm4, %v9080_v63, %v9084_v43  ;;  %v9102_v61 = vrot.slane %v9100_v0, 5  ;;  %v9095_v28 = vsel %vm13133_vm4, %v9090_v15, %v9094_v21  ;;  %v7777_v48 = vrot.slane %v7776_v22, 4  ;;  %v17156_v21 = vpop.f32.mrf.mxu0  ;;  %v17161_v15 = vld [vmem:[#allocation2 + $0x38] sm:$0x1] }
 0x308   : > { %12576 = vmatprep.mubr.bf16.mxu1 %v11396_v29  ;;  %v7786_v31 = vor.u32 %v7785_v45, %v7781_v19  ;;  %v9106_v52 = vshll.u32 %v17130_v35, 16  ;;  %v11520_v24 = vcombine.low %v9085_v9, %v9095_v28  ;;  %v9110_v16 = vshrl.u32 %v17130_v35, 16 }
 0x309   : > { %v9103_v29 = vor.u32 %v9102_v61, %v9099_v40  ;;  %v9116_v39 = vshll.u32 %v17133_v62, 16  ;;  %v7782_v53 = vsel %vm13133_vm4, %v7777_v48, %v7781_v19  ;;  %v7794_v13 = vshrl.u32 %v7430_v6, 16  ;;  %v9033_v61 = vld [vmem:[#allocation2 + $0x3c] sm:$0xf] }
 0x30a   : > { %v7787_v26 = vrot.slane %v7786_v31, 4  ;;  %v9108_v33 = vrot.slane %v9106_v52, 5  ;;  %12696 = vmatprep.mubr.bf16.mxu0 %v11520_v24  ;;  %v9112_v58 = vrot.slane %v9110_v16, 4  ;;  %v7797_v14 = vshll.u32 %v7430_v6, 16  ;;  %v17167_v6 = vpop.f32.mrf.mxu0  ;;  %v17171_v52 = vld [vmem:[#allocation2 + $0x40] sm:$0xf] }
 0x30b   : > { %v9104_v49 = vrot.slane %v9103_v29, 4  ;;  %v9118_v18 = vrot.slane %v9116_v39, 5  ;;  %v7796_v57 = vrot.slane %v7794_v13, 4  ;;  %v7803_v43 = vshll.u32 %v17081_v11, 16 }
 0x30c   : > { %v7792_v1 = vsel %vm13133_vm4, %v7787_v26, %v7791_v25  ;;  %v7807_v27 = vshrl.u32 %v17081_v11, 16  ;;  %v9113_v55 = vor.u32 %v9112_v58, %v9108_v33  ;;  %v7799_v8 = vrot.slane %v7797_v14, 5 }
 0x30d   : > { %v11398_v44 = vcombine.low %v7782_v53, %v7792_v1  ;;  %v9109_v51 = vsel %vm13133_vm4, %v9104_v49, %v9108_v33  ;;  %v7805_v42 = vrot.slane %v7803_v43, 5  ;;  %v7813_v3 = vshll.u32 %v17083_v4, 16 }
 0x30e   : > { %v7809_v63 = vrot.slane %v7807_v27, 4  ;;  %v9121_v54 = vshrl.u32 %v9030_v46, 16  ;;  %v9114_v11 = vrot.slane %v9113_v55, 4  ;;  %v7800_v0 = vor.u32 %v7799_v8, %v7796_v57 }
 0x30f   : > { %12577 = vmatmul.mubr.bf16.gmra.mxu1 %v11397_v7  ;;  %v9124_v22 = vshll.u32 %v9030_v46, 16  ;;  %v9130_v19 = vshll.u32 %v17152_v37, 16  ;;  %v7815_v9 = vrot.slane %v7813_v3, 5  ;;  %v9134_v40 = vshrl.u32 %v17152_v37, 16  ;;  %v17165_v7 = vpop.f32.mrf.mxu1  ;;  %v9036_v46 = vld [vmem:[#allocation2 + $0x48] sm:$0xf] }
 0x310   : > { %12580 = vmatprep.mubr.bf16.mxu1 %v11398_v44  ;;  %v7810_v45 = vor.u32 %v7809_v63, %v7805_v42  ;;  %v9123_v25 = vrot.slane %v9121_v54, 4  ;;  %v9119_v4 = vsel %vm13133_vm4, %v9114_v11, %v9118_v18  ;;  %v7801_v28 = vrot.slane %v7800_v0, 4  ;;  %v17178_v18 = vld [vmem:[#allocation2 + $0x44] sm:$0x1]  ;;  %v12977_v44 = vld [vmem:[#allocation2 + $0x18] sm:$0xff]  }
 0x311   : > { %v9126_v48 = vrot.slane %v9124_v22, 5  ;;  %v9132_v31 = vrot.slane %v9130_v19, 5  ;;  %v11521_v24 = vcombine.low %v9109_v51, %v9119_v4  ;;  %v9136_v16 = vrot.slane %v9134_v40, 4  ;;  %v17181_v1 = vpop.f32.mrf.mxu1  ;;  %v17186_v54 = vld [vmem:[#allocation2 + $0x4c] sm:$0xf] }
 0x312   : > { %v7811_v29 = vrot.slane %v7810_v45, 4  ;;  %v9140_v39 = vshll.u32 %v17161_v15, 16  ;;  %v9145_v26 = vshrl.u32 %v9033_v61, 16  ;;  %v9148_v33 = vshll.u32 %v9033_v61, 16  ;;  %v17183_v57 = vpop.f32.mrf.mxu0 }
 0x313   : > { %v9127_v53 = vor.u32 %v9126_v48, %v9123_v25  ;;  %12697 = vmatmul.mubr.bf16.vlgmr.msra.gmra.mxu0 %v11521_v24  ;;  %v7806_v13 = vsel %vm13133_vm4, %v7801_v28, %v7805_v42  ;;  %v9137_v58 = vor.u32 %v9136_v16, %v9132_v31  ;;  %v9154_v14 = vshll.u32 %v17171_v52, 16  ;;  %v17197_v61 = vpop.f32.mrf.mxu1  ;;  %v17201_v24 = vld [vmem:[#allocation2 + $0x50] sm:$0x1] }
 0x314   : > { %v7816_v49 = vsel %vm13133_vm4, %v7811_v29, %v7815_v9  ;;  %v9147_v51 = vrot.slane %v9145_v26, 4  ;;  %v9150_v55 = vrot.slane %v9148_v33, 5  ;;  %v9142_v42 = vrot.slane %v9140_v39, 5  ;;  %v17199_v4 = vpop.f32.mrf.mxu0  ;;  %v9039_v39 = vld [vmem:[#allocation2 + $0x54] sm:$0xf] }
 0x315   : > { %v11399_v43 = vcombine.low %v7806_v13, %v7816_v49  ;;  %v9128_v27 = vrot.slane %v9127_v53, 4  ;;  %v9138_v8 = vrot.slane %v9137_v58, 4  ;;  %v9156_v63 = vrot.slane %v9154_v14, 5  ;;  %v17211_v49 = vld [vmem:[#allocation2 + $0x58] sm:$0xf] }
 0x316   : > { %v9158_v3 = vshrl.u32 %v17171_v52, 16  ;;  %v9151_v11 = vor.u32 %v9150_v55, %v9147_v51  ;;  %v9164_v0 = vshll.u32 %v17178_v18, 16  ;;  %v17191_v22 = vadd.f32 %v16974_v20, %v17115_v47 }
 0x317   : > { %12581 = vmatmul.mubr.bf16.gmra.mxu1 %v11399_v43  ;;  %v9169_v19 = vshrl.u32 %v9036_v46, 16  ;;  %v9133_v45 = vsel %vm13133_vm4, %v9128_v27, %v9132_v31  ;;  %v9143_v9 = vsel %vm13133_vm4, %v9138_v8, %v9142_v42  ;;  %v9172_v40 = vshll.u32 %v9036_v46, 16  ;;  %v17214_v27 = vpop.f32.mrf.mxu1  ;;  %v12981_v42 = vld [vmem:[%s18297_s3 + $0x230] sm:$0xff]  }
 0x318   : > { %12648 = vmatprep.mubr.bf16.mxu1 %v12977_v44  ;;  %v9160_v25 = vrot.slane %v9158_v3, 4  ;;  %v11522_v28 = vcombine.low %v9133_v45, %v9143_v9  ;;  %v9152_v48 = vrot.slane %v9151_v11, 4  ;;  %v9178_v47 = vshll.u32 %v17186_v54, 16  ;;  %18630 = vst [vmem:[#allocation37_spill] sm:$0xff] %v17214_v27  ;;  %v17216_v44 = vpop.f32.mrf.mxu0  ;;  %v9042_v45 = vld [vmem:[#allocation2 + $0x60] sm:$0xf] }
 0x319   : > { %v9171_v20 = vrot.slane %v9169_v19, 4  ;;  %v9174_v16 = vrot.slane %v9172_v40, 5  ;;  %v9182_v31 = vshrl.u32 %v17186_v54, 16  ;;  %v9166_v53 = vrot.slane %v9164_v0, 5  ;;  %v12980_v19 = vld [vmem:[#allocation2 + $0x30] sm:$0xff]  }
 0x31a   : > { %v9161_v29 = vor.u32 %v9160_v25, %v9156_v63  ;;  %12700 = vmatprep.mubr.bf16.mxu0 %v11522_v28  ;;  %v9180_v26 = vrot.slane %v9178_v47, 5  ;;  %v17207_v33 = vadd.f32 %v16998_v59, %v17125_v32  ;;  %v10278_v13 = vsel %vm788_vm0, %v16992_v17, 0  ;;  %v12979_v59 = vld [vmem:[#allocation2 + $0x24] sm:$0xff]   ;;  %v17224_v17 = vld [vmem:[#allocation2 + $0x5c] sm:$0x1] }
 0x31b   : > { %v9175_v14 = vor.u32 %v9174_v16, %v9171_v20  ;;  %v9184_v46 = vrot.slane %v9182_v31, 4  ;;  %v9188_v43 = vshll.u32 %v17201_v24, 16  ;;  %12777 = vmatpush3.bf16.msra.mxu0 %v10278_v13  ;;  %v9157_v51 = vsel %vm13133_vm4, %v9152_v48, %v9156_v63  ;;  %v17233_v40 = vld [vmem:[#allocation2 + $0x64] sm:$0xf]  ;;  %v17239_v16 = vpop.f32.mrf.mxu0  ;;  %v17245_v13 = vld [vmem:[#allocation2 + $0x68] sm:$0x1] }
 0x31c   : > { %v9162_v58 = vrot.slane %v9161_v29, 4  ;;  %v17222_v32 = vadd.f32 %v17030_v30, %v17140_v23  ;;  %v9193_v55 = vshrl.u32 %v9039_v39, 16  ;;  %v9196_v8 = vshll.u32 %v9039_v39, 16  ;;  %v9057_v27 = vld [vmem:[#allocation2 + $0x9c] sm:$0xf] }
 0x31d   : > { %v9176_v11 = vrot.slane %v9175_v14, 4  ;;  %v9185_v0 = vor.u32 %v9184_v46, %v9180_v26  ;;  %v9202_v63 = vshll.u32 %v17211_v49, 16  ;;  %v9206_v25 = vshrl.u32 %v17211_v49, 16 }
 0x31e   : > { %v9167_v3 = vsel %vm13133_vm4, %v9162_v58, %v9166_v53  ;;  %v9195_v30 = vrot.slane %v9193_v55, 4  ;;  %v9198_v23 = vrot.slane %v9196_v8, 5  ;;  %v9190_v48 = vrot.slane %v9188_v43, 5  ;;  %v9045_v8 = vld [vmem:[#allocation2 + $0x6c] sm:$0xf] }
 0x31f   : > { %v11523_v9 = vcombine.low %v9157_v51, %v9167_v3  ;;  %12649 = vmatmul.mubr.bf16.vlgmr.msra.gmra.mxu1 %v12979_v59  ;;  %v9186_v28 = vrot.slane %v9185_v0, 4  ;;  %v9204_v20 = vrot.slane %v9202_v63, 5  ;;  %v9212_v47 = vshll.u32 %v17224_v17, 16  ;;  %v17237_v29 = vpop.f32.mrf.mxu1 }
 0x320   : > { %12729 = vmatpush3.bf16.msra.mxu1 %v17093_v2  ;;  %12652 = vmatprep.mubr.bf16.mxu1 %v12980_v19  ;;  %v9199_v31 = vor.u32 %v9198_v23, %v9195_v30  ;;  %v9208_v39 = vrot.slane %v9206_v25, 4  ;;  %v17243_v53 = vadd.f32 %v17071_v38, %v17165_v7  ;;  %v9217_v58 = vshrl.u32 %v9042_v45, 16  ;;  %v12984_v2 = vld [vmem:[%s18297_s3 + $0x228] sm:$0xff]   ;;  %v12982_v23 = vld [vmem:[#allocation2 + $0x3c] sm:$0xff]  }
 0x321   : > { %12701 = vmatmul.mubr.bf16.gmra.mxu0 %v11523_v9  ;;  %12730 = vmatprep.subr.bf16.mxu1 %v12981_v42  ;;  %v9181_v14 = vsel %vm13133_vm4, %v9176_v11, %v9180_v26  ;;  %v9191_v46 = vsel %vm13133_vm4, %v9186_v28, %v9190_v48  ;;  %v9220_v43 = vshll.u32 %v9042_v45, 16  ;;  %v9226_v51 = vshll.u32 %v17233_v40, 16  ;;  %v17255_v3 = vpop.f32.mrf.mxu1  ;;  %v17259_v26 = vld [vmem:[#allocation2 + $0x70] sm:$0xf] }
 0x322   : > { %v11524_v59 = vcombine.low %v9181_v14, %v9191_v46  ;;  %v9200_v55 = vrot.slane %v9199_v31, 4  ;;  %v9209_v38 = vor.u32 %v9208_v39, %v9204_v20  ;;  %v9219_v7 = vrot.slane %v9217_v58, 4  ;;  %v12983_v58 = vld [vmem:[#allocation2 + $0x48] sm:$0xff]   ;;  %v17276_v14 = vld [vmem:[#allocation2 + $0x74] sm:$0x1] }
 0x323   : > { %v9222_v0 = vrot.slane %v9220_v43, 5  ;;  %v9228_v19 = vrot.slane %v9226_v51, 5  ;;  %v9230_v63 = vshrl.u32 %v17233_v40, 16  ;;  %v9236_v9 = vshll.u32 %v17245_v13, 16  ;;  %v12371_v43 = vpop.f32.mrf.mxu1 }
 0x324   : > { %12731 = vmatpush3.bf16.msra.mxu1 %v12981_v42  ;;  %v17261_v11 = vpop.f32.mrf.mxu0  ;;  %12704 = vmatprep.mubr.bf16.mxu0 %v11524_v59  ;;  %v9210_v45 = vrot.slane %v9209_v38, 4  ;;  %v9214_v30 = vrot.slane %v9212_v47, 5  ;;  %v17265_v25 = vadd.f32 %v17095_v41, %v17181_v1  ;;  %v17269_v28 = vadd.f32 %v17104_v34, %v17197_v61  ;;  %v12987_v42 = vld [vmem:[%s18297_s3 + $0x220] sm:$0xff]   ;;  %v9048_v38 = vld [vmem:[#allocation2 + $0x78] sm:$0xf] }
 0x325   : > { %12732 = vmatprep.subr.bf16.mxu1 %v12984_v2  ;;  %v9205_v48 = vsel %vm13133_vm4, %v9200_v55, %v9204_v20  ;;  %v9223_v31 = vor.u32 %v9222_v0, %v9219_v7  ;;  %v9232_v39 = vrot.slane %v9230_v63, 4  ;;  %v9238_v47 = vrot.slane %v9236_v9, 5  ;;  %v17284_v7 = vld [vmem:[#allocation2 + $0x7c] sm:$0xf] }
 0x326   : > { %18631 = vst [vmem:[#allocation48_spill] sm:$0xff] %v17265_v25  ;;  %18632 = vst [vmem:[#allocation49_spill] sm:$0xff] %v17269_v28  ;;  %v17278_v41 = vpop.f32.mrf.mxu0  ;;  %v9215_v34 = vsel %vm13133_vm4, %v9210_v45, %v9214_v30  ;;  %v9241_v1 = vshrl.u32 %v9045_v8, 16  ;;  %v9244_v61 = vshll.u32 %v9045_v8, 16  ;;  %v9250_v46 = vshll.u32 %v17259_v26, 16  ;;  %v12990_v8 = vld [vmem:[%s18297_s3 + $0x218] sm:$0xff]  }
 0x327   : > { %12653 = vmatmul.mubr.bf16.gmra.mxu1 %v12982_v23  ;;  %v11525_v51 = vcombine.low %v9205_v48, %v9215_v34  ;;  %v9224_v59 = vrot.slane %v9223_v31, 4  ;;  %v9233_v20 = vor.u32 %v9232_v39, %v9228_v19  ;;  %v9254_v55 = vshrl.u32 %v17259_v26, 16  ;;  %v17298_v34 = vld [vmem:[#allocation2 + $0x80] sm:$0x1] }
 0x328   : > { %12656 = vmatprep.mubr.bf16.mxu1 %v12983_v58  ;;  %12733 = vmatpush3.bf16.msra.mxu1 %v12984_v2  ;;  %v9243_v0 = vrot.slane %v9241_v1, 4  ;;  %v9246_v63 = vrot.slane %v9244_v61, 5  ;;  %v9252_v9 = vrot.slane %v9250_v46, 5  ;;  %v9260_v45 = vshll.u32 %v17276_v14, 16  ;;  %v17296_v2 = vpop.f32.mrf.mxu0  ;;  %v6120_v46 = vpop.f32.mrf.mxu1  ;;  %v17363_v25 = vld [vmem:[#allocation2 + $0xa0] sm:$0xf] }
 0x329   : > { %12734 = vmatprep.subr.bf16.mxu1 %v12987_v42  ;;  %12705 = vmatmul.mubr.bf16.gmra.mxu0 %v11525_v51  ;;  %v9229_v30 = vsel %vm13133_vm4, %v9224_v59, %v9228_v19  ;;  %v9234_v23 = vrot.slane %v9233_v20, 4  ;;  %v9256_v48 = vrot.slane %v9254_v55, 4  ;;  %v17294_v31 = vadd.f32 %v17127_v36, %v17237_v29  ;;  %v9051_v20 = vld [vmem:[#allocation2 + $0x84] sm:$0xf]  ;;  %v12985_v55 = vld [vmem:[#allocation2 + $0x54] sm:$0xff]  }
 0x32a   : > { %v9247_v39 = vor.u32 %v9246_v63, %v9243_v0  ;;  %v9262_v58 = vrot.slane %v9260_v45, 5  ;;  %v9265_v1 = vshrl.u32 %v9048_v38, 16  ;;  %v9268_v61 = vshll.u32 %v9048_v38, 16  ;;  %v12993_v38 = vld [vmem:[%s18297_s3 + $0x210] sm:$0xff]   ;;  %v17308_v60 = vpop.f32.mrf.mxu0 }
 0x32b   : > { %18633 = vst [vmem:[#allocation25_spill] sm:$0xff] %v17294_v31  ;;  %v9239_v51 = vsel %vm13133_vm4, %v9234_v23, %v9238_v47  ;;  %v9257_v28 = vor.u32 %v9256_v48, %v9252_v9  ;;  %v9274_v19 = vshll.u32 %v17284_v7, 16  ;;  %v9278_v59 = vshrl.u32 %v17284_v7, 16  ;;  %v12986_v48 = vld [vmem:[#allocation2 + $0x60] sm:$0xff]  }
 0x32c   : > { %12735 = vmatpush3.bf16.msra.mxu1 %v12987_v42  ;;  %v11526_v36 = vcombine.low %v9229_v30, %v9239_v51  ;;  %v9248_v29 = vrot.slane %v9247_v39, 4  ;;  %v9267_v0 = vrot.slane %v9265_v1, 4  ;;  %v9270_v63 = vrot.slane %v9268_v61, 5  ;;  %v17316_v1 = vld [vmem:[#allocation2 + $0x88] sm:$0xf] }
 0x32d   : > { %12736 = vmatprep.subr.bf16.mxu1 %v12990_v8  ;;  %v9258_v45 = vrot.slane %v9257_v28, 4  ;;  %v9276_v31 = vrot.slane %v9274_v19, 5  ;;  %v9280_v47 = vrot.slane %v9278_v59, 4  ;;  %v9284_v23 = vshll.u32 %v17298_v34, 16 }
 0x32e   : > { %12708 = vmatprep.mubr.bf16.mxu0 %v11526_v36  ;;  %v9253_v42 = vsel %vm13133_vm4, %v9248_v29, %v9252_v9  ;;  %v9271_v30 = vor.u32 %v9270_v63, %v9267_v0  ;;  %v17314_v39 = vadd.f32 %v17142_v12, %v17255_v3  ;;  %v9289_v28 = vshrl.u32 %v9051_v20, 16  ;;  %v17323_v9 = vld [vmem:[#allocation2 + $0x8c] sm:$0x1]  ;;  %v9054_v29 = vld [vmem:[#allocation2 + $0x90] sm:$0xf] }
 0x32f   : > { %12657 = vmatmul.mubr.bf16.gmra.mxu1 %v12985_v55  ;;  %v12374_v61 = vpop.f32.mrf.mxu1  ;;  %v9263_v51 = vsel %vm13133_vm4, %v9258_v45, %v9262_v58  ;;  %v9281_v19 = vor.u32 %v9280_v47, %v9276_v31  ;;  %v9286_v59 = vrot.slane %v9284_v23, 5  ;;  %v17321_v36 = vadd.f32 %v17156_v21, %v12371_v43  ;;  %v12996_v58 = vld [vmem:[%s18297_s3 + $0x208] sm:$0xff]  }
 0x330   : > { %18634 = vst [vmem:[#allocation10_spill] sm:$0xff] %v17314_v39  ;;  %12660 = vmatprep.mubr.bf16.mxu1 %v12986_v48  ;;  %12737 = vmatpush3.bf16.msra.mxu1 %v12990_v8  ;;  %v11527_v55 = vcombine.low %v9253_v42, %v9263_v51  ;;  %v9272_v12 = vrot.slane %v9271_v30, 4  ;;  %v17326_v3 = vadd.f32 %v17167_v6, %v6120_v46  ;;  %v9291_v0 = vrot.slane %v9289_v28, 4  ;;  %v17341_v48 = vld [vmem:[#allocation2 + $0x94] sm:$0xf] }
 0x331   : > { %18635 = vst [vmem:[#allocation38_spill] sm:$0xff] %v17321_v36  ;;  %v6133_v63 = vpop.f32.mrf.mxu1  ;;  %12738 = vmatprep.subr.bf16.mxu1 %v12993_v38  ;;  %v9282_v45 = vrot.slane %v9281_v19, 4  ;;  %v9292_v47 = vshll.u32 %v9051_v20, 16  ;;  %v9298_v21 = vshll.u32 %v17316_v1, 16  ;;  %v9302_v43 = vshrl.u32 %v17316_v1, 16  ;;  %v17333_v23 = vpop.f32.mrf.mxu0  ;;  %18638 = vst [vmem:[#allocation21_spill] sm:$0xff] %v17341_v48 }
 0x332   : > { %18636 = vst [vmem:[#allocation18_spill] sm:$0xff] %v17326_v3  ;;  %12709 = vmatmul.mubr.bf16.gmra.mxu0 %v11527_v55  ;;  %v9277_v6 = vsel %vm13133_vm4, %v9272_v12, %v9276_v31  ;;  %v9308_v8 = vshll.u32 %v17323_v9, 16  ;;  %v17339_v46 = vadd.f32 %v17183_v57, %v12374_v61  ;;  %v9313_v42 = vshrl.u32 %v9054_v29, 16  ;;  %v17345_v3 = vld [vmem:[#allocation2 + $0x98] sm:$0x1]  ;;  %v12988_v36 = vld [vmem:[#allocation2 + $0x6c] sm:$0xff]  }
 0x333   : > { %v12375_v30 = vpop.f32.mrf.mxu1  ;;  %v9287_v20 = vsel %vm13133_vm4, %v9282_v45, %v9286_v59  ;;  %v9294_v28 = vrot.slane %v9292_v47, 5  ;;  %v9300_v51 = vrot.slane %v9298_v21, 5  ;;  %v9304_v19 = vrot.slane %v9302_v43, 4  ;;  %18639 = vst [vmem:[#allocation42_spill] sm:$0xff] %v17345_v3  ;;  %v17347_v55 = vpop.f32.mrf.mxu0  ;;  %v12989_v21 = vld [vmem:[#allocation2 + $0x78] sm:$0xff]  }
 0x334   : > { %18637 = vst [vmem:[#allocation9_spill] sm:$0xff] %v17339_v46  ;;  %12739 = vmatpush3.bf16.msra.mxu1 %v12993_v38  ;;  %v11528_v31 = vcombine.low %v9277_v6, %v9287_v20  ;;  %v9310_v12 = vrot.slane %v9308_v8, 5  ;;  %v9315_v57 = vrot.slane %v9313_v42, 4  ;;  %v9316_v61 = vshll.u32 %v9054_v29, 16  ;;  %v12999_v46 = vld [vmem:[%s18297_s3 + $0x200] sm:$0xff]  }
 0x335   : > { %12740 = vmatprep.subr.bf16.mxu1 %v12996_v58  ;;  %v9295_v39 = vor.u32 %v9294_v28, %v9291_v0  ;;  %v9305_v59 = vor.u32 %v9304_v19, %v9300_v51  ;;  %v9322_v45 = vshll.u32 %v17341_v48, 16  ;;  %v9326_v47 = vshrl.u32 %v17341_v48, 16  ;;  %v6136_v43 = vpop.f32.mrf.mxu1  ;;  %v17354_v38 = vpop.f32.mrf.mxu0 }
 0x336   : > { %12712 = vmatprep.mubr.bf16.mxu0 %v11528_v31  ;;  %v9318_v6 = vrot.slane %v9316_v61, 5  ;;  %v9332_v29 = vshll.u32 %v17345_v3, 16  ;;  %v17358_v8 = vadd.f32 %v17199_v4, %v6133_v63  ;;  %v17361_v0 = vadd.f32 %v17216_v44, %v12375_v30  ;;  %v17370_v4 = vld [vmem:[#allocation2 + $0xa4] sm:$0x1] }
 0x337   : > { %12661 = vmatmul.mubr.bf16.gmra.mxu1 %v12988_v36  ;;  %v9296_v42 = vrot.slane %v9295_v39, 4  ;;  %v9306_v20 = vrot.slane %v9305_v59, 4  ;;  %v9324_v28 = vrot.slane %v9322_v45, 5  ;;  %v9328_v19 = vrot.slane %v9326_v47, 4  ;;  %v17365_v48 = vpop.f32.mrf.mxu0  ;;  %18643 = vst [vmem:[#allocation36_spill] sm:$0xff] %v17370_v4 }
 0x338   : > { %18640 = vst [vmem:[#allocation23_spill] sm:$0xff] %v17358_v8  ;;  %18641 = vst [vmem:[#allocation43_spill] sm:$0xff] %v17361_v0  ;;  %12664 = vmatprep.mubr.bf16.mxu1 %v12989_v21  ;;  %12741 = vmatpush3.bf16.msra.mxu1 %v12996_v58  ;;  %v9319_v36 = vor.u32 %v9318_v6, %v9315_v57  ;;  %v9334_v31 = vrot.slane %v9332_v29, 5  ;;  %v17368_v61 = vadd.f32 %v17239_v16, %v6136_v43  ;;  %v9060_v45 = vld [vmem:[#allocation2 + $0xa8] sm:$0xf]  ;;  %v12992_v8 = vld [vmem:[#allocation2 + $0x90] sm:$0xff]  }
 0x339   : > { %v9337_v63 = vshrl.u32 %v9057_v27, 16  ;;  %12742 = vmatprep.subr.bf16.mxu1 %v12999_v46  ;;  %v9301_v44 = vsel %vm13133_vm4, %v9296_v42, %v9300_v51  ;;  %v9311_v39 = vsel %vm13133_vm4, %v9306_v20, %v9310_v12  ;;  %v9329_v30 = vor.u32 %v9328_v19, %v9324_v28  ;;  %v17376_v47 = vpop.f32.mrf.mxu0  ;;  %v17381_v42 = vld [vmem:[#allocation2 + $0xac] sm:$0xf] }
 0x33a   : > { %18642 = vst [vmem:[#allocation34_spill] sm:$0xff] %v17368_v61  ;;  %v9340_v59 = vshll.u32 %v9057_v27, 16  ;;  %v11529_v58 = vcombine.low %v9301_v44, %v9311_v39  ;;  %v9320_v57 = vrot.slane %v9319_v36, 4  ;;  %v9346_v16 = vshll.u32 %v17363_v25, 16  ;;  %18644 = vst [vmem:[#allocation17_spill] sm:$0xff] %v17381_v42  ;;  %v12991_v36 = vld [vmem:[#allocation2 + $0x84] sm:$0xff]  }
 0x33b   : > { %v9339_v21 = vrot.slane %v9337_v63, 4  ;;  %v9330_v43 = vrot.slane %v9329_v30, 4  ;;  %v9350_v29 = vshrl.u32 %v17363_v25, 16  ;;  %v9356_v61 = vshll.u32 %v17370_v4, 16  ;;  %v17383_v12 = vpop.f32.mrf.mxu0  ;;  %v17390_v63 = vld [vmem:[#allocation2 + $0xb0] sm:$0x1] }
 0x33c   : > { %v9342_v6 = vrot.slane %v9340_v59, 5  ;;  %v12378_v51 = vpop.f32.mrf.mxu1  ;;  %12743 = vmatpush3.bf16.msra.mxu1 %v12999_v46  ;;  %12713 = vmatmul.mubr.bf16.gmra.mxu0 %v11529_v58  ;;  %v9325_v27 = vsel %vm13133_vm4, %v9320_v57, %v9324_v28  ;;  %v9348_v20 = vrot.slane %v9346_v16, 5  ;;  %18646 = vst [vmem:[#allocation12_spill] sm:$0xff] %v17390_v63  ;;  %v9361_v44 = vshrl.u32 %v9060_v45, 16 }
 0x33d   : > { %v17388_v19 = vadd.f32 %v17261_v11, %v12378_v51  ;;  %v9335_v39 = vsel %vm13133_vm4, %v9330_v43, %v9334_v31  ;;  %v9352_v59 = vrot.slane %v9350_v29, 4  ;;  %v9358_v0 = vrot.slane %v9356_v61, 5  ;;  %v17394_v58 = vpop.f32.mrf.mxu0 }
 0x33e   : > { %v9343_v30 = vor.u32 %v9342_v6, %v9339_v21  ;;  %v6149_v46 = vpop.f32.mrf.mxu1  ;;  %v11530_v4 = vcombine.low %v9325_v27, %v9335_v39  ;;  %v9363_v28 = vrot.slane %v9361_v44, 4  ;;  %v9364_v57 = vshll.u32 %v9060_v45, 16  ;;  %v9063_v21 = vld [vmem:[#allocation2 + $0xb4] sm:$0xf]  ;;  %v17407_v27 = vld [vmem:[#allocation2 + $0xb8] sm:$0xf] }
 0x33f   : > { %18645 = vst [vmem:[#allocation45_spill] sm:$0xff] %v17388_v19  ;;  %12665 = vmatmul.mubr.bf16.gmra.mxu1 %v12991_v36  ;;  %v9370_v11 = vshll.u32 %v17381_v42, 16  ;;  %v9353_v51 = vor.u32 %v9352_v59, %v9348_v20  ;;  %v9374_v19 = vshrl.u32 %v17381_v42, 16  ;;  %v9380_v3 = vshll.u32 %v17390_v63, 16  ;;  %v17399_v61 = vpop.f32.mrf.mxu0  ;;  %18649 = vst [vmem:[#allocation47_spill] sm:$0xff] %v17407_v27 }
 0x340   : > { %v9344_v16 = vrot.slane %v9343_v30, 4  ;;  %12668 = vmatprep.mubr.bf16.mxu1 %v12992_v8  ;;  %v12379_v31 = vpop.f32.mrf.mxu1  ;;  %12716 = vmatprep.mubr.bf16.mxu0 %v11530_v4  ;;  %v9366_v43 = vrot.slane %v9364_v57, 5  ;;  %v17402_v29 = vadd.f32 %v17278_v41, %v6149_v46  ;;  %v17414_v57 = vld [vmem:[#allocation2 + $0xbc] sm:$0x1]  ;;  %v9385_v41 = vshrl.u32 %v9063_v21, 16 }
 0x341   : > { %v9372_v6 = vrot.slane %v9370_v11, 5  ;;  %v17405_v45 = vadd.f32 %v17296_v2, %v12379_v31  ;;  %v9354_v44 = vrot.slane %v9353_v51, 4  ;;  %v9376_v8 = vrot.slane %v9374_v19, 4  ;;  %18651 = vst [vmem:[#allocation22_spill] sm:$0xff] %v17414_v57 }
 0x342   : > { %18647 = vst [vmem:[#allocation39_spill] sm:$0xff] %v17402_v29  ;;  %v9349_v36 = vsel %vm13133_vm4, %v9344_v16, %v9348_v20  ;;  %v9382_v39 = vrot.slane %v9380_v3, 5  ;;  %v6152_v30 = vpop.f32.mrf.mxu1  ;;  %v9367_v59 = vor.u32 %v9366_v43, %v9363_v28  ;;  %v9388_v46 = vshll.u32 %v9063_v21, 16  ;;  %v17416_v11 = vpop.f32.mrf.mxu0  ;;  %v9066_v16 = vld [vmem:[#allocation2 + $0xc0] sm:$0xf] }
 0x343   : > { %18648 = vst [vmem:[#allocation41_spill] sm:$0xff] %v17405_v45  ;;  %v17412_v4 = vadd.f32 %v17308_v60, %v6152_v30  ;;  %v9359_v2 = vsel %vm13133_vm4, %v9354_v44, %v9358_v0  ;;  %v9377_v31 = vor.u32 %v9376_v8, %v9372_v6  ;;  %v9394_v20 = vshll.u32 %v17407_v27, 16  ;;  %v12994_v30 = vld [vmem:[#allocation2 + $0x9c] sm:$0xff]   ;;  %v17425_v44 = vld [vmem:[#allocation2 + $0xc4] sm:$0xf] }
 0x344   : > { %v9398_v19 = vshrl.u32 %v17407_v27, 16  ;;  %v12382_v3 = vpop.f32.mrf.mxu1  ;;  %v11531_v28 = vcombine.low %v9349_v36, %v9359_v2  ;;  %v9368_v51 = vrot.slane %v9367_v59, 4  ;;  %v9387_v60 = vrot.slane %v9385_v41, 4  ;;  %v17422_v45 = vpop.f32.mrf.mxu0 }
 0x345   : > { %18650 = vst [vmem:[#allocation4_spill] sm:$0xff] %v17412_v4  ;;  %v9390_v43 = vrot.slane %v9388_v46, 5  ;;  %v12995_v4 = vld [vmem:[#allocation2 + $0xa8] sm:$0xff]   ;;  %v9378_v21 = vrot.slane %v9377_v31, 4  ;;  %v9396_v63 = vrot.slane %v9394_v20, 5  ;;  %v9404_v0 = vshll.u32 %v17414_v57, 16 }
 0x346   : > { %v9400_v29 = vrot.slane %v9398_v19, 4  ;;  %v6165_v8 = vpop.f32.mrf.mxu1  ;;  %12717 = vmatmul.mubr.bf16.gmra.mxu0 %v11531_v28  ;;  %v17428_v27 = vadd.f32 %v17333_v23, %v12382_v3  ;;  %v9409_v36 = vshrl.u32 %v9066_v16, 16  ;;  %v17430_v59 = vpop.f32.mrf.mxu0  ;;  %v9373_v41 = vsel %vm13133_vm4, %v9368_v51, %v9372_v6  ;;  %v17436_v31 = vld [vmem:[#allocation2 + $0xc8] sm:$0x1] }
 0x347   : > { %v9391_v42 = vor.u32 %v9390_v43, %v9387_v60  ;;  %12669 = vmatmul.mubr.bf16.gmra.mxu1 %v12994_v30  ;;  %v9383_v46 = vsel %vm13133_vm4, %v9378_v21, %v9382_v39  ;;  %18653 = vst [vmem:[#allocation19_spill] sm:$0xff] %v17436_v31  ;;  %v9412_v20 = vshll.u32 %v9066_v16, 16  ;;  %v9418_v3 = vshll.u32 %v17425_v44, 16  ;;  %v9069_v39 = vld [vmem:[#allocation2 + $0xcc] sm:$0xf] }
 0x348   : > { %18652 = vst [vmem:[#allocation26_spill] sm:$0xff] %v17428_v27  ;;  %v9401_v2 = vor.u32 %v9400_v29, %v9396_v63  ;;  %12672 = vmatprep.mubr.bf16.mxu1 %v12995_v4  ;;  %v12383_v19 = vpop.f32.mrf.mxu1  ;;  %v11532_v28 = vcombine.low %v9373_v41, %v9383_v46  ;;  %v9411_v23 = vrot.slane %v9409_v36, 4  ;;  %v17439_v43 = vpop.f32.mrf.mxu0  ;;  %v9406_v27 = vrot.slane %v9404_v0, 5  ;;  %v17449_v21 = vld [vmem:[#allocation2 + $0xd0] sm:$0xf] }
 0x349   : > { %v9392_v60 = vrot.slane %v9391_v42, 4  ;;  %v9414_v57 = vrot.slane %v9412_v20, 5  ;;  %v9422_v6 = vshrl.u32 %v17425_v44, 16  ;;  %v9420_v29 = vrot.slane %v9418_v3, 5  ;;  %v17457_v20 = vld [vmem:[#allocation2 + $0xd4] sm:$0x1] }
 0x34a   : > { %v9402_v30 = vrot.slane %v9401_v2, 4  ;;  %v6168_v51 = vpop.f32.mrf.mxu1  ;;  %12720 = vmatprep.mubr.bf16.mxu0 %v11532_v28  ;;  %v9428_v16 = vshll.u32 %v17436_v31, 16  ;;  %v17444_v4 = vadd.f32 %v17347_v55, %v6165_v8  ;;  %v17447_v42 = vadd.f32 %v17354_v38, %v12383_v19  ;;  %v17451_v36 = vpop.f32.mrf.mxu0  ;;  %v12997_v38 = vld [vmem:[#allocation2 + $0xb4] sm:$0xff]  }
 0x34b   : > { %v9397_v0 = vsel %vm13133_vm4, %v9392_v60, %v9396_v63  ;;  %v9415_v46 = vor.u32 %v9414_v57, %v9411_v23  ;;  %v9424_v2 = vrot.slane %v9422_v6, 4  ;;  %v17460_v55 = vadd.f32 %v17365_v48, %v6168_v51  ;;  %v12998_v63 = vld [vmem:[#allocation2 + $0xc0] sm:$0xff]  }
 0x34c   : > { %18654 = vst [vmem:[#allocation35_spill] sm:$0xff] %v17444_v4  ;;  %18655 = vst [vmem:[#allocation44_spill] sm:$0xff] %v17447_v42  ;;  %v9407_v41 = vsel %vm13133_vm4, %v9402_v30, %v9406_v27  ;;  %v9433_v8 = vshrl.u32 %v9069_v39, 16  ;;  %v9436_v19 = vshll.u32 %v9069_v39, 16  ;;  %v17462_v3 = vpop.f32.mrf.mxu0  ;;  %v9442_v60 = vshll.u32 %v17449_v21, 16 }
 0x34d   : > { %v11533_v28 = vcombine.low %v9397_v0, %v9407_v41  ;;  %18656 = vst [vmem:[#allocation40_spill] sm:$0xff] %v17460_v55  ;;  %v9416_v42 = vrot.slane %v9415_v46, 4  ;;  %v9425_v31 = vor.u32 %v9424_v2, %v9420_v29  ;;  %v12386_v4 = vpop.f32.mrf.mxu1  ;;  %v9446_v27 = vshrl.u32 %v17449_v21, 16  ;;  %v9778_v2 = vld [vmem:[#allocation2 + $0x18] sm:$0xe] }
 0x34e   : > { %v17467_v57 = vadd.f32 %v17376_v47, %v12386_v4  ;;  %v9435_v48 = vrot.slane %v9433_v8, 4  ;;  %v9438_v23 = vrot.slane %v9436_v19, 5  ;;  %v9452_v30 = vshll.u32 %v17457_v20, 16  ;;  %v17470_v6 = vpop.f32.mrf.mxu0  ;;  %v13016_v55 = vld [vmem:[#allocation2 + $0x20] sm:$0x1] }
 0x34f   : > { %12721 = vmatmul.mubr.bf16.gmra.mxu0 %v11533_v28  ;;  %12673 = vmatmul.mubr.bf16.gmra.mxu1 %v12997_v38  ;;  %v9426_v51 = vrot.slane %v9425_v31, 4  ;;  %v9430_v39 = vrot.slane %v9428_v16, 5  ;;  %v6181_v0 = vpop.f32.mrf.mxu1  ;;  %v9444_v41 = vrot.slane %v9442_v60, 5  ;;  %v9448_v46 = vrot.slane %v9446_v27, 4  ;;  %v13015_v60 = vld [vmem:[#allocation2 + $0x1c] sm:$0xf] }
 0x350   : > { %18657 = vst [vmem:[#allocation46_spill] sm:$0xff] %v17467_v57  ;;  %12676 = vmatprep.mubr.bf16.mxu1 %v12998_v63  ;;  %v17474_v28 = vadd.f32 %v17051_v50, %v17154_v10  ;;  %v9421_v47 = vsel %vm13133_vm4, %v9416_v42, %v9420_v29  ;;  %v17479_v4 = vadd.f32 %v17383_v12, %v6181_v0  ;;  %v17481_v8 = vpop.f32.mrf.mxu0  ;;  %v9454_v63 = vrot.slane %v9452_v30, 5  ;;  %v9779_v57 = vld [vmem:[#allocation2 + $0x24] sm:$0xe]  ;;  %v13000_v42 = vld [vmem:[#allocation2 + $0xcc] sm:$0xff]  }
 0x351   : > { %v9439_v38 = vor.u32 %v9438_v23, %v9435_v48  ;;  %v9431_v31 = vsel %vm13133_vm4, %v9426_v51, %v9430_v39  ;;  %v12387_v16 = vpop.f32.mrf.mxu1  ;;  %v9449_v19 = vor.u32 %v9448_v46, %v9444_v41  ;;  %v9844_v27 = vrot.slane %v13015_v60, 5 }
 0x352   : > { %18658 = vst [vmem:[#allocation50_spill] sm:$0xff] %v17479_v4  ;;  %v11534_v50 = vcombine.low %v9421_v47, %v9431_v31  ;;  %v17486_v10 = vadd.f32 %v17394_v58, %v12387_v16  ;;  %v11544_v12 = vrot.slane %v9778_v2, 9  ;;  %v17488_v0 = vpop.f32.mrf.mxu0  ;;  %v9847_v51 = vrot.slane %v13016_v55, 5 }
 0x353   : > { %v9440_v29 = vrot.slane %v9439_v38, 4  ;;  %v9450_v48 = vrot.slane %v9449_v19, 4  ;;  %v6184_v23 = vpop.f32.mrf.mxu1  ;;  %v9846_v4 = vrot.slane %v9844_v27, 4  ;;  %v9851_v39 = vrot.slane %v17130_v35, 5  ;;  %v9780_v38 = vld [vmem:[#allocation2 + $0x30] sm:$0xe] }
 0x354   : > { %12724 = vmatprep.mubr.bf16.mxu0 %v11534_v50  ;;  %v17494_v46 = vadd.f32 %v17399_v61, %v6184_v23  ;;  %v9845_v58 = vsel %vm13419_vm7, %v11544_v12, %v9844_v27  ;;  %v11545_v2 = vrot.slane %v9779_v57, 9  ;;  %v17498_v47 = vpop.f32.mrf.mxu0  ;;  %v9781_v19 = vld [vmem:[#allocation2 + $0x3c] sm:$0xe]  ;;  %v9858_v27 = vrot.slane %v17152_v37, 5  ;;  %v9782_v23 = vld [vmem:[#allocation2 + $0x48] sm:$0xe] }
 0x355   : > { %v9445_v30 = vsel %vm13133_vm4, %v9440_v29, %v9444_v41  ;;  %v9455_v31 = vsel %vm13133_vm4, %v9450_v48, %v9454_v63  ;;  %v12390_v55 = vpop.f32.mrf.mxu1  ;;  %v9848_v35 = vsel %vm13419_vm7, %v9846_v4, %v9847_v51  ;;  %v9853_v16 = vrot.slane %v9851_v39, 4  ;;  %v18659_v51 = vld [vmem:[#allocation5_spill] sm:$0xff] }
 0x356   : > { %v9854_v41 = vrot.slane %v17133_v62, 5  ;;  %v11535_v61 = vcombine.low %v9445_v30, %v9455_v31  ;;  %v17506_v60 = vadd.f32 %v17416_v11, %v12390_v55  ;;  %v11576_v57 = vcombine.low %v9845_v58, %v9848_v35  ;;  %v17509_v50 = vpop.f32.mrf.mxu0 }
 0x357   : > { %12677 = vmatmul.mubr.bf16.gmra.mxu1 %v13000_v42  ;;  %v6197_v56 = vpop.f32.mrf.mxu1  ;;  %v9852_v63 = vsel %vm13419_vm7, %v11545_v2, %v9851_v39  ;;  %v11546_v29 = vrot.slane %v9780_v38, 9  ;;  %v9865_v62 = vrot.slane %v17171_v52, 5  ;;  %v9860_v42 = vrot.slane %v9858_v27, 4 }
 0x358   : > { %v9855_v4 = vsel %vm13419_vm7, %v9853_v16, %v9854_v41  ;;  %12725 = vmatmul.mubr.bf16.gmra.mxu0 %v11535_v61  ;;  %12744 = vmatprep.mubr.bf16.mxu1 %v11576_v57  ;;  %v17517_v11 = vadd.f32 %v17422_v45, %v6197_v56  ;;  %v9861_v37 = vrot.slane %v17161_v15, 5  ;;  %v17520_v12 = vpop.f32.mrf.mxu0  ;;  %v11547_v48 = vrot.slane %v9781_v19, 9  ;;  %v9783_v45 = vld [vmem:[#allocation2 + $0x54] sm:$0xe]  ;;  %v9784_v61 = vld [vmem:[#allocation2 + $0x60] sm:$0xe] }
 0x359   : > { %12778 = vmatprep.mubr.msk.bf16.mxu0 %vm739_vm3, %v18659_v51  ;;  %v12391_v39 = vpop.f32.mrf.mxu1  ;;  %v11577_v30 = vcombine.low %v9852_v63, %v9855_v4  ;;  %v9859_v52 = vsel %vm13419_vm7, %v11546_v29, %v9858_v27  ;;  %v9867_v58 = vrot.slane %v9865_v62, 4  ;;  %v9868_v2 = vrot.slane %v17178_v18, 5 }
 0x35a   : > { %v17528_v38 = vadd.f32 %v17430_v59, %v12391_v39  ;;  %v9862_v15 = vsel %vm13419_vm7, %v9860_v42, %v9861_v37  ;;  %v17532_v31 = vpop.f32.mrf.mxu0  ;;  %v17536_v55 = vsel %vm13419_vm7, %v11547_v48, %v9865_v62  ;;  %v9872_v35 = vrot.slane %v17186_v54, 5  ;;  %v9785_v54 = vld [vmem:[#allocation2 + $0x6c] sm:$0xe] }
 0x35b   : > { %v6200_v16 = vpop.f32.mrf.mxu1  ;;  %v17541_v41 = vsel %vm13419_vm7, %v9867_v58, %v9868_v2  ;;  %v11548_v18 = vrot.slane %v9782_v23, 9  ;;  %v9875_v59 = vrot.slane %v17201_v24, 5  ;;  %v9879_v19 = vrot.slane %v17211_v49, 5  ;;  %v9786_v58 = vld [vmem:[#allocation2 + $0x78] sm:$0xe] }
 0x35c   : > { %v17546_v57 = vadd.f32 %v17439_v43, %v6200_v16  ;;  %v11578_v27 = vcombine.low %v9859_v52, %v9862_v15  ;;  %v17548_v56 = vpop.f32.mrf.mxu0  ;;  %v9874_v63 = vrot.slane %v9872_v35, 4  ;;  %v11549_v4 = vrot.slane %v9783_v45, 9  ;;  %v18661_v2 = vld [vmem:[#allocation7_spill] sm:$0xff]  ;;  %v18662_v16 = vld [vmem:[#allocation6_spill] sm:$0xff] }
 0x35d   : > { %v12458_v29 = vpop.f32.mrf.mxu1  ;;  %v11579_v62 = vcombine.low %v17536_v55, %v17541_v41  ;;  %v9873_v42 = vsel %vm13419_vm7, %v11548_v18, %v9872_v35  ;;  %v9881_v24 = vrot.slane %v9879_v19, 4  ;;  %v9882_v49 = vrot.slane %v17224_v17, 5  ;;  %v18673_v15 = vld [vmem:[#allocation22_spill] sm:$0xff] }
 0x35e   : > { %18660 = vst [vmem:[#allocation3_spill] sm:$0xff] %v17546_v57  ;;  %v17556_v37 = vadd.f32 %v12458_v29, %v17191_v22  ;;  %v17558_v43 = vpop.f32.mrf.mxu0  ;;  %v17562_v48 = vsel %vm13419_vm7, %v11549_v4, %v9879_v19  ;;  %v11550_v23 = vrot.slane %v9784_v61, 9  ;;  %v9886_v51 = vrot.slane %v17233_v40, 5  ;;  %v9787_v19 = vld [vmem:[#allocation2 + $0x84] sm:$0xe] }
 0x35f   : > { %12745 = vmatmul.mubr.bf16.vlgmr.msra.gmra.mxu1 %v11577_v30  ;;  %v6840_v39 = vpop.f32.mrf.mxu1  ;;  %v9876_v52 = vsel %vm13419_vm7, %v9874_v63, %v9875_v59  ;;  %v17569_v17 = vsel %vm13419_vm7, %v9881_v24, %v9882_v49  ;;  %v11551_v22 = vrot.slane %v9785_v54, 9  ;;  %v9893_v30 = vrot.slane %v17259_v26, 5 }
 0x360   : > { %12748 = vmatprep.mubr.bf16.mxu1 %v11578_v27  ;;  %12779 = vmatmul.mubr.msk.bf16.vlgmr.msra.gmra.mxu0 %vm739_vm3, %v18661_v2  ;;  %v17575_v45 = vadd.f32 %v6840_v39, %v17207_v33  ;;  %v17577_v40 = vpop.f32.mrf.mxu0  ;;  %v9888_v55 = vrot.slane %v9886_v51, 4  ;;  %v9889_v35 = vrot.slane %v17245_v13, 5  ;;  %v17586_v26 = vsel %vm13419_vm7, %v11550_v23, %v9886_v51 }
 0x361   : > { %12782 = vmatprep.mubr.msk.bf16.mxu0 %vm739_vm3, %v18662_v16  ;;  %v12459_v41 = vpop.f32.mrf.mxu1  ;;  %v17590_v33 = vsel %vm13419_vm7, %v11551_v22, %v9893_v30  ;;  %v9895_v18 = vrot.slane %v9893_v30, 4  ;;  %v9896_v59 = vrot.slane %v17276_v14, 5  ;;  %v11552_v63 = vrot.slane %v9786_v58, 9  ;;  %v9788_v22 = vld [vmem:[#allocation2 + $0x90] sm:$0xe] }
 0x362   : > { %v17594_v61 = vadd.f32 %v12459_v41, %v17222_v32  ;;  %v17596_v13 = vpop.f32.mrf.mxu0  ;;  %v17600_v27 = vsel %vm13419_vm7, %v9888_v55, %v9889_v35  ;;  %v9900_v4 = vrot.slane %v17284_v7, 5  ;;  %v9903_v32 = vrot.slane %v17298_v34, 5  ;;  %v9789_v41 = vld [vmem:[#allocation2 + $0x9c] sm:$0xe] }
 0x363   : > { %v6843_v54 = vpop.f32.mrf.mxu1  ;;  %v11582_v29 = vcombine.low %v17586_v26, %v17600_v27  ;;  %v17607_v14 = vsel %vm13419_vm7, %v9895_v18, %v9896_v59  ;;  %v9907_v24 = vrot.slane %v17316_v1, 5  ;;  %v11553_v39 = vrot.slane %v9787_v19, 9  ;;  %v18664_v59 = vld [vmem:[#allocation8_spill] sm:$0xff] }
 0x364   : > { %v17612_v49 = vadd.f32 %v6843_v54, %v17474_v28  ;;  %v17614_v23 = vpop.f32.mrf.mxu0  ;;  %v9902_v51 = vrot.slane %v9900_v4, 4  ;;  %v11580_v58 = vcombine.low %v9873_v42, %v9876_v52  ;;  %v17620_v2 = vsel %vm13419_vm7, %v11552_v63, %v9900_v4  ;;  %v18663_v52 = vld [vmem:[#allocation21_spill] sm:$0xff]  ;;  %v18665_v19 = vld [vmem:[#allocation48_spill] sm:$0xff] }
 0x365   : > { %v12462_v30 = vpop.f32.mrf.mxu1  ;;  %v9909_v34 = vrot.slane %v9907_v24, 4  ;;  %v9910_v1 = vrot.slane %v17323_v9, 5  ;;  %v17634_v42 = vsel %vm13419_vm7, %v11553_v39, %v9907_v24  ;;  %v9914_v16 = vrot.slane %v18663_v52, 5 }
 0x366   : > { %v17624_v28 = vadd.f32 %v12462_v30, %v17243_v53  ;;  %v17626_v55 = vpop.f32.mrf.mxu0  ;;  %v17630_v35 = vsel %vm13419_vm7, %v9902_v51, %v9903_v32  ;;  %v9921_v18 = vrot.slane %v17363_v25, 5  ;;  %v18666_v32 = vld [vmem:[#allocation42_spill] sm:$0xff]  ;;  %v18667_v51 = vld [vmem:[#allocation11_spill] sm:$0xff]  ;;  %v18668_v25 = vld [vmem:[#allocation36_spill] sm:$0xff]  ;;  %v9938_v57 = vrot.slane %v18673_v15, 5 }
 0x367   : > { %12749 = vmatmul.mubr.bf16.gmra.mxu1 %v11579_v62  ;;  %v6856_v26 = vpop.f32.mrf.mxu1  ;;  %v17641_v9 = vsel %vm13419_vm7, %v9909_v34, %v9910_v1  ;;  %v11554_v62 = vrot.slane %v9788_v22, 9  ;;  %v9916_v54 = vrot.slane %v9914_v16, 4  ;;  %v9917_v24 = vrot.slane %v18666_v32, 5  ;;  %v18669_v34 = vld [vmem:[#allocation37_spill] sm:$0xff]  ;;  %v18670_v1 = vld [vmem:[#allocation24_spill] sm:$0xff] }
 0x368   : > { %12752 = vmatprep.mubr.bf16.mxu1 %v11580_v58  ;;  %12783 = vmatmul.mubr.msk.bf16.gmra.mxu0 %vm739_vm3, %v18664_v59  ;;  %v6971_v27 = vadd.f32 %v6856_v26, %v18665_v19  ;;  %v17647_v63 = vpop.f32.mrf.mxu0  ;;  %v11555_v22 = vrot.slane %v9789_v41, 9  ;;  %v9923_v30 = vrot.slane %v9921_v18, 4  ;;  %v9924_v58 = vrot.slane %v18668_v25, 5  ;;  %v18671_v26 = vld [vmem:[#allocation49_spill] sm:$0xff] }
 0x369   : > { %12786 = vmatprep.mubr.msk.bf16.mxu0 %vm739_vm3, %v18667_v51  ;;  %v12463_v39 = vpop.f32.mrf.mxu1  ;;  %v6410_v52 = vadd.f32 %v18670_v1, %v18669_v34  ;;  %v17662_v4 = vsel %vm13419_vm7, %v11554_v62, %v9914_v16  ;;  %v17666_v32 = vsel %vm13419_vm7, %v9916_v54, %v9917_v24  ;;  %v9791_v51 = vld [vmem:[#allocation2 + $0xb4] sm:$0xe]  ;;  %v18672_v1 = vld [vmem:[#allocation47_spill] sm:$0xff]  ;;  %v9793_v24 = vld [vmem:[#allocation2 + $0xcc] sm:$0xe]  ;;  %v9949_v15 = vrot.slane %v17449_v21, 5 }
 0x36a   : > { %v6974_v59 = vadd.f32 %v12463_v39, %v18671_v26  ;;  %v17658_v19 = vpop.f32.mrf.mxu0  ;;  %v17672_v34 = vsel %vm13419_vm7, %v11555_v22, %v9921_v18  ;;  %v17676_v39 = vsel %vm13419_vm7, %v9923_v30, %v9924_v58  ;;  %v9935_v16 = vrot.slane %v18672_v1, 5  ;;  %v18674_v18 = vld [vmem:[#allocation25_spill] sm:$0xff] }
 0x36b   : > { %v6859_v41 = vpop.f32.mrf.mxu1  ;;  %v11587_v54 = vcombine.low %v17672_v34, %v17676_v39  ;;  %v11557_v7 = vrot.slane %v9791_v51, 9  ;;  %v18675_v30 = vcombine.low %v17562_v48, %v17569_v17  ;;  %v11559_v1 = vrot.slane %v9793_v24, 9  ;;  %v18677_v48 = vld [vmem:[#allocation10_spill] sm:$0xff]  ;;  %v18703_v34 = vld [vmem:[#allocation31_spill] sm:$0xff] }
 0x36c   : > { %v6972_v62 = vadd.f32 %v6859_v41, %v6410_v52  ;;  %v17679_v26 = vpop.f32.mrf.mxu0  ;;  %v9937_v25 = vrot.slane %v9935_v16, 4  ;;  %v9952_v21 = vrot.slane %v17457_v20, 5  ;;  %v18679_v24 = vld [vmem:[#allocation38_spill] sm:$0xff] }
 0x36d   : > { %v12466_v53 = vpop.f32.mrf.mxu1  ;;  %v17692_v41 = vsel %vm13419_vm7, %v11557_v7, %v9935_v16  ;;  %v17715_v16 = vadd.f32 %v17451_v36, %v17556_v37  ;;  %v17734_v36 = vadd.f32 %v17481_v8, %v17612_v49  ;;  %v17738_v37 = vadd.f32 %v17488_v0, %v17624_v28 }
 0x36e   : > { %v6977_v22 = vadd.f32 %v12466_v53, %v18674_v18  ;;  %v17688_v58 = vpop.f32.mrf.mxu0  ;;  %v17696_v51 = vsel %vm13419_vm7, %v9937_v25, %v9938_v57  ;;  %v18676_v53 = vld [vmem:[#allocation14_spill] sm:$0xff]  ;;  %v17710_v57 = vsel %vm13419_vm7, %v11559_v1, %v9949_v15  ;;  %v9951_v25 = vrot.slane %v9949_v15, 4 }
 0x36f   : > { %12753 = vmatmul.mubr.bf16.gmra.mxu1 %v18675_v30  ;;  %v6872_v52 = vpop.f32.mrf.mxu1  ;;  %v18678_v30 = vld [vmem:[#allocation15_spill] sm:$0xff]  ;;  %v18680_v15 = vld [vmem:[#allocation18_spill] sm:$0xff]  ;;  %v17752_v8 = vadd.f32 %v17520_v12, %v6972_v62 }
 0x370   : > { %12756 = vmatprep.mubr.bf16.mxu1 %v11582_v29  ;;  %12787 = vmatmul.mubr.msk.bf16.gmra.mxu0 %vm739_vm3, %v18676_v53  ;;  %v6975_v17 = vadd.f32 %v6872_v52, %v18677_v48  ;;  %v17702_v18 = vpop.f32.mrf.mxu0  ;;  %v11589_v29 = vcombine.low %v17692_v41, %v17696_v51  ;;  %v17722_v48 = vadd.f32 %v17462_v3, %v17575_v45 }
 0x371   : > { %12790 = vmatprep.mubr.msk.bf16.mxu0 %vm739_vm3, %v18678_v30  ;;  %v12467_v7 = vpop.f32.mrf.mxu1  ;;  %v17726_v30 = vadd.f32 %v17470_v6, %v17594_v61  ;;  %v17730_v20 = vsel %vm13419_vm7, %v9951_v25, %v9952_v21  ;;  %v17746_v61 = vadd.f32 %v17498_v47, %v6971_v27  ;;  %v17755_v0 = vadd.f32 %v17532_v31, %v6977_v22  ;;  %v18681_v21 = vld [vmem:[#allocation9_spill] sm:$0xff]  ;;  %v18684_v27 = vld [vmem:[#allocation20_spill] sm:$0xff]  ;;  %v18687_v22 = vld [vmem:[#allocation43_spill] sm:$0xff] }
 0x372   : > { %v6978_v52 = vadd.f32 %v12467_v7, %v18679_v24  ;;  %v17718_v53 = vpop.f32.mrf.mxu0  ;;  %v11591_v6 = vcombine.low %v17710_v57, %v17730_v20  ;;  %v17749_v7 = vadd.f32 %v17509_v50, %v6974_v59  ;;  %v17758_v49 = vadd.f32 %v17548_v56, %v6975_v17 }
 0x373   : > { %v6875_v1 = vpop.f32.mrf.mxu1  ;;  %v18682_v47 = vcombine.low %v17590_v33, %v17607_v14  ;;  %v18683_v31 = vcombine.low %v17620_v2, %v17630_v35  ;;  %v18686_v14 = vld [vmem:[#allocation27_spill] sm:$0xff]  ;;  %v18688_v2 = vld [vmem:[#allocation17_spill] sm:$0xff] }
 0x374   : > { %v6976_v3 = vadd.f32 %v6875_v1, %v18680_v15  ;;  %v17741_v45 = vpop.f32.mrf.mxu0  ;;  %v17761_v28 = vadd.f32 %v17558_v43, %v6978_v52  ;;  %v18685_v43 = vld [vmem:[#allocation23_spill] sm:$0xff]  ;;  %v9928_v35 = vrot.slane %v18688_v2, 5  ;;  %v18695_v2 = vld [vmem:[#allocation12_spill] sm:$0xff] }
 0x375   : > { %v12470_v25 = vpop.f32.mrf.mxu1 }
 0x376   : > { %v6981_v24 = vadd.f32 %v12470_v25, %v18681_v21  ;;  %v17767_v50 = vpop.f32.mrf.mxu0  ;;  %v17770_v12 = vadd.f32 %v17577_v40, %v6976_v3  ;;  %v18689_v3 = vld [vmem:[#allocation34_spill] sm:$0xff] }
 0x377   : > { %12757 = vmatmul.mubr.bf16.gmra.mxu1 %v18682_v47  ;;  %v6888_v56 = vpop.f32.mrf.mxu1  ;;  %v18690_v47 = vld [vmem:[#allocation45_spill] sm:$0xff] }
 0x378   : > { %12760 = vmatprep.mubr.bf16.mxu1 %v18683_v31  ;;  %12791 = vmatmul.mubr.msk.bf16.gmra.mxu0 %vm739_vm3, %v18684_v27  ;;  %v6979_v59 = vadd.f32 %v6888_v56, %v18685_v43  ;;  %v17778_v62 = vpop.f32.mrf.mxu0  ;;  %v17781_v33 = vadd.f32 %v17596_v13, %v6981_v24  ;;  %v18691_v56 = vcombine.low %v17634_v42, %v17641_v9  ;;  %v9790_v27 = vld [vmem:[#allocation2 + $0xa8] sm:$0xe]  ;;  %v9930_v43 = vrot.slane %v9928_v35, 4 }
 0x379   : > { %12794 = vmatprep.mubr.msk.bf16.mxu0 %vm739_vm3, %v18686_v14  ;;  %v12471_v40 = vpop.f32.mrf.mxu1  ;;  %v9931_v42 = vrot.slane %v18695_v2, 5 }
 0x37a   : > { %v6982_v17 = vadd.f32 %v12471_v40, %v18687_v22  ;;  %v17786_v52 = vpop.f32.mrf.mxu0  ;;  %v17790_v1 = vadd.f32 %v17614_v23, %v6979_v59  ;;  %v18692_v59 = vcombine.low %v17662_v4, %v17666_v32  ;;  %v18693_v40 = vld [vmem:[#allocation28_spill] sm:$0xff]  ;;  %v18694_v22 = vld [vmem:[#allocation39_spill] sm:$0xff]  ;;  %v18697_v4 = vld [vmem:[#allocation41_spill] sm:$0xff] }
 0x37b   : > { %v6891_v15 = vpop.f32.mrf.mxu1 }
 0x37c   : > { %v6980_v25 = vadd.f32 %v6891_v15, %v18689_v3  ;;  %v17793_v21 = vpop.f32.mrf.mxu0  ;;  %v17796_v13 = vadd.f32 %v17626_v55, %v6982_v17  ;;  %v18696_v3 = vld [vmem:[#allocation29_spill] sm:$0xff] }
 0x37d   : > { %v12474_v24 = vpop.f32.mrf.mxu1 }
 0x37e   : > { %v6985_v31 = vadd.f32 %v12474_v24, %v18690_v47  ;;  %v17802_v14 = vpop.f32.mrf.mxu0  ;;  %v17805_v23 = vadd.f32 %v17647_v63, %v6980_v25  ;;  %v11556_v25 = vrot.slane %v9790_v27, 9  ;;  %v9932_v24 = vsel %vm13419_vm7, %v9930_v43, %v9931_v42  ;;  %v18699_v42 = vld [vmem:[#allocation26_spill] sm:$0xff] }
 0x37f   : > { %12761 = vmatmul.mubr.bf16.gmra.mxu1 %v18691_v56  ;;  %v6904_v55 = vpop.f32.mrf.mxu1  ;;  %v9942_v56 = vrot.slane %v17425_v44, 5 }
 0x380   : > { %12764 = vmatprep.mubr.bf16.mxu1 %v18692_v59  ;;  %12795 = vmatmul.mubr.msk.bf16.gmra.mxu0 %vm739_vm3, %v18693_v40  ;;  %v6983_v17 = vadd.f32 %v6904_v55, %v18694_v22  ;;  %v17814_v9 = vpop.f32.mrf.mxu0  ;;  %v17817_v15 = vadd.f32 %v17658_v19, %v6985_v31  ;;  %v18698_v19 = vld [vmem:[#allocation4_spill] sm:$0xff]  ;;  %v9929_v40 = vsel %vm13419_vm7, %v11556_v25, %v9928_v35  ;;  %v18700_v25 = vld [vmem:[#allocation30_spill] sm:$0xff] }
 0x381   : > { %12798 = vmatprep.mubr.msk.bf16.mxu0 %vm739_vm3, %v18696_v3  ;;  %v12475_v63 = vpop.f32.mrf.mxu1  ;;  %v11588_v43 = vcombine.low %v9929_v40, %v9932_v24  ;;  %v9944_v44 = vrot.slane %v9942_v56, 4 }
 0x382   : > { %v6986_v32 = vadd.f32 %v12475_v63, %v18697_v4  ;;  %v17824_v47 = vpop.f32.mrf.mxu0  ;;  %v17828_v59 = vadd.f32 %v17679_v26, %v6983_v17  ;;  %v9792_v63 = vld [vmem:[#allocation2 + $0xc0] sm:$0xe] }
 0x383   : > { %v6907_v55 = vpop.f32.mrf.mxu1 }
 0x384   : > { %v6984_v31 = vadd.f32 %v6907_v55, %v18698_v19  ;;  %v17833_v22 = vpop.f32.mrf.mxu0  ;;  %v17836_v27 = vadd.f32 %v17688_v58, %v6986_v32  ;;  %v18701_v58 = vld [vmem:[#allocation35_spill] sm:$0xff] }
 0x385   : > { %v12478_v2 = vpop.f32.mrf.mxu1  ;;  %v18702_v32 = vld [vmem:[#allocation19_spill] sm:$0xff] }
 0x386   : > { %v6989_v3 = vadd.f32 %v12478_v2, %v18699_v42  ;;  %v12535_v26 = vpop.f32.mrf.mxu0  ;;  %v17843_v17 = vadd.f32 %v17702_v18, %v6984_v31  ;;  %v9945_v24 = vrot.slane %v18702_v32, 5  ;;  %v11558_v31 = vrot.slane %v9792_v63, 9  ;;  %v18706_v63 = vld [vmem:[#allocation46_spill] sm:$0xff] }
 0x387   : > { %12765 = vmatmul.mubr.bf16.gmra.mxu1 %v11587_v54  ;;  %v6920_v35 = vpop.f32.mrf.mxu1  ;;  %v18704_v54 = vld [vmem:[#allocation44_spill] sm:$0xff] }
 0x388   : > { %12768 = vmatprep.mubr.bf16.mxu1 %v11588_v43  ;;  %12799 = vmatmul.mubr.msk.bf16.gmra.mxu0 %vm739_vm3, %v18700_v25  ;;  %v6987_v4 = vadd.f32 %v6920_v35, %v18701_v58  ;;  %v7341_v55 = vpop.f32.mrf.mxu0  ;;  %v17850_v19 = vadd.f32 %v17718_v53, %v6989_v3  ;;  %v9946_v40 = vsel %vm13419_vm7, %v9944_v44, %v9945_v24  ;;  %v18705_v35 = vld [vmem:[#allocation40_spill] sm:$0xff] }
 0x389   : > { %12802 = vmatprep.mubr.msk.bf16.mxu0 %vm739_vm3, %v18703_v34  ;;  %v12479_v39 = vpop.f32.mrf.mxu1  ;;  %v9943_v53 = vsel %vm13419_vm7, %v11558_v31, %v9942_v56  ;;  %v18708_v56 = vld [vmem:[#allocation50_spill] sm:$0xff] }
 0x38a   : > { %v6990_v18 = vadd.f32 %v12479_v39, %v18704_v54  ;;  %v17858_v43 = vadd.f32 %v17741_v45, %v6987_v4  ;;  %v11590_v34 = vcombine.low %v9943_v53, %v9946_v40 }
 0x38b   : > { %v12602_v2 = vpop.f32.mrf.mxu0  ;;  %v6923_v42 = vpop.f32.mrf.mxu1 }
 0x38c   : > { %v6988_v25 = vadd.f32 %v6923_v42, %v18705_v35  ;;  %v17864_v58 = vadd.f32 %v17767_v50, %v6990_v18  ;;  %v18709_v18 = vld [vmem:[#allocation33_spill] sm:$0xff] }
 0x38d   : > { %v8478_v3 = vpop.f32.mrf.mxu0 }
 0x38e   : > { %v12482_v32 = vpop.f32.mrf.mxu1  ;;  %v17871_v44 = vadd.f32 %v17778_v62, %v6988_v25 }
 0x38f   : > { %v6993_v39 = vadd.f32 %v12482_v32, %v18706_v63  ;;  %12769 = vmatmul.mubr.bf16.gmra.mxu1 %v11589_v29  ;;  %v12603_v45 = vpop.f32.mrf.mxu0  ;;  %v18710_v32 = vld [vmem:[#allocation13_spill] sm:$0xff] }
 0x390   : > { %12772 = vmatprep.mubr.bf16.mxu1 %v11590_v34  ;;  %v6936_v4 = vpop.f32.mrf.mxu1  ;;  %12803 = vmatmul.mubr.msk.bf16.gmra.mxu0 %vm739_vm3, %v18707_v5 }
 0x391   : > { %v6991_v50 = vadd.f32 %v6936_v4, %v18708_v56  ;;  %v8481_v24 = vpop.f32.mrf.mxu0  ;;  %v17877_v54 = vadd.f32 %v17786_v52, %v6993_v39  ;;  %12806 = vmatprep.mubr.msk.bf16.mxu0 %vm739_vm3, %v18709_v18 }
 0x392   : > { %v12483_v41 = vpop.f32.mrf.mxu1 }
 0x393   : > { %v6994_v51 = vadd.f32 %v12483_v41, %v17486_v10  ;;  %v12606_v29 = vpop.f32.mrf.mxu0  ;;  %v17883_v62 = vadd.f32 %v17793_v21, %v6991_v50 }
 0x394   : > { %v6939_v31 = vpop.f32.mrf.mxu1 }
 0x395   : > { %v6992_v40 = vadd.f32 %v6939_v31, %v17494_v46  ;;  %v8494_v42 = vpop.f32.mrf.mxu0  ;;  %v17887_v35 = vadd.f32 %v17802_v14, %v6994_v51 }
 0x397   : > { %v12486_v25 = vpop.f32.mrf.mxu1  ;;  %12773 = vmatmul.mubr.bf16.gmra.mxu1 %v11591_v6  ;;  %v12607_v53 = vpop.f32.mrf.mxu0  ;;  %v17894_v10 = vadd.f32 %v17814_v9, %v6992_v40  ;;  %v18711_v6 = vld [vmem:[#allocation3_spill] sm:$0xff] }
 0x398   : > { %v6997_v52 = vadd.f32 %v12486_v25, %v17506_v60  ;;  %12807 = vmatmul.mubr.msk.bf16.gmra.mxu0 %vm739_vm3, %v18710_v32 }
 0x399   : > { %v6952_v21 = vpop.f32.mrf.mxu1  ;;  %v8497_v34 = vpop.f32.mrf.mxu0 }
 0x39a   : > { %v6995_v46 = vadd.f32 %v6952_v21, %v17517_v11  ;;  %v17900_v14 = vadd.f32 %v17824_v47, %v6997_v52 }
 0x39b   : > { %v12487_v63 = vpop.f32.mrf.mxu1  ;;  %v12610_v39 = vpop.f32.mrf.mxu0 }
 0x39c   : > { %v6998_v60 = vadd.f32 %v12487_v63, %v17528_v38  ;;  %v17904_v57 = vadd.f32 %v17833_v22, %v6995_v46 }
 0x39d   : > { %v6955_v20 = vpop.f32.mrf.mxu1  ;;  %v8510_v4 = vpop.f32.mrf.mxu0 }
 0x39e   : > { %v6996_v9 = vadd.f32 %v6955_v20, %v18711_v6  ;;  %v17907_v5 = vadd.f32 %v12535_v26, %v6998_v60 }
 0x39f   : > { %v12554_v56 = vpop.f32.mrf.mxu1  ;;  %v12611_v50 = vpop.f32.mrf.mxu0 }
 0x3a0   : > { %v8109_v11 = vadd.f32 %v12554_v56, %v17715_v16  ;;  %v17910_v18 = vadd.f32 %v7341_v55, %v6996_v9 }
 0x3a1   : > { %v7980_v47 = vpop.f32.mrf.mxu1  ;;  %v8513_v38 = vpop.f32.mrf.mxu0 }
 0x3a2   : > { %v8107_v41 = vadd.f32 %v7980_v47, %v17722_v48  ;;  %v17913_v51 = vadd.f32 %v12602_v2, %v8109_v11 }
 0x3a3   : > { %v12555_v22 = vpop.f32.mrf.mxu1  ;;  %v12614_v40 = vpop.f32.mrf.mxu0 }
 0x3a4   : > { %v8110_v31 = vadd.f32 %v12555_v22, %v17726_v30  ;;  %v17916_v25 = vadd.f32 %v8478_v3, %v8107_v41 }
 0x3a5   : > { %v7983_v26 = vpop.f32.mrf.mxu1  ;;  %v8526_v21 = vpop.f32.mrf.mxu0 }
 0x3a6   : > { %v8108_v52 = vadd.f32 %v7983_v26, %v17734_v36  ;;  %v17919_v16 = vadd.f32 %v12603_v45, %v8110_v31 }
 0x3a7   : > { %v12558_v55 = vpop.f32.mrf.mxu1  ;;  %v12615_v46 = vpop.f32.mrf.mxu0 }
 0x3a8   : > { %v8113_v32 = vadd.f32 %v12558_v55, %v17738_v37  ;;  %v17922_v48 = vadd.f32 %v8481_v24, %v8108_v52 }
 0x3a9   : > { %v7996_v2 = vpop.f32.mrf.mxu1  ;;  %v8529_v60 = vpop.f32.mrf.mxu0 }
 0x3aa   : > { %v8111_v63 = vadd.f32 %v7996_v2, %v17746_v61  ;;  %v17925_v30 = vadd.f32 %v12606_v29, %v8113_v32 }
 0x3ab   : > { %v12559_v3 = vpop.f32.mrf.mxu1  ;;  %v12618_v6 = vpop.f32.mrf.mxu0 }
 0x3ac   : > { %v8114_v20 = vadd.f32 %v12559_v3, %v17749_v7  ;;  %v17928_v36 = vadd.f32 %v8494_v42, %v8111_v63 }
 0x3ad   : > { %v7999_v45 = vpop.f32.mrf.mxu1  ;;  %v8542_v56 = vpop.f32.mrf.mxu0 }
 0x3ae   : > { %v8112_v9 = vadd.f32 %v7999_v45, %v17752_v8  ;;  %v17931_v37 = vadd.f32 %v12607_v53, %v8114_v20 }
 0x3af   : > { %v12562_v24 = vpop.f32.mrf.mxu1  ;;  %v12619_v47 = vpop.f32.mrf.mxu0 }
 0x3b0   : > { %v8117_v11 = vadd.f32 %v12562_v24, %v17755_v0  ;;  %v17934_v61 = vadd.f32 %v8497_v34, %v8112_v9 }
 0x3b1   : > { %v8012_v29 = vpop.f32.mrf.mxu1  ;;  %v8545_v22 = vpop.f32.mrf.mxu0 }
 0x3b2   : > { %v8115_v41 = vadd.f32 %v8012_v29, %v17758_v49  ;;  %v17937_v7 = vadd.f32 %v12610_v39, %v8117_v11 }
 0x3b3   : > { %v12563_v42 = vpop.f32.mrf.mxu1  ;;  %v12622_v26 = vpop.f32.mrf.mxu0 }
 0x3b4   : > { %v8118_v31 = vadd.f32 %v12563_v42, %v17761_v28  ;;  %v17940_v8 = vadd.f32 %v8510_v4, %v8115_v41 }
 0x3b5   : > { %v8015_v53 = vpop.f32.mrf.mxu1  ;;  %v8558_v55 = vpop.f32.mrf.mxu0 }
 0x3b6   : > { %v8116_v52 = vadd.f32 %v8015_v53, %v17770_v12  ;;  %v17943_v0 = vadd.f32 %v12611_v50, %v8118_v31 }
 0x3b7   : > { %v12566_v34 = vpop.f32.mrf.mxu1  ;;  %v12623_v2 = vpop.f32.mrf.mxu0 }
 0x3b8   : > { %v8121_v32 = vadd.f32 %v12566_v34, %v17781_v33  ;;  %v17946_v49 = vadd.f32 %v8513_v38, %v8116_v52 }
 0x3b9   : > { %v8028_v39 = vpop.f32.mrf.mxu1  ;;  %v8561_v3 = vpop.f32.mrf.mxu0 }
 0x3ba   : > { %v8119_v63 = vadd.f32 %v8028_v39, %v17790_v1  ;;  %v17949_v28 = vadd.f32 %v12614_v40, %v8121_v32 }
 0x3bb   : > { %v12567_v4 = vpop.f32.mrf.mxu1  ;;  %v12626_v45 = vpop.f32.mrf.mxu0 }
 0x3bc   : > { %v8122_v20 = vadd.f32 %v12567_v4, %v17796_v13  ;;  %v17952_v12 = vadd.f32 %v8526_v21, %v8119_v63 }
 0x3bd   : > { %v8031_v50 = vpop.f32.mrf.mxu1  ;;  %v8574_v24 = vpop.f32.mrf.mxu0 }
 0x3be   : > { %v8120_v9 = vadd.f32 %v8031_v50, %v17805_v23  ;;  %v17955_v33 = vadd.f32 %v12615_v46, %v8122_v20 }
 0x3bf   : > { %v12570_v38 = vpop.f32.mrf.mxu1  ;;  %v12627_v29 = vpop.f32.mrf.mxu0 }
 0x3c0   : > { %v8125_v11 = vadd.f32 %v12570_v38, %v17817_v15  ;;  %v17958_v1 = vadd.f32 %v8529_v60, %v8120_v9 }
 0x3c1   : > { %v8044_v40 = vpop.f32.mrf.mxu1  ;;  %v8577_v42 = vpop.f32.mrf.mxu0 }
 0x3c2   : > { %v8123_v41 = vadd.f32 %v8044_v40, %v17828_v59  ;;  %v17961_v13 = vadd.f32 %v12618_v6, %v8125_v11 }
 0x3c3   : > { %v12571_v21 = vpop.f32.mrf.mxu1  ;;  %v12630_v46 = vpop.f32.mrf.mxu0 }
 0x3c4   : > { %v8126_v31 = vadd.f32 %v12571_v21, %v17836_v27  ;;  %v17964_v53 = vadd.f32 %v8542_v56, %v8123_v41 }
 0x3c5   : > { %v8047_v23 = vpop.f32.mrf.mxu1  ;;  %v8590_v39 = vpop.f32.mrf.mxu0 }
 0x3c6   : > { %v8124_v52 = vadd.f32 %v8047_v23, %v17843_v17  ;;  %v17967_v34 = vadd.f32 %v12619_v47, %v8126_v31 }
 0x3c7   : > { %v12574_v15 = vpop.f32.mrf.mxu1  ;;  %v12631_v17 = vpop.f32.mrf.mxu0 }
 0x3c8   : > { %v8129_v60 = vadd.f32 %v12574_v15, %v17850_v19  ;;  %v17970_v32 = vadd.f32 %v8545_v22, %v8124_v52 }
 0x3c9   : > { %v8060_v59 = vpop.f32.mrf.mxu1 }
 0x3ca   : > { %18712 = vst [vmem:[#allocation51_spill] sm:$0xff] %v17970_v32  ;;  %v8127_v6 = vadd.f32 %v8060_v59, %v17858_v43  ;;  %v17973_v63 = vadd.f32 %v12622_v26, %v8129_v60  ;;  %v8593_v43 = vpop.f32.mrf.mxu0 }
 0x3cb   : > { %v12575_v27 = vpop.f32.mrf.mxu1 }
 0x3cc   : > { %18713 = vst [vmem:[#allocation52_spill] sm:$0xff] %v17973_v63  ;;  %v8130_v56 = vadd.f32 %v12575_v27, %v17864_v58  ;;  %v17976_v4 = vadd.f32 %v8558_v55, %v8127_v6 }
 0x3cd   : > { %v8063_v20 = vpop.f32.mrf.mxu1 }
 0x3ce   : > { %18714 = vst [vmem:[#allocation53_spill] sm:$0xff] %v17976_v4  ;;  %v8128_v47 = vadd.f32 %v8063_v20, %v17871_v44  ;;  %v17979_v50 = vadd.f32 %v12623_v2, %v8130_v56 }
 0x3cf   : > { %v12578_v19 = vpop.f32.mrf.mxu1 }
 0x3d0   : > { %18715 = vst [vmem:[#allocation16_spill] sm:$0xff] %v17979_v50  ;;  %v8133_v22 = vadd.f32 %v12578_v19, %v17877_v54  ;;  %v17982_v9 = vadd.f32 %v8561_v3, %v8128_v47 }
 0x3d1   : > { %v8076_v38 = vpop.f32.mrf.mxu1 }
 0x3d2   : > { %18716 = vst [vmem:[#allocation5_spill] sm:$0xff] %v17982_v9  ;;  %v8131_v26 = vadd.f32 %v8076_v38, %v17883_v62  ;;  %v17985_v11 = vadd.f32 %v12626_v45, %v8133_v22 }
 0x3d3   : > { %v12579_v58 = vpop.f32.mrf.mxu1  ;;  %v17990_v44 = vpop.f32.mrf.mxu0 }
 0x3d4   : > { %18717 = vst [vmem:[#allocation7_spill] sm:$0xff] %v17985_v11  ;;  %v8134_v55 = vadd.f32 %v12579_v58, %v17887_v35  ;;  %v17988_v40 = vadd.f32 %v8574_v24, %v8131_v26 }
 0x3d5   : > { %v8079_v41 = vpop.f32.mrf.mxu1  ;;  %v17995_v54 = vpop.f32.mrf.mxu0 }
 0x3d6   : > { %18718 = vst [vmem:[#allocation6_spill] sm:$0xff] %v17988_v40  ;;  %v8132_v2 = vadd.f32 %v8079_v41, %v17894_v10  ;;  %v17993_v21 = vadd.f32 %v12627_v29, %v8134_v55 }
 0x3d7   : > { %v12582_v3 = vpop.f32.mrf.mxu1  ;;  %v18000_v23 = vpop.f32.mrf.mxu0 }
 0x3d8   : > { %18719 = vst [vmem:[#allocation21_spill] sm:$0xff] %v17993_v21  ;;  %v17997_v31 = vadd.f32 %v8577_v42, %v8132_v2  ;;  %v8137_v62 = vadd.f32 %v12582_v3, %v17900_v14 }
 0x3d9   : > { %v8092_v45 = vpop.f32.mrf.mxu1  ;;  %v18008_v29 = vpop.f32.mrf.mxu0 }
 0x3da   : > { %18720 = vst [vmem:[#allocation8_spill] sm:$0xff] %v17997_v31  ;;  %v8135_v35 = vadd.f32 %v8092_v45, %v17904_v57  ;;  %v18003_v24 = vadd.f32 %v12630_v46, %v8137_v62 }
 0x3db   : > { %v12583_v52 = vpop.f32.mrf.mxu1 }
 0x3dc   : > { %18721 = vst [vmem:[#allocation48_spill] sm:$0xff] %v18003_v24  ;;  %v8138_v15 = vadd.f32 %v12583_v52, %v17907_v5  ;;  %v18006_v10 = vadd.f32 %v8590_v39, %v8135_v35 }
 0x3dd   : > { %v8095_v60 = vpop.f32.mrf.mxu1 }
 0x3de   : > { %18722 = vst [vmem:[#allocation42_spill] sm:$0xff] %v18006_v10  ;;  %v8136_v42 = vadd.f32 %v8095_v60, %v17910_v18  ;;  %v18011_v59 = vadd.f32 %v12631_v17, %v8138_v15 }
 0x3df   : > { %v12650_v14 = vpop.f32.mrf.mxu1 }
 0x3e0   : > { %18723 = vst [vmem:[#allocation11_spill] sm:$0xff] %v18011_v59  ;;  %v18013_v6 = vadd.f32 %v8593_v43, %v8136_v42 }
 0x3e1   : > { %v18015_v27 = vpop.f32.mrf.mxu0  ;;  %v8865_v57 = vpop.f32.mrf.mxu1 }
 0x3e2   : > { %18724 = vst [vmem:[#allocation36_spill] sm:$0xff] %v18013_v6 }
 0x3e3   : > { %v18017_v46 = vpop.f32.mrf.mxu0  ;;  %v12651_v56 = vpop.f32.mrf.mxu1 }
 0x3e5   : > { %v18019_v20 = vpop.f32.mrf.mxu0  ;;  %v8868_v5 = vpop.f32.mrf.mxu1 }
 0x3e7   : > { %v18021_v39 = vpop.f32.mrf.mxu0  ;;  %v12654_v47 = vpop.f32.mrf.mxu1 }
 0x3e9   : > { %v18023_v19 = vpop.f32.mrf.mxu1  ;;  %v18025_v18 = vpop.f32.mrf.mxu0 }
 0x3eb   : > { %v18027_v17 = vpop.f32.mrf.mxu1  ;;  %v18029_v22 = vpop.f32.mrf.mxu0 }
 0x3ed   : > { %v18031_v38 = vpop.f32.mrf.mxu1  ;;  %v18033_v43 = vpop.f32.mrf.mxu0 }
 0x3ef   : > { %v18035_v26 = vpop.f32.mrf.mxu1  ;;  %v18037_v58 = vpop.f32.mrf.mxu0 }
 0x3f1   : > { %v18039_v55 = vpop.f32.mrf.mxu1 }
 0x3f2   : > { %v18041_v41 = vpop.f32.mrf.mxu0 }
 0x3f3   : > { %v18043_v2 = vpop.f32.mrf.mxu1 }
 0x3f4   : > { %v18045_v3 = vpop.f32.mrf.mxu0 }
 0x3f5   : > { %v18047_v62 = vpop.f32.mrf.mxu1 }
 0x3f6   : > { %v18049_v45 = vpop.f32.mrf.mxu0 }
 0x3f7   : > { %v18051_v35 = vpop.f32.mrf.mxu1 }
 0x3f8   : > { %v18053_v52 = vpop.f32.mrf.mxu0 }
 0x3f9   : > { %v18055_v15 = vpop.f32.mrf.mxu1 }
 0x3fb   : > { %v18057_v60 = vpop.f32.mrf.mxu1 }
 0x3fc   : > { %v18059_v42 = vpop.f32.mrf.mxu0 }
 0x3fd   : > { %18725 = vst [vmem:[#allocation37_spill] sm:$0xff] %v18059_v42  ;;  %v18061_v6 = vpop.f32.mrf.mxu1 }
 0x3fe   : > { %v18063_v59 = vpop.f32.mrf.mxu0 }
 0x3ff   : > { %18726 = vst [vmem:[#allocation24_spill] sm:$0xff] %v18063_v59  ;;  %v18065_v10 = vpop.f32.mrf.mxu1 }
 0x400   : > { %v18067_v24 = vpop.f32.mrf.mxu0 }
 0x401   : > { %18727 = vst [vmem:[#allocation49_spill] sm:$0xff] %v18067_v24  ;;  %v18069_v31 = vpop.f32.mrf.mxu1 }
 0x402   : > { %v18071_v21 = vpop.f32.mrf.mxu0 }
 0x403   : > { %18728 = vst [vmem:[#allocation47_spill] sm:$0xff] %v18071_v21  ;;  %v18073_v40 = vpop.f32.mrf.mxu1 }
 0x404   : > { %18729 = vst [vmem:[#allocation22_spill] sm:$0xff] %v18073_v40 }
 0x405   : > { %v18075_v11 = vpop.f32.mrf.mxu1 }
 0x406   : > { %18730 = vst [vmem:[#allocation25_spill] sm:$0xff] %v18075_v11  ;;  %v18077_v9 = vpop.f32.mrf.mxu0 }
 0x407   : > { %18731 = vst [vmem:[#allocation14_spill] sm:$0xff] %v18077_v9  ;;  %v18079_v50 = vpop.f32.mrf.mxu1 }
 0x408   : > { %18732 = vst [vmem:[#allocation10_spill] sm:$0xff] %v18079_v50  ;;  %v18081_v4 = vpop.f32.mrf.mxu0 }
 0x409   : > { %18733 = vst [vmem:[#allocation15_spill] sm:$0xff] %v18081_v4  ;;  %v18083_v63 = vpop.f32.mrf.mxu1 }
 0x40a   : > { %18734 = vst [vmem:[#allocation38_spill] sm:$0xff] %v18083_v63  ;;  %v18085_v59 = vpop.f32.mrf.mxu0 }
 0x40b   : > { %18735 = vst [vmem:[#allocation18_spill] sm:$0xff] %v18085_v59  ;;  %v18087_v32 = vpop.f32.mrf.mxu1 }
 0x40c   : > { %18736 = vst [vmem:[#allocation9_spill] sm:$0xff] %v18087_v32  ;;  %v18089_v24 = vpop.f32.mrf.mxu0 }
 0x40d   : > { %18737 = vst [vmem:[#allocation20_spill] sm:$0xff] %v18089_v24  ;;  %v18091_v42 = vpop.f32.mrf.mxu1 }
 0x40e   : > { %18738 = vst [vmem:[#allocation23_spill] sm:$0xff] %v18091_v42 }
 0x40f   : > { %v18093_v21 = vpop.f32.mrf.mxu0  ;;  %v18095_v40 = vpop.f32.mrf.mxu1 }
 0x410   : > { %18739 = vst [vmem:[#allocation27_spill] sm:$0xff] %v18093_v21  ;;  %18740 = vst [vmem:[#allocation43_spill] sm:$0xff] %v18095_v40  ;;  %v8994_v21 = vadd.f32 %v12650_v14, %v17913_v51  ;;  %v8993_v51 = vadd.f32 %v8868_v5, %v17922_v48  ;;  %v8996_v48 = vadd.f32 %v18023_v19, %v17928_v36 }
 0x411   : > { %v18097_v11 = vpop.f32.mrf.mxu0  ;;  %v18099_v9 = vpop.f32.mrf.mxu1 }
 0x412   : > { %18741 = vst [vmem:[#allocation17_spill] sm:$0xff] %v18097_v11  ;;  %18742 = vst [vmem:[#allocation34_spill] sm:$0xff] %v18099_v9  ;;  %v9747_v5 = vadd.f32 %v18008_v29, %v8993_v51  ;;  %v8997_v29 = vadd.f32 %v18031_v38, %v17934_v61  ;;  %v9750_v51 = vadd.f32 %v18017_v46, %v8996_v48 }
 0x413   : > { %v18101_v50 = vpop.f32.mrf.mxu0  ;;  %v18103_v4 = vpop.f32.mrf.mxu1 }
 0x414   : > { %18743 = vst [vmem:[#allocation45_spill] sm:$0xff] %v18101_v50  ;;  %18744 = vst [vmem:[#allocation28_spill] sm:$0xff] %v18103_v4  ;;  %v8992_v50 = vadd.f32 %v8865_v57, %v17916_v25  ;;  %v18135_v25 = vld [vmem:[%s18298_s4] ss:$0 sm:$0xff] }
 0x415   : > { %v18105_v63 = vpop.f32.mrf.mxu1  ;;  %v18107_v59 = vpop.f32.mrf.mxu0 }
 0x416   : > { %18745 = vst [vmem:[#allocation39_spill] sm:$0xff] %v18105_v63  ;;  %18746 = vst [vmem:[#allocation12_spill] sm:$0xff] %v18107_v59  ;;  %v8995_v59 = vadd.f32 %v12651_v56, %v17919_v16 }
 0x417   : > { %v18109_v32 = vpop.f32.mrf.mxu1 }
 0x418   : > { %18747 = vst [vmem:[#allocation29_spill] sm:$0xff] %v18109_v32  ;;  %v18111_v24 = vpop.f32.mrf.mxu0  ;;  %v9748_v32 = vadd.f32 %v17990_v44, %v8994_v21  ;;  %v9749_v21 = vadd.f32 %v18000_v23, %v8995_v59 }
 0x419   : > { %18748 = vst [vmem:[#allocation41_spill] sm:$0xff] %v18111_v24  ;;  %v18113_v42 = vpop.f32.mrf.mxu1 }
 0x41a   : > { %18749 = vst [vmem:[#allocation4_spill] sm:$0xff] %v18113_v42  ;;  %v18116_v40 = vpop.f32.mrf.mxu0 }
 0x41b   : > { %18750 = vst [vmem:[#allocation26_spill] sm:$0xff] %v18116_v40  ;;  %v18118_v11 = vpop.f32.mrf.mxu1  ;;  %v9746_v40 = vadd.f32 %v17995_v54, %v8992_v50 }
 0x41c   : > { %18751 = vst [vmem:[#allocation30_spill] sm:$0xff] %v18118_v11  ;;  %v18121_v4 = vpop.f32.mrf.mxu0  ;;  %v8998_v11 = vadd.f32 %v12654_v47, %v17925_v30  ;;  %v8999_v47 = vadd.f32 %v18027_v17, %v17931_v37 }
 0x41d   : > { %v18123_v63 = vpop.f32.mrf.mxu1 }
 0x41e   : > { %v18127_v24 = vpop.f32.mrf.mxu0  ;;  %v9752_v36 = vadd.f32 %v18015_v27, %v8998_v11  ;;  %v9002_v27 = vadd.f32 %v18035_v26, %v17937_v7 }
 0x41f   : > { %v12746_v42 = vpop.f32.mrf.mxu1 }
 0x420   : > { %v10246_v14 = vadd.f32 %v12746_v42, %v9748_v32  ;;  %v12780_v9 = vpop.f32.mrf.mxu0 }
 0x421   : > { %v10117_v57 = vpop.f32.mrf.mxu1 }
 0x422   : > { %v10443_v16 = vadd.f32 %v12780_v9, %v10246_v14  ;;  %v10244_v44 = vadd.f32 %v10117_v57, %v9746_v40  ;;  %v10314_v32 = vpop.f32.mrf.mxu0 }
 0x423   : > { %v12747_v56 = vpop.f32.mrf.mxu1 }
 0x424   : > { %v10482_v50 = vadd.f32 %v18135_v25, %v10443_v16  ;;  %v10441_v30 = vadd.f32 %v10314_v32, %v10244_v44  ;;  %v10247_v54 = vadd.f32 %v12747_v56, %v9749_v21  ;;  %v12781_v9 = vpop.f32.mrf.mxu0  ;;  %v9753_v32 = vadd.f32 %v18019_v20, %v8999_v47 }
 0x425   : > { %v10120_v40 = vpop.f32.mrf.mxu1  ;;  %v9000_v56 = vadd.f32 %v18039_v55, %v17940_v8  ;;  %v9003_v47 = vadd.f32 %v18043_v2, %v17943_v0 }
 0x426   : > { %v10514_v23 = vmax.f32 %v10482_v50, 0.0  ;;  %v10480_v59 = vadd.f32 %v18135_v25, %v10441_v30  ;;  %v10444_v19 = vadd.f32 %v12781_v9, %v10247_v54  ;;  %v10245_v42 = vadd.f32 %v10120_v40, %v9747_v5  ;;  %v10317_v37 = vpop.f32.mrf.mxu0 }
 0x427   : > { %v12750_v17 = vpop.f32.mrf.mxu1  ;;  %v9751_v54 = vadd.f32 %v18021_v39, %v8997_v29  ;;  %v9754_v29 = vadd.f32 %v18029_v22, %v9000_v56 }
 0x428   : > { %10546 = vst [vmem:[%s18148_s27 + $0x10] sm:$0xff] %v10514_v23  ;;  %v10512_v14 = vmax.f32 %v10480_v59, 0.0  ;;  %v10483_v57 = vadd.f32 %v18135_v25, %v10444_v19  ;;  %v10442_v16 = vadd.f32 %v10317_v37, %v10245_v42  ;;  %v10250_v11 = vadd.f32 %v12750_v17, %v9752_v36  ;;  %v12784_v44 = vpop.f32.mrf.mxu0 }
 0x429   : > { %v10133_v21 = vpop.f32.mrf.mxu1  ;;  %v9756_v36 = vadd.f32 %v18025_v18, %v9002_v27  ;;  %v9001_v59 = vadd.f32 %v18047_v62, %v17946_v49  ;;  %v9006_v17 = vadd.f32 %v18051_v35, %v17949_v28 }
 0x42a   : > { %10544 = vst [vmem:[%s18148_s27] sm:$0xff] %v10512_v14  ;;  %v10515_v61 = vmax.f32 %v10483_v57, 0.0  ;;  %v10481_v38 = vadd.f32 %v18135_v25, %v10442_v16  ;;  %v10447_v46 = vadd.f32 %v12784_v44, %v10250_v11  ;;  %v10248_v48 = vadd.f32 %v10133_v21, %v9750_v51  ;;  %v10330_v50 = vpop.f32.mrf.mxu0 }
 0x42b   : > { %v12751_v30 = vpop.f32.mrf.mxu1  ;;  %v9757_v57 = vadd.f32 %v18033_v43, %v9003_v47  ;;  %v9004_v11 = vadd.f32 %v18055_v15, %v17952_v12  ;;  %v9755_v21 = vadd.f32 %v18037_v58, %v9001_v59  ;;  %v18752_v59 = vld [vmem:[#allocation22_spill] sm:$0xff] }
 0x42c   : > { %10547 = vst [vmem:[%s18148_s27 + $0x18] sm:$0xff] %v10515_v61  ;;  %v10513_v7 = vmax.f32 %v10481_v38, 0.0  ;;  %v10486_v26 = vadd.f32 %v18135_v25, %v10447_v46  ;;  %v10445_v20 = vadd.f32 %v10330_v50, %v10248_v48  ;;  %v10251_v5 = vadd.f32 %v12751_v30, %v9753_v32  ;;  %v12785_v9 = vpop.f32.mrf.mxu0 }
 0x42d   : > { %v10136_v40 = vpop.f32.mrf.mxu1  ;;  %v9007_v61 = vadd.f32 %v18057_v60, %v17955_v33  ;;  %v9760_v48 = vadd.f32 %v18041_v41, %v9006_v17  ;;  %v9005_v50 = vadd.f32 %v18061_v6, %v17958_v1  ;;  %v18755_v17 = vld [vmem:[#allocation25_spill] sm:$0xff] }
 0x42e   : > { %10545 = vst [vmem:[%s18148_s27 + $0x8] sm:$0xff] %v10513_v7  ;;  %v10518_v8 = vmax.f32 %v10486_v26, 0.0  ;;  %v10484_v55 = vadd.f32 %v18135_v25, %v10445_v20  ;;  %v10448_v39 = vadd.f32 %v12785_v9, %v10251_v5  ;;  %v10249_v23 = vadd.f32 %v10136_v40, %v9751_v54  ;;  %v10333_v19 = vpop.f32.mrf.mxu0 }
 0x42f   : > { %v12754_v42 = vpop.f32.mrf.mxu1  ;;  %v9758_v7 = vadd.f32 %v18045_v3, %v9004_v11  ;;  %v9010_v20 = vadd.f32 %v18065_v10, %v17961_v13  ;;  %v9761_v9 = vadd.f32 %v18049_v45, %v9007_v61 }
 0x430   : > { %10550 = vst [vmem:[%s18148_s27 + $0x30] sm:$0xff] %v10518_v8  ;;  %v10516_v0 = vmax.f32 %v10484_v55, 0.0  ;;  %v10487_v2 = vadd.f32 %v18135_v25, %v10448_v39  ;;  %v10446_v18 = vadd.f32 %v10333_v19, %v10249_v23  ;;  %v10254_v37 = vadd.f32 %v12754_v42, %v9756_v36  ;;  %v12788_v51 = vpop.f32.mrf.mxu0 }
 0x431   : > { %v10149_v14 = vpop.f32.mrf.mxu1  ;;  %v9008_v36 = vadd.f32 %v18069_v31, %v17964_v53  ;;  %v9759_v39 = vadd.f32 %v18053_v52, %v9005_v50  ;;  %v9011_v19 = vadd.f32 %v18752_v59, %v17967_v34 }
 0x432   : > { %10548 = vst [vmem:[%s18148_s27 + $0x20] sm:$0xff] %v10516_v0  ;;  %v10519_v49 = vmax.f32 %v10487_v2, 0.0  ;;  %v10485_v62 = vadd.f32 %v18135_v25, %v10446_v18  ;;  %v10451_v22 = vadd.f32 %v12788_v51, %v10254_v37  ;;  %v10252_v16 = vadd.f32 %v10149_v14, %v9754_v29  ;;  %v10346_v27 = vpop.f32.mrf.mxu0  ;;  %v18753_v0 = vld [vmem:[#allocation37_spill] sm:$0xff]  ;;  %v18754_v37 = vld [vmem:[#allocation51_spill] sm:$0xff] }
 0x433   : > { %v12755_v44 = vpop.f32.mrf.mxu1  ;;  %v9764_v2 = vadd.f32 %v18753_v0, %v9010_v20  ;;  %v9009_v51 = vadd.f32 %v18755_v17, %v18754_v37  ;;  %v18764_v20 = vld [vmem:[#allocation9_spill] sm:$0xff]  ;;  %v18771_v37 = vld [vmem:[#allocation18_spill] sm:$0xff] }
 0x434   : > { %10551 = vst [vmem:[%s18148_s27 + $0x38] sm:$0xff] %v10519_v49  ;;  %v10517_v28 = vmax.f32 %v10485_v62, 0.0  ;;  %v10490_v35 = vadd.f32 %v18135_v25, %v10451_v22  ;;  %v10449_v43 = vadd.f32 %v10346_v27, %v10252_v16  ;;  %v10255_v32 = vadd.f32 %v12755_v44, %v9757_v57  ;;  %v12789_v38 = vpop.f32.mrf.mxu0  ;;  %v18756_v49 = vld [vmem:[#allocation24_spill] sm:$0xff]  ;;  %v18758_v44 = vld [vmem:[#allocation10_spill] sm:$0xff] }
 0x435   : > { %v10152_v46 = vpop.f32.mrf.mxu1  ;;  %v9762_v62 = vadd.f32 %v18756_v49, %v9008_v36  ;;  %v18757_v27 = vld [vmem:[#allocation52_spill] sm:$0xff] }
 0x436   : > { %10549 = vst [vmem:[%s18148_s27 + $0x28] sm:$0xff] %v10517_v28  ;;  %v10522_v12 = vmax.f32 %v10490_v35, 0.0  ;;  %v10488_v15 = vadd.f32 %v18135_v25, %v10449_v43  ;;  %v10452_v58 = vadd.f32 %v12789_v38, %v10255_v32  ;;  %v10253_v56 = vadd.f32 %v10152_v46, %v9755_v21  ;;  %v10349_v30 = vpop.f32.mrf.mxu0  ;;  %v18759_v43 = vld [vmem:[#allocation49_spill] sm:$0xff] }
 0x437   : > { %v12758_v54 = vpop.f32.mrf.mxu1  ;;  %v9014_v21 = vadd.f32 %v18758_v44, %v18757_v27  ;;  %v9765_v32 = vadd.f32 %v18759_v43, %v9011_v19  ;;  %v18774_v27 = vld [vmem:[#allocation20_spill] sm:$0xff] }
 0x438   : > { %10554 = vst [vmem:[%s18148_s27 + $0x50] sm:$0xff] %v10522_v12  ;;  %v10520_v33 = vmax.f32 %v10488_v15, 0.0  ;;  %v10491_v60 = vadd.f32 %v18135_v25, %v10452_v58  ;;  %v10450_v41 = vadd.f32 %v10349_v30, %v10253_v56  ;;  %v10258_v26 = vadd.f32 %v12758_v54, %v9760_v48  ;;  %v12792_v5 = vpop.f32.mrf.mxu0  ;;  %v18760_v12 = vld [vmem:[#allocation53_spill] sm:$0xff]  ;;  %v18761_v15 = vld [vmem:[#allocation38_spill] sm:$0xff]  ;;  %v18762_v30 = vld [vmem:[#allocation47_spill] sm:$0xff] }
 0x439   : > { %v10165_v47 = vpop.f32.mrf.mxu1  ;;  %v9012_v58 = vadd.f32 %v18761_v15, %v18760_v12  ;;  %v9763_v54 = vadd.f32 %v18762_v30, %v9009_v51  ;;  %v18777_v12 = vld [vmem:[#allocation27_spill] sm:$0xff] }
 0x43a   : > { %10552 = vst [vmem:[%s18148_s27 + $0x40] sm:$0xff] %v10520_v33  ;;  %v10523_v1 = vmax.f32 %v10491_v60, 0.0  ;;  %v10489_v6 = vadd.f32 %v18135_v25, %v10450_v41  ;;  %v10455_v3 = vadd.f32 %v12792_v5, %v10258_v26  ;;  %v10256_v40 = vadd.f32 %v10165_v47, %v9758_v7  ;;  %v10362_v8 = vpop.f32.mrf.mxu0  ;;  %v18763_v26 = vld [vmem:[#allocation16_spill] sm:$0xff] }
 0x43b   : > { %v12759_v55 = vpop.f32.mrf.mxu1  ;;  %v9015_v5 = vadd.f32 %v18764_v20, %v18763_v26  ;;  %v18780_v26 = vld [vmem:[#allocation17_spill] sm:$0xff] }
 0x43c   : > { %10555 = vst [vmem:[%s18148_s27 + $0x58] sm:$0xff] %v10523_v1  ;;  %v10521_v13 = vmax.f32 %v10489_v6, 0.0  ;;  %v10494_v10 = vadd.f32 %v18135_v25, %v10455_v3  ;;  %v10453_v45 = vadd.f32 %v10362_v8, %v10256_v40  ;;  %v10259_v23 = vadd.f32 %v12759_v55, %v9761_v9  ;;  %v12793_v42 = vpop.f32.mrf.mxu0  ;;  %v18765_v1 = vld [vmem:[#allocation14_spill] sm:$0xff]  ;;  %v18766_v55 = vld [vmem:[#allocation5_spill] sm:$0xff] }
 0x43d   : > { %v10168_v29 = vpop.f32.mrf.mxu1  ;;  %v9768_v6 = vadd.f32 %v18765_v1, %v9014_v21  ;;  %v9769_v17 = vadd.f32 %v18771_v37, %v9015_v5 }
 0x43e   : > { %10553 = vst [vmem:[%s18148_s27 + $0x48] sm:$0xff] %v10521_v13  ;;  %v10526_v53 = vmax.f32 %v10494_v10, 0.0  ;;  %v10492_v31 = vadd.f32 %v18135_v25, %v10453_v45  ;;  %v10456_v52 = vadd.f32 %v12793_v42, %v10259_v23  ;;  %v10257_v18 = vadd.f32 %v10168_v29, %v9759_v39  ;;  %v10365_v14 = vpop.f32.mrf.mxu0  ;;  %v18767_v39 = vld [vmem:[#allocation23_spill] sm:$0xff] }
 0x43f   : > { %v12762_v57 = vpop.f32.mrf.mxu1  ;;  %v9013_v13 = vadd.f32 %v18767_v39, %v18766_v55  ;;  %v18768_v23 = vld [vmem:[#allocation15_spill] sm:$0xff]  ;;  %v18783_v55 = vld [vmem:[#allocation45_spill] sm:$0xff] }
 0x440   : > { %10558 = vst [vmem:[%s18148_s27 + $0x70] sm:$0xff] %v10526_v53  ;;  %v10524_v34 = vmax.f32 %v10492_v31, 0.0  ;;  %v10495_v22 = vadd.f32 %v18135_v25, %v10456_v52  ;;  %v10454_v16 = vadd.f32 %v10365_v14, %v10257_v18  ;;  %v10262_v11 = vadd.f32 %v12762_v57, %v9764_v2  ;;  %v12796_v28 = vpop.f32.mrf.mxu0  ;;  %v18769_v2 = vld [vmem:[#allocation7_spill] sm:$0xff] }
 0x441   : > { %v10181_v35 = vpop.f32.mrf.mxu1  ;;  %v9766_v59 = vadd.f32 %v18768_v23, %v9012_v58  ;;  %v18770_v53 = vld [vmem:[#allocation43_spill] sm:$0xff]  ;;  %v9767_v44 = vadd.f32 %v18774_v27, %v9013_v13 }
 0x442   : > { %10556 = vst [vmem:[%s18148_s27 + $0x60] sm:$0xff] %v10524_v34  ;;  %v10527_v61 = vmax.f32 %v10495_v22, 0.0  ;;  %v10493_v38 = vadd.f32 %v18135_v25, %v10454_v16  ;;  %v10459_v46 = vadd.f32 %v12796_v28, %v10262_v11  ;;  %v10260_v48 = vadd.f32 %v10181_v35, %v9762_v62  ;;  %v10378_v56 = vpop.f32.mrf.mxu0  ;;  %v18772_v62 = vld [vmem:[#allocation6_spill] sm:$0xff] }
 0x443   : > { %v12763_v50 = vpop.f32.mrf.mxu1  ;;  %v9018_v31 = vadd.f32 %v18770_v53, %v18769_v2  ;;  %v18773_v34 = vld [vmem:[#allocation34_spill] sm:$0xff]  ;;  %v18786_v2 = vld [vmem:[#allocation12_spill] sm:$0xff] }
 0x444   : > { %10559 = vst [vmem:[%s18148_s27 + $0x78] sm:$0xff] %v10527_v61  ;;  %v10525_v7 = vmax.f32 %v10493_v38, 0.0  ;;  %v10498_v33 = vadd.f32 %v18135_v25, %v10459_v46  ;;  %v10457_v60 = vadd.f32 %v10378_v56, %v10260_v48  ;;  %v10263_v41 = vadd.f32 %v12763_v50, %v9765_v32  ;;  %v12797_v47 = vpop.f32.mrf.mxu0  ;;  %v18775_v32 = vld [vmem:[#allocation21_spill] sm:$0xff]  ;;  %v18776_v61 = vld [vmem:[#allocation28_spill] sm:$0xff] }
 0x445   : > { %v10184_v9 = vpop.f32.mrf.mxu1  ;;  %v9016_v22 = vadd.f32 %v18773_v34, %v18772_v62  ;;  %v9019_v38 = vadd.f32 %v18776_v61, %v18775_v32  ;;  %v9772_v15 = vadd.f32 %v18777_v12, %v9018_v31  ;;  %v18789_v62 = vld [vmem:[#allocation41_spill] sm:$0xff] }
 0x446   : > { %10557 = vst [vmem:[%s18148_s27 + $0x68] sm:$0xff] %v10525_v7  ;;  %v10530_v3 = vmax.f32 %v10498_v33, 0.0  ;;  %v10496_v40 = vadd.f32 %v18135_v25, %v10457_v60  ;;  %v10460_v36 = vadd.f32 %v12797_v47, %v10263_v41  ;;  %v10261_v8 = vadd.f32 %v10184_v9, %v9763_v54  ;;  %v10381_v10 = vpop.f32.mrf.mxu0  ;;  %v18778_v54 = vld [vmem:[#allocation8_spill] sm:$0xff]  ;;  %v18779_v7 = vld [vmem:[#allocation39_spill] sm:$0xff] }
 0x447   : > { %v12766_v45 = vpop.f32.mrf.mxu1  ;;  %v9017_v33 = vadd.f32 %v18779_v7, %v18778_v54  ;;  %v9770_v20 = vadd.f32 %v18780_v26, %v9016_v22  ;;  %v9773_v39 = vadd.f32 %v18783_v55, %v9019_v38 }
 0x448   : > { %10562 = vst [vmem:[%s18148_s27 + $0x90] sm:$0xff] %v10530_v3  ;;  %v10528_v19 = vmax.f32 %v10496_v40, 0.0  ;;  %v10499_v42 = vadd.f32 %v18135_v25, %v10460_v36  ;;  %v10458_v29 = vadd.f32 %v10381_v10, %v10261_v8  ;;  %v10266_v0 = vadd.f32 %v12766_v45, %v9768_v6  ;;  %v12800_v52 = vpop.f32.mrf.mxu0  ;;  %v18781_v6 = vld [vmem:[#allocation48_spill] sm:$0xff]  ;;  %v18782_v3 = vld [vmem:[#allocation29_spill] sm:$0xff] }
 0x449   : > { %v10197_v18 = vpop.f32.mrf.mxu1  ;;  %v9022_v40 = vadd.f32 %v18782_v3, %v18781_v6  ;;  %v9771_v53 = vadd.f32 %v18786_v2, %v9017_v33 }
 0x44a   : > { %10560 = vst [vmem:[%s18148_s27 + $0x80] sm:$0xff] %v10528_v19  ;;  %v10531_v51 = vmax.f32 %v10499_v42, 0.0  ;;  %v10497_v14 = vadd.f32 %v18135_v25, %v10458_v29  ;;  %v10463_v57 = vadd.f32 %v12800_v52, %v10266_v0  ;;  %v10264_v49 = vadd.f32 %v10197_v18, %v9766_v59  ;;  %v10394_v16 = vpop.f32.mrf.mxu0  ;;  %v18784_v59 = vld [vmem:[#allocation42_spill] sm:$0xff]  ;;  %v18785_v19 = vld [vmem:[#allocation4_spill] sm:$0xff] }
 0x44b   : > { %v12767_v11 = vpop.f32.mrf.mxu1  ;;  %v9020_v42 = vadd.f32 %v18785_v19, %v18784_v59  ;;  %v9776_v34 = vadd.f32 %v18789_v62, %v9022_v40 }
 0x44c   : > { %10563 = vst [vmem:[%s18148_s27 + $0x98] sm:$0xff] %v10531_v51  ;;  %v10529_v21 = vmax.f32 %v10497_v14, 0.0  ;;  %v10502_v28 = vadd.f32 %v18135_v25, %v10463_v57  ;;  %v10461_v35 = vadd.f32 %v10394_v16, %v10264_v49  ;;  %v10267_v43 = vadd.f32 %v12767_v11, %v9769_v17  ;;  %v12801_v46 = vpop.f32.mrf.mxu0  ;;  %v18787_v17 = vld [vmem:[#allocation11_spill] sm:$0xff]  ;;  %v18788_v51 = vld [vmem:[#allocation30_spill] sm:$0xff] }
 0x44d   : > { %v10200_v48 = vpop.f32.mrf.mxu1  ;;  %v9023_v14 = vadd.f32 %v18788_v51, %v18787_v17 }
 0x44e   : > { %10561 = vst [vmem:[%s18148_s27 + $0x88] sm:$0xff] %v10529_v21  ;;  %v10534_v58 = vmax.f32 %v10502_v28, 0.0  ;;  %v10500_v56 = vadd.f32 %v18135_v25, %v10461_v35  ;;  %v10464_v50 = vadd.f32 %v12801_v46, %v10267_v43  ;;  %v10265_v30 = vadd.f32 %v10200_v48, %v9767_v44  ;;  %v10397_v60 = vpop.f32.mrf.mxu0  ;;  %v18790_v44 = vld [vmem:[#allocation36_spill] sm:$0xff]  ;;  %v18791_v43 = vld [vmem:[#allocation26_spill] sm:$0xff] }
 0x44f   : > { %v12770_v41 = vpop.f32.mrf.mxu1  ;;  %v9021_v21 = vadd.f32 %v18123_v63, %v18790_v44  ;;  %v9774_v32 = vadd.f32 %v18791_v43, %v9020_v42 }
 0x450   : > { %10566 = vst [vmem:[%s18148_s27 + $0xb0] sm:$0xff] %v10534_v58  ;;  %v10532_v5 = vmax.f32 %v10500_v56, 0.0  ;;  %v10503_v47 = vadd.f32 %v18135_v25, %v10464_v50  ;;  %v10462_v9 = vadd.f32 %v10397_v60, %v10265_v30  ;;  %v10270_v1 = vadd.f32 %v12770_v41, %v9772_v15  ;;  %v12804_v36 = vpop.f32.mrf.mxu0 }
 0x451   : > { %v10213_v8 = vpop.f32.mrf.mxu1  ;;  %v9777_v58 = vadd.f32 %v18121_v4, %v9023_v14  ;;  %v9775_v33 = vadd.f32 %v18127_v24, %v9021_v21 }
 0x452   : > { %10564 = vst [vmem:[%s18148_s27 + $0xa0] sm:$0xff] %v10532_v5  ;;  %v10535_v13 = vmax.f32 %v10503_v47, 0.0  ;;  %v10501_v10 = vadd.f32 %v18135_v25, %v10462_v9  ;;  %v10467_v45 = vadd.f32 %v12804_v36, %v10270_v1  ;;  %v10268_v23 = vadd.f32 %v10213_v8, %v9770_v20  ;;  %v10410_v29 = vpop.f32.mrf.mxu0 }
 0x453   : > { %v12771_v0 = vpop.f32.mrf.mxu1 }
 0x454   : > { %10567 = vst [vmem:[%s18148_s27 + $0xb8] sm:$0xff] %v10535_v13  ;;  %v10533_v31 = vmax.f32 %v10501_v10, 0.0  ;;  %v10506_v52 = vadd.f32 %v18135_v25, %v10467_v45  ;;  %v10465_v18 = vadd.f32 %v10410_v29, %v10268_v23  ;;  %v10271_v37 = vadd.f32 %v12771_v0, %v9773_v39  ;;  %v12805_v57 = vpop.f32.mrf.mxu0 }
 0x455   : > { %v10216_v49 = vpop.f32.mrf.mxu1 }
 0x456   : > { %10565 = vst [vmem:[%s18148_s27 + $0xa8] sm:$0xff] %v10533_v31  ;;  %v10538_v22 = vmax.f32 %v10506_v52, 0.0  ;;  %v10504_v16 = vadd.f32 %v18135_v25, %v10465_v18  ;;  %v10468_v11 = vadd.f32 %v12805_v57, %v10271_v37  ;;  %v10269_v27 = vadd.f32 %v10216_v49, %v9771_v53  ;;  %v10413_v28 = vpop.f32.mrf.mxu0 }
 0x457   : > { %v12774_v35 = vpop.f32.mrf.mxu1 }
 0x458   : > { %10570 = vst [vmem:[%s18148_s27 + $0xd0] sm:$0xff] %v10538_v22  ;;  %v10536_v61 = vmax.f32 %v10504_v16, 0.0  ;;  %v10507_v38 = vadd.f32 %v18135_v25, %v10468_v11  ;;  %v10466_v46 = vadd.f32 %v10413_v28, %v10269_v27  ;;  %v10274_v48 = vadd.f32 %v12774_v35, %v9776_v34  ;;  %v12808_v12 = vpop.f32.mrf.mxu0 }
 0x459   : > { %v10229_v15 = vpop.f32.mrf.mxu1 }
 0x45a   : > { %10568 = vst [vmem:[%s18148_s27 + $0xc0] sm:$0xff] %v10536_v61  ;;  %v10539_v56 = vmax.f32 %v10507_v38, 0.0  ;;  %v10505_v63 = vadd.f32 %v18135_v25, %v10466_v46  ;;  %v10471_v50 = vadd.f32 %v12808_v12, %v10274_v48  ;;  %v10272_v30 = vadd.f32 %v10229_v15, %v9774_v32  ;;  %v10426_v54 = vpop.f32.mrf.mxu0 }
 0x45b   : > { %v12775_v7 = vpop.f32.mrf.mxu1 }
 0x45c   : > { %10571 = vst [vmem:[%s18148_s27 + $0xd8] sm:$0xff] %v10539_v56  ;;  %v10537_v60 = vmax.f32 %v10505_v63, 0.0  ;;  %v10510_v41 = vadd.f32 %v18135_v25, %v10471_v50  ;;  %v10469_v26 = vadd.f32 %v10426_v54, %v10272_v30  ;;  %v10275_v20 = vadd.f32 %v12775_v7, %v9777_v58  ;;  %v12809_v4 = vpop.f32.mrf.mxu0 }
 0x45d   : > { %v10232_v5 = vpop.f32.mrf.mxu1 }
 0x45e   : > { %10569 = vst [vmem:[%s18148_s27 + $0xc8] sm:$0xff] %v10537_v60  ;;  %v10542_v47 = vmax.f32 %v10510_v41, 0.0  ;;  %v10508_v9 = vadd.f32 %v18135_v25, %v10469_v26  ;;  %v10472_v1 = vadd.f32 %v12809_v4, %v10275_v20  ;;  %v10273_v6 = vadd.f32 %v10232_v5, %v9775_v33  ;;  %v10429_v3 = vpop.f32.mrf.mxu0 }
 0x460   : > { %10574 = vst [vmem:[%s18148_s27 + $0xf0] sm:$0xff] %v10542_v47  ;;  %v10540_v24 = vmax.f32 %v10508_v9, 0.0  ;;  %v10511_v40 = vadd.f32 %v18135_v25, %v10472_v1  ;;  %v10470_v36 = vadd.f32 %v10429_v3, %v10273_v6 }
 0x462   : > { %10572 = vst [vmem:[%s18148_s27 + $0xe0] sm:$0xff] %v10540_v24  ;;  %v10543_v8 = vmax.f32 %v10511_v40, 0.0  ;;  %v10509_v55 = vadd.f32 %v18135_v25, %v10470_v36 }
 0x464   : > { %10575 = vst [vmem:[%s18148_s27 + $0xf8] sm:$0xff] %v10543_v8  ;;  %v10541_v39 = vmax.f32 %v10509_v55, 0.0 }
 0x466   : > { %10573 = vst [vmem:[%s18148_s27 + $0xe8] sm:$0xff] %v10541_v39 }
 0x467 PF: > { %s16_s21 = sadd.s32 1, %s13023_s21  }
 0x468   : > { %p13_p4 = scmp.ge.s32.totalorder %s16_s21, 4  }
 0x46a   :  { %15 = sbr.rel (!%p13_p4) target bundleno = 1 (0x1), region = 94 }

</bundles_post_ra>
